<compile_context>
chip_gen: v7x
topology: tpu7x:2x2x1
jax: 0.10.0
libtpu: 0.0.40
codegen_flags: <defaults>
</compile_context>

<pallas_src>
import functools
import math

import jax
import jax.numpy as jnp
from jax.experimental import pallas as pl
from jax.experimental.pallas import tpu as pltpu

# ---------------- hyperparameters (SAVER kwargs, small) ----------------
FEA = 1          # kwargs['fea']  (<=5 -> data.x branch; cat with pos -> 4 features)
CLA = 4          # kwargs['cla']
HIDDEN = 32      # kwargs['hidden']
DEPTHS = 2       # kwargs['depths']
HEADS = 2        # kwargs['heads']
PF_DIM = 64      # kwargs['posfeed']
SEQ = 96         # fixed by the reshape in SAVER.forward
IN_DIM = FEA + 3 # cat([x, pos], dim=1)
HEAD_DIM = HIDDEN // HEADS
LN_EPS = 1e-5

VMEM_LIMIT = 64 * 1024 * 1024   # raised scoped-VMEM budget (<= v7x physical 64 MiB)


# ---------------- small helpers ----------------
def _const_spec(a):
    nd = a.ndim
    return pl.BlockSpec(a.shape, lambda g, _nd=nd: (0,) * _nd)


def _layer_norm(x, g, b):
    mean = jnp.mean(x, axis=-1, keepdims=True)
    var = jnp.mean(jnp.square(x - mean), axis=-1, keepdims=True)
    return (x - mean) * jax.lax.rsqrt(var + LN_EPS) * g + b


# ---------------- fused encoder kernel (embed + DEPTHS layers) ----------------
def saver_encoder_kernel(x_ref, pos_ref, wex_ref, wepos_ref, be_ref, pe_ref,
                         wqkv_ref, bqkv_ref, wo_ref, lvec_ref,
                         wf1_ref, bf1_ref, wf2_ref, o_ref,
                         *, n_layers, n_heads, g_tile, seq, hidden, fea_dim):
    head_dim = hidden // n_heads
    inv_scale = 1.0 / math.sqrt(head_dim)
    emb_scale = math.sqrt(hidden)
    rows = g_tile * seq

    # ---- embedding: x @ We_x + pos @ We_pos + be, scaled, plus positional ----
    x = x_ref[...]
    if fea_dim == 1:
        tok = x * wex_ref[...]                          # (rows,1)*(1,H) == 1-feature matmul
    else:
        tok = jnp.dot(x, wex_ref[...], preferred_element_type=jnp.float32)
    tok = tok + jnp.dot(pos_ref[...], wepos_ref[...],
                        preferred_element_type=jnp.float32) + be_ref[...]
    # positional embedding broadcast over the group dim (leading-dim reshapes are free)
    h = (tok.reshape(g_tile, seq, hidden) * emb_scale + pe_ref[...][None])
    h = h.reshape(rows, hidden)

    # ---- encoder layers (statically unrolled; weights resident in VMEM) ----
    for li in range(n_layers):
        vec = lvec_ref[li]                              # (6, H): bo,g1,t1,bf2,g2,t2
        bo, g1, t1 = vec[0:1], vec[1:2], vec[2:3]
        bf2, g2, t2 = vec[3:4], vec[4:5], vec[5:6]

        # multi-head attention: per-head weights pre-split host-side -> no lane slicing
        attn = jnp.zeros((rows, hidden), jnp.float32)
        for hh in range(n_heads):                       # tiny static loop (2 heads)
            wq = wqkv_ref[li, hh, 0]                    # (H, hd)
            wk = wqkv_ref[li, hh, 1]
            wv = wqkv_ref[li, hh, 2]
            bq = bqkv_ref[li, hh, 0]                    # (1, hd)
            bk = bqkv_ref[li, hh, 1]
            bv = bqkv_ref[li, hh, 2]
            q = (jnp.dot(h, wq, preferred_element_type=jnp.float32) + bq
                 ).reshape(g_tile, seq, head_dim)
            k = (jnp.dot(h, wk, preferred_element_type=jnp.float32) + bk
                 ).reshape(g_tile, seq, head_dim)
            v = (jnp.dot(h, wv, preferred_element_type=jnp.float32) + bv
                 ).reshape(g_tile, seq, head_dim)
            s = jnp.einsum('gqd,gkd->gqk', q, k,
                           preferred_element_type=jnp.float32) * inv_scale
            s = s - jnp.max(s, axis=-1, keepdims=True)
            p = jnp.exp(s)
            p = p / jnp.sum(p, axis=-1, keepdims=True)  # exact divide (numeric parity)
            oh = jnp.einsum('gqk,gkd->gqd', p, v,
                            preferred_element_type=jnp.float32)
            # accumulate per-head output projection: == concat(heads) @ Wo
            attn = attn + jnp.dot(oh.reshape(rows, head_dim), wo_ref[li, hh],
                                  preferred_element_type=jnp.float32)
        h = _layer_norm(h + attn + bo, g1, t1)

        # position-wise feed-forward
        ff = jnp.dot(h, wf1_ref[li], preferred_element_type=jnp.float32) + bf1_ref[li]
        ff = jnp.maximum(ff, 0.0)
        ff = jnp.dot(ff, wf2_ref[li], preferred_element_type=jnp.float32) + bf2
        h = _layer_norm(h + ff, g2, t2)

    o_ref[...] = h


# ---------------- MLP head kernel (gridded over groups) ----------------
def mlp_head_kernel(x_ref, w1_ref, b1_ref, w2_ref, b2_ref, w3_ref, b3_ref,
                    w4_ref, b4_ref, o_ref):
    h = jnp.dot(x_ref[...], w1_ref[...], preferred_element_type=jnp.float32) + b1_ref[...]
    h = jnp.maximum(h, 0.0)
    h = jnp.dot(h, w2_ref[...], preferred_element_type=jnp.float32) + b2_ref[...]
    h = jnp.maximum(h, 0.0)
    h = jnp.dot(h, w3_ref[...], preferred_element_type=jnp.float32) + b3_ref[...]
    h = jnp.maximum(h, 0.0)
    o_ref[...] = jnp.dot(h, w4_ref[...], preferred_element_type=jnp.float32) + b4_ref[...]


# ---------------- tiling choices ----------------
def _pick_g_tile(n_groups):
    # target ~3072 rows/tile; keep >= 2 grid steps when possible (v7x: 2 TensorCores).
    g = min(32, n_groups)
    if n_groups >= 2:
        g = min(g, pl.cdiv(n_groups, 2))
    return max(1, g)


def _pick_head_block(n_groups):
    if n_groups <= 8:
        return n_groups                      # single step; block == full array dim
    target = pl.cdiv(n_groups, 2)            # >= 2 grid steps
    return min(256, ((target + 7) // 8) * 8) # sublane-dim multiple of 8


# ---------------- pallas_call wrappers ----------------
def saver_encoder(x, pos, params):
    n_rows = x.shape[0]
    n_groups = n_rows // SEQ
    g_tile = _pick_g_tile(n_groups)
    n_tiles = pl.cdiv(n_groups, g_tile)
    pad_rows_total = n_tiles * g_tile * SEQ
    if pad_rows_total != n_rows:             # pad whole groups (independent; no NaNs)
        extra = pad_rows_total - n_rows
        x = jnp.pad(x, ((0, extra), (0, 0)))
        pos = jnp.pad(pos, ((0, extra), (0, 0)))
    rows = g_tile * SEQ

    consts = [params["wex"], params["wepos"], params["be"], params["pe"],
              params["wqkv"], params["bqkv"], params["wo"], params["lvec"],
              params["wf1"], params["bf1"], params["wf2"]]

    kernel = functools.partial(saver_encoder_kernel, n_layers=DEPTHS, n_heads=HEADS,
                               g_tile=g_tile, seq=SEQ, hidden=HIDDEN, fea_dim=FEA)

    # rough cost hint for XLA scheduling around the custom call
    flops_row = (2 * IN_DIM * HIDDEN
                 + DEPTHS * (6 * HIDDEN * HIDDEN        # per-head QKV projections
                             + 4 * SEQ * HIDDEN          # QK^T + PV
                             + 2 * HIDDEN * HIDDEN       # output projection
                             + 4 * HIDDEN * PF_DIM))     # FFN
    weight_bytes = sum(int(a.size) for a in consts) * 4
    cost = pl.CostEstimate(
        flops=int(pad_rows_total * flops_row),
        transcendentals=int(pad_rows_total * DEPTHS * HEADS * SEQ),
        bytes_accessed=int(pad_rows_total * (IN_DIM + HIDDEN) * 4 + weight_bytes))

    return pl.pallas_call(
        kernel,
        out_shape=jax.ShapeDtypeStruct((pad_rows_total, HIDDEN), jnp.float32),
        grid=(n_tiles,),
        in_specs=[pl.BlockSpec((rows, FEA), lambda g: (g, 0)),
                  pl.BlockSpec((rows, 3), lambda g: (g, 0))]
                 + [_const_spec(a) for a in consts],
        out_specs=pl.BlockSpec((rows, HIDDEN), lambda g: (g, 0)),
        compiler_params=pltpu.CompilerParams(
            dimension_semantics=("parallel",),
            vmem_limit_bytes=VMEM_LIMIT),
        cost_estimate=cost,
    )(x, pos, *consts)


def mlp_head(flat, mp):
    n_groups, feat = flat.shape
    hb = _pick_head_block(n_groups)
    n_steps = pl.cdiv(n_groups, hb)
    padded = n_steps * hb
    if padded != n_groups:
        flat = jnp.pad(flat, ((0, padded - n_groups), (0, 0)))

    names = ["w1", "b1", "w2", "b2", "w3", "b3", "w4", "b4"]
    consts = [mp[n] for n in names]
    cla = mp["w4"].shape[1]

    weight_bytes = sum(int(a.size) for a in consts) * 4
    cost = pl.CostEstimate(
        flops=int(padded * 2 * (feat * 256 + 256 * 128 + 128 * 16 + 16 * cla)),
        transcendentals=0,
        bytes_accessed=int(padded * (feat + cla) * 4 + weight_bytes))

    out = pl.pallas_call(
        mlp_head_kernel,
        out_shape=jax.ShapeDtypeStruct((padded, cla), jnp.float32),
        grid=(n_steps,),
        in_specs=[pl.BlockSpec((hb, feat), lambda g: (g, 0))]
                 + [_const_spec(a) for a in consts],
        out_specs=pl.BlockSpec((hb, cla), lambda g: (g, 0)),
        compiler_params=pltpu.CompilerParams(
            dimension_semantics=("parallel",),
            vmem_limit_bytes=VMEM_LIMIT),
        cost_estimate=cost,
    )(flat, *consts)
    return out[:n_groups]


# ---------------- parameter init (deterministic, PyTorch-Linear-style) ----------------
def _dense(key, fan_in, fan_out):
    kw, kb = jax.random.split(key)
    lim = 1.0 / math.sqrt(fan_in)
    w = jax.random.uniform(kw, (fan_in, fan_out), jnp.float32, -lim, lim)
    b = jax.random.uniform(kb, (1, fan_out), jnp.float32, -lim, lim)
    return w, b


def _split_heads_w(w):   # (H, H) -> (HEADS, H, hd)   (per-head output columns)
    return jnp.transpose(w.reshape(HIDDEN, HEADS, HEAD_DIM), (1, 0, 2))


def _split_heads_b(b):   # (1, H) -> (HEADS, 1, hd)
    return jnp.transpose(b.reshape(1, HEADS, HEAD_DIM), (1, 0, 2))


def init_params(key):
    keys = jax.random.split(key, 3 + DEPTHS)
    params = {}
    we, be = _dense(keys[0], IN_DIM, HIDDEN)
    params["wex"] = we[:FEA]                               # (FEA, H)
    params["wepos"] = we[FEA:]                             # (3, H)
    params["be"] = be                                      # (1, H)
    params["pe"] = 0.02 * jax.random.normal(keys[1], (SEQ, HIDDEN), jnp.float32)

    wqkv, bqkv, wo, lvec, wf1, bf1, wf2 = [], [], [], [], [], [], []
    for li in range(DEPTHS):
        lk = jax.random.split(keys[2 + li], 6)
        wq, bq = _dense(lk[0], HIDDEN, HIDDEN)
        wk, bk = _dense(lk[1], HIDDEN, HIDDEN)
        wv, bv = _dense(lk[2], HIDDEN, HIDDEN)
        wo_l, bo_l = _dense(lk[3], HIDDEN, HIDDEN)
        wf1_l, bf1_l = _dense(lk[4], HIDDEN, PF_DIM)
        wf2_l, bf2_l = _dense(lk[5], PF_DIM, HIDDEN)
        g1 = jnp.ones((1, HIDDEN), jnp.float32)
        t1 = jnp.zeros((1, HIDDEN), jnp.float32)
        g2 = jnp.ones((1, HIDDEN), jnp.float32)
        t2 = jnp.zeros((1, HIDDEN), jnp.float32)

        # host-side per-head splits (kernel never slices lanes)
        wqkv.append(jnp.stack([_split_heads_w(wq), _split_heads_w(wk),
                               _split_heads_w(wv)], axis=1))        # (HEADS, 3, H, hd)
        bqkv.append(jnp.stack([_split_heads_b(bq), _split_heads_b(bk),
                               _split_heads_b(bv)], axis=1))        # (HEADS, 3, 1, hd)
        wo.append(wo_l.reshape(HEADS, HEAD_DIM, HIDDEN))             # (HEADS, hd, H)
        lvec.append(jnp.concatenate([bo_l, g1, t1, bf2_l, g2, t2], axis=0))  # (6, H)
        wf1.append(wf1_l)
        bf1.append(bf1_l)
        wf2.append(wf2_l)

    params["wqkv"] = jnp.stack(wqkv)     # (DEPTHS, HEADS, 3, H, hd)
    params["bqkv"] = jnp.stack(bqkv)     # (DEPTHS, HEADS, 3, 1, hd)
    params["wo"] = jnp.stack(wo)         # (DEPTHS, HEADS, hd, H)
    params["lvec"] = jnp.stack(lvec)     # (DEPTHS, 6, H)
    params["wf1"] = jnp.stack(wf1)       # (DEPTHS, H, PF)
    params["bf1"] = jnp.stack(bf1)       # (DEPTHS, 1, PF)
    params["wf2"] = jnp.stack(wf2)       # (DEPTHS, PF, H)

    mk = jax.random.split(keys[2 + DEPTHS], 4)
    mp = {}
    mp["w1"], mp["b1"] = _dense(mk[0], SEQ * HIDDEN, 256)
    mp["w2"], mp["b2"] = _dense(mk[1], 256, 128)
    mp["w3"], mp["b3"] = _dense(mk[2], 128, 16)
    mp["w4"], mp["b4"] = _dense(mk[3], 16, CLA)
    params["mlp"] = mp
    return params


# ---------------- SAVER forward ----------------
def saver_forward(x, pos, params):
    n_groups = x.shape[0] // SEQ
    enc = saver_encoder(x, pos, params)                    # (pad_groups*96, HIDDEN)
    pad_groups = enc.shape[0] // SEQ
    # row-major (rows, H) -> (groups, 96*H): free metadata reshape; drop padded groups
    flat = enc.reshape(pad_groups, SEQ * HIDDEN)[:n_groups]
    return mlp_head(flat, params["mlp"])                   # (n_groups, CLA)


if __name__ == "__main__":
    key = jax.random.PRNGKey(0)
    kx, kpos, kparams = jax.random.split(key, 3)

    B = 2                      # number of 96-point groups
    N = SEQ * B                # total points
    x = jax.random.normal(kx, (N, FEA), jnp.float32)       # data.x
    pos = jax.random.normal(kpos, (N, 3), jnp.float32)     # data.pos

    params = init_params(kparams)

    fwd = jax.jit(saver_forward)
    out = fwd(x, pos, params)
    out = jax.block_until_ready(out)
    assert out.shape == (B, CLA), out.shape
    print("KERNEL_OK")
</pallas_src>

<mosaic_0001>
module attributes {stable_mosaic.version = 11 : i64} {
  func.func @mlp_head_kernel(%arg0: i32, %arg1: memref<2x3072xf32, #tpu.memory_space<vmem>>, %arg2: memref<3072x256xf32, #tpu.memory_space<vmem>>, %arg3: memref<1x256xf32, #tpu.memory_space<vmem>>, %arg4: memref<256x128xf32, #tpu.memory_space<vmem>>, %arg5: memref<1x128xf32, #tpu.memory_space<vmem>>, %arg6: memref<128x16xf32, #tpu.memory_space<vmem>>, %arg7: memref<1x16xf32, #tpu.memory_space<vmem>>, %arg8: memref<16x4xf32, #tpu.memory_space<vmem>>, %arg9: memref<1x4xf32, #tpu.memory_space<vmem>>, %arg10: memref<2x4xf32, #tpu.memory_space<vmem>>) attributes {dimension_semantics = [#tpu.dimension_semantics<parallel>], iteration_bounds = array<i64: 1>, scalar_prefetch = 0 : i64, scratch_operands = 0 : i64, tpu.core_type = #tpu.core_type<tc>, window_params = [{transform_indices = @transform_0, window_bounds = array<i64: 2, 3072>}, {pipeline_mode = #tpu.pipeline_mode<synchronous>, transform_indices = @transform_1, window_bounds = array<i64: 3072, 256>}, {pipeline_mode = #tpu.pipeline_mode<synchronous>, transform_indices = @transform_2, window_bounds = array<i64: 1, 256>}, {pipeline_mode = #tpu.pipeline_mode<synchronous>, transform_indices = @transform_3, window_bounds = array<i64: 256, 128>}, {pipeline_mode = #tpu.pipeline_mode<synchronous>, transform_indices = @transform_4, window_bounds = array<i64: 1, 128>}, {pipeline_mode = #tpu.pipeline_mode<synchronous>, transform_indices = @transform_5, window_bounds = array<i64: 128, 16>}, {pipeline_mode = #tpu.pipeline_mode<synchronous>, transform_indices = @transform_6, window_bounds = array<i64: 1, 16>}, {pipeline_mode = #tpu.pipeline_mode<synchronous>, transform_indices = @transform_7, window_bounds = array<i64: 16, 4>}, {pipeline_mode = #tpu.pipeline_mode<synchronous>, transform_indices = @transform_8, window_bounds = array<i64: 1, 4>}, {transform_indices = @transform_9, window_bounds = array<i64: 2, 4>}]} {
    %c0 = arith.constant 0 : index
    %c0_0 = arith.constant 0 : index
    %0 = vector.load %arg1[%c0, %c0_0] : memref<2x3072xf32, #tpu.memory_space<vmem>>, vector<2x3072xf32>
    %c0_1 = arith.constant 0 : index
    %c0_2 = arith.constant 0 : index
    %1 = vector.load %arg2[%c0_1, %c0_2] : memref<3072x256xf32, #tpu.memory_space<vmem>>, vector<3072x256xf32>
    %cst = arith.constant dense<0.000000e+00> : vector<2x256xf32>
    %2 = tpu.matmul %0, %1, %cst {dimension_numbers = #tpu.dot_dimension_numbers<[1], [0], [0], [1], [0, 0, 1, 1], [], []>} : vector<2x3072xf32>, vector<3072x256xf32>, vector<2x256xf32> -> vector<2x256xf32>
    %c0_3 = arith.constant 0 : index
    %c0_4 = arith.constant 0 : index
    %3 = vector.load %arg3[%c0_3, %c0_4] : memref<1x256xf32, #tpu.memory_space<vmem>>, vector<1x256xf32>
    %4 = vector.broadcast %3 : vector<1x256xf32> to vector<2x256xf32>
    %5 = arith.addf %2, %4 : vector<2x256xf32>
    %cst_5 = arith.constant 0.000000e+00 : f32
    %6 = vector.broadcast %cst_5 : f32 to vector<2x256xf32>
    %7 = arith.maximumf %5, %6 : vector<2x256xf32>
    %c0_6 = arith.constant 0 : index
    %c0_7 = arith.constant 0 : index
    %8 = vector.load %arg4[%c0_6, %c0_7] : memref<256x128xf32, #tpu.memory_space<vmem>>, vector<256x128xf32>
    %cst_8 = arith.constant dense<0.000000e+00> : vector<2x128xf32>
    %9 = tpu.matmul %7, %8, %cst_8 {dimension_numbers = #tpu.dot_dimension_numbers<[1], [0], [0], [1], [0, 0, 1, 1], [], []>} : vector<2x256xf32>, vector<256x128xf32>, vector<2x128xf32> -> vector<2x128xf32>
    %c0_9 = arith.constant 0 : index
    %c0_10 = arith.constant 0 : index
    %10 = vector.load %arg5[%c0_9, %c0_10] : memref<1x128xf32, #tpu.memory_space<vmem>>, vector<1x128xf32>
    %11 = vector.broadcast %10 : vector<1x128xf32> to vector<2x128xf32>
    %12 = arith.addf %9, %11 : vector<2x128xf32>
    %cst_11 = arith.constant 0.000000e+00 : f32
    %13 = vector.broadcast %cst_11 : f32 to vector<2x128xf32>
    %14 = arith.maximumf %12, %13 : vector<2x128xf32>
    %c0_12 = arith.constant 0 : index
    %c0_13 = arith.constant 0 : index
    %15 = vector.load %arg6[%c0_12, %c0_13] : memref<128x16xf32, #tpu.memory_space<vmem>>, vector<128x16xf32>
    %cst_14 = arith.constant dense<0.000000e+00> : vector<2x16xf32>
    %16 = tpu.matmul %14, %15, %cst_14 {dimension_numbers = #tpu.dot_dimension_numbers<[1], [0], [0], [1], [0, 0, 1, 1], [], []>} : vector<2x128xf32>, vector<128x16xf32>, vector<2x16xf32> -> vector<2x16xf32>
    %c0_15 = arith.constant 0 : index
    %c0_16 = arith.constant 0 : index
    %17 = vector.load %arg7[%c0_15, %c0_16] : memref<1x16xf32, #tpu.memory_space<vmem>>, vector<1x16xf32>
    %18 = vector.broadcast %17 : vector<1x16xf32> to vector<2x16xf32>
    %19 = arith.addf %16, %18 : vector<2x16xf32>
    %cst_17 = arith.constant 0.000000e+00 : f32
    %20 = vector.broadcast %cst_17 : f32 to vector<2x16xf32>
    %21 = arith.maximumf %19, %20 : vector<2x16xf32>
    %c0_18 = arith.constant 0 : index
    %c0_19 = arith.constant 0 : index
    %22 = vector.load %arg8[%c0_18, %c0_19] : memref<16x4xf32, #tpu.memory_space<vmem>>, vector<16x4xf32>
    %cst_20 = arith.constant dense<0.000000e+00> : vector<2x4xf32>
    %23 = tpu.matmul %21, %22, %cst_20 {dimension_numbers = #tpu.dot_dimension_numbers<[1], [0], [0], [1], [0, 0, 1, 1], [], []>} : vector<2x16xf32>, vector<16x4xf32>, vector<2x4xf32> -> vector<2x4xf32>
    %c0_21 = arith.constant 0 : index
    %c0_22 = arith.constant 0 : index
    %24 = vector.load %arg9[%c0_21, %c0_22] : memref<1x4xf32, #tpu.memory_space<vmem>>, vector<1x4xf32>
    %25 = vector.broadcast %24 : vector<1x4xf32> to vector<2x4xf32>
    %26 = arith.addf %23, %25 : vector<2x4xf32>
    %c0_23 = arith.constant 0 : index
    %c0_24 = arith.constant 0 : index
    %27 = vector.load %arg10[%c0_23, %c0_24] : memref<2x4xf32, #tpu.memory_space<vmem>>, vector<2x4xf32>
    tpu.vector_store %arg10[%c0_23, %c0_24], %26 {strides = array<i32>} : memref<2x4xf32, #tpu.memory_space<vmem>>, vector<2x4xf32>,
    return
  }
  func.func @transform_0(%arg0: i32) -> (i32, i32) {
    %c0_i32 = arith.constant 0 : i32
    %c0_i32_0 = arith.constant 0 : i32
    return %arg0, %c0_i32 : i32, i32
  }
  func.func @transform_1(%arg0: i32) -> (i32, i32) {
    %c0_i32 = arith.constant 0 : i32
    %c0_i32_0 = arith.constant 0 : i32
    %c0_i32_1 = arith.constant 0 : i32
    return %c0_i32, %c0_i32_0 : i32, i32
  }
  func.func @transform_2(%arg0: i32) -> (i32, i32) {
    %c0_i32 = arith.constant 0 : i32
    %c0_i32_0 = arith.constant 0 : i32
    %c0_i32_1 = arith.constant 0 : i32
    return %c0_i32, %c0_i32_0 : i32, i32
  }
  func.func @transform_3(%arg0: i32) -> (i32, i32) {
    %c0_i32 = arith.constant 0 : i32
    %c0_i32_0 = arith.constant 0 : i32
    %c0_i32_1 = arith.constant 0 : i32
    return %c0_i32, %c0_i32_0 : i32, i32
  }
  func.func @transform_4(%arg0: i32) -> (i32, i32) {
    %c0_i32 = arith.constant 0 : i32
    %c0_i32_0 = arith.constant 0 : i32
    %c0_i32_1 = arith.constant 0 : i32
    return %c0_i32, %c0_i32_0 : i32, i32
  }
  func.func @transform_5(%arg0: i32) -> (i32, i32) {
    %c0_i32 = arith.constant 0 : i32
    %c0_i32_0 = arith.constant 0 : i32
    %c0_i32_1 = arith.constant 0 : i32
    return %c0_i32, %c0_i32_0 : i32, i32
  }
  func.func @transform_6(%arg0: i32) -> (i32, i32) {
    %c0_i32 = arith.constant 0 : i32
    %c0_i32_0 = arith.constant 0 : i32
    %c0_i32_1 = arith.constant 0 : i32
    return %c0_i32, %c0_i32_0 : i32, i32
  }
  func.func @transform_7(%arg0: i32) -> (i32, i32) {
    %c0_i32 = arith.constant 0 : i32
    %c0_i32_0 = arith.constant 0 : i32
    %c0_i32_1 = arith.constant 0 : i32
    return %c0_i32, %c0_i32_0 : i32, i32
  }
  func.func @transform_8(%arg0: i32) -> (i32, i32) {
    %c0_i32 = arith.constant 0 : i32
    %c0_i32_0 = arith.constant 0 : i32
    %c0_i32_1 = arith.constant 0 : i32
    return %c0_i32, %c0_i32_0 : i32, i32
  }
  func.func @transform_9(%arg0: i32) -> (i32, i32) {
    %c0_i32 = arith.constant 0 : i32
    %c0_i32_0 = arith.constant 0 : i32
    return %arg0, %c0_i32 : i32, i32
  }
}

module attributes {stable_mosaic.version = 11 : i64} {
  func.func @saver_encoder_kernel(%arg0: i32, %arg1: memref<96x1xf32, #tpu.memory_space<vmem>>, %arg2: memref<96x3xf32, #tpu.memory_space<vmem>>, %arg3: memref<1x32xf32, #tpu.memory_space<vmem>>, %arg4: memref<3x32xf32, #tpu.memory_space<vmem>>, %arg5: memref<1x32xf32, #tpu.memory_space<vmem>>, %arg6: memref<96x32xf32, #tpu.memory_space<vmem>>, %arg7: memref<2x2x3x32x16xf32, #tpu.memory_space<vmem>>, %arg8: memref<2x2x3x1x16xf32, #tpu.memory_space<vmem>>, %arg9: memref<2x2x16x32xf32, #tpu.memory_space<vmem>>, %arg10: memref<2x6x32xf32, #tpu.memory_space<vmem>>, %arg11: memref<2x32x64xf32, #tpu.memory_space<vmem>>, %arg12: memref<2x1x64xf32, #tpu.memory_space<vmem>>, %arg13: memref<2x64x32xf32, #tpu.memory_space<vmem>>, %arg14: memref<96x32xf32, #tpu.memory_space<vmem>>) attributes {dimension_semantics = [#tpu.dimension_semantics<parallel>], iteration_bounds = array<i64: 2>, scalar_prefetch = 0 : i64, scratch_operands = 0 : i64, tpu.core_type = #tpu.core_type<tc>, window_params = [{transform_indices = @transform_0, window_bounds = array<i64: 96, 1>}, {transform_indices = @transform_1, window_bounds = array<i64: 96, 3>}, {pipeline_mode = #tpu.pipeline_mode<synchronous>, transform_indices = @transform_2, window_bounds = array<i64: 1, 32>}, {pipeline_mode = #tpu.pipeline_mode<synchronous>, transform_indices = @transform_3, window_bounds = array<i64: 3, 32>}, {pipeline_mode = #tpu.pipeline_mode<synchronous>, transform_indices = @transform_4, window_bounds = array<i64: 1, 32>}, {pipeline_mode = #tpu.pipeline_mode<synchronous>, transform_indices = @transform_5, window_bounds = array<i64: 96, 32>}, {pipeline_mode = #tpu.pipeline_mode<synchronous>, transform_indices = @transform_6, window_bounds = array<i64: 2, 2, 3, 32, 16>}, {pipeline_mode = #tpu.pipeline_mode<synchronous>, transform_indices = @transform_7, window_bounds = array<i64: 2, 2, 3, 1, 16>}, {pipeline_mode = #tpu.pipeline_mode<synchronous>, transform_indices = @transform_8, window_bounds = array<i64: 2, 2, 16, 32>}, {pipeline_mode = #tpu.pipeline_mode<synchronous>, transform_indices = @transform_9, window_bounds = array<i64: 2, 6, 32>}, {pipeline_mode = #tpu.pipeline_mode<synchronous>, transform_indices = @transform_10, window_bounds = array<i64: 2, 32, 64>}, {pipeline_mode = #tpu.pipeline_mode<synchronous>, transform_indices = @transform_11, window_bounds = array<i64: 2, 1, 64>}, {pipeline_mode = #tpu.pipeline_mode<synchronous>, transform_indices = @transform_12, window_bounds = array<i64: 2, 64, 32>}, {transform_indices = @transform_13, window_bounds = array<i64: 96, 32>}]} {
    %c0 = arith.constant 0 : index
    %c0_0 = arith.constant 0 : index
    %0 = vector.load %arg1[%c0, %c0_0] : memref<96x1xf32, #tpu.memory_space<vmem>>, vector<96x1xf32>
    %c0_1 = arith.constant 0 : index
    %c0_2 = arith.constant 0 : index
    %1 = vector.load %arg3[%c0_1, %c0_2] : memref<1x32xf32, #tpu.memory_space<vmem>>, vector<1x32xf32>
    %2 = vector.broadcast %0 : vector<96x1xf32> to vector<96x32xf32>
    %3 = vector.broadcast %1 : vector<1x32xf32> to vector<96x32xf32>
    %4 = arith.mulf %2, %3 : vector<96x32xf32>
    %c0_3 = arith.constant 0 : index
    %c0_4 = arith.constant 0 : index
    %5 = vector.load %arg2[%c0_3, %c0_4] : memref<96x3xf32, #tpu.memory_space<vmem>>, vector<96x3xf32>
    %c0_5 = arith.constant 0 : index
    %c0_6 = arith.constant 0 : index
    %6 = vector.load %arg4[%c0_5, %c0_6] : memref<3x32xf32, #tpu.memory_space<vmem>>, vector<3x32xf32>
    %cst = arith.constant dense<0.000000e+00> : vector<96x32xf32>
    %7 = tpu.matmul %5, %6, %cst {dimension_numbers = #tpu.dot_dimension_numbers<[1], [0], [0], [1], [0, 0, 1, 1], [], []>} : vector<96x3xf32>, vector<3x32xf32>, vector<96x32xf32> -> vector<96x32xf32>
    %8 = arith.addf %4, %7 : vector<96x32xf32>
    %c0_7 = arith.constant 0 : index
    %c0_8 = arith.constant 0 : index
    %9 = vector.load %arg5[%c0_7, %c0_8] : memref<1x32xf32, #tpu.memory_space<vmem>>, vector<1x32xf32>
    %10 = vector.broadcast %9 : vector<1x32xf32> to vector<96x32xf32>
    %11 = arith.addf %8, %10 : vector<96x32xf32>
    %12 = vector.shape_cast %11 : vector<96x32xf32> to vector<1x96x32xf32>
    %cst_9 = arith.constant 5.65685415 : f32
    %13 = vector.broadcast %cst_9 : f32 to vector<1x96x32xf32>
    %14 = arith.mulf %12, %13 : vector<1x96x32xf32>
    %c0_10 = arith.constant 0 : index
    %c0_11 = arith.constant 0 : index
    %15 = vector.load %arg6[%c0_10, %c0_11] : memref<96x32xf32, #tpu.memory_space<vmem>>, vector<96x32xf32>
    %16 = vector.shape_cast %15 : vector<96x32xf32> to vector<1x96x32xf32>
    %17 = arith.addf %14, %16 : vector<1x96x32xf32>
    %18 = vector.shape_cast %17 : vector<1x96x32xf32> to vector<96x32xf32>
    %c0_12 = arith.constant 0 : index
    %c0_13 = arith.constant 0 : index
    %c0_14 = arith.constant 0 : index
    %19 = vector.load %arg10[%c0_12, %c0_13, %c0_14] : memref<2x6x32xf32, #tpu.memory_space<vmem>>, vector<1x6x32xf32>
    %20 = vector.shape_cast %19 : vector<1x6x32xf32> to vector<6x32xf32>
    %21 = vector.extract_strided_slice %20 {offsets = [0, 0], sizes = [1, 32], strides = [1, 1]} : vector<6x32xf32> to vector<1x32xf32>
    %22 = vector.extract_strided_slice %20 {offsets = [1, 0], sizes = [1, 32], strides = [1, 1]} : vector<6x32xf32> to vector<1x32xf32>
    %23 = vector.extract_strided_slice %20 {offsets = [2, 0], sizes = [1, 32], strides = [1, 1]} : vector<6x32xf32> to vector<1x32xf32>
    %24 = vector.extract_strided_slice %20 {offsets = [3, 0], sizes = [1, 32], strides = [1, 1]} : vector<6x32xf32> to vector<1x32xf32>
    %25 = vector.extract_strided_slice %20 {offsets = [4, 0], sizes = [1, 32], strides = [1, 1]} : vector<6x32xf32> to vector<1x32xf32>
    %26 = vector.extract_strided_slice %20 {offsets = [5, 0], sizes = [1, 32], strides = [1, 1]} : vector<6x32xf32> to vector<1x32xf32>
    %cst_15 = arith.constant 0.000000e+00 : f32
    %27 = vector.broadcast %cst_15 : f32 to vector<96x32xf32>
    %c0_16 = arith.constant 0 : index
    %c0_17 = arith.constant 0 : index
    %c0_18 = arith.constant 0 : index
    %c0_19 = arith.constant 0 : index
    %c0_20 = arith.constant 0 : index
    %28 = vector.load %arg7[%c0_16, %c0_17, %c0_18, %c0_19, %c0_20] : memref<2x2x3x32x16xf32, #tpu.memory_space<vmem>>, vector<1x1x1x32x16xf32>
    %29 = vector.shape_cast %28 : vector<1x1x1x32x16xf32> to vector<32x16xf32>
    %c0_21 = arith.constant 0 : index
    %c0_22 = arith.constant 0 : index
    %c1 = arith.constant 1 : index
    %c0_23 = arith.constant 0 : index
    %c0_24 = arith.constant 0 : index
    %30 = vector.load %arg7[%c0_21, %c0_22, %c1, %c0_23, %c0_24] : memref<2x2x3x32x16xf32, #tpu.memory_space<vmem>>, vector<1x1x1x32x16xf32>
    %31 = vector.shape_cast %30 : vector<1x1x1x32x16xf32> to vector<32x16xf32>
    %c0_25 = arith.constant 0 : index
    %c0_26 = arith.constant 0 : index
    %c2 = arith.constant 2 : index
    %c0_27 = arith.constant 0 : index
    %c0_28 = arith.constant 0 : index
    %32 = vector.load %arg7[%c0_25, %c0_26, %c2, %c0_27, %c0_28] : memref<2x2x3x32x16xf32, #tpu.memory_space<vmem>>, vector<1x1x1x32x16xf32>
    %33 = vector.shape_cast %32 : vector<1x1x1x32x16xf32> to vector<32x16xf32>
    %c0_29 = arith.constant 0 : index
    %c0_30 = arith.constant 0 : index
    %c0_31 = arith.constant 0 : index
    %c0_32 = arith.constant 0 : index
    %c0_33 = arith.constant 0 : index
    %34 = vector.load %arg8[%c0_29, %c0_30, %c0_31, %c0_32, %c0_33] : memref<2x2x3x1x16xf32, #tpu.memory_space<vmem>>, vector<1x1x1x1x16xf32>
    %35 = vector.shape_cast %34 : vector<1x1x1x1x16xf32> to vector<1x16xf32>
    %c0_34 = arith.constant 0 : index
    %c0_35 = arith.constant 0 : index
    %c1_36 = arith.constant 1 : index
    %c0_37 = arith.constant 0 : index
    %c0_38 = arith.constant 0 : index
    %36 = vector.load %arg8[%c0_34, %c0_35, %c1_36, %c0_37, %c0_38] : memref<2x2x3x1x16xf32, #tpu.memory_space<vmem>>, vector<1x1x1x1x16xf32>
    %37 = vector.shape_cast %36 : vector<1x1x1x1x16xf32> to vector<1x16xf32>
    %c0_39 = arith.constant 0 : index
    %c0_40 = arith.constant 0 : index
    %c2_41 = arith.constant 2 : index
    %c0_42 = arith.constant 0 : index
    %c0_43 = arith.constant 0 : index
    %38 = vector.load %arg8[%c0_39, %c0_40, %c2_41, %c0_42, %c0_43] : memref<2x2x3x1x16xf32, #tpu.memory_space<vmem>>, vector<1x1x1x1x16xf32>
    %39 = vector.shape_cast %38 : vector<1x1x1x1x16xf32> to vector<1x16xf32>
    %cst_44 = arith.constant dense<0.000000e+00> : vector<96x16xf32>
    %40 = tpu.matmul %18, %29, %cst_44 {dimension_numbers = #tpu.dot_dimension_numbers<[1], [0], [0], [1], [0, 0, 1, 1], [], []>} : vector<96x32xf32>, vector<32x16xf32>, vector<96x16xf32> -> vector<96x16xf32>
    %41 = vector.broadcast %35 : vector<1x16xf32> to vector<96x16xf32>
    %42 = arith.addf %40, %41 : vector<96x16xf32>
    %43 = vector.shape_cast %42 : vector<96x16xf32> to vector<1x96x16xf32>
    %cst_45 = arith.constant dense<0.000000e+00> : vector<96x16xf32>
    %44 = tpu.matmul %18, %31, %cst_45 {dimension_numbers = #tpu.dot_dimension_numbers<[1], [0], [0], [1], [0, 0, 1, 1], [], []>} : vector<96x32xf32>, vector<32x16xf32>, vector<96x16xf32> -> vector<96x16xf32>
    %45 = vector.broadcast %37 : vector<1x16xf32> to vector<96x16xf32>
    %46 = arith.addf %44, %45 : vector<96x16xf32>
    %47 = vector.shape_cast %46 : vector<96x16xf32> to vector<1x96x16xf32>
    %cst_46 = arith.constant dense<0.000000e+00> : vector<96x16xf32>
    %48 = tpu.matmul %18, %33, %cst_46 {dimension_numbers = #tpu.dot_dimension_numbers<[1], [0], [0], [1], [0, 0, 1, 1], [], []>} : vector<96x32xf32>, vector<32x16xf32>, vector<96x16xf32> -> vector<96x16xf32>
    %49 = vector.broadcast %39 : vector<1x16xf32> to vector<96x16xf32>
    %50 = arith.addf %48, %49 : vector<96x16xf32>
    %51 = vector.shape_cast %50 : vector<96x16xf32> to vector<1x96x16xf32>
    "tpu.trace_start"() <{level = 10 : i32, message = "gqd,gkd->gqk"}> : () -> ()
    %cst_47 = arith.constant dense<0.000000e+00> : vector<1x96x96xf32>
    %52 = tpu.matmul %43, %47, %cst_47 {dimension_numbers = #tpu.dot_dimension_numbers<[2], [2], [1], [1], [0, 0, 0, 1, 1, 1], [0], [0]>} : vector<1x96x16xf32>, vector<1x96x16xf32>, vector<1x96x96xf32> -> vector<1x96x96xf32>
    "tpu.trace_stop"() : () -> ()
    %cst_48 = arith.constant 2.500000e-01 : f32
    %53 = vector.broadcast %cst_48 : f32 to vector<1x96x96xf32>
    %54 = arith.mulf %52, %53 : vector<1x96x96xf32>
    %cst_49 = arith.constant dense<0xFF800000> : vector<1x96xf32>
    %55 = vector.multi_reduction <maximumf>, %54, %cst_49 [2] : vector<1x96x96xf32> to vector<1x96xf32>
    %56 = vector.shape_cast %55 : vector<1x96xf32> to vector<1x96x1xf32>
    %57 = vector.broadcast %56 : vector<1x96x1xf32> to vector<1x96x96xf32>
    %58 = arith.subf %54, %57 : vector<1x96x96xf32>
    %59 = math.exp %58 : vector<1x96x96xf32>
    %cst_50 = arith.constant dense<0.000000e+00> : vector<1x96xf32>
    %60 = vector.multi_reduction <add>, %59, %cst_50 [2] : vector<1x96x96xf32> to vector<1x96xf32>
    %61 = vector.shape_cast %60 : vector<1x96xf32> to vector<1x96x1xf32>
    %62 = vector.broadcast %61 : vector<1x96x1xf32> to vector<1x96x96xf32>
    %63 = arith.divf %59, %62 : vector<1x96x96xf32>
    "tpu.trace_start"() <{level = 10 : i32, message = "gqk,gkd->gqd"}> : () -> ()
    %cst_51 = arith.constant dense<0.000000e+00> : vector<1x96x16xf32>
    %64 = tpu.matmul %63, %51, %cst_51 {dimension_numbers = #tpu.dot_dimension_numbers<[2], [1], [1], [2], [0, 0, 0, 1, 1, 2], [0], [0]>} : vector<1x96x96xf32>, vector<1x96x16xf32>, vector<1x96x16xf32> -> vector<1x96x16xf32>
    "tpu.trace_stop"() : () -> ()
    %65 = vector.shape_cast %64 : vector<1x96x16xf32> to vector<96x16xf32>
    %c0_52 = arith.constant 0 : index
    %c0_53 = arith.constant 0 : index
    %c0_54 = arith.constant 0 : index
    %c0_55 = arith.constant 0 : index
    %66 = vector.load %arg9[%c0_52, %c0_53, %c0_54, %c0_55] : memref<2x2x16x32xf32, #tpu.memory_space<vmem>>, vector<1x1x16x32xf32>
    %67 = vector.shape_cast %66 : vector<1x1x16x32xf32> to vector<16x32xf32>
    %cst_56 = arith.constant dense<0.000000e+00> : vector<96x32xf32>
    %68 = tpu.matmul %65, %67, %cst_56 {dimension_numbers = #tpu.dot_dimension_numbers<[1], [0], [0], [1], [0, 0, 1, 1], [], []>} : vector<96x16xf32>, vector<16x32xf32>, vector<96x32xf32> -> vector<96x32xf32>
    %69 = arith.addf %27, %68 : vector<96x32xf32>
    %c0_57 = arith.constant 0 : index
    %c1_58 = arith.constant 1 : index
    %c0_59 = arith.constant 0 : index
    %c0_60 = arith.constant 0 : index
    %c0_61 = arith.constant 0 : index
    %70 = vector.load %arg7[%c0_57, %c1_58, %c0_59, %c0_60, %c0_61] : memref<2x2x3x32x16xf32, #tpu.memory_space<vmem>>, vector<1x1x1x32x16xf32>
    %71 = vector.shape_cast %70 : vector<1x1x1x32x16xf32> to vector<32x16xf32>
    %c0_62 = arith.constant 0 : index
    %c1_63 = arith.constant 1 : index
    %c1_64 = arith.constant 1 : index
    %c0_65 = arith.constant 0 : index
    %c0_66 = arith.constant 0 : index
    %72 = vector.load %arg7[%c0_62, %c1_63, %c1_64, %c0_65, %c0_66] : memref<2x2x3x32x16xf32, #tpu.memory_space<vmem>>, vector<1x1x1x32x16xf32>
    %73 = vector.shape_cast %72 : vector<1x1x1x32x16xf32> to vector<32x16xf32>
    %c0_67 = arith.constant 0 : index
    %c1_68 = arith.constant 1 : index
    %c2_69 = arith.constant 2 : index
    %c0_70 = arith.constant 0 : index
    %c0_71 = arith.constant 0 : index
    %74 = vector.load %arg7[%c0_67, %c1_68, %c2_69, %c0_70, %c0_71] : memref<2x2x3x32x16xf32, #tpu.memory_space<vmem>>, vector<1x1x1x32x16xf32>
    %75 = vector.shape_cast %74 : vector<1x1x1x32x16xf32> to vector<32x16xf32>
    %c0_72 = arith.constant 0 : index
    %c1_73 = arith.constant 1 : index
    %c0_74 = arith.constant 0 : index
    %c0_75 = arith.constant 0 : index
    %c0_76 = arith.constant 0 : index
    %76 = vector.load %arg8[%c0_72, %c1_73, %c0_74, %c0_75, %c0_76] : memref<2x2x3x1x16xf32, #tpu.memory_space<vmem>>, vector<1x1x1x1x16xf32>
    %77 = vector.shape_cast %76 : vector<1x1x1x1x16xf32> to vector<1x16xf32>
    %c0_77 = arith.constant 0 : index
    %c1_78 = arith.constant 1 : index
    %c1_79 = arith.constant 1 : index
    %c0_80 = arith.constant 0 : index
    %c0_81 = arith.constant 0 : index
    %78 = vector.load %arg8[%c0_77, %c1_78, %c1_79, %c0_80, %c0_81] : memref<2x2x3x1x16xf32, #tpu.memory_space<vmem>>, vector<1x1x1x1x16xf32>
    %79 = vector.shape_cast %78 : vector<1x1x1x1x16xf32> to vector<1x16xf32>
    %c0_82 = arith.constant 0 : index
    %c1_83 = arith.constant 1 : index
    %c2_84 = arith.constant 2 : index
    %c0_85 = arith.constant 0 : index
    %c0_86 = arith.constant 0 : index
    %80 = vector.load %arg8[%c0_82, %c1_83, %c2_84, %c0_85, %c0_86] : memref<2x2x3x1x16xf32, #tpu.memory_space<vmem>>, vector<1x1x1x1x16xf32>
    %81 = vector.shape_cast %80 : vector<1x1x1x1x16xf32> to vector<1x16xf32>
    %cst_87 = arith.constant dense<0.000000e+00> : vector<96x16xf32>
    %82 = tpu.matmul %18, %71, %cst_87 {dimension_numbers = #tpu.dot_dimension_numbers<[1], [0], [0], [1], [0, 0, 1, 1], [], []>} : vector<96x32xf32>, vector<32x16xf32>, vector<96x16xf32> -> vector<96x16xf32>
    %83 = vector.broadcast %77 : vector<1x16xf32> to vector<96x16xf32>
    %84 = arith.addf %82, %83 : vector<96x16xf32>
    %85 = vector.shape_cast %84 : vector<96x16xf32> to vector<1x96x16xf32>
    %cst_88 = arith.constant dense<0.000000e+00> : vector<96x16xf32>
    %86 = tpu.matmul %18, %73, %cst_88 {dimension_numbers = #tpu.dot_dimension_numbers<[1], [0], [0], [1], [0, 0, 1, 1], [], []>} : vector<96x32xf32>, vector<32x16xf32>, vector<96x16xf32> -> vector<96x16xf32>
    %87 = vector.broadcast %79 : vector<1x16xf32> to vector<96x16xf32>
    %88 = arith.addf %86, %87 : vector<96x16xf32>
    %89 = vector.shape_cast %88 : vector<96x16xf32> to vector<1x96x16xf32>
    %cst_89 = arith.constant dense<0.000000e+00> : vector<96x16xf32>
    %90 = tpu.matmul %18, %75, %cst_89 {dimension_numbers = #tpu.dot_dimension_numbers<[1], [0], [0], [1], [0, 0, 1, 1], [], []>} : vector<96x32xf32>, vector<32x16xf32>, vector<96x16xf32> -> vector<96x16xf32>
    %91 = vector.broadcast %81 : vector<1x16xf32> to vector<96x16xf32>
    %92 = arith.addf %90, %91 : vector<96x16xf32>
    %93 = vector.shape_cast %92 : vector<96x16xf32> to vector<1x96x16xf32>
    "tpu.trace_start"() <{level = 10 : i32, message = "gqd,gkd->gqk"}> : () -> ()
    %cst_90 = arith.constant dense<0.000000e+00> : vector<1x96x96xf32>
    %94 = tpu.matmul %85, %89, %cst_90 {dimension_numbers = #tpu.dot_dimension_numbers<[2], [2], [1], [1], [0, 0, 0, 1, 1, 1], [0], [0]>} : vector<1x96x16xf32>, vector<1x96x16xf32>, vector<1x96x96xf32> -> vector<1x96x96xf32>
    "tpu.trace_stop"() : () -> ()
    %cst_91 = arith.constant 2.500000e-01 : f32
    %95 = vector.broadcast %cst_91 : f32 to vector<1x96x96xf32>
    %96 = arith.mulf %94, %95 : vector<1x96x96xf32>
    %cst_92 = arith.constant dense<0xFF800000> : vector<1x96xf32>
    %97 = vector.multi_reduction <maximumf>, %96, %cst_92 [2] : vector<1x96x96xf32> to vector<1x96xf32>
    %98 = vector.shape_cast %97 : vector<1x96xf32> to vector<1x96x1xf32>
    %99 = vector.broadcast %98 : vector<1x96x1xf32> to vector<1x96x96xf32>
    %100 = arith.subf %96, %99 : vector<1x96x96xf32>
    %101 = math.exp %100 : vector<1x96x96xf32>
    %cst_93 = arith.constant dense<0.000000e+00> : vector<1x96xf32>
    %102 = vector.multi_reduction <add>, %101, %cst_93 [2] : vector<1x96x96xf32> to vector<1x96xf32>
    %103 = vector.shape_cast %102 : vector<1x96xf32> to vector<1x96x1xf32>
    %104 = vector.broadcast %103 : vector<1x96x1xf32> to vector<1x96x96xf32>
    %105 = arith.divf %101, %104 : vector<1x96x96xf32>
    "tpu.trace_start"() <{level = 10 : i32, message = "gqk,gkd->gqd"}> : () -> ()
    %cst_94 = arith.constant dense<0.000000e+00> : vector<1x96x16xf32>
    %106 = tpu.matmul %105, %93, %cst_94 {dimension_numbers = #tpu.dot_dimension_numbers<[2], [1], [1], [2], [0, 0, 0, 1, 1, 2], [0], [0]>} : vector<1x96x96xf32>, vector<1x96x16xf32>, vector<1x96x16xf32> -> vector<1x96x16xf32>
    "tpu.trace_stop"() : () -> ()
    %107 = vector.shape_cast %106 : vector<1x96x16xf32> to vector<96x16xf32>
    %c0_95 = arith.constant 0 : index
    %c1_96 = arith.constant 1 : index
    %c0_97 = arith.constant 0 : index
    %c0_98 = arith.constant 0 : index
    %108 = vector.load %arg9[%c0_95, %c1_96, %c0_97, %c0_98] : memref<2x2x16x32xf32, #tpu.memory_space<vmem>>, vector<1x1x16x32xf32>
    %109 = vector.shape_cast %108 : vector<1x1x16x32xf32> to vector<16x32xf32>
    %cst_99 = arith.constant dense<0.000000e+00> : vector<96x32xf32>
    %110 = tpu.matmul %107, %109, %cst_99 {dimension_numbers = #tpu.dot_dimension_numbers<[1], [0], [0], [1], [0, 0, 1, 1], [], []>} : vector<96x16xf32>, vector<16x32xf32>, vector<96x32xf32> -> vector<96x32xf32>
    %111 = arith.addf %69, %110 : vector<96x32xf32>
    %112 = arith.addf %18, %111 : vector<96x32xf32>
    %113 = vector.broadcast %21 : vector<1x32xf32> to vector<96x32xf32>
    %114 = arith.addf %112, %113 : vector<96x32xf32>
    %cst_100 = arith.constant dense<0.000000e+00> : vector<96xf32>
    %115 = vector.multi_reduction <add>, %114, %cst_100 [1] : vector<96x32xf32> to vector<96xf32>
    %116 = vector.shape_cast %115 : vector<96xf32> to vector<96x1xf32>
    %cst_101 = arith.constant 3.200000e+01 : f32
    %117 = vector.broadcast %cst_101 : f32 to vector<96x1xf32>
    %118 = arith.divf %116, %117 : vector<96x1xf32>
    %119 = vector.broadcast %118 : vector<96x1xf32> to vector<96x32xf32>
    %120 = arith.subf %114, %119 : vector<96x32xf32>
    %121 = arith.mulf %120, %120 : vector<96x32xf32>
    %cst_102 = arith.constant dense<0.000000e+00> : vector<96xf32>
    %122 = vector.multi_reduction <add>, %121, %cst_102 [1] : vector<96x32xf32> to vector<96xf32>
    %123 = vector.shape_cast %122 : vector<96xf32> to vector<96x1xf32>
    %cst_103 = arith.constant 3.200000e+01 : f32
    %124 = vector.broadcast %cst_103 : f32 to vector<96x1xf32>
    %125 = arith.divf %123, %124 : vector<96x1xf32>
    %126 = vector.broadcast %118 : vector<96x1xf32> to vector<96x32xf32>
    %127 = arith.subf %114, %126 : vector<96x32xf32>
    %cst_104 = arith.constant 9.99999974E-6 : f32
    %128 = vector.broadcast %cst_104 : f32 to vector<96x1xf32>
    %129 = arith.addf %125, %128 : vector<96x1xf32>
    %130 = math.rsqrt %129 : vector<96x1xf32>
    %131 = vector.broadcast %130 : vector<96x1xf32> to vector<96x32xf32>
    %132 = arith.mulf %127, %131 : vector<96x32xf32>
    %133 = vector.broadcast %22 : vector<1x32xf32> to vector<96x32xf32>
    %134 = arith.mulf %132, %133 : vector<96x32xf32>
    %135 = vector.broadcast %23 : vector<1x32xf32> to vector<96x32xf32>
    %136 = arith.addf %134, %135 : vector<96x32xf32>
    %c0_105 = arith.constant 0 : index
    %c0_106 = arith.constant 0 : index
    %c0_107 = arith.constant 0 : index
    %137 = vector.load %arg11[%c0_105, %c0_106, %c0_107] : memref<2x32x64xf32, #tpu.memory_space<vmem>>, vector<1x32x64xf32>
    %138 = vector.shape_cast %137 : vector<1x32x64xf32> to vector<32x64xf32>
    %cst_108 = arith.constant dense<0.000000e+00> : vector<96x64xf32>
    %139 = tpu.matmul %136, %138, %cst_108 {dimension_numbers = #tpu.dot_dimension_numbers<[1], [0], [0], [1], [0, 0, 1, 1], [], []>} : vector<96x32xf32>, vector<32x64xf32>, vector<96x64xf32> -> vector<96x64xf32>
    %c0_109 = arith.constant 0 : index
    %c0_110 = arith.constant 0 : index
    %c0_111 = arith.constant 0 : index
    %140 = vector.load %arg12[%c0_109, %c0_110, %c0_111] : memref<2x1x64xf32, #tpu.memory_space<vmem>>, vector<1x1x64xf32>
    %141 = vector.shape_cast %140 : vector<1x1x64xf32> to vector<1x64xf32>
    %142 = vector.broadcast %141 : vector<1x64xf32> to vector<96x64xf32>
    %143 = arith.addf %139, %142 : vector<96x64xf32>
    %cst_112 = arith.constant 0.000000e+00 : f32
    %144 = vector.broadcast %cst_112 : f32 to vector<96x64xf32>
    %145 = arith.maximumf %143, %144 : vector<96x64xf32>
    %c0_113 = arith.constant 0 : index
    %c0_114 = arith.constant 0 : index
    %c0_115 = arith.constant 0 : index
    %146 = vector.load %arg13[%c0_113, %c0_114, %c0_115] : memref<2x64x32xf32, #tpu.memory_space<vmem>>, vector<1x64x32xf32>
    %147 = vector.shape_cast %146 : vector<1x64x32xf32> to vector<64x32xf32>
    %cst_116 = arith.constant dense<0.000000e+00> : vector<96x32xf32>
    %148 = tpu.matmul %145, %147, %cst_116 {dimension_numbers = #tpu.dot_dimension_numbers<[1], [0], [0], [1], [0, 0, 1, 1], [], []>} : vector<96x64xf32>, vector<64x32xf32>, vector<96x32xf32> -> vector<96x32xf32>
    %149 = vector.broadcast %24 : vector<1x32xf32> to vector<96x32xf32>
    %150 = arith.addf %148, %149 : vector<96x32xf32>
    %151 = arith.addf %136, %150 : vector<96x32xf32>
    %cst_117 = arith.constant dense<0.000000e+00> : vector<96xf32>
    %152 = vector.multi_reduction <add>, %151, %cst_117 [1] : vector<96x32xf32> to vector<96xf32>
    %153 = vector.shape_cast %152 : vector<96xf32> to vector<96x1xf32>
    %cst_118 = arith.constant 3.200000e+01 : f32
    %154 = vector.broadcast %cst_118 : f32 to vector<96x1xf32>
    %155 = arith.divf %153, %154 : vector<96x1xf32>
    %156 = vector.broadcast %155 : vector<96x1xf32> to vector<96x32xf32>
    %157 = arith.subf %151, %156 : vector<96x32xf32>
    %158 = arith.mulf %157, %157 : vector<96x32xf32>
    %cst_119 = arith.constant dense<0.000000e+00> : vector<96xf32>
    %159 = vector.multi_reduction <add>, %158, %cst_119 [1] : vector<96x32xf32> to vector<96xf32>
    %160 = vector.shape_cast %159 : vector<96xf32> to vector<96x1xf32>
    %cst_120 = arith.constant 3.200000e+01 : f32
    %161 = vector.broadcast %cst_120 : f32 to vector<96x1xf32>
    %162 = arith.divf %160, %161 : vector<96x1xf32>
    %163 = vector.broadcast %155 : vector<96x1xf32> to vector<96x32xf32>
    %164 = arith.subf %151, %163 : vector<96x32xf32>
    %cst_121 = arith.constant 9.99999974E-6 : f32
    %165 = vector.broadcast %cst_121 : f32 to vector<96x1xf32>
    %166 = arith.addf %162, %165 : vector<96x1xf32>
    %167 = math.rsqrt %166 : vector<96x1xf32>
    %168 = vector.broadcast %167 : vector<96x1xf32> to vector<96x32xf32>
    %169 = arith.mulf %164, %168 : vector<96x32xf32>
    %170 = vector.broadcast %25 : vector<1x32xf32> to vector<96x32xf32>
    %171 = arith.mulf %169, %170 : vector<96x32xf32>
    %172 = vector.broadcast %26 : vector<1x32xf32> to vector<96x32xf32>
    %173 = arith.addf %171, %172 : vector<96x32xf32>
    %c1_122 = arith.constant 1 : index
    %c0_123 = arith.constant 0 : index
    %c0_124 = arith.constant 0 : index
    %174 = vector.load %arg10[%c1_122, %c0_123, %c0_124] : memref<2x6x32xf32, #tpu.memory_space<vmem>>, vector<1x6x32xf32>
    %175 = vector.shape_cast %174 : vector<1x6x32xf32> to vector<6x32xf32>
    %176 = vector.extract_strided_slice %175 {offsets = [0, 0], sizes = [1, 32], strides = [1, 1]} : vector<6x32xf32> to vector<1x32xf32>
    %177 = vector.extract_strided_slice %175 {offsets = [1, 0], sizes = [1, 32], strides = [1, 1]} : vector<6x32xf32> to vector<1x32xf32>
    %178 = vector.extract_strided_slice %175 {offsets = [2, 0], sizes = [1, 32], strides = [1, 1]} : vector<6x32xf32> to vector<1x32xf32>
    %179 = vector.extract_strided_slice %175 {offsets = [3, 0], sizes = [1, 32], strides = [1, 1]} : vector<6x32xf32> to vector<1x32xf32>
    %180 = vector.extract_strided_slice %175 {offsets = [4, 0], sizes = [1, 32], strides = [1, 1]} : vector<6x32xf32> to vector<1x32xf32>
    %181 = vector.extract_strided_slice %175 {offsets = [5, 0], sizes = [1, 32], strides = [1, 1]} : vector<6x32xf32> to vector<1x32xf32>
    %cst_125 = arith.constant 0.000000e+00 : f32
    %182 = vector.broadcast %cst_125 : f32 to vector<96x32xf32>
    %c1_126 = arith.constant 1 : index
    %c0_127 = arith.constant 0 : index
    %c0_128 = arith.constant 0 : index
    %c0_129 = arith.constant 0 : index
    %c0_130 = arith.constant 0 : index
    %183 = vector.load %arg7[%c1_126, %c0_127, %c0_128, %c0_129, %c0_130] : memref<2x2x3x32x16xf32, #tpu.memory_space<vmem>>, vector<1x1x1x32x16xf32>
    %184 = vector.shape_cast %183 : vector<1x1x1x32x16xf32> to vector<32x16xf32>
    %c1_131 = arith.constant 1 : index
    %c0_132 = arith.constant 0 : index
    %c1_133 = arith.constant 1 : index
    %c0_134 = arith.constant 0 : index
    %c0_135 = arith.constant 0 : index
    %185 = vector.load %arg7[%c1_131, %c0_132, %c1_133, %c0_134, %c0_135] : memref<2x2x3x32x16xf32, #tpu.memory_space<vmem>>, vector<1x1x1x32x16xf32>
    %186 = vector.shape_cast %185 : vector<1x1x1x32x16xf32> to vector<32x16xf32>
    %c1_136 = arith.constant 1 : index
    %c0_137 = arith.constant 0 : index
    %c2_138 = arith.constant 2 : index
    %c0_139 = arith.constant 0 : index
    %c0_140 = arith.constant 0 : index
    %187 = vector.load %arg7[%c1_136, %c0_137, %c2_138, %c0_139, %c0_140] : memref<2x2x3x32x16xf32, #tpu.memory_space<vmem>>, vector<1x1x1x32x16xf32>
    %188 = vector.shape_cast %187 : vector<1x1x1x32x16xf32> to vector<32x16xf32>
    %c1_141 = arith.constant 1 : index
    %c0_142 = arith.constant 0 : index
    %c0_143 = arith.constant 0 : index
    %c0_144 = arith.constant 0 : index
    %c0_145 = arith.constant 0 : index
    %189 = vector.load %arg8[%c1_141, %c0_142, %c0_143, %c0_144, %c0_145] : memref<2x2x3x1x16xf32, #tpu.memory_space<vmem>>, vector<1x1x1x1x16xf32>
    %190 = vector.shape_cast %189 : vector<1x1x1x1x16xf32> to vector<1x16xf32>
    %c1_146 = arith.constant 1 : index
    %c0_147 = arith.constant 0 : index
    %c1_148 = arith.constant 1 : index
    %c0_149 = arith.constant 0 : index
    %c0_150 = arith.constant 0 : index
    %191 = vector.load %arg8[%c1_146, %c0_147, %c1_148, %c0_149, %c0_150] : memref<2x2x3x1x16xf32, #tpu.memory_space<vmem>>, vector<1x1x1x1x16xf32>
    %192 = vector.shape_cast %191 : vector<1x1x1x1x16xf32> to vector<1x16xf32>
    %c1_151 = arith.constant 1 : index
    %c0_152 = arith.constant 0 : index
    %c2_153 = arith.constant 2 : index
    %c0_154 = arith.constant 0 : index
    %c0_155 = arith.constant 0 : index
    %193 = vector.load %arg8[%c1_151, %c0_152, %c2_153, %c0_154, %c0_155] : memref<2x2x3x1x16xf32, #tpu.memory_space<vmem>>, vector<1x1x1x1x16xf32>
    %194 = vector.shape_cast %193 : vector<1x1x1x1x16xf32> to vector<1x16xf32>
    %cst_156 = arith.constant dense<0.000000e+00> : vector<96x16xf32>
    %195 = tpu.matmul %173, %184, %cst_156 {dimension_numbers = #tpu.dot_dimension_numbers<[1], [0], [0], [1], [0, 0, 1, 1], [], []>} : vector<96x32xf32>, vector<32x16xf32>, vector<96x16xf32> -> vector<96x16xf32>
    %196 = vector.broadcast %190 : vector<1x16xf32> to vector<96x16xf32>
    %197 = arith.addf %195, %196 : vector<96x16xf32>
    %198 = vector.shape_cast %197 : vector<96x16xf32> to vector<1x96x16xf32>
    %cst_157 = arith.constant dense<0.000000e+00> : vector<96x16xf32>
    %199 = tpu.matmul %173, %186, %cst_157 {dimension_numbers = #tpu.dot_dimension_numbers<[1], [0], [0], [1], [0, 0, 1, 1], [], []>} : vector<96x32xf32>, vector<32x16xf32>, vector<96x16xf32> -> vector<96x16xf32>
    %200 = vector.broadcast %192 : vector<1x16xf32> to vector<96x16xf32>
    %201 = arith.addf %199, %200 : vector<96x16xf32>
    %202 = vector.shape_cast %201 : vector<96x16xf32> to vector<1x96x16xf32>
    %cst_158 = arith.constant dense<0.000000e+00> : vector<96x16xf32>
    %203 = tpu.matmul %173, %188, %cst_158 {dimension_numbers = #tpu.dot_dimension_numbers<[1], [0], [0], [1], [0, 0, 1, 1], [], []>} : vector<96x32xf32>, vector<32x16xf32>, vector<96x16xf32> -> vector<96x16xf32>
    %204 = vector.broadcast %194 : vector<1x16xf32> to vector<96x16xf32>
    %205 = arith.addf %203, %204 : vector<96x16xf32>
    %206 = vector.shape_cast %205 : vector<96x16xf32> to vector<1x96x16xf32>
    "tpu.trace_start"() <{level = 10 : i32, message = "gqd,gkd->gqk"}> : () -> ()
    %cst_159 = arith.constant dense<0.000000e+00> : vector<1x96x96xf32>
    %207 = tpu.matmul %198, %202, %cst_159 {dimension_numbers = #tpu.dot_dimension_numbers<[2], [2], [1], [1], [0, 0, 0, 1, 1, 1], [0], [0]>} : vector<1x96x16xf32>, vector<1x96x16xf32>, vector<1x96x96xf32> -> vector<1x96x96xf32>
    "tpu.trace_stop"() : () -> ()
    %cst_160 = arith.constant 2.500000e-01 : f32
    %208 = vector.broadcast %cst_160 : f32 to vector<1x96x96xf32>
    %209 = arith.mulf %207, %208 : vector<1x96x96xf32>
    %cst_161 = arith.constant dense<0xFF800000> : vector<1x96xf32>
    %210 = vector.multi_reduction <maximumf>, %209, %cst_161 [2] : vector<1x96x96xf32> to vector<1x96xf32>
    %211 = vector.shape_cast %210 : vector<1x96xf32> to vector<1x96x1xf32>
    %212 = vector.broadcast %211 : vector<1x96x1xf32> to vector<1x96x96xf32>
    %213 = arith.subf %209, %212 : vector<1x96x96xf32>
    %214 = math.exp %213 : vector<1x96x96xf32>
    %cst_162 = arith.constant dense<0.000000e+00> : vector<1x96xf32>
    %215 = vector.multi_reduction <add>, %214, %cst_162 [2] : vector<1x96x96xf32> to vector<1x96xf32>
    %216 = vector.shape_cast %215 : vector<1x96xf32> to vector<1x96x1xf32>
    %217 = vector.broadcast %216 : vector<1x96x1xf32> to vector<1x96x96xf32>
    %218 = arith.divf %214, %217 : vector<1x96x96xf32>
    "tpu.trace_start"() <{level = 10 : i32, message = "gqk,gkd->gqd"}> : () -> ()
    %cst_163 = arith.constant dense<0.000000e+00> : vector<1x96x16xf32>
    %219 = tpu.matmul %218, %206, %cst_163 {dimension_numbers = #tpu.dot_dimension_numbers<[2], [1], [1], [2], [0, 0, 0, 1, 1, 2], [0], [0]>} : vector<1x96x96xf32>, vector<1x96x16xf32>, vector<1x96x16xf32> -> vector<1x96x16xf32>
    "tpu.trace_stop"() : () -> ()
    %220 = vector.shape_cast %219 : vector<1x96x16xf32> to vector<96x16xf32>
    %c1_164 = arith.constant 1 : index
    %c0_165 = arith.constant 0 : index
    %c0_166 = arith.constant 0 : index
    %c0_167 = arith.constant 0 : index
    %221 = vector.load %arg9[%c1_164, %c0_165, %c0_166, %c0_167] : memref<2x2x16x32xf32, #tpu.memory_space<vmem>>, vector<1x1x16x32xf32>
    %222 = vector.shape_cast %221 : vector<1x1x16x32xf32> to vector<16x32xf32>
    %cst_168 = arith.constant dense<0.000000e+00> : vector<96x32xf32>
    %223 = tpu.matmul %220, %222, %cst_168 {dimension_numbers = #tpu.dot_dimension_numbers<[1], [0], [0], [1], [0, 0, 1, 1], [], []>} : vector<96x16xf32>, vector<16x32xf32>, vector<96x32xf32> -> vector<96x32xf32>
    %224 = arith.addf %182, %223 : vector<96x32xf32>
    %c1_169 = arith.constant 1 : index
    %c1_170 = arith.constant 1 : index
    %c0_171 = arith.constant 0 : index
    %c0_172 = arith.constant 0 : index
    %c0_173 = arith.constant 0 : index
    %225 = vector.load %arg7[%c1_169, %c1_170, %c0_171, %c0_172, %c0_173] : memref<2x2x3x32x16xf32, #tpu.memory_space<vmem>>, vector<1x1x1x32x16xf32>
    %226 = vector.shape_cast %225 : vector<1x1x1x32x16xf32> to vector<32x16xf32>
    %c1_174 = arith.constant 1 : index
    %c1_175 = arith.constant 1 : index
    %c1_176 = arith.constant 1 : index
    %c0_177 = arith.constant 0 : index
    %c0_178 = arith.constant 0 : index
    %227 = vector.load %arg7[%c1_174, %c1_175, %c1_176, %c0_177, %c0_178] : memref<2x2x3x32x16xf32, #tpu.memory_space<vmem>>, vector<1x1x1x32x16xf32>
    %228 = vector.shape_cast %227 : vector<1x1x1x32x16xf32> to vector<32x16xf32>
    %c1_179 = arith.constant 1 : index
    %c1_180 = arith.constant 1 : index
    %c2_181 = arith.constant 2 : index
    %c0_182 = arith.constant 0 : index
    %c0_183 = arith.constant 0 : index
    %229 = vector.load %arg7[%c1_179, %c1_180, %c2_181, %c0_182, %c0_183] : memref<2x2x3x32x16xf32, #tpu.memory_space<vmem>>, vector<1x1x1x32x16xf32>
    %230 = vector.shape_cast %229 : vector<1x1x1x32x16xf32> to vector<32x16xf32>
    %c1_184 = arith.constant 1 : index
    %c1_185 = arith.constant 1 : index
    %c0_186 = arith.constant 0 : index
    %c0_187 = arith.constant 0 : index
    %c0_188 = arith.constant 0 : index
    %231 = vector.load %arg8[%c1_184, %c1_185, %c0_186, %c0_187, %c0_188] : memref<2x2x3x1x16xf32, #tpu.memory_space<vmem>>, vector<1x1x1x1x16xf32>
    %232 = vector.shape_cast %231 : vector<1x1x1x1x16xf32> to vector<1x16xf32>
    %c1_189 = arith.constant 1 : index
    %c1_190 = arith.constant 1 : index
    %c1_191 = arith.constant 1 : index
    %c0_192 = arith.constant 0 : index
    %c0_193 = arith.constant 0 : index
    %233 = vector.load %arg8[%c1_189, %c1_190, %c1_191, %c0_192, %c0_193] : memref<2x2x3x1x16xf32, #tpu.memory_space<vmem>>, vector<1x1x1x1x16xf32>
    %234 = vector.shape_cast %233 : vector<1x1x1x1x16xf32> to vector<1x16xf32>
    %c1_194 = arith.constant 1 : index
    %c1_195 = arith.constant 1 : index
    %c2_196 = arith.constant 2 : index
    %c0_197 = arith.constant 0 : index
    %c0_198 = arith.constant 0 : index
    %235 = vector.load %arg8[%c1_194, %c1_195, %c2_196, %c0_197, %c0_198] : memref<2x2x3x1x16xf32, #tpu.memory_space<vmem>>, vector<1x1x1x1x16xf32>
    %236 = vector.shape_cast %235 : vector<1x1x1x1x16xf32> to vector<1x16xf32>
    %cst_199 = arith.constant dense<0.000000e+00> : vector<96x16xf32>
    %237 = tpu.matmul %173, %226, %cst_199 {dimension_numbers = #tpu.dot_dimension_numbers<[1], [0], [0], [1], [0, 0, 1, 1], [], []>} : vector<96x32xf32>, vector<32x16xf32>, vector<96x16xf32> -> vector<96x16xf32>
    %238 = vector.broadcast %232 : vector<1x16xf32> to vector<96x16xf32>
    %239 = arith.addf %237, %238 : vector<96x16xf32>
    %240 = vector.shape_cast %239 : vector<96x16xf32> to vector<1x96x16xf32>
    %cst_200 = arith.constant dense<0.000000e+00> : vector<96x16xf32>
    %241 = tpu.matmul %173, %228, %cst_200 {dimension_numbers = #tpu.dot_dimension_numbers<[1], [0], [0], [1], [0, 0, 1, 1], [], []>} : vector<96x32xf32>, vector<32x16xf32>, vector<96x16xf32> -> vector<96x16xf32>
    %242 = vector.broadcast %234 : vector<1x16xf32> to vector<96x16xf32>
    %243 = arith.addf %241, %242 : vector<96x16xf32>
    %244 = vector.shape_cast %243 : vector<96x16xf32> to vector<1x96x16xf32>
    %cst_201 = arith.constant dense<0.000000e+00> : vector<96x16xf32>
    %245 = tpu.matmul %173, %230, %cst_201 {dimension_numbers = #tpu.dot_dimension_numbers<[1], [0], [0], [1], [0, 0, 1, 1], [], []>} : vector<96x32xf32>, vector<32x16xf32>, vector<96x16xf32> -> vector<96x16xf32>
    %246 = vector.broadcast %236 : vector<1x16xf32> to vector<96x16xf32>
    %247 = arith.addf %245, %246 : vector<96x16xf32>
    %248 = vector.shape_cast %247 : vector<96x16xf32> to vector<1x96x16xf32>
    "tpu.trace_start"() <{level = 10 : i32, message = "gqd,gkd->gqk"}> : () -> ()
    %cst_202 = arith.constant dense<0.000000e+00> : vector<1x96x96xf32>
    %249 = tpu.matmul %240, %244, %cst_202 {dimension_numbers = #tpu.dot_dimension_numbers<[2], [2], [1], [1], [0, 0, 0, 1, 1, 1], [0], [0]>} : vector<1x96x16xf32>, vector<1x96x16xf32>, vector<1x96x96xf32> -> vector<1x96x96xf32>
    "tpu.trace_stop"() : () -> ()
    %cst_203 = arith.constant 2.500000e-01 : f32
    %250 = vector.broadcast %cst_203 : f32 to vector<1x96x96xf32>
    %251 = arith.mulf %249, %250 : vector<1x96x96xf32>
    %cst_204 = arith.constant dense<0xFF800000> : vector<1x96xf32>
    %252 = vector.multi_reduction <maximumf>, %251, %cst_204 [2] : vector<1x96x96xf32> to vector<1x96xf32>
    %253 = vector.shape_cast %252 : vector<1x96xf32> to vector<1x96x1xf32>
    %254 = vector.broadcast %253 : vector<1x96x1xf32> to vector<1x96x96xf32>
    %255 = arith.subf %251, %254 : vector<1x96x96xf32>
    %256 = math.exp %255 : vector<1x96x96xf32>
    %cst_205 = arith.constant dense<0.000000e+00> : vector<1x96xf32>
    %257 = vector.multi_reduction <add>, %256, %cst_205 [2] : vector<1x96x96xf32> to vector<1x96xf32>
    %258 = vector.shape_cast %257 : vector<1x96xf32> to vector<1x96x1xf32>
    %259 = vector.broadcast %258 : vector<1x96x1xf32> to vector<1x96x96xf32>
    %260 = arith.divf %256, %259 : vector<1x96x96xf32>
    "tpu.trace_start"() <{level = 10 : i32, message = "gqk,gkd->gqd"}> : () -> ()
    %cst_206 = arith.constant dense<0.000000e+00> : vector<1x96x16xf32>
    %261 = tpu.matmul %260, %248, %cst_206 {dimension_numbers = #tpu.dot_dimension_numbers<[2], [1], [1], [2], [0, 0, 0, 1, 1, 2], [0], [0]>} : vector<1x96x96xf32>, vector<1x96x16xf32>, vector<1x96x16xf32> -> vector<1x96x16xf32>
    "tpu.trace_stop"() : () -> ()
    %262 = vector.shape_cast %261 : vector<1x96x16xf32> to vector<96x16xf32>
    %c1_207 = arith.constant 1 : index
    %c1_208 = arith.constant 1 : index
    %c0_209 = arith.constant 0 : index
    %c0_210 = arith.constant 0 : index
    %263 = vector.load %arg9[%c1_207, %c1_208, %c0_209, %c0_210] : memref<2x2x16x32xf32, #tpu.memory_space<vmem>>, vector<1x1x16x32xf32>
    %264 = vector.shape_cast %263 : vector<1x1x16x32xf32> to vector<16x32xf32>
    %cst_211 = arith.constant dense<0.000000e+00> : vector<96x32xf32>
    %265 = tpu.matmul %262, %264, %cst_211 {dimension_numbers = #tpu.dot_dimension_numbers<[1], [0], [0], [1], [0, 0, 1, 1], [], []>} : vector<96x16xf32>, vector<16x32xf32>, vector<96x32xf32> -> vector<96x32xf32>
    %266 = arith.addf %224, %265 : vector<96x32xf32>
    %267 = arith.addf %173, %266 : vector<96x32xf32>
    %268 = vector.broadcast %176 : vector<1x32xf32> to vector<96x32xf32>
    %269 = arith.addf %267, %268 : vector<96x32xf32>
    %cst_212 = arith.constant dense<0.000000e+00> : vector<96xf32>
    %270 = vector.multi_reduction <add>, %269, %cst_212 [1] : vector<96x32xf32> to vector<96xf32>
    %271 = vector.shape_cast %270 : vector<96xf32> to vector<96x1xf32>
    %cst_213 = arith.constant 3.200000e+01 : f32
    %272 = vector.broadcast %cst_213 : f32 to vector<96x1xf32>
    %273 = arith.divf %271, %272 : vector<96x1xf32>
    %274 = vector.broadcast %273 : vector<96x1xf32> to vector<96x32xf32>
    %275 = arith.subf %269, %274 : vector<96x32xf32>
    %276 = arith.mulf %275, %275 : vector<96x32xf32>
    %cst_214 = arith.constant dense<0.000000e+00> : vector<96xf32>
    %277 = vector.multi_reduction <add>, %276, %cst_214 [1] : vector<96x32xf32> to vector<96xf32>
    %278 = vector.shape_cast %277 : vector<96xf32> to vector<96x1xf32>
    %cst_215 = arith.constant 3.200000e+01 : f32
    %279 = vector.broadcast %cst_215 : f32 to vector<96x1xf32>
    %280 = arith.divf %278, %279 : vector<96x1xf32>
    %281 = vector.broadcast %273 : vector<96x1xf32> to vector<96x32xf32>
    %282 = arith.subf %269, %281 : vector<96x32xf32>
    %cst_216 = arith.constant 9.99999974E-6 : f32
    %283 = vector.broadcast %cst_216 : f32 to vector<96x1xf32>
    %284 = arith.addf %280, %283 : vector<96x1xf32>
    %285 = math.rsqrt %284 : vector<96x1xf32>
    %286 = vector.broadcast %285 : vector<96x1xf32> to vector<96x32xf32>
    %287 = arith.mulf %282, %286 : vector<96x32xf32>
    %288 = vector.broadcast %177 : vector<1x32xf32> to vector<96x32xf32>
    %289 = arith.mulf %287, %288 : vector<96x32xf32>
    %290 = vector.broadcast %178 : vector<1x32xf32> to vector<96x32xf32>
    %291 = arith.addf %289, %290 : vector<96x32xf32>
    %c1_217 = arith.constant 1 : index
    %c0_218 = arith.constant 0 : index
    %c0_219 = arith.constant 0 : index
    %292 = vector.load %arg11[%c1_217, %c0_218, %c0_219] : memref<2x32x64xf32, #tpu.memory_space<vmem>>, vector<1x32x64xf32>
    %293 = vector.shape_cast %292 : vector<1x32x64xf32> to vector<32x64xf32>
    %cst_220 = arith.constant dense<0.000000e+00> : vector<96x64xf32>
    %294 = tpu.matmul %291, %293, %cst_220 {dimension_numbers = #tpu.dot_dimension_numbers<[1], [0], [0], [1], [0, 0, 1, 1], [], []>} : vector<96x32xf32>, vector<32x64xf32>, vector<96x64xf32> -> vector<96x64xf32>
    %c1_221 = arith.constant 1 : index
    %c0_222 = arith.constant 0 : index
    %c0_223 = arith.constant 0 : index
    %295 = vector.load %arg12[%c1_221, %c0_222, %c0_223] : memref<2x1x64xf32, #tpu.memory_space<vmem>>, vector<1x1x64xf32>
    %296 = vector.shape_cast %295 : vector<1x1x64xf32> to vector<1x64xf32>
    %297 = vector.broadcast %296 : vector<1x64xf32> to vector<96x64xf32>
    %298 = arith.addf %294, %297 : vector<96x64xf32>
    %cst_224 = arith.constant 0.000000e+00 : f32
    %299 = vector.broadcast %cst_224 : f32 to vector<96x64xf32>
    %300 = arith.maximumf %298, %299 : vector<96x64xf32>
    %c1_225 = arith.constant 1 : index
    %c0_226 = arith.constant 0 : index
    %c0_227 = arith.constant 0 : index
    %301 = vector.load %arg13[%c1_225, %c0_226, %c0_227] : memref<2x64x32xf32, #tpu.memory_space<vmem>>, vector<1x64x32xf32>
    %302 = vector.shape_cast %301 : vector<1x64x32xf32> to vector<64x32xf32>
    %cst_228 = arith.constant dense<0.000000e+00> : vector<96x32xf32>
    %303 = tpu.matmul %300, %302, %cst_228 {dimension_numbers = #tpu.dot_dimension_numbers<[1], [0], [0], [1], [0, 0, 1, 1], [], []>} : vector<96x64xf32>, vector<64x32xf32>, vector<96x32xf32> -> vector<96x32xf32>
    %304 = vector.broadcast %179 : vector<1x32xf32> to vector<96x32xf32>
    %305 = arith.addf %303, %304 : vector<96x32xf32>
    %306 = arith.addf %291, %305 : vector<96x32xf32>
    %cst_229 = arith.constant dense<0.000000e+00> : vector<96xf32>
    %307 = vector.multi_reduction <add>, %306, %cst_229 [1] : vector<96x32xf32> to vector<96xf32>
    %308 = vector.shape_cast %307 : vector<96xf32> to vector<96x1xf32>
    %cst_230 = arith.constant 3.200000e+01 : f32
    %309 = vector.broadcast %cst_230 : f32 to vector<96x1xf32>
    %310 = arith.divf %308, %309 : vector<96x1xf32>
    %311 = vector.broadcast %310 : vector<96x1xf32> to vector<96x32xf32>
    %312 = arith.subf %306, %311 : vector<96x32xf32>
    %313 = arith.mulf %312, %312 : vector<96x32xf32>
    %cst_231 = arith.constant dense<0.000000e+00> : vector<96xf32>
    %314 = vector.multi_reduction <add>, %313, %cst_231 [1] : vector<96x32xf32> to vector<96xf32>
    %315 = vector.shape_cast %314 : vector<96xf32> to vector<96x1xf32>
    %cst_232 = arith.constant 3.200000e+01 : f32
    %316 = vector.broadcast %cst_232 : f32 to vector<96x1xf32>
    %317 = arith.divf %315, %316 : vector<96x1xf32>
    %318 = vector.broadcast %310 : vector<96x1xf32> to vector<96x32xf32>
    %319 = arith.subf %306, %318 : vector<96x32xf32>
    %cst_233 = arith.constant 9.99999974E-6 : f32
    %320 = vector.broadcast %cst_233 : f32 to vector<96x1xf32>
    %321 = arith.addf %317, %320 : vector<96x1xf32>
    %322 = math.rsqrt %321 : vector<96x1xf32>
    %323 = vector.broadcast %322 : vector<96x1xf32> to vector<96x32xf32>
    %324 = arith.mulf %319, %323 : vector<96x32xf32>
    %325 = vector.broadcast %180 : vector<1x32xf32> to vector<96x32xf32>
    %326 = arith.mulf %324, %325 : vector<96x32xf32>
    %327 = vector.broadcast %181 : vector<1x32xf32> to vector<96x32xf32>
    %328 = arith.addf %326, %327 : vector<96x32xf32>
    %c0_234 = arith.constant 0 : index
    %c0_235 = arith.constant 0 : index
    %329 = vector.load %arg14[%c0_234, %c0_235] : memref<96x32xf32, #tpu.memory_space<vmem>>, vector<96x32xf32>
    tpu.vector_store %arg14[%c0_234, %c0_235], %328 {strides = array<i32>} : memref<96x32xf32, #tpu.memory_space<vmem>>, vector<96x32xf32>,
    return
  }
  func.func @transform_0(%arg0: i32) -> (i32, i32) {
    %c0_i32 = arith.constant 0 : i32
    %c0_i32_0 = arith.constant 0 : i32
    return %arg0, %c0_i32 : i32, i32
  }
  func.func @transform_1(%arg0: i32) -> (i32, i32) {
    %c0_i32 = arith.constant 0 : i32
    %c0_i32_0 = arith.constant 0 : i32
    return %arg0, %c0_i32 : i32, i32
  }
  func.func @transform_2(%arg0: i32) -> (i32, i32) {
    %c0_i32 = arith.constant 0 : i32
    %c0_i32_0 = arith.constant 0 : i32
    %c0_i32_1 = arith.constant 0 : i32
    return %c0_i32, %c0_i32_0 : i32, i32
  }
  func.func @transform_3(%arg0: i32) -> (i32, i32) {
    %c0_i32 = arith.constant 0 : i32
    %c0_i32_0 = arith.constant 0 : i32
    %c0_i32_1 = arith.constant 0 : i32
    return %c0_i32, %c0_i32_0 : i32, i32
  }
  func.func @transform_4(%arg0: i32) -> (i32, i32) {
    %c0_i32 = arith.constant 0 : i32
    %c0_i32_0 = arith.constant 0 : i32
    %c0_i32_1 = arith.constant 0 : i32
    return %c0_i32, %c0_i32_0 : i32, i32
  }
  func.func @transform_5(%arg0: i32) -> (i32, i32) {
    %c0_i32 = arith.constant 0 : i32
    %c0_i32_0 = arith.constant 0 : i32
    %c0_i32_1 = arith.constant 0 : i32
    return %c0_i32, %c0_i32_0 : i32, i32
  }
  func.func @transform_6(%arg0: i32) -> (i32, i32, i32, i32, i32) {
    %c0_i32 = arith.constant 0 : i32
    %c0_i32_0 = arith.constant 0 : i32
    %c0_i32_1 = arith.constant 0 : i32
    %c0_i32_2 = arith.constant 0 : i32
    %c0_i32_3 = arith.constant 0 : i32
    %c0_i32_4 = arith.constant 0 : i32
    return %c0_i32, %c0_i32_0, %c0_i32_1, %c0_i32_2, %c0_i32_3 : i32, i32, i32, i32, i32
  }
  func.func @transform_7(%arg0: i32) -> (i32, i32, i32, i32, i32) {
    %c0_i32 = arith.constant 0 : i32
    %c0_i32_0 = arith.constant 0 : i32
    %c0_i32_1 = arith.constant 0 : i32
    %c0_i32_2 = arith.constant 0 : i32
    %c0_i32_3 = arith.constant 0 : i32
    %c0_i32_4 = arith.constant 0 : i32
    return %c0_i32, %c0_i32_0, %c0_i32_1, %c0_i32_2, %c0_i32_3 : i32, i32, i32, i32, i32
  }
  func.func @transform_8(%arg0: i32) -> (i32, i32, i32, i32) {
    %c0_i32 = arith.constant 0 : i32
    %c0_i32_0 = arith.constant 0 : i32
    %c0_i32_1 = arith.constant 0 : i32
    %c0_i32_2 = arith.constant 0 : i32
    %c0_i32_3 = arith.constant 0 : i32
    return %c0_i32, %c0_i32_0, %c0_i32_1, %c0_i32_2 : i32, i32, i32, i32
  }
  func.func @transform_9(%arg0: i32) -> (i32, i32, i32) {
    %c0_i32 = arith.constant 0 : i32
    %c0_i32_0 = arith.constant 0 : i32
    %c0_i32_1 = arith.constant 0 : i32
    %c0_i32_2 = arith.constant 0 : i32
    return %c0_i32, %c0_i32_0, %c0_i32_1 : i32, i32, i32
  }
  func.func @transform_10(%arg0: i32) -> (i32, i32, i32) {
    %c0_i32 = arith.constant 0 : i32
    %c0_i32_0 = arith.constant 0 : i32
    %c0_i32_1 = arith.constant 0 : i32
    %c0_i32_2 = arith.constant 0 : i32
    return %c0_i32, %c0_i32_0, %c0_i32_1 : i32, i32, i32
  }
  func.func @transform_11(%arg0: i32) -> (i32, i32, i32) {
    %c0_i32 = arith.constant 0 : i32
    %c0_i32_0 = arith.constant 0 : i32
    %c0_i32_1 = arith.constant 0 : i32
    %c0_i32_2 = arith.constant 0 : i32
    return %c0_i32, %c0_i32_0, %c0_i32_1 : i32, i32, i32
  }
  func.func @transform_12(%arg0: i32) -> (i32, i32, i32) {
    %c0_i32 = arith.constant 0 : i32
    %c0_i32_0 = arith.constant 0 : i32
    %c0_i32_1 = arith.constant 0 : i32
    %c0_i32_2 = arith.constant 0 : i32
    return %c0_i32, %c0_i32_0, %c0_i32_1 : i32, i32, i32
  }
  func.func @transform_13(%arg0: i32) -> (i32, i32) {
    %c0_i32 = arith.constant 0 : i32
    %c0_i32_0 = arith.constant 0 : i32
    return %arg0, %c0_i32 : i32, i32
  }
}

</mosaic_0001>

<bundles_post_ra>
// kernel: saver_forward.3
= control target key start
LH: loop header
LB: loop body
LE: loop exit
PB: predicated region body
PF: predicated region fallthrough
CT: control target
= control target key end

     0   :  { %14 = vsyncpa [#allocation3], 0  ;;  %s3742_s0 = inlined_call_operand.hbm [shape: f32[2,3072], index: 0, kind: input, shape index: {}]   ;;  %s3743_s1 = inlined_call_operand.hbm [shape: f32[3072,256], index: 1, kind: input, shape index: {}]   ;;  %s3744_s2 = inlined_call_operand.hbm [shape: f32[1,256], index: 2, kind: input, shape index: {}]   ;;  %s3745_s3 = inlined_call_operand.hbm [shape: f32[256,128], index: 3, kind: input, shape index: {}]   ;;  %s3746_s4 = inlined_call_operand.hbm [shape: f32[1,128], index: 4, kind: input, shape index: {}]   ;;  %s3747_s5 = inlined_call_operand.hbm [shape: f32[128,16], index: 5, kind: input, shape index: {}]   ;;  %s3748_s6 = inlined_call_operand.hbm [shape: f32[1,16], index: 6, kind: input, shape index: {}]   ;;  %s3749_s7 = inlined_call_operand.hbm [shape: f32[16,4], index: 7, kind: input, shape index: {}]   ;;  %s3750_s8 = inlined_call_operand.hbm [shape: f32[1,4], index: 8, kind: input, shape index: {}]   ;;  %s3751_s9 = inlined_call_operand.hbm [shape: f32[2,4], index: 9, kind: output, shape index: {}]  }
   0x1   :  { %15 = vsyncpa [#allocation6], 0 }
   0x2   :  { %16 = vsyncpa [#allocation9], 0 }
   0x3   :  { %17 = vsyncpa [#allocation12], 0 }
   0x4   :  { %18 = vsyncpa [#allocation15], 0 }
   0x5   :  { %19 = vsyncpa [#allocation4], 0  ;;  %s3435_s30 = smov [#allocation5]   ;;  %s3203_s13 = scalar_lea.hbm %s3743_s1, 98304 }
   0x6   :  { %s35_s10 = sshll.u32 %s3435_s30, 4  ;;  %p3204_p0 = scmp.ne.s32.totalorder %s3743_s1, %s3203_s13  ;;  %s36_s10 = int_to_ptr.vmem [resolvable:$true] %s35_s10 }
   0x7   :  { %p3207_p1 = scmp.lt.u32.totalorder %s3203_s13, %s3743_s1 }
   0x9   :  { %p3209_p2 = pnand %p3207_p1, %p3204_p0 }
   0xb   :  { %3212 = shalt.err (!%p3209_p2)
}
   0xc   :  { %s3213_s18 = scalar_lea.vmem %s36_s10, 98304  ;;  %p3218_p4 = scmp.lt.s32.totalorder %s36_s10, %s36_s10 }
   0xd   :  { %p3214_p3 = scmp.ne.s32.totalorder %s36_s10, %s3213_s18  ;;  %p3219_p5 = scmp.lt.s32.totalorder %s3213_s18, %s3213_s18 }
   0xf   :  { %p3220_p6 = por %p3219_p5, %p3218_p4 }
  0x11   :  { %p3221_p7 = pnand %p3220_p6, %p3214_p3 }
  0x13   :  { %3224 = shalt.err (!%p3221_p7)
}
  0x14   :  { %s3436_s19 = smov 256   ;;  %s3437_s20 = smov 16  }
  0x15   :  { %41 = dma.hbm_to_vmem [thread:$0]  %s3743_s1, 98304, %s36_s10, [#allocation6], %s3436_s19, %s3436_s19, %s3437_s20  }
  0x16   :  { %s3438_s23 = smov [#allocation8]   ;;  %s3225_s27 = scalar_lea.hbm %s3745_s3, 4096 }
  0x17   :  { %s57_s24 = sshll.u32 %s3438_s23, 4  ;;  %p3226_p8 = scmp.ne.s32.totalorder %s3745_s3, %s3225_s27  ;;  %s58_s24 = int_to_ptr.vmem [resolvable:$true] %s57_s24 }
  0x18   :  { %p3229_p9 = scmp.lt.u32.totalorder %s3225_s27, %s3745_s3 }
  0x1a   :  { %p3231_p10 = pnand %p3229_p9, %p3226_p8 }
  0x1c   :  { %3234 = shalt.err (!%p3231_p10)
}
  0x1d   :  { %s3235_s12 = scalar_lea.vmem %s58_s24, 4096  ;;  %p3240_p12 = scmp.lt.s32.totalorder %s58_s24, %s58_s24 }
  0x1e   :  { %p3236_p11 = scmp.ne.s32.totalorder %s58_s24, %s3235_s12  ;;  %p3241_p13 = scmp.lt.s32.totalorder %s3235_s12, %s3235_s12 }
  0x20   :  { %p3242_p0 = por %p3241_p13, %p3240_p12 }
  0x22   :  { %p3243_p1 = pnand %p3242_p0, %p3236_p11 }
  0x24   :  { %3246 = shalt.err (!%p3243_p1)
}
  0x25   :  { %s3439_s1 = smov 128   ;;  %s3440_s10 = smov 8  }
  0x26   :  { %63 = dma.hbm_to_vmem [thread:$0]  %s3745_s3, 4096, %s58_s24, [#allocation9], %s3439_s1, %s3439_s1, %s3440_s10  }
  0x27   :  { %s3441_s15 = smov [#allocation11]   ;;  %s3442_s17 = smov [#allocation14]  }
  0x28   :  { %s79_s16 = sshll.u32 %s3441_s15, 4  ;;  %s101_s18 = sshll.u32 %s3442_s17, 4  ;;  %s80_s16 = int_to_ptr.vmem [resolvable:$true] %s79_s16  ;;  %s3530_s18 = int_to_ptr.vmem [resolvable:$true] %s101_s18 }
  0x29   :  { %s3247_s21 = scalar_lea.hbm %s3747_s5, 2048 }
  0x2a   :  { %p3248_p2 = scmp.ne.s32.totalorder %s3747_s5, %s3247_s21  ;;  %p3251_p3 = scmp.lt.u32.totalorder %s3247_s21, %s3747_s5 }
  0x2c   :  { %p3253_p4 = pnand %p3251_p3, %p3248_p2 }
  0x2e   :  { %3256 = shalt.err (!%p3253_p4)
}
  0x2f   :  { %s3257_s3 = scalar_lea.vmem %s80_s16, 2048  ;;  %p3262_p6 = scmp.lt.s32.totalorder %s80_s16, %s80_s16 }
  0x30   :  { %p3258_p5 = scmp.ne.s32.totalorder %s80_s16, %s3257_s3  ;;  %p3263_p7 = scmp.lt.s32.totalorder %s3257_s3, %s3257_s3 }
  0x32   :  { %p3264_p8 = por %p3263_p7, %p3262_p6 }
  0x34   :  { %p3265_p9 = pnand %p3264_p8, %p3258_p5 }
  0x36   :  { %3268 = shalt.err (!%p3265_p9)
}
  0x37   :  { %85 = dma.hbm_to_vmem [thread:$0]  %s3747_s5, 2048, %s80_s16, [#allocation12], %s3439_s1, %s3439_s1, %s3440_s10  }
  0x38   :  { %s3269_s30 = scalar_lea.hbm %s3749_s7, 256 }
  0x39   :  { %p3270_p10 = scmp.ne.s32.totalorder %s3749_s7, %s3269_s30  ;;  %p3273_p11 = scmp.lt.u32.totalorder %s3269_s30, %s3749_s7 }
  0x3b   :  { %p3275_p12 = pnand %p3273_p11, %p3270_p10 }
  0x3d   :  { %3278 = shalt.err (!%p3275_p12)
}
  0x3e   :  { %s3279_s15 = scalar_lea.vmem %s3530_s18, 256  ;;  %p3284_p0 = scmp.lt.s32.totalorder %s3530_s18, %s3530_s18 }
  0x3f   :  { %p3280_p13 = scmp.ne.s32.totalorder %s3530_s18, %s3279_s15  ;;  %p3285_p1 = scmp.lt.s32.totalorder %s3279_s15, %s3279_s15 }
  0x41   :  { %p3286_p2 = por %p3285_p1, %p3284_p0 }
  0x43   :  { %p3287_p3 = pnand %p3286_p2, %p3280_p13 }
  0x45   :  { %3290 = shalt.err (!%p3287_p3)
}
  0x46   :  { %107 = dma.hbm_to_vmem [thread:$0]  %s3749_s7, 256, %s3530_s18, [#allocation15], %s3439_s1, %s3439_s1, %s3440_s10  }
  0x47   :  { %s3443_s17 = smov [#allocation2]   ;;  %s3444_s20 = smov [#allocation7]  }
  0x48   :  { %s26_s19 = sshll.u32 %s3443_s17, 4  ;;  %s48_s21 = sshll.u32 %s3444_s20, 4  ;;  %s27_s19 = int_to_ptr.vmem [resolvable:$true] %s26_s19  ;;  %s49_s21 = int_to_ptr.vmem [resolvable:$true] %s48_s21 }
  0x49   :  { %s3291_s25 = scalar_lea.hbm %s3742_s0, 768 }
  0x4a   :  { %p3292_p4 = scmp.ne.s32.totalorder %s3742_s0, %s3291_s25  ;;  %p3295_p5 = scmp.lt.u32.totalorder %s3291_s25, %s3742_s0 }
  0x4c   :  { %p3297_p6 = pnand %p3295_p5, %p3292_p4 }
  0x4e   :  { %3300 = shalt.err (!%p3297_p6)
}
  0x4f   :  { %s3301_s7 = scalar_lea.vmem %s27_s19, 768  ;;  %p3306_p8 = scmp.lt.s32.totalorder %s27_s19, %s27_s19 }
  0x50   :  { %p3302_p7 = scmp.ne.s32.totalorder %s27_s19, %s3301_s7  ;;  %p3307_p9 = scmp.lt.s32.totalorder %s3301_s7, %s3301_s7 }
  0x52   :  { %p3308_p10 = por %p3307_p9, %p3306_p8 }
  0x54   :  { %p3309_p11 = pnand %p3308_p10, %p3302_p7 }
  0x56   :  { %3312 = shalt.err (!%p3309_p11)
}
  0x57   :  { %29 = dma.hbm_to_vmem [thread:$0]  %s3742_s0, 768, %s27_s19, [#allocation3]  }
  0x58   :  { %s3313_s29 = scalar_lea.hbm %s3744_s2, 32 }
  0x59   :  { %p3314_p12 = scmp.ne.s32.totalorder %s3744_s2, %s3313_s29  ;;  %p3317_p13 = scmp.lt.u32.totalorder %s3313_s29, %s3744_s2 }
  0x5b   :  { %p3319_p0 = pnand %p3317_p13, %p3314_p12 }
  0x5d   :  { %3322 = shalt.err (!%p3319_p0)
}
  0x5e   :  { %s3323_s14 = scalar_lea.vmem %s49_s21, 32  ;;  %p3328_p2 = scmp.lt.s32.totalorder %s49_s21, %s49_s21 }
  0x5f   :  { %p3324_p1 = scmp.ne.s32.totalorder %s49_s21, %s3323_s14  ;;  %p3329_p3 = scmp.lt.s32.totalorder %s3323_s14, %s3323_s14 }
  0x61   :  { %p3330_p4 = por %p3329_p3, %p3328_p2 }
  0x63   :  { %p3331_p5 = pnand %p3330_p4, %p3324_p1 }
  0x65   :  { %3334 = shalt.err (!%p3331_p5)
}
  0x66   :  { %51 = dma.hbm_to_vmem [thread:$0]  %s3744_s2, 32, %s49_s21, [#allocation6]  }
  0x67   :  { %s3445_s5 = smov [#allocation10]   ;;  %s3446_s17 = smov [#allocation13]  }
  0x68   :  { %s70_s16 = sshll.u32 %s3445_s5, 4  ;;  %s92_s19 = sshll.u32 %s3446_s17, 4  ;;  %s71_s16 = int_to_ptr.vmem [resolvable:$true] %s70_s16  ;;  %s93_s19 = int_to_ptr.vmem [resolvable:$true] %s92_s19 }
  0x69   :  { %s3335_s23 = scalar_lea.hbm %s3746_s4, 16 }
  0x6a   :  { %p3336_p6 = scmp.ne.s32.totalorder %s3746_s4, %s3335_s23  ;;  %p3339_p7 = scmp.lt.u32.totalorder %s3335_s23, %s3746_s4 }
  0x6c   :  { %p3341_p8 = pnand %p3339_p7, %p3336_p6 }
  0x6e   :  { %3344 = shalt.err (!%p3341_p8)
}
  0x6f   :  { %s3345_s2 = scalar_lea.vmem %s71_s16, 16  ;;  %s3349_s21 = scalar_lea.vmem %s71_s16, 32 }
  0x70   :  { %p3346_p9 = scmp.ne.s32.totalorder %s71_s16, %s3345_s2  ;;  %p3350_p10 = scmp.lt.s32.totalorder %s71_s16, %s71_s16 }
  0x71   :  { %p3351_p11 = scmp.lt.s32.totalorder %s3349_s21, %s3345_s2 }
  0x73   :  { %p3352_p12 = por %p3351_p11, %p3350_p10 }
  0x75   :  { %p3353_p13 = pnand %p3352_p12, %p3346_p9 }
  0x77   :  { %3356 = shalt.err (!%p3353_p13)
}
  0x78   :  { %73 = dma.hbm_to_vmem [thread:$0]  %s3746_s4, 16, %s71_s16, [#allocation9]  }
  0x79   :  { %s3357_s18 = scalar_lea.hbm %s3748_s6, 16 }
  0x7a   :  { %p3358_p0 = scmp.ne.s32.totalorder %s3748_s6, %s3357_s18  ;;  %p3361_p1 = scmp.lt.u32.totalorder %s3357_s18, %s3748_s6 }
  0x7c   :  { %p3363_p2 = pnand %p3361_p1, %p3358_p0 }
  0x7e   :  { %3366 = shalt.err (!%p3363_p2)
}
  0x7f   :  { %s3367_s12 = scalar_lea.vmem %s93_s19, 16  ;;  %s3371_s13 = scalar_lea.vmem %s93_s19, 32 }
  0x80   :  { %p3368_p3 = scmp.ne.s32.totalorder %s93_s19, %s3367_s12  ;;  %p3372_p4 = scmp.lt.s32.totalorder %s93_s19, %s93_s19 }
  0x81   :  { %p3373_p5 = scmp.lt.s32.totalorder %s3371_s13, %s3367_s12 }
  0x83   :  { %p3374_p6 = por %p3373_p5, %p3372_p4 }
  0x85   :  { %p3375_p7 = pnand %p3374_p6, %p3368_p3 }
  0x87   :  { %3378 = shalt.err (!%p3375_p7)
}
  0x88   :  { %95 = dma.hbm_to_vmem [thread:$0]  %s3748_s6, 16, %s93_s19, [#allocation12]  }
  0x89   :  { %s3447_s0 = smov [#allocation16]   ;;  %s3379_s17 = scalar_lea.hbm %s3750_s8, 16 }
  0x8a   :  { %s114_s15 = sshll.u32 %s3447_s0, 4  ;;  %p3380_p8 = scmp.ne.s32.totalorder %s3750_s8, %s3379_s17  ;;  %s115_s15 = int_to_ptr.vmem [resolvable:$true] %s114_s15 }
  0x8b   :  { %p3383_p9 = scmp.lt.u32.totalorder %s3379_s17, %s3750_s8 }
  0x8d   :  { %p3385_p10 = pnand %p3383_p9, %p3380_p8 }
  0x8f   :  { %3388 = shalt.err (!%p3385_p10)
}
  0x90   :  { %s3389_s26 = scalar_lea.vmem %s115_s15, 16  ;;  %s3393_s6 = scalar_lea.vmem %s115_s15, 32 }
  0x91   :  { %p3390_p11 = scmp.ne.s32.totalorder %s115_s15, %s3389_s26  ;;  %p3394_p12 = scmp.lt.s32.totalorder %s115_s15, %s115_s15 }
  0x92   :  { %p3395_p13 = scmp.lt.s32.totalorder %s3393_s6, %s3389_s26 }
  0x94   :  { %p3396_p0 = por %p3395_p13, %p3394_p12 }
  0x96   :  { %p3397_p1 = pnand %p3396_p0, %p3390_p11 }
  0x98   :  { %3400 = shalt.err (!%p3397_p1)
}
  0x99   :  { %117 = dma.hbm_to_vmem [thread:$0]  %s3750_s8, 16, %s115_s15, [#allocation15]  }
  0x9a   :  { %3423 = dma.done.wait [#allocation3], 768  }
  0x9b   :  { %3424 = vsyncadd [#allocation3], 4294966528 }
  0x9c   :  { %3425 = dma.done.wait [#allocation6], 98336  }
  0x9d   :  { %3426 = vsyncadd [#allocation6], 4294868960 }
  0x9e   :  { %3427 = dma.done.wait [#allocation9], 4112  }
  0x9f   :  { %3428 = vsyncadd [#allocation9], 4294963184 }
  0xa0   :  { %3429 = dma.done.wait [#allocation12], 2064  }
  0xa1   :  { %3430 = vsyncadd [#allocation12], 4294965232 }
  0xa2   :  { %3431 = dma.done.wait [#allocation15], 272  }
  0xa3   :  { %3432 = vsyncadd [#allocation15], 4294967024  ;;  %v152_v0 = vld [vmem:[#allocation5 + $0x8] sm:$0xff]  ;;  %v154_v1 = vld [vmem:[#allocation5 + $0x18] sm:$0xff]  ;;  %vm3450_vm0 = vmmov 0   ;;  %vm2130_vm1 = vcmask 130048  }
  0xa4   :  { %v472_v2 = vld [vmem:[#allocation5 + $0xa08] sm:$0xff]  ;;  %v2326_v3 = vpack.c.bf16 %v154_v1, %v152_v0  ;;  %v474_v4 = vld [vmem:[#allocation5 + $0xa18] sm:$0xff]  ;;  %v151_v5 = vld [vmem:[#allocation5] sm:$0xff]  ;;  %s3452_s8 = smov [#allocation17]   ;;  %vm2204_vm2 = vcmask 25600  }
  0xa5   :  { %v153_v6 = vld [vmem:[#allocation5 + $0x10] sm:$0xff]  ;;  %v2646_v7 = vpack.c.bf16 %v474_v4, %v472_v2  ;;  %v471_v9 = vld [vmem:[#allocation5 + $0xa00] sm:$0xff]  ;;  %v156_v11 = vld [vmem:[#allocation5 + $0x28] sm:$0xff]  ;;  %s2212_s24 = sshll.u32 %s3452_s8, 4  ;;  %s2213_s24 = int_to_ptr.vmem [resolvable:$true] %s2212_s24 }
  0xa6   :  { %v2328_v8 = vpack.c.bf16 %v153_v6, %v151_v5  ;;  %v473_v10 = vld [vmem:[#allocation5 + $0xa10] sm:$0xff]  ;;  %2327 = vmatprep.subr.bf16.mxu1 %v2326_v3  ;;  %v158_v13 = vld [vmem:[#allocation5 + $0x38] sm:$0xff]  ;;  %v476_v14 = vld [vmem:[#allocation5 + $0xa28] sm:$0xff]  ;;  %s3401_s2 = scalar_lea.vmem %s2213_s24, 32  ;;  %p3406_p3 = scmp.lt.s32.totalorder %s2213_s24, %s2213_s24 }
  0xa7   :  { %v2648_v12 = vpack.c.bf16 %v473_v10, %v471_v9  ;;  %v478_v15 = vld [vmem:[#allocation5 + $0xa38] sm:$0xff]  ;;  %2647 = vmatprep.subr.bf16.mxu0 %v2646_v7  ;;  %v2330_v16 = vpack.c.bf16 %v158_v13, %v156_v11  ;;  %v155_v18 = vld [vmem:[#allocation5 + $0x20] sm:$0xff]  ;;  %v157_v19 = vld [vmem:[#allocation5 + $0x30] sm:$0xff]  ;;  %p3402_p2 = scmp.ne.s32.totalorder %s2213_s24, %s3401_s2  ;;  %p3407_p4 = scmp.lt.s32.totalorder %s3401_s2, %s3401_s2 }
  0xa8   :  { %2329 = vmatpush1.bf16.msra.mxu1 %v2328_v8  ;;  %v2650_v17 = vpack.c.bf16 %v478_v15, %v476_v14  ;;  %v475_v20 = vld [vmem:[#allocation5 + $0xa20] sm:$0xff]  ;;  %v2332_v21 = vpack.c.bf16 %v157_v19, %v155_v18  ;;  %v477_v22 = vld [vmem:[#allocation5 + $0xa30] sm:$0xff]  ;;  %v160_v23 = vld [vmem:[#allocation5 + $0x48] sm:$0xff] }
  0xa9   :  { %2649 = vmatpush1.bf16.msra.mxu0 %v2648_v12  ;;  %v162_v24 = vld [vmem:[#allocation5 + $0x58] sm:$0xff]  ;;  %2331 = vmatprep.subr.bf16.mxu1 %v2330_v16  ;;  %v2652_v25 = vpack.c.bf16 %v477_v22, %v475_v20  ;;  %v480_v27 = vld [vmem:[#allocation5 + $0xa48] sm:$0xff]  ;;  %v159_v29 = vld [vmem:[#allocation5 + $0x40] sm:$0xff]  ;;  %p3408_p5 = por %p3407_p4, %p3406_p3 }
  0xaa   :  { %2651 = vmatprep.subr.bf16.mxu0 %v2650_v17  ;;  %v2334_v26 = vpack.c.bf16 %v162_v24, %v160_v23  ;;  %v482_v28 = vld [vmem:[#allocation5 + $0xa58] sm:$0xff]  ;;  %v161_v31 = vld [vmem:[#allocation5 + $0x50] sm:$0xff]  ;;  %v479_v32 = vld [vmem:[#allocation5 + $0xa40] sm:$0xff] }
  0xab   :  { %v2654_v30 = vpack.c.bf16 %v482_v28, %v480_v27  ;;  %v481_v33 = vld [vmem:[#allocation5 + $0xa50] sm:$0xff]  ;;  %v2336_v34 = vpack.c.bf16 %v161_v31, %v159_v29  ;;  %v164_v35 = vld [vmem:[#allocation5 + $0x68] sm:$0xff]  ;;  %v166_v36 = vld [vmem:[#allocation5 + $0x78] sm:$0xff]  ;;  %p3409_p6 = pnand %p3408_p5, %p3402_p2 }
  0xac   :  { %2333 = vmatpush1.bf16.msra.mxu1 %v2332_v21  ;;  %v484_v37 = vld [vmem:[#allocation5 + $0xa68] sm:$0xff]  ;;  %v2656_v38 = vpack.c.bf16 %v481_v33, %v479_v32  ;;  %v2338_v39 = vpack.c.bf16 %v166_v36, %v164_v35  ;;  %v486_v40 = vld [vmem:[#allocation5 + $0xa78] sm:$0xff]  ;;  %v163_v41 = vld [vmem:[#allocation5 + $0x60] sm:$0xff] }
  0xad   :  { %2653 = vmatpush1.bf16.msra.mxu0 %v2652_v25  ;;  %2335 = vmatprep.subr.bf16.mxu1 %v2334_v26  ;;  %v165_v42 = vld [vmem:[#allocation5 + $0x70] sm:$0xff]  ;;  %v2658_v43 = vpack.c.bf16 %v486_v40, %v484_v37  ;;  %v483_v44 = vld [vmem:[#allocation5 + $0xa60] sm:$0xff]  ;;  %v168_v46 = vld [vmem:[#allocation5 + $0x88] sm:$0xff] }
  0xae   :  { %2655 = vmatprep.subr.bf16.mxu0 %v2654_v30  ;;  %v485_v45 = vld [vmem:[#allocation5 + $0xa70] sm:$0xff]  ;;  %v170_v47 = vld [vmem:[#allocation5 + $0x98] sm:$0xff]  ;;  %v488_v48 = vld [vmem:[#allocation5 + $0xa88] sm:$0xff]  ;;  %v2340_v50 = vpack.c.bf16 %v165_v42, %v163_v41 }
  0xaf   :  { %v490_v49 = vld [vmem:[#allocation5 + $0xa98] sm:$0xff]  ;;  %v2660_v51 = vpack.c.bf16 %v485_v45, %v483_v44  ;;  %v2342_v52 = vpack.c.bf16 %v170_v47, %v168_v46  ;;  %v167_v53 = vld [vmem:[#allocation5 + $0x80] sm:$0xff]  ;;  %v169_v54 = vld [vmem:[#allocation5 + $0x90] sm:$0xff]  ;;  %v921_v46 = vlaneseq  ;;  %v3448_v47 = vmov 1983009808  }
  0xb0   :  { %2337 = vmatpush1.bf16.msra.mxu1 %v2336_v34  ;;  %v487_v55 = vld [vmem:[#allocation5 + $0xa80] sm:$0xff]  ;;  %v2662_v56 = vpack.c.bf16 %v490_v49, %v488_v48  ;;  %v489_v57 = vld [vmem:[#allocation5 + $0xa90] sm:$0xff]  ;;  %v172_v58 = vld [vmem:[#allocation5 + $0xa8] sm:$0xff]  ;;  %v2344_v62 = vpack.c.bf16 %v169_v54, %v167_v53  ;;  %v939_v48 = vunpack.c.l.s4 %v3448_v47 }
  0xb1   :  { %2657 = vmatpush1.bf16.msra.mxu0 %v2656_v38  ;;  %2339 = vmatprep.subr.bf16.mxu1 %v2338_v39  ;;  %v174_v59 = vld [vmem:[#allocation5 + $0xb8] sm:$0xff]  ;;  %v492_v60 = vld [vmem:[#allocation5 + $0xaa8] sm:$0xff]  ;;  %v2664_v63 = vpack.c.bf16 %v489_v57, %v487_v55  ;;  %v171_v1 = vld [vmem:[#allocation5 + $0xa0] sm:$0xff] }
  0xb2   :  { %2659 = vmatprep.subr.bf16.mxu0 %v2658_v43  ;;  %v494_v61 = vld [vmem:[#allocation5 + $0xab8] sm:$0xff]  ;;  %v2346_v0 = vpack.c.bf16 %v174_v59, %v172_v58  ;;  %v173_v2 = vld [vmem:[#allocation5 + $0xb0] sm:$0xff]  ;;  %v491_v3 = vld [vmem:[#allocation5 + $0xaa0] sm:$0xff] }
  0xb3   :  { %v2666_v4 = vpack.c.bf16 %v494_v61, %v492_v60  ;;  %v493_v5 = vld [vmem:[#allocation5 + $0xab0] sm:$0xff]  ;;  %v176_v6 = vld [vmem:[#allocation5 + $0xc8] sm:$0xff]  ;;  %v178_v7 = vld [vmem:[#allocation5 + $0xd8] sm:$0xff]  ;;  %v2348_v10 = vpack.c.bf16 %v173_v2, %v171_v1  ;;  %v3627_v61 = vshrl.u32 %v921_v46, 7 }
  0xb4   :  { %2341 = vmatpush1.bf16.msra.mxu1 %v2340_v50  ;;  %v496_v8 = vld [vmem:[#allocation5 + $0xac8] sm:$0xff]  ;;  %v498_v9 = vld [vmem:[#allocation5 + $0xad8] sm:$0xff]  ;;  %v2668_v11 = vpack.c.bf16 %v493_v5, %v491_v3  ;;  %v2350_v12 = vpack.c.bf16 %v178_v7, %v176_v6  ;;  %v175_v13 = vld [vmem:[#allocation5 + $0xc0] sm:$0xff] }
  0xb5   :  { %2661 = vmatpush1.bf16.msra.mxu0 %v2660_v51  ;;  %2343 = vmatprep.subr.bf16.mxu1 %v2342_v52  ;;  %v177_v14 = vld [vmem:[#allocation5 + $0xd0] sm:$0xff]  ;;  %v495_v15 = vld [vmem:[#allocation5 + $0xac0] sm:$0xff]  ;;  %v2670_v16 = vpack.c.bf16 %v498_v9, %v496_v8  ;;  %v180_v18 = vld [vmem:[#allocation5 + $0xe8] sm:$0xff] }
  0xb6   :  { %2663 = vmatprep.subr.bf16.mxu0 %v2662_v56  ;;  %v497_v17 = vld [vmem:[#allocation5 + $0xad0] sm:$0xff]  ;;  %v182_v19 = vld [vmem:[#allocation5 + $0xf8] sm:$0xff]  ;;  %v500_v20 = vld [vmem:[#allocation5 + $0xae8] sm:$0xff]  ;;  %v2352_v22 = vpack.c.bf16 %v177_v14, %v175_v13 }
  0xb7   :  { %v502_v21 = vld [vmem:[#allocation5 + $0xaf8] sm:$0xff]  ;;  %v2672_v23 = vpack.c.bf16 %v497_v17, %v495_v15  ;;  %v2354_v24 = vpack.c.bf16 %v182_v19, %v180_v18  ;;  %v179_v25 = vld [vmem:[#allocation5 + $0xe0] sm:$0xff]  ;;  %v181_v26 = vld [vmem:[#allocation5 + $0xf0] sm:$0xff] }
  0xb8   :  { %2345 = vmatpush1.bf16.msra.mxu1 %v2344_v62  ;;  %v499_v27 = vld [vmem:[#allocation5 + $0xae0] sm:$0xff]  ;;  %v2674_v28 = vpack.c.bf16 %v502_v21, %v500_v20  ;;  %v501_v29 = vld [vmem:[#allocation5 + $0xaf0] sm:$0xff]  ;;  %v184_v30 = vld [vmem:[#allocation5 + $0x108] sm:$0xff]  ;;  %v2356_v34 = vpack.c.bf16 %v181_v26, %v179_v25  ;;  %v940_v62 = vunpack.c.0.s8 %v939_v48 }
  0xb9   :  { %2665 = vmatpush1.bf16.msra.mxu0 %v2664_v63  ;;  %2347 = vmatprep.subr.bf16.mxu1 %v2346_v0  ;;  %v186_v31 = vld [vmem:[#allocation5 + $0x118] sm:$0xff]  ;;  %v504_v32 = vld [vmem:[#allocation5 + $0xb08] sm:$0xff]  ;;  %v2676_v35 = vpack.c.bf16 %v501_v29, %v499_v27  ;;  %v183_v37 = vld [vmem:[#allocation5 + $0x100] sm:$0xff] }
  0xba   :  { %2667 = vmatprep.subr.bf16.mxu0 %v2666_v4  ;;  %v506_v33 = vld [vmem:[#allocation5 + $0xb18] sm:$0xff]  ;;  %v2358_v36 = vpack.c.bf16 %v186_v31, %v184_v30  ;;  %v185_v38 = vld [vmem:[#allocation5 + $0x110] sm:$0xff]  ;;  %v503_v39 = vld [vmem:[#allocation5 + $0xb00] sm:$0xff] }
  0xbb   :  { %v2678_v40 = vpack.c.bf16 %v506_v33, %v504_v32  ;;  %v505_v41 = vld [vmem:[#allocation5 + $0xb10] sm:$0xff]  ;;  %v188_v42 = vld [vmem:[#allocation5 + $0x128] sm:$0xff]  ;;  %v190_v43 = vld [vmem:[#allocation5 + $0x138] sm:$0xff]  ;;  %v2360_v49 = vpack.c.bf16 %v185_v38, %v183_v37 }
  0xbc   :  { %2349 = vmatpush1.bf16.msra.mxu1 %v2348_v10  ;;  %v508_v44 = vld [vmem:[#allocation5 + $0xb28] sm:$0xff]  ;;  %v510_v45 = vld [vmem:[#allocation5 + $0xb38] sm:$0xff]  ;;  %v2680_v50 = vpack.c.bf16 %v505_v41, %v503_v39  ;;  %v2362_v51 = vpack.c.bf16 %v190_v43, %v188_v42  ;;  %v187_v52 = vld [vmem:[#allocation5 + $0x120] sm:$0xff] }
  0xbd   :  { %2669 = vmatpush1.bf16.msra.mxu0 %v2668_v11  ;;  %2351 = vmatprep.subr.bf16.mxu1 %v2350_v12  ;;  %v189_v53 = vld [vmem:[#allocation5 + $0x130] sm:$0xff]  ;;  %v507_v54 = vld [vmem:[#allocation5 + $0xb20] sm:$0xff]  ;;  %v2682_v55 = vpack.c.bf16 %v510_v45, %v508_v44  ;;  %v192_v57 = vld [vmem:[#allocation5 + $0x148] sm:$0xff]  ;;  %v3630_v11 = vsub.s32 %v940_v62, %v3627_v61 }
  0xbe   :  { %2671 = vmatprep.subr.bf16.mxu0 %v2670_v16  ;;  %v509_v56 = vld [vmem:[#allocation5 + $0xb30] sm:$0xff]  ;;  %v194_v58 = vld [vmem:[#allocation5 + $0x158] sm:$0xff]  ;;  %v512_v59 = vld [vmem:[#allocation5 + $0xb48] sm:$0xff]  ;;  %v2364_v63 = vpack.c.bf16 %v189_v53, %v187_v52 }
  0xbf   :  { %v514_v60 = vld [vmem:[#allocation5 + $0xb58] sm:$0xff]  ;;  %v2684_v0 = vpack.c.bf16 %v509_v56, %v507_v54  ;;  %v2366_v1 = vpack.c.bf16 %v194_v58, %v192_v57  ;;  %v191_v2 = vld [vmem:[#allocation5 + $0x140] sm:$0xff]  ;;  %v193_v3 = vld [vmem:[#allocation5 + $0x150] sm:$0xff] }
  0xc0   :  { %2353 = vmatpush1.bf16.msra.mxu1 %v2352_v22  ;;  %v511_v4 = vld [vmem:[#allocation5 + $0xb40] sm:$0xff]  ;;  %v2686_v5 = vpack.c.bf16 %v514_v60, %v512_v59  ;;  %v513_v6 = vld [vmem:[#allocation5 + $0xb50] sm:$0xff]  ;;  %v196_v7 = vld [vmem:[#allocation5 + $0x168] sm:$0xff]  ;;  %v2368_v12 = vpack.c.bf16 %v193_v3, %v191_v2 }
  0xc1   :  { %2673 = vmatpush1.bf16.msra.mxu0 %v2672_v23  ;;  %2355 = vmatprep.subr.bf16.mxu1 %v2354_v24  ;;  %v198_v8 = vld [vmem:[#allocation5 + $0x178] sm:$0xff]  ;;  %v516_v9 = vld [vmem:[#allocation5 + $0xb68] sm:$0xff]  ;;  %v195_v13 = vld [vmem:[#allocation5 + $0x160] sm:$0xff]  ;;  %v2688_v14 = vpack.c.bf16 %v513_v6, %v511_v4 }
  0xc2   :  { %2675 = vmatprep.subr.bf16.mxu0 %v2674_v28  ;;  %v518_v10 = vld [vmem:[#allocation5 + $0xb78] sm:$0xff]  ;;  %v2370_v15 = vpack.c.bf16 %v198_v8, %v196_v7  ;;  %v197_v16 = vld [vmem:[#allocation5 + $0x170] sm:$0xff]  ;;  %v515_v17 = vld [vmem:[#allocation5 + $0xb60] sm:$0xff] }
  0xc3   :  { %v517_v18 = vld [vmem:[#allocation5 + $0xb70] sm:$0xff]  ;;  %v2690_v19 = vpack.c.bf16 %v518_v10, %v516_v9  ;;  %v200_v20 = vld [vmem:[#allocation5 + $0x188] sm:$0xff]  ;;  %v202_v21 = vld [vmem:[#allocation5 + $0x198] sm:$0xff]  ;;  %v2372_v27 = vpack.c.bf16 %v197_v16, %v195_v13 }
  0xc4   :  { %2357 = vmatpush1.bf16.msra.mxu1 %v2356_v34  ;;  %v3632_v22 = vld [vmem:[#allocation2] sm:$0xff]  ;;  %v520_v23 = vld [vmem:[#allocation5 + $0xb88] sm:$0xff]  ;;  %v522_v24 = vld [vmem:[#allocation5 + $0xb98] sm:$0xff]  ;;  %v2692_v29 = vpack.c.bf16 %v517_v18, %v515_v17  ;;  %v2374_v30 = vpack.c.bf16 %v202_v21, %v200_v20 }
  0xc5   :  { %2677 = vmatpush1.bf16.msra.mxu0 %v2676_v35  ;;  %2359 = vmatprep.subr.bf16.mxu1 %v2358_v36  ;;  %v3636_v25 = vrot.slane %v3632_v22, %v3630_v11  ;;  %v147_v26 = vld [vmem:[#allocation2 + $0x10] sm:$0xff]  ;;  %v201_v32 = vld [vmem:[#allocation5 + $0x190] sm:$0xff]  ;;  %v2694_v35 = vpack.c.bf16 %v522_v24, %v520_v23  ;;  %v204_v37 = vld [vmem:[#allocation5 + $0x1a8] sm:$0xff]  ;;  %v937_v13 = vcombine.high %v3632_v22, %v3632_v22 }
  0xc6   :  { %2679 = vmatprep.subr.bf16.mxu0 %v2678_v40  ;;  %v971_v28 = vcombine.high %v147_v26, %v147_v26  ;;  %v199_v31 = vld [vmem:[#allocation5 + $0x180] sm:$0xff]  ;;  %v521_v36 = vld [vmem:[#allocation5 + $0xb90] sm:$0xff]  ;;  %v206_v38 = vld [vmem:[#allocation5 + $0x1b8] sm:$0xff] }
  0xc7   :  { %v519_v33 = vld [vmem:[#allocation5 + $0xb80] sm:$0xff]  ;;  %v952_v34 = vcombine.high %v3636_v25, %v3636_v25  ;;  %v524_v40 = vld [vmem:[#allocation5 + $0xba8] sm:$0xff]  ;;  %v526_v41 = vld [vmem:[#allocation5 + $0xbb8] sm:$0xff]  ;;  %v2376_v42 = vpack.c.bf16 %v201_v32, %v199_v31  ;;  %v2378_v45 = vpack.c.bf16 %v206_v38, %v204_v37  ;;  %v3648_v22 = vrot.slane %v937_v13, %v3630_v11 }
  0xc8   :  { %2361 = vmatpush1.bf16.msra.mxu1 %v2360_v49  ;;  %v3641_v39 = vrot.slane %v971_v28, %v3630_v11  ;;  %v2696_v44 = vpack.c.bf16 %v521_v36, %v519_v33  ;;  %v203_v46 = vld [vmem:[#allocation5 + $0x1a0] sm:$0xff]  ;;  %v205_v47 = vld [vmem:[#allocation5 + $0x1b0] sm:$0xff]  ;;  %v2698_v49 = vpack.c.bf16 %v526_v41, %v524_v40  ;;  %v210_v52 = vld [vmem:[#allocation5 + $0x1d8] sm:$0xff] }
  0xc9   :  { %2681 = vmatpush1.bf16.msra.mxu0 %v2680_v50  ;;  %2363 = vmatprep.subr.bf16.mxu1 %v2362_v51  ;;  %v523_v48 = vld [vmem:[#allocation5 + $0xba0] sm:$0xff]  ;;  %v525_v50 = vld [vmem:[#allocation5 + $0xbb0] sm:$0xff]  ;;  %v208_v51 = vld [vmem:[#allocation5 + $0x1c8] sm:$0xff] }
  0xca   :  { %2683 = vmatprep.subr.bf16.mxu0 %v2682_v55  ;;  %1127 = vmatprep.mubr.f32.mxu1 %v952_v34  ;;  %v987_v43 = vcombine.high %v3641_v39, %v3641_v39  ;;  %v528_v53 = vld [vmem:[#allocation5 + $0xbc8] sm:$0xff]  ;;  %v530_v54 = vld [vmem:[#allocation5 + $0xbd8] sm:$0xff]  ;;  %v2380_v55 = vpack.c.bf16 %v205_v47, %v203_v46  ;;  %v2700_v56 = vpack.c.bf16 %v525_v50, %v523_v48  ;;  %v207_v58 = vld [vmem:[#allocation5 + $0x1c0] sm:$0xff] }
  0xcb   :  { %v2382_v57 = vpack.c.bf16 %v210_v52, %v208_v51  ;;  %v209_v59 = vld [vmem:[#allocation5 + $0x1d0] sm:$0xff]  ;;  %v527_v60 = vld [vmem:[#allocation5 + $0xbc0] sm:$0xff]  ;;  %v2702_v62 = vpack.c.bf16 %v530_v54, %v528_v53  ;;  %v532_v2 = vld [vmem:[#allocation5 + $0xbe8] sm:$0xff] }
  0xcc   :  { %2365 = vmatpush1.bf16.msra.mxu1 %v2364_v63  ;;  %1482 = vmatprep.mubr.f32.mxu0 %v987_v43  ;;  %v529_v63 = vld [vmem:[#allocation5 + $0xbd0] sm:$0xff]  ;;  %v534_v3 = vld [vmem:[#allocation5 + $0xbf8] sm:$0xff]  ;;  %v2384_v4 = vpack.c.bf16 %v209_v59, %v207_v58  ;;  %v211_v7 = vld [vmem:[#allocation5 + $0x1e0] sm:$0xff]  ;;  %v953_v43 = vcombine.high %v3648_v22, %v3648_v22 }
  0xcd   :  { %2685 = vmatpush1.bf16.msra.mxu0 %v2684_v0  ;;  %2367 = vmatprep.subr.bf16.mxu1 %v2366_v1  ;;  %v212_v0 = vld [vmem:[#allocation5 + $0x1e8] sm:$0xff]  ;;  %v214_v1 = vld [vmem:[#allocation5 + $0x1f8] sm:$0xff]  ;;  %v213_v8 = vld [vmem:[#allocation5 + $0x1f0] sm:$0xff]  ;;  %v2706_v10 = vpack.c.bf16 %v534_v3, %v532_v2 }
  0xce   :  { %2687 = vmatprep.subr.bf16.mxu0 %v2686_v5  ;;  %v2704_v5 = vpack.c.bf16 %v529_v63, %v527_v60  ;;  %v2386_v6 = vpack.c.bf16 %v214_v1, %v212_v0  ;;  %v531_v9 = vld [vmem:[#allocation5 + $0xbe0] sm:$0xff]  ;;  %v536_v16 = vld [vmem:[#allocation5 + $0xc08] sm:$0xff]  ;;  %v538_v17 = vld [vmem:[#allocation5 + $0xc18] sm:$0xff]  ;;  %v2388_v18 = vpack.c.bf16 %v213_v8, %v211_v7 }
  0xcf   :  { %v215_v21 = vld [vmem:[#allocation5 + $0x200] sm:$0xff]  ;;  %v217_v23 = vld [vmem:[#allocation5 + $0x210] sm:$0xff]  ;;  %v2710_v26 = vpack.c.bf16 %v538_v17, %v536_v16  ;;  %v220_v28 = vld [vmem:[#allocation5 + $0x228] sm:$0xff] }
  0xd0   :  { %2369 = vmatpush1.bf16.msra.mxu1 %v2368_v12  ;;  %v533_v12 = vld [vmem:[#allocation5 + $0xbf0] sm:$0xff]  ;;  %v535_v24 = vld [vmem:[#allocation5 + $0xc00] sm:$0xff]  ;;  %v542_v31 = vld [vmem:[#allocation5 + $0xc38] sm:$0xff]  ;;  %v2392_v32 = vpack.c.bf16 %v217_v23, %v215_v21 }
  0xd1   :  { %2689 = vmatpush1.bf16.msra.mxu0 %v2688_v14  ;;  %2371 = vmatprep.subr.bf16.mxu1 %v2370_v15  ;;  %v216_v14 = vld [vmem:[#allocation5 + $0x208] sm:$0xff]  ;;  %v218_v15 = vld [vmem:[#allocation5 + $0x218] sm:$0xff]  ;;  %v221_v36 = vld [vmem:[#allocation5 + $0x230] sm:$0xff] }
  0xd2   :  { %2691 = vmatprep.subr.bf16.mxu0 %v2690_v19  ;;  %v2708_v19 = vpack.c.bf16 %v533_v12, %v531_v9  ;;  %v2390_v20 = vpack.c.bf16 %v218_v15, %v216_v14  ;;  %v539_v37 = vld [vmem:[#allocation5 + $0xc20] sm:$0xff]  ;;  %v541_v40 = vld [vmem:[#allocation5 + $0xc30] sm:$0xff]  ;;  %v224_v41 = vld [vmem:[#allocation5 + $0x248] sm:$0xff] }
  0xd3   :  { %v2716_v47 = vpack.c.bf16 %v541_v40, %v539_v37  ;;  %v225_v50 = vld [vmem:[#allocation5 + $0x250] sm:$0xff]  ;;  %v543_v51 = vld [vmem:[#allocation5 + $0xc40] sm:$0xff]  ;;  %v228_v54 = vld [vmem:[#allocation5 + $0x268] sm:$0xff] }
  0xd4   :  { %2373 = vmatpush1.bf16.msra.mxu1 %v2372_v27  ;;  %v537_v27 = vld [vmem:[#allocation5 + $0xc10] sm:$0xff]  ;;  %v227_v59 = vld [vmem:[#allocation5 + $0x260] sm:$0xff]  ;;  %v232_v1 = vld [vmem:[#allocation5 + $0x288] sm:$0xff] }
  0xd5   :  { %2693 = vmatpush1.bf16.msra.mxu0 %v2692_v29  ;;  %2375 = vmatprep.subr.bf16.mxu1 %v2374_v30  ;;  %v222_v29 = vld [vmem:[#allocation5 + $0x238] sm:$0xff]  ;;  %v540_v30 = vld [vmem:[#allocation5 + $0xc28] sm:$0xff]  ;;  %v2712_v33 = vpack.c.bf16 %v537_v27, %v535_v24  ;;  %v545_v53 = vld [vmem:[#allocation5 + $0xc50] sm:$0xff] }
  0xd6   :  { %2695 = vmatprep.subr.bf16.mxu0 %v2694_v35  ;;  %v2394_v34 = vpack.c.bf16 %v222_v29, %v220_v28  ;;  %v219_v35 = vld [vmem:[#allocation5 + $0x220] sm:$0xff]  ;;  %v2714_v38 = vpack.c.bf16 %v542_v31, %v540_v30  ;;  %v229_v60 = vld [vmem:[#allocation5 + $0x270] sm:$0xff]  ;;  %v234_v2 = vld [vmem:[#allocation5 + $0x298] sm:$0xff] }
  0xd7   :  { %v2396_v46 = vpack.c.bf16 %v221_v36, %v219_v35  ;;  %v549_v0 = vld [vmem:[#allocation5 + $0xc70] sm:$0xff]  ;;  %v552_v3 = vld [vmem:[#allocation5 + $0xc88] sm:$0xff]  ;;  %v2406_v7 = vpack.c.bf16 %v234_v2, %v232_v1  ;;  %v231_v8 = vld [vmem:[#allocation5 + $0x280] sm:$0xff] }
  0xd8   :  { %2377 = vmatpush1.bf16.msra.mxu1 %v2376_v42  ;;  %v226_v42 = vld [vmem:[#allocation5 + $0x258] sm:$0xff]  ;;  %v233_v9 = vld [vmem:[#allocation5 + $0x290] sm:$0xff]  ;;  %v236_v14 = vld [vmem:[#allocation5 + $0x2a8] sm:$0xff] }
  0xd9   :  { %2697 = vmatpush1.bf16.msra.mxu0 %v2696_v44  ;;  %2379 = vmatprep.subr.bf16.mxu1 %v2378_v45  ;;  %v544_v44 = vld [vmem:[#allocation5 + $0xc48] sm:$0xff]  ;;  %v546_v45 = vld [vmem:[#allocation5 + $0xc58] sm:$0xff]  ;;  %v2398_v48 = vpack.c.bf16 %v226_v42, %v224_v41  ;;  %v553_v13 = vld [vmem:[#allocation5 + $0xc90] sm:$0xff] }
  0xda   :  { %2699 = vmatprep.subr.bf16.mxu0 %v2698_v49  ;;  %v223_v49 = vld [vmem:[#allocation5 + $0x240] sm:$0xff]  ;;  %v2718_v52 = vpack.c.bf16 %v546_v45, %v544_v44  ;;  %v238_v15 = vld [vmem:[#allocation5 + $0x2b8] sm:$0xff]  ;;  %v556_v16 = vld [vmem:[#allocation5 + $0xca8] sm:$0xff] }
  0xdb   :  { %v558_v17 = vld [vmem:[#allocation5 + $0xcb8] sm:$0xff]  ;;  %v235_v21 = vld [vmem:[#allocation5 + $0x2a0] sm:$0xff]  ;;  %v237_v23 = vld [vmem:[#allocation5 + $0x2b0] sm:$0xff] }
  0xdc   :  { %2381 = vmatpush1.bf16.msra.mxu1 %v2380_v55  ;;  %v230_v55 = vld [vmem:[#allocation5 + $0x278] sm:$0xff]  ;;  %v555_v24 = vld [vmem:[#allocation5 + $0xca0] sm:$0xff]  ;;  %v557_v27 = vld [vmem:[#allocation5 + $0xcb0] sm:$0xff] }
  0xdd   :  { %2701 = vmatpush1.bf16.msra.mxu0 %v2700_v56  ;;  %2383 = vmatprep.subr.bf16.mxu1 %v2382_v57  ;;  %v550_v56 = vld [vmem:[#allocation5 + $0xc78] sm:$0xff]  ;;  %v2400_v57 = vpack.c.bf16 %v225_v50, %v223_v49  ;;  %v2402_v58 = vpack.c.bf16 %v230_v55, %v228_v54  ;;  %v240_v28 = vld [vmem:[#allocation5 + $0x2c8] sm:$0xff]  ;;  %v241_v36 = vld [vmem:[#allocation5 + $0x2d0] sm:$0xff] }
  0xde   :  { %2703 = vmatprep.subr.bf16.mxu0 %v2702_v62  ;;  %v547_v62 = vld [vmem:[#allocation5 + $0xc60] sm:$0xff]  ;;  %v242_v29 = vld [vmem:[#allocation5 + $0x2d8] sm:$0xff]  ;;  %v560_v30 = vld [vmem:[#allocation5 + $0xcc8] sm:$0xff] }
  0xdf   :  { %v562_v31 = vld [vmem:[#allocation5 + $0xcd8] sm:$0xff]  ;;  %v2414_v35 = vpack.c.bf16 %v242_v29, %v240_v28  ;;  %v559_v37 = vld [vmem:[#allocation5 + $0xcc0] sm:$0xff]  ;;  %v244_v41 = vld [vmem:[#allocation5 + $0x2e8] sm:$0xff] }
  0xe0   :  { %2385 = vmatpush1.bf16.msra.mxu1 %v2384_v4  ;;  %v554_v4 = vld [vmem:[#allocation5 + $0xc98] sm:$0xff]  ;;  %v2734_v40 = vpack.c.bf16 %v562_v31, %v560_v30  ;;  %v564_v44 = vld [vmem:[#allocation5 + $0xce8] sm:$0xff]  ;;  %v243_v50 = vld [vmem:[#allocation5 + $0x2e0] sm:$0xff] }
  0xe1   :  { %2705 = vmatpush1.bf16.msra.mxu0 %v2704_v5  ;;  %2387 = vmatprep.subr.bf16.mxu1 %v2386_v6  ;;  %v2404_v5 = vpack.c.bf16 %v229_v60, %v227_v59  ;;  %v2724_v6 = vpack.c.bf16 %v549_v0, %v547_v62  ;;  %v2726_v12 = vpack.c.bf16 %v554_v4, %v552_v3  ;;  %v246_v42 = vld [vmem:[#allocation5 + $0x2f8] sm:$0xff]  ;;  %v565_v55 = vld [vmem:[#allocation5 + $0xcf0] sm:$0xff]  ;;  %v247_v62 = vld [vmem:[#allocation5 + $0x300] sm:$0xff] }
  0xe2   :  { %2707 = vmatprep.subr.bf16.mxu0 %v2706_v10  ;;  %v551_v10 = vld [vmem:[#allocation5 + $0xc80] sm:$0xff]  ;;  %v566_v45 = vld [vmem:[#allocation5 + $0xcf8] sm:$0xff]  ;;  %v2418_v49 = vpack.c.bf16 %v246_v42, %v244_v41  ;;  %v569_v2 = vld [vmem:[#allocation5 + $0xd10] sm:$0xff] }
  0xe3   :  { %v2738_v54 = vpack.c.bf16 %v566_v45, %v564_v44  ;;  %v567_v0 = vld [vmem:[#allocation5 + $0xd00] sm:$0xff]  ;;  %v252_v3 = vld [vmem:[#allocation5 + $0x328] sm:$0xff]  ;;  %v254_v4 = vld [vmem:[#allocation5 + $0x338] sm:$0xff] }
  0xe4   :  { %2389 = vmatpush1.bf16.msra.mxu1 %v2388_v18  ;;  %v2408_v18 = vpack.c.bf16 %v233_v9, %v231_v8  ;;  %v2744_v8 = vpack.c.bf16 %v569_v2, %v567_v0  ;;  %v2426_v9 = vpack.c.bf16 %v254_v4, %v252_v3  ;;  %v577_v29 = vld [vmem:[#allocation5 + $0xd50] sm:$0xff]  ;;  %v260_v30 = vld [vmem:[#allocation5 + $0x368] sm:$0xff]  ;;  %v262_v31 = vld [vmem:[#allocation5 + $0x378] sm:$0xff] }
  0xe5   :  { %2709 = vmatpush1.bf16.msra.mxu0 %v2708_v19  ;;  %2391 = vmatprep.subr.bf16.mxu1 %v2390_v20  ;;  %v2728_v19 = vpack.c.bf16 %v553_v13, %v551_v10  ;;  %v2410_v20 = vpack.c.bf16 %v238_v15, %v236_v14  ;;  %v251_v10 = vld [vmem:[#allocation5 + $0x320] sm:$0xff]  ;;  %v573_v15 = vld [vmem:[#allocation5 + $0xd30] sm:$0xff]  ;;  %v264_v44 = vld [vmem:[#allocation5 + $0x388] sm:$0xff] }
  0xe6   :  { %2711 = vmatprep.subr.bf16.mxu0 %v2710_v26  ;;  %v2730_v26 = vpack.c.bf16 %v558_v17, %v556_v16  ;;  %v571_v13 = vld [vmem:[#allocation5 + $0xd20] sm:$0xff]  ;;  %v256_v16 = vld [vmem:[#allocation5 + $0x348] sm:$0xff]  ;;  %v258_v17 = vld [vmem:[#allocation5 + $0x358] sm:$0xff] }
  0xe7   :  { %1128 = vmatmul.mubr.f32.vlgmr.msra.gmra.mrb[0].mxu1 %v3636_v25  ;;  %v548_v25 = vld [vmem:[#allocation5 + $0xc68] sm:$0xff]  ;;  %v581_v42 = vld [vmem:[#allocation5 + $0xd70] sm:$0xff]  ;;  %v266_v45 = vld [vmem:[#allocation5 + $0x398] sm:$0xff] }
  0xe8   :  { %2393 = vmatpush1.bf16.msra.mxu1 %v2392_v32  ;;  %1483 = vmatmul.mubr.f32.vlgmr.msra.gmra.mrb[0].mxu0 %v3641_v39  ;;  %v2720_v39 = vpack.c.bf16 %v545_v53, %v543_v51  ;;  %v2722_v63 = vpack.c.bf16 %v550_v56, %v548_v25  ;;  %v2412_v32 = vpack.c.bf16 %v237_v23, %v235_v21  ;;  %v245_v51 = vld [vmem:[#allocation5 + $0x2f0] sm:$0xff]  ;;  %v248_v25 = vld [vmem:[#allocation5 + $0x308] sm:$0xff]  ;;  %v250_v56 = vld [vmem:[#allocation5 + $0x318] sm:$0xff] }
  0xe9   :  { %2713 = vmatpush1.bf16.msra.mxu0 %v2712_v33  ;;  %2395 = vmatprep.subr.bf16.mxu1 %v2394_v34  ;;  %v239_v33 = vld [vmem:[#allocation5 + $0x2c0] sm:$0xff]  ;;  %v2732_v34 = vpack.c.bf16 %v557_v27, %v555_v24  ;;  %v2422_v60 = vpack.c.bf16 %v250_v56, %v248_v25  ;;  %v2748_v21 = vpack.c.bf16 %v573_v15, %v571_v13  ;;  %v585_v25 = vld [vmem:[#allocation5 + $0xd90] sm:$0xff]  ;;  %v268_v56 = vld [vmem:[#allocation5 + $0x3a8] sm:$0xff] }
  0xea   :  { %2715 = vmatprep.subr.bf16.mxu0 %v2714_v38  ;;  %1198 = vmatprep.mubr.f32.mxu1 %v953_v43  ;;  %v561_v38 = vld [vmem:[#allocation5 + $0xcd0] sm:$0xff]  ;;  %v3654_v43 = vld [vmem:[#allocation2 + $0x18] sm:$0xff]  ;;  %v2430_v23 = vpack.c.bf16 %v258_v17, %v256_v16  ;;  %v255_v24 = vld [vmem:[#allocation5 + $0x340] sm:$0xff] }
  0xeb   :  { %v575_v27 = vld [vmem:[#allocation5 + $0xd40] sm:$0xff]  ;;  %v269_v0 = vld [vmem:[#allocation5 + $0x3b0] sm:$0xff]  ;;  %v272_v4 = vld [vmem:[#allocation5 + $0x3c8] sm:$0xff] }
  0xec   :  { %2397 = vmatpush1.bf16.msra.mxu1 %v2396_v46  ;;  %v3658_v46 = vrot.slane %v3654_v43, %v3630_v11  ;;  %v589_v3 = vld [vmem:[#allocation5 + $0xdb0] sm:$0xff]  ;;  %v276_v17 = vld [vmem:[#allocation5 + $0x3e8] sm:$0xff] }
  0xed   :  { %2717 = vmatpush1.bf16.msra.mxu0 %v2716_v47  ;;  %2399 = vmatprep.subr.bf16.mxu1 %v2398_v48  ;;  %v2416_v47 = vpack.c.bf16 %v241_v36, %v239_v33  ;;  %v2736_v48 = vpack.c.bf16 %v561_v38, %v559_v37  ;;  %v582_v33 = vld [vmem:[#allocation5 + $0xd78] sm:$0xff]  ;;  %v2434_v36 = vpack.c.bf16 %v262_v31, %v260_v30  ;;  %v259_v37 = vld [vmem:[#allocation5 + $0x360] sm:$0xff]  ;;  %v261_v38 = vld [vmem:[#allocation5 + $0x370] sm:$0xff] }
  0xee   :  { %2719 = vmatprep.subr.bf16.mxu0 %v2718_v52  ;;  %v563_v52 = vld [vmem:[#allocation5 + $0xce0] sm:$0xff]  ;;  %v1003_v53 = vcombine.high %v3658_v46, %v3658_v46  ;;  %v273_v13 = vld [vmem:[#allocation5 + $0x3d0] sm:$0xff]  ;;  %v280_v31 = vld [vmem:[#allocation5 + $0x408] sm:$0xff] }
  0xef   :  { %v2740_v59 = vpack.c.bf16 %v565_v55, %v563_v52  ;;  %v263_v52 = vld [vmem:[#allocation5 + $0x380] sm:$0xff]  ;;  %v593_v16 = vld [vmem:[#allocation5 + $0xdd0] sm:$0xff] }
  0xf0   :  { %2401 = vmatpush1.bf16.msra.mxu1 %v2400_v57  ;;  %v568_v57 = vld [vmem:[#allocation5 + $0xd08] sm:$0xff]  ;;  %1553 = vmatprep.mubr.f32.mxu0 %v1003_v53  ;;  %v265_v53 = vld [vmem:[#allocation5 + $0x390] sm:$0xff] }
  0xf1   :  { %2721 = vmatpush1.bf16.msra.mxu0 %v2720_v39  ;;  %2403 = vmatprep.subr.bf16.mxu1 %v2402_v58  ;;  %v570_v39 = vld [vmem:[#allocation5 + $0xd18] sm:$0xff]  ;;  %v2420_v58 = vpack.c.bf16 %v245_v51, %v243_v50  ;;  %v2438_v51 = vpack.c.bf16 %v266_v45, %v264_v44  ;;  %v597_v30 = vld [vmem:[#allocation5 + $0xdf0] sm:$0xff] }
  0xf2   :  { %2723 = vmatprep.subr.bf16.mxu0 %v2722_v63  ;;  %v249_v63 = vld [vmem:[#allocation5 + $0x310] sm:$0xff]  ;;  %v2742_v1 = vpack.c.bf16 %v570_v39, %v568_v57  ;;  %v270_v57 = vld [vmem:[#allocation5 + $0x3b8] sm:$0xff]  ;;  %v588_v39 = vld [vmem:[#allocation5 + $0xda8] sm:$0xff] }
  0xf3   :  { %v601_v45 = vld [vmem:[#allocation5 + $0xe10] sm:$0xff] }
  0xf4   :  { %2405 = vmatpush1.bf16.msra.mxu1 %v2404_v5  ;;  %v572_v5 = vld [vmem:[#allocation5 + $0xd28] sm:$0xff] }
  0xf5   :  { %2725 = vmatpush1.bf16.msra.mxu0 %v2724_v6  ;;  %2407 = vmatprep.subr.bf16.mxu1 %v2406_v7  ;;  %v574_v6 = vld [vmem:[#allocation5 + $0xd38] sm:$0xff]  ;;  %v2424_v7 = vpack.c.bf16 %v249_v63, %v247_v62  ;;  %v2442_v62 = vpack.c.bf16 %v270_v57, %v268_v56  ;;  %v267_v63 = vld [vmem:[#allocation5 + $0x3a0] sm:$0xff] }
  0xf6   :  { %2727 = vmatprep.subr.bf16.mxu0 %v2726_v12  ;;  %v253_v12 = vld [vmem:[#allocation5 + $0x330] sm:$0xff]  ;;  %v2746_v14 = vpack.c.bf16 %v574_v6, %v572_v5  ;;  %v274_v5 = vld [vmem:[#allocation5 + $0x3d8] sm:$0xff]  ;;  %v592_v6 = vld [vmem:[#allocation5 + $0xdc8] sm:$0xff] }
  0xf7   :  { %v3667_v56 = vld [vmem:[#allocation2 + $0x8] sm:$0xff] }
  0xf8   :  { %2409 = vmatpush1.bf16.msra.mxu1 %v2408_v18  ;;  %v576_v18 = vld [vmem:[#allocation5 + $0xd48] sm:$0xff] }
  0xf9   :  { %2729 = vmatpush1.bf16.msra.mxu0 %v2728_v19  ;;  %2411 = vmatprep.subr.bf16.mxu1 %v2410_v20  ;;  %v578_v19 = vld [vmem:[#allocation5 + $0xd58] sm:$0xff]  ;;  %v2428_v20 = vpack.c.bf16 %v253_v12, %v251_v10  ;;  %v2446_v10 = vpack.c.bf16 %v274_v5, %v272_v4  ;;  %v271_v12 = vld [vmem:[#allocation5 + $0x3c0] sm:$0xff] }
  0xfa   :  { %2731 = vmatprep.subr.bf16.mxu0 %v2730_v26  ;;  %v257_v26 = vld [vmem:[#allocation5 + $0x350] sm:$0xff]  ;;  %v2750_v28 = vpack.c.bf16 %v578_v19, %v576_v18  ;;  %v278_v18 = vld [vmem:[#allocation5 + $0x3f8] sm:$0xff]  ;;  %v596_v19 = vld [vmem:[#allocation5 + $0xde8] sm:$0xff] }
  0xfb   :  { %v287_v5 = vld [vmem:[#allocation5 + $0x440] sm:$0xff] }
  0xfc   :  { %2413 = vmatpush1.bf16.msra.mxu1 %v2412_v32  ;;  %v580_v32 = vld [vmem:[#allocation5 + $0xd68] sm:$0xff] }
  0xfd   :  { %2733 = vmatpush1.bf16.msra.mxu0 %v2732_v34  ;;  %2415 = vmatprep.subr.bf16.mxu1 %v2414_v35  ;;  %v2432_v34 = vpack.c.bf16 %v257_v26, %v255_v24  ;;  %v2752_v35 = vpack.c.bf16 %v577_v29, %v575_v27  ;;  %v2754_v41 = vpack.c.bf16 %v582_v33, %v580_v32  ;;  %v275_v26 = vld [vmem:[#allocation5 + $0x3e0] sm:$0xff]  ;;  %v277_v27 = vld [vmem:[#allocation5 + $0x3f0] sm:$0xff]  ;;  %v282_v32 = vld [vmem:[#allocation5 + $0x418] sm:$0xff] }
  0xfe   :  { %2735 = vmatprep.subr.bf16.mxu0 %v2734_v40  ;;  %v579_v40 = vld [vmem:[#allocation5 + $0xd60] sm:$0xff]  ;;  %v2450_v24 = vpack.c.bf16 %v278_v18, %v276_v17  ;;  %v600_v33 = vld [vmem:[#allocation5 + $0xe08] sm:$0xff]  ;;  %v293_v17 = vld [vmem:[#allocation5 + $0x470] sm:$0xff] }
  0xff   :  { %v2756_v50 = vpack.c.bf16 %v581_v42, %v579_v40  ;;  %v279_v40 = vld [vmem:[#allocation5 + $0x400] sm:$0xff] }
 0x100   :  { %2417 = vmatpush1.bf16.msra.mxu1 %v2416_v47  ;;  %v584_v47 = vld [vmem:[#allocation5 + $0xd88] sm:$0xff]  ;;  %v599_v42 = vld [vmem:[#allocation5 + $0xe00] sm:$0xff] }
 0x101   :  { %2737 = vmatpush1.bf16.msra.mxu0 %v2736_v48  ;;  %2419 = vmatprep.subr.bf16.mxu1 %v2418_v49  ;;  %v586_v48 = vld [vmem:[#allocation5 + $0xd98] sm:$0xff]  ;;  %v2436_v49 = vpack.c.bf16 %v261_v38, %v259_v37  ;;  %v2454_v38 = vpack.c.bf16 %v282_v32, %v280_v31  ;;  %v611_v18 = vld [vmem:[#allocation5 + $0xe60] sm:$0xff]  ;;  %v297_v31 = vld [vmem:[#allocation5 + $0x490] sm:$0xff] }
 0x102   :  { %2739 = vmatprep.subr.bf16.mxu0 %v2738_v54  ;;  %v583_v54 = vld [vmem:[#allocation5 + $0xd80] sm:$0xff]  ;;  %v2758_v55 = vpack.c.bf16 %v586_v48, %v584_v47  ;;  %v284_v47 = vld [vmem:[#allocation5 + $0x428] sm:$0xff]  ;;  %v286_v48 = vld [vmem:[#allocation5 + $0x438] sm:$0xff] }
 0x103   :  { %v615_v32 = vld [vmem:[#allocation5 + $0xe80] sm:$0xff] }
 0x104   :  { %2421 = vmatpush1.bf16.msra.mxu1 %v2420_v58  ;;  %v590_v58 = vld [vmem:[#allocation5 + $0xdb8] sm:$0xff] }
 0x105   :  { %2741 = vmatpush1.bf16.msra.mxu0 %v2740_v59  ;;  %2423 = vmatprep.subr.bf16.mxu1 %v2422_v60  ;;  %v2440_v59 = vpack.c.bf16 %v265_v53, %v263_v52  ;;  %v2760_v60 = vpack.c.bf16 %v585_v25, %v583_v54  ;;  %v2762_v2 = vpack.c.bf16 %v590_v58, %v588_v39  ;;  %v283_v52 = vld [vmem:[#allocation5 + $0x420] sm:$0xff]  ;;  %v605_v39 = vld [vmem:[#allocation5 + $0xe30] sm:$0xff]  ;;  %v288_v58 = vld [vmem:[#allocation5 + $0x448] sm:$0xff] }
 0x106   :  { %2743 = vmatprep.subr.bf16.mxu0 %v2742_v1  ;;  %v587_v1 = vld [vmem:[#allocation5 + $0xda0] sm:$0xff]  ;;  %v2776_v53 = vpack.c.bf16 %v601_v45, %v599_v42  ;;  %v2458_v54 = vpack.c.bf16 %v286_v48, %v284_v47  ;;  %v301_v45 = vld [vmem:[#allocation5 + $0x4b0] sm:$0xff] }
 0x107   :  { %v603_v25 = vld [vmem:[#allocation5 + $0xe20] sm:$0xff] }
 0x108   :  { %2425 = vmatpush1.bf16.msra.mxu1 %v2424_v7  ;;  %v594_v7 = vld [vmem:[#allocation5 + $0xdd8] sm:$0xff]  ;;  %v619_v47 = vld [vmem:[#allocation5 + $0xea0] sm:$0xff] }
 0x109   :  { %2745 = vmatpush1.bf16.msra.mxu0 %v2744_v8  ;;  %2427 = vmatprep.subr.bf16.mxu1 %v2426_v9  ;;  %v2444_v8 = vpack.c.bf16 %v269_v0, %v267_v63  ;;  %v2764_v9 = vpack.c.bf16 %v589_v3, %v587_v1  ;;  %v2766_v15 = vpack.c.bf16 %v594_v7, %v592_v6  ;;  %v610_v63 = vld [vmem:[#allocation5 + $0xe58] sm:$0xff]  ;;  %v289_v6 = vld [vmem:[#allocation5 + $0x450] sm:$0xff]  ;;  %v607_v7 = vld [vmem:[#allocation5 + $0xe40] sm:$0xff] }
 0x10a   :  { %2747 = vmatprep.subr.bf16.mxu0 %v2746_v14  ;;  %v591_v14 = vld [vmem:[#allocation5 + $0xdc0] sm:$0xff]  ;;  %v2780_v3 = vpack.c.bf16 %v605_v39, %v603_v25  ;;  %v305_v39 = vld [vmem:[#allocation5 + $0x4d0] sm:$0xff] }
 0x10c   :  { %2429 = vmatpush1.bf16.msra.mxu1 %v2428_v20  ;;  %v598_v20 = vld [vmem:[#allocation5 + $0xdf8] sm:$0xff] }
 0x10d   :  { %2749 = vmatpush1.bf16.msra.mxu0 %v2748_v21  ;;  %2431 = vmatprep.subr.bf16.mxu1 %v2430_v23  ;;  %v2448_v21 = vpack.c.bf16 %v273_v13, %v271_v12  ;;  %v2768_v23 = vpack.c.bf16 %v593_v16, %v591_v14  ;;  %v2770_v29 = vpack.c.bf16 %v598_v20, %v596_v19  ;;  %v612_v12 = vld [vmem:[#allocation5 + $0xe68] sm:$0xff]  ;;  %v614_v13 = vld [vmem:[#allocation5 + $0xe78] sm:$0xff]  ;;  %v291_v16 = vld [vmem:[#allocation5 + $0x460] sm:$0xff] }
 0x10e   :  { %2751 = vmatprep.subr.bf16.mxu0 %v2750_v28  ;;  %v595_v28 = vld [vmem:[#allocation5 + $0xde0] sm:$0xff]  ;;  %v2786_v19 = vpack.c.bf16 %v614_v13, %v612_v12  ;;  %v613_v20 = vld [vmem:[#allocation5 + $0xe70] sm:$0xff]  ;;  %v314_v12 = vld [vmem:[#allocation5 + $0x518] sm:$0xff] }
 0x10f   :  { %v2772_v37 = vpack.c.bf16 %v597_v30, %v595_v28  ;;  %v2788_v28 = vpack.c.bf16 %v613_v20, %v611_v18  ;;  %v295_v30 = vld [vmem:[#allocation5 + $0x480] sm:$0xff]  ;;  %v632_v13 = vld [vmem:[#allocation5 + $0xf08] sm:$0xff]  ;;  %v313_v18 = vld [vmem:[#allocation5 + $0x510] sm:$0xff] }
 0x110   :  { %2433 = vmatpush1.bf16.msra.mxu1 %v2432_v34  ;;  %v602_v34 = vld [vmem:[#allocation5 + $0xe18] sm:$0xff] }
 0x111   :  { %2753 = vmatpush1.bf16.msra.mxu0 %v2752_v35  ;;  %2435 = vmatprep.subr.bf16.mxu1 %v2434_v36  ;;  %v988_v35 = vcombine.high %v3654_v43, %v3654_v43  ;;  %v2452_v36 = vpack.c.bf16 %v277_v27, %v275_v26  ;;  %v2774_v44 = vpack.c.bf16 %v602_v34, %v600_v33  ;;  %v618_v26 = vld [vmem:[#allocation5 + $0xe98] sm:$0xff]  ;;  %v617_v34 = vld [vmem:[#allocation5 + $0xe90] sm:$0xff] }
 0x112   :  { %2755 = vmatprep.subr.bf16.mxu0 %v2754_v41  ;;  %v281_v41 = vld [vmem:[#allocation5 + $0x410] sm:$0xff]  ;;  %v2468_v27 = vpack.c.bf16 %v293_v17, %v291_v16  ;;  %v311_v17 = vld [vmem:[#allocation5 + $0x500] sm:$0xff] }
 0x113   :  { %v2456_v43 = vpack.c.bf16 %v281_v41, %v279_v40  ;;  %v2472_v40 = vpack.c.bf16 %v297_v31, %v295_v30  ;;  %v2792_v41 = vpack.c.bf16 %v617_v34, %v615_v32  ;;  %v315_v31 = vld [vmem:[#allocation5 + $0x520] sm:$0xff]  ;;  %v317_v32 = vld [vmem:[#allocation5 + $0x530] sm:$0xff] }
 0x114   :  { %2437 = vmatpush1.bf16.msra.mxu1 %v2436_v49  ;;  %v604_v49 = vld [vmem:[#allocation5 + $0xe28] sm:$0xff] }
 0x115   :  { %2757 = vmatpush1.bf16.msra.mxu0 %v2756_v50  ;;  %2439 = vmatprep.subr.bf16.mxu1 %v2438_v51  ;;  %v606_v50 = vld [vmem:[#allocation5 + $0xe38] sm:$0xff]  ;;  %v3665_v51 = vrot.slane %v988_v35, %v3630_v11  ;;  %v300_v35 = vld [vmem:[#allocation5 + $0x4a8] sm:$0xff] }
 0x116   :  { %2759 = vmatprep.subr.bf16.mxu0 %v2758_v55  ;;  %v285_v55 = vld [vmem:[#allocation5 + $0x430] sm:$0xff]  ;;  %v2778_v57 = vpack.c.bf16 %v606_v50, %v604_v49  ;;  %v304_v50 = vld [vmem:[#allocation5 + $0x4c8] sm:$0xff] }
 0x117   :  { %v1004_v0 = vcombine.high %v3665_v51, %v3665_v51  ;;  %v2460_v1 = vpack.c.bf16 %v285_v55, %v283_v52  ;;  %v621_v49 = vld [vmem:[#allocation5 + $0xeb0] sm:$0xff]  ;;  %v624_v52 = vld [vmem:[#allocation5 + $0xec8] sm:$0xff] }
 0x118   :  { %2441 = vmatpush1.bf16.msra.mxu1 %v2440_v59  ;;  %v290_v59 = vld [vmem:[#allocation5 + $0x458] sm:$0xff]  ;;  %v2796_v55 = vpack.c.bf16 %v621_v49, %v619_v47  ;;  %v321_v47 = vld [vmem:[#allocation5 + $0x550] sm:$0xff] }
 0x119   :  { %2761 = vmatpush1.bf16.msra.mxu0 %v2760_v60  ;;  %2443 = vmatprep.subr.bf16.mxu1 %v2442_v62  ;;  %v3671_v60 = vrot.slane %v3667_v56, %v3630_v11  ;;  %v608_v62 = vld [vmem:[#allocation5 + $0xe48] sm:$0xff]  ;;  %v2462_v4 = vpack.c.bf16 %v290_v59, %v288_v58  ;;  %v623_v58 = vld [vmem:[#allocation5 + $0xec0] sm:$0xff] }
 0x11a   :  { %2763 = vmatprep.subr.bf16.mxu0 %v2762_v2 }
 0x11b   :  { %v969_v2 = vcombine.high %v3671_v60, %v3671_v60 }
 0x11c   :  { %2445 = vmatpush1.bf16.msra.mxu1 %v2444_v8  ;;  %v609_v8 = vld [vmem:[#allocation5 + $0xe50] sm:$0xff] }
 0x11d   :  { %2765 = vmatpush1.bf16.msra.mxu0 %v2764_v9  ;;  %2447 = vmatprep.subr.bf16.mxu1 %v2446_v10  ;;  %v292_v9 = vld [vmem:[#allocation5 + $0x468] sm:$0xff]  ;;  %v294_v10 = vld [vmem:[#allocation5 + $0x478] sm:$0xff]  ;;  %v2784_v14 = vpack.c.bf16 %v609_v8, %v607_v7  ;;  %v309_v7 = vld [vmem:[#allocation5 + $0x4f0] sm:$0xff] }
 0x11e   :  { %2767 = vmatprep.subr.bf16.mxu0 %v2766_v15  ;;  %v2466_v15 = vpack.c.bf16 %v294_v10, %v292_v9  ;;  %v629_v9 = vld [vmem:[#allocation5 + $0xef0] sm:$0xff]  ;;  %v312_v10 = vld [vmem:[#allocation5 + $0x508] sm:$0xff] }
 0x11f   :  { %v2486_v16 = vpack.c.bf16 %v314_v12, %v312_v10  ;;  %v649_v10 = vld [vmem:[#allocation5 + $0xf90] sm:$0xff]  ;;  %v332_v12 = vld [vmem:[#allocation5 + $0x5a8] sm:$0xff] }
 0x120   :  { %2449 = vmatpush1.bf16.msra.mxu1 %v2448_v21  ;;  %v296_v21 = vld [vmem:[#allocation5 + $0x488] sm:$0xff] }
 0x121   :  { %2769 = vmatpush1.bf16.msra.mxu0 %v2768_v23  ;;  %2451 = vmatprep.subr.bf16.mxu1 %v2450_v24  ;;  %v298_v23 = vld [vmem:[#allocation5 + $0x498] sm:$0xff]  ;;  %v616_v24 = vld [vmem:[#allocation5 + $0xe88] sm:$0xff] }
 0x122   :  { %2771 = vmatprep.subr.bf16.mxu0 %v2770_v29  ;;  %v2470_v29 = vpack.c.bf16 %v298_v23, %v296_v21  ;;  %v2790_v33 = vpack.c.bf16 %v618_v26, %v616_v24  ;;  %v633_v21 = vld [vmem:[#allocation5 + $0xf10] sm:$0xff]  ;;  %v316_v23 = vld [vmem:[#allocation5 + $0x528] sm:$0xff]  ;;  %v318_v24 = vld [vmem:[#allocation5 + $0x538] sm:$0xff] }
 0x123   :  { %v636_v26 = vld [vmem:[#allocation5 + $0xf28] sm:$0xff]  ;;  %v2490_v30 = vpack.c.bf16 %v318_v24, %v316_v23  ;;  %v653_v23 = vld [vmem:[#allocation5 + $0xfb0] sm:$0xff] }
 0x124   :  { %2453 = vmatpush1.bf16.msra.mxu1 %v2452_v36  ;;  %v302_v36 = vld [vmem:[#allocation5 + $0x4b8] sm:$0xff]  ;;  %v336_v24 = vld [vmem:[#allocation5 + $0x5c8] sm:$0xff] }
 0x125   :  { %2773 = vmatpush1.bf16.msra.mxu0 %v2772_v37  ;;  %2455 = vmatprep.subr.bf16.mxu1 %v2454_v38  ;;  %v620_v37 = vld [vmem:[#allocation5 + $0xea8] sm:$0xff]  ;;  %v622_v38 = vld [vmem:[#allocation5 + $0xeb8] sm:$0xff]  ;;  %v2474_v42 = vpack.c.bf16 %v302_v36, %v300_v35  ;;  %v637_v35 = vld [vmem:[#allocation5 + $0xf30] sm:$0xff] }
 0x126   :  { %2775 = vmatprep.subr.bf16.mxu0 %v2774_v44  ;;  %v299_v44 = vld [vmem:[#allocation5 + $0x4a0] sm:$0xff]  ;;  %v2794_v48 = vpack.c.bf16 %v622_v38, %v620_v37  ;;  %v320_v36 = vld [vmem:[#allocation5 + $0x548] sm:$0xff]  ;;  %v322_v37 = vld [vmem:[#allocation5 + $0x558] sm:$0xff] }
 0x127   :  { %1199 = vmatmul.mubr.f32.vlgmr.msra.gmra.mrb[0].mxu1 %v3648_v22  ;;  %v2782_v22 = vpack.c.bf16 %v610_v63, %v608_v62  ;;  %v625_v62 = vld [vmem:[#allocation5 + $0xed0] sm:$0xff]  ;;  %v308_v63 = vld [vmem:[#allocation5 + $0x4e8] sm:$0xff] }
 0x128   :  { %2457 = vmatpush1.bf16.msra.mxu1 %v2456_v43  ;;  %1554 = vmatmul.mubr.f32.vlgmr.msra.gmra.mrb[0].mxu0 %v3658_v46  ;;  %v2464_v46 = vpack.c.bf16 %v289_v6, %v287_v5  ;;  %v306_v43 = vld [vmem:[#allocation5 + $0x4d8] sm:$0xff]  ;;  %v307_v6 = vld [vmem:[#allocation5 + $0x4e0] sm:$0xff]  ;;  %v640_v38 = vld [vmem:[#allocation5 + $0xf48] sm:$0xff] }
 0x129   :  { %2777 = vmatpush1.bf16.msra.mxu0 %v2776_v53  ;;  %2459 = vmatprep.subr.bf16.mxu1 %v2458_v54  ;;  %v626_v53 = vld [vmem:[#allocation5 + $0xed8] sm:$0xff]  ;;  %v2476_v54 = vpack.c.bf16 %v301_v45, %v299_v44  ;;  %v2478_v25 = vpack.c.bf16 %v306_v43, %v304_v50  ;;  %v2494_v44 = vpack.c.bf16 %v322_v37, %v320_v36  ;;  %v319_v45 = vld [vmem:[#allocation5 + $0x540] sm:$0xff]  ;;  %v641_v50 = vld [vmem:[#allocation5 + $0xf50] sm:$0xff] }
 0x12a   :  { %2779 = vmatprep.subr.bf16.mxu0 %v2778_v57  ;;  %1269 = vmatprep.mubr.f32.mxu1 %v969_v2  ;;  %v303_v57 = vld [vmem:[#allocation5 + $0x4c0] sm:$0xff]  ;;  %v2798_v59 = vpack.c.bf16 %v626_v53, %v624_v52  ;;  %v630_v2 = vld [vmem:[#allocation5 + $0xef8] sm:$0xff]  ;;  %v324_v43 = vld [vmem:[#allocation5 + $0x568] sm:$0xff] }
 0x12b   :  { %1624 = vmatprep.mubr.f32.mxu0 %v1004_v0  ;;  %v310_v0 = vld [vmem:[#allocation5 + $0x4f8] sm:$0xff]  ;;  %v644_v53 = vld [vmem:[#allocation5 + $0xf68] sm:$0xff]  ;;  %v657_v36 = vld [vmem:[#allocation5 + $0xfd0] sm:$0xff] }
 0x12c   :  { %2461 = vmatpush1.bf16.msra.mxu1 %v2460_v1  ;;  %v628_v1 = vld [vmem:[#allocation5 + $0xee8] sm:$0xff]  ;;  %v2482_v5 = vpack.c.bf16 %v310_v0, %v308_v63  ;;  %v326_v52 = vld [vmem:[#allocation5 + $0x578] sm:$0xff]  ;;  %v645_v63 = vld [vmem:[#allocation5 + $0xf70] sm:$0xff] }
 0x12d   :  { %2781 = vmatpush1.bf16.msra.mxu0 %v2780_v3  ;;  %2463 = vmatprep.subr.bf16.mxu1 %v2462_v4  ;;  %v2480_v3 = vpack.c.bf16 %v305_v39, %v303_v57  ;;  %v2800_v4 = vpack.c.bf16 %v625_v62, %v623_v58  ;;  %v2802_v8 = vpack.c.bf16 %v630_v2, %v628_v1  ;;  %v323_v39 = vld [vmem:[#allocation5 + $0x560] sm:$0xff]  ;;  %v325_v58 = vld [vmem:[#allocation5 + $0x570] sm:$0xff]  ;;  %v328_v0 = vld [vmem:[#allocation5 + $0x588] sm:$0xff] }
 0x12e   :  { %2783 = vmatprep.subr.bf16.mxu0 %v2782_v22  ;;  %v627_v22 = vld [vmem:[#allocation5 + $0xee0] sm:$0xff]  ;;  %v2498_v57 = vpack.c.bf16 %v326_v52, %v324_v43  ;;  %v330_v1 = vld [vmem:[#allocation5 + $0x598] sm:$0xff]  ;;  %v648_v2 = vld [vmem:[#allocation5 + $0xf88] sm:$0xff] }
 0x12f   :  { %v340_v37 = vld [vmem:[#allocation5 + $0x5e8] sm:$0xff]  ;;  %v661_v43 = vld [vmem:[#allocation5 + $0xff0] sm:$0xff] }
 0x130   :  { %2465 = vmatpush1.bf16.msra.mxu1 %v2464_v46  ;;  %v634_v46 = vld [vmem:[#allocation5 + $0xf18] sm:$0xff]  ;;  %v344_v52 = vld [vmem:[#allocation5 + $0x608] sm:$0xff] }
 0x131   :  { %2785 = vmatpush1.bf16.msra.mxu0 %v2784_v14  ;;  %2467 = vmatprep.subr.bf16.mxu1 %v2466_v15  ;;  %v2484_v14 = vpack.c.bf16 %v309_v7, %v307_v6  ;;  %v2804_v15 = vpack.c.bf16 %v629_v9, %v627_v22  ;;  %v2806_v20 = vpack.c.bf16 %v634_v46, %v632_v13  ;;  %v327_v7 = vld [vmem:[#allocation5 + $0x580] sm:$0xff]  ;;  %v329_v22 = vld [vmem:[#allocation5 + $0x590] sm:$0xff]  ;;  %v334_v13 = vld [vmem:[#allocation5 + $0x5b8] sm:$0xff] }
 0x132   :  { %2787 = vmatprep.subr.bf16.mxu0 %v2786_v19  ;;  %v631_v19 = vld [vmem:[#allocation5 + $0xf00] sm:$0xff]  ;;  %v2502_v6 = vpack.c.bf16 %v330_v1, %v328_v0  ;;  %v652_v46 = vld [vmem:[#allocation5 + $0xfa8] sm:$0xff] }
 0x133   :  { %v663_v0 = vld [vmem:[#allocation5 + $0x1000] sm:$0xff] }
 0x134   :  { %2469 = vmatpush1.bf16.msra.mxu1 %v2468_v27  ;;  %v638_v27 = vld [vmem:[#allocation5 + $0xf38] sm:$0xff] }
 0x135   :  { %2789 = vmatpush1.bf16.msra.mxu0 %v2788_v28  ;;  %2471 = vmatprep.subr.bf16.mxu1 %v2470_v29  ;;  %v2488_v28 = vpack.c.bf16 %v313_v18, %v311_v17  ;;  %v2808_v29 = vpack.c.bf16 %v633_v21, %v631_v19  ;;  %v2810_v34 = vpack.c.bf16 %v638_v27, %v636_v26  ;;  %v331_v18 = vld [vmem:[#allocation5 + $0x5a0] sm:$0xff]  ;;  %v333_v19 = vld [vmem:[#allocation5 + $0x5b0] sm:$0xff]  ;;  %v338_v26 = vld [vmem:[#allocation5 + $0x5d8] sm:$0xff] }
 0x136   :  { %2791 = vmatprep.subr.bf16.mxu0 %v2790_v33  ;;  %v635_v33 = vld [vmem:[#allocation5 + $0xf20] sm:$0xff]  ;;  %v2506_v17 = vpack.c.bf16 %v334_v13, %v332_v12  ;;  %v656_v27 = vld [vmem:[#allocation5 + $0xfc8] sm:$0xff]  ;;  %v349_v12 = vld [vmem:[#allocation5 + $0x630] sm:$0xff] }
 0x137   :  { %v667_v13 = vld [vmem:[#allocation5 + $0x1020] sm:$0xff] }
 0x138   :  { %2473 = vmatpush1.bf16.msra.mxu1 %v2472_v40  ;;  %v642_v40 = vld [vmem:[#allocation5 + $0xf58] sm:$0xff] }
 0x139   :  { %2793 = vmatpush1.bf16.msra.mxu0 %v2792_v41  ;;  %2475 = vmatprep.subr.bf16.mxu1 %v2474_v42  ;;  %v2492_v41 = vpack.c.bf16 %v317_v32, %v315_v31  ;;  %v2812_v42 = vpack.c.bf16 %v637_v35, %v635_v33  ;;  %v2814_v49 = vpack.c.bf16 %v642_v40, %v640_v38  ;;  %v335_v32 = vld [vmem:[#allocation5 + $0x5c0] sm:$0xff]  ;;  %v337_v33 = vld [vmem:[#allocation5 + $0x5d0] sm:$0xff]  ;;  %v342_v38 = vld [vmem:[#allocation5 + $0x5f8] sm:$0xff] }
 0x13a   :  { %2795 = vmatprep.subr.bf16.mxu0 %v2794_v48  ;;  %v639_v48 = vld [vmem:[#allocation5 + $0xf40] sm:$0xff]  ;;  %v2510_v31 = vpack.c.bf16 %v338_v26, %v336_v24  ;;  %v660_v40 = vld [vmem:[#allocation5 + $0xfe8] sm:$0xff] }
 0x13b   :  { %v351_v26 = vld [vmem:[#allocation5 + $0x640] sm:$0xff] }
 0x13c   :  { %2477 = vmatpush1.bf16.msra.mxu1 %v2476_v54  ;;  %v646_v54 = vld [vmem:[#allocation5 + $0xf78] sm:$0xff] }
 0x13d   :  { %2797 = vmatpush1.bf16.msra.mxu0 %v2796_v55  ;;  %2479 = vmatprep.subr.bf16.mxu1 %v2478_v25  ;;  %v2496_v55 = vpack.c.bf16 %v321_v47, %v319_v45  ;;  %v2816_v25 = vpack.c.bf16 %v641_v50, %v639_v48  ;;  %v2818_v62 = vpack.c.bf16 %v646_v54, %v644_v53  ;;  %v339_v47 = vld [vmem:[#allocation5 + $0x5e0] sm:$0xff]  ;;  %v341_v48 = vld [vmem:[#allocation5 + $0x5f0] sm:$0xff]  ;;  %v346_v53 = vld [vmem:[#allocation5 + $0x618] sm:$0xff] }
 0x13e   :  { %2799 = vmatprep.subr.bf16.mxu0 %v2798_v59  ;;  %v643_v59 = vld [vmem:[#allocation5 + $0xf60] sm:$0xff]  ;;  %v2514_v45 = vpack.c.bf16 %v342_v38, %v340_v37  ;;  %v954_v54 = vcombine.high %v3667_v56, %v3667_v56  ;;  %v357_v37 = vld [vmem:[#allocation5 + $0x670] sm:$0xff] }
 0x13f   :  { %v675_v38 = vld [vmem:[#allocation5 + $0x1060] sm:$0xff] }
 0x140   :  { %2481 = vmatpush1.bf16.msra.mxu1 %v2480_v3  ;;  %v650_v3 = vld [vmem:[#allocation5 + $0xf98] sm:$0xff]  ;;  %v3684_v56 = vrot.slane %v954_v54, %v3630_v11 }
 0x141   :  { %2801 = vmatpush1.bf16.msra.mxu0 %v2800_v4  ;;  %2483 = vmatprep.subr.bf16.mxu1 %v2482_v5  ;;  %v2500_v4 = vpack.c.bf16 %v325_v58, %v323_v39  ;;  %v2820_v5 = vpack.c.bf16 %v645_v63, %v643_v59  ;;  %v2822_v9 = vpack.c.bf16 %v650_v3, %v648_v2  ;;  %v3681_v39 = vld [vmem:[#allocation2 + $0x20] sm:$0xff]  ;;  %v348_v3 = vld [vmem:[#allocation5 + $0x628] sm:$0xff] }
 0x142   :  { %2803 = vmatprep.subr.bf16.mxu0 %v2802_v8  ;;  %v647_v8 = vld [vmem:[#allocation5 + $0xf80] sm:$0xff]  ;;  %v2518_v59 = vpack.c.bf16 %v346_v53, %v344_v52  ;;  %v345_v63 = vld [vmem:[#allocation5 + $0x610] sm:$0xff] }
 0x143   :  { %v665_v2 = vld [vmem:[#allocation5 + $0x1010] sm:$0xff]  ;;  %v679_v53 = vld [vmem:[#allocation5 + $0x1080] sm:$0xff] }
 0x144   :  { %2485 = vmatpush1.bf16.msra.mxu1 %v2484_v14  ;;  %v654_v14 = vld [vmem:[#allocation5 + $0xfb8] sm:$0xff]  ;;  %v361_v52 = vld [vmem:[#allocation5 + $0x690] sm:$0xff] }
 0x145   :  { %2805 = vmatpush1.bf16.msra.mxu0 %v2804_v15  ;;  %2487 = vmatprep.subr.bf16.mxu1 %v2486_v16  ;;  %v2504_v15 = vpack.c.bf16 %v329_v22, %v327_v7  ;;  %v2824_v16 = vpack.c.bf16 %v649_v10, %v647_v8  ;;  %v2826_v21 = vpack.c.bf16 %v654_v14, %v652_v46  ;;  %v347_v10 = vld [vmem:[#allocation5 + $0x620] sm:$0xff]  ;;  %v669_v14 = vld [vmem:[#allocation5 + $0x1030] sm:$0xff] }
 0x146   :  { %2807 = vmatprep.subr.bf16.mxu0 %v2806_v20  ;;  %v651_v20 = vld [vmem:[#allocation5 + $0xfa0] sm:$0xff]  ;;  %v3688_v7 = vrot.slane %v3681_v39, %v3630_v11  ;;  %v2840_v8 = vpack.c.bf16 %v665_v2, %v663_v0  ;;  %v365_v2 = vld [vmem:[#allocation5 + $0x6b0] sm:$0xff] }
 0x148   :  { %2489 = vmatpush1.bf16.msra.mxu1 %v2488_v28  ;;  %v658_v28 = vld [vmem:[#allocation5 + $0xfd8] sm:$0xff] }
 0x149   :  { %2809 = vmatpush1.bf16.msra.mxu0 %v2808_v29  ;;  %2491 = vmatprep.subr.bf16.mxu1 %v2490_v30  ;;  %v2508_v29 = vpack.c.bf16 %v333_v19, %v331_v18  ;;  %v2828_v30 = vpack.c.bf16 %v653_v23, %v651_v20  ;;  %v2830_v35 = vpack.c.bf16 %v658_v28, %v656_v27  ;;  %v672_v18 = vld [vmem:[#allocation5 + $0x1048] sm:$0xff]  ;;  %v674_v19 = vld [vmem:[#allocation5 + $0x1058] sm:$0xff]  ;;  %v353_v27 = vld [vmem:[#allocation5 + $0x650] sm:$0xff] }
 0x14a   :  { %2811 = vmatprep.subr.bf16.mxu0 %v2810_v34  ;;  %v655_v34 = vld [vmem:[#allocation5 + $0xfc0] sm:$0xff]  ;;  %v1020_v20 = vcombine.high %v3688_v7, %v3688_v7  ;;  %v2844_v23 = vpack.c.bf16 %v669_v14, %v667_v13  ;;  %v369_v14 = vld [vmem:[#allocation5 + $0x6d0] sm:$0xff] }
 0x14b   :  { %v671_v28 = vld [vmem:[#allocation5 + $0x1040] sm:$0xff] }
 0x14c   :  { %2493 = vmatpush1.bf16.msra.mxu1 %v2492_v41  ;;  %v662_v41 = vld [vmem:[#allocation5 + $0xff8] sm:$0xff] }
 0x14d   :  { %2813 = vmatpush1.bf16.msra.mxu0 %v2812_v42  ;;  %2495 = vmatprep.subr.bf16.mxu1 %v2494_v44  ;;  %v2512_v42 = vpack.c.bf16 %v337_v33, %v335_v32  ;;  %v2832_v44 = vpack.c.bf16 %v657_v36, %v655_v34  ;;  %v2834_v50 = vpack.c.bf16 %v662_v41, %v660_v40  ;;  %v676_v32 = vld [vmem:[#allocation5 + $0x1068] sm:$0xff]  ;;  %v678_v33 = vld [vmem:[#allocation5 + $0x1078] sm:$0xff]  ;;  %v355_v36 = vld [vmem:[#allocation5 + $0x660] sm:$0xff] }
 0x14e   :  { %2815 = vmatprep.subr.bf16.mxu0 %v2814_v49  ;;  %v659_v49 = vld [vmem:[#allocation5 + $0xfe0] sm:$0xff]  ;;  %v2528_v34 = vpack.c.bf16 %v353_v27, %v351_v26  ;;  %v2850_v40 = vpack.c.bf16 %v678_v33, %v676_v32  ;;  %v677_v41 = vld [vmem:[#allocation5 + $0x1070] sm:$0xff]  ;;  %v378_v32 = vld [vmem:[#allocation5 + $0x718] sm:$0xff] }
 0x14f   :  { %v2836_v58 = vpack.c.bf16 %v661_v43, %v659_v49  ;;  %v2852_v49 = vpack.c.bf16 %v677_v41, %v675_v38  ;;  %v359_v43 = vld [vmem:[#allocation5 + $0x680] sm:$0xff]  ;;  %v696_v33 = vld [vmem:[#allocation5 + $0x1108] sm:$0xff]  ;;  %v377_v38 = vld [vmem:[#allocation5 + $0x710] sm:$0xff] }
 0x150   :  { %2497 = vmatpush1.bf16.msra.mxu1 %v2496_v55  ;;  %v664_v55 = vld [vmem:[#allocation5 + $0x1008] sm:$0xff]  ;;  %v371_v27 = vld [vmem:[#allocation5 + $0x6e0] sm:$0xff] }
 0x151   :  { %2817 = vmatpush1.bf16.msra.mxu0 %v2816_v25  ;;  %2499 = vmatprep.subr.bf16.mxu1 %v2498_v57  ;;  %v666_v25 = vld [vmem:[#allocation5 + $0x1018] sm:$0xff]  ;;  %v2516_v57 = vpack.c.bf16 %v341_v48, %v339_v47  ;;  %v2532_v48 = vpack.c.bf16 %v357_v37, %v355_v36  ;;  %v375_v37 = vld [vmem:[#allocation5 + $0x700] sm:$0xff] }
 0x152   :  { %2819 = vmatprep.subr.bf16.mxu0 %v2818_v62  ;;  %v343_v62 = vld [vmem:[#allocation5 + $0x600] sm:$0xff]  ;;  %v2838_v1 = vpack.c.bf16 %v666_v25, %v664_v55  ;;  %v682_v47 = vld [vmem:[#allocation5 + $0x1098] sm:$0xff]  ;;  %v681_v55 = vld [vmem:[#allocation5 + $0x1090] sm:$0xff] }
 0x153   :  { %v2520_v22 = vpack.c.bf16 %v345_v63, %v343_v62  ;;  %v364_v25 = vld [vmem:[#allocation5 + $0x6a8] sm:$0xff]  ;;  %v2536_v62 = vpack.c.bf16 %v361_v52, %v359_v43  ;;  %v2856_v63 = vpack.c.bf16 %v681_v55, %v679_v53  ;;  %v379_v52 = vld [vmem:[#allocation5 + $0x720] sm:$0xff]  ;;  %v381_v53 = vld [vmem:[#allocation5 + $0x730] sm:$0xff] }
 0x154   :  { %2501 = vmatpush1.bf16.msra.mxu1 %v2500_v4  ;;  %v350_v4 = vld [vmem:[#allocation5 + $0x638] sm:$0xff] }
 0x155   :  { %2821 = vmatpush1.bf16.msra.mxu0 %v2820_v5  ;;  %2503 = vmatprep.subr.bf16.mxu1 %v2502_v6  ;;  %v668_v5 = vld [vmem:[#allocation5 + $0x1028] sm:$0xff]  ;;  %v670_v6 = vld [vmem:[#allocation5 + $0x1038] sm:$0xff] }
 0x156   :  { %2823 = vmatprep.subr.bf16.mxu0 %v2822_v9  ;;  %v2522_v9 = vpack.c.bf16 %v350_v4, %v348_v3  ;;  %v2842_v46 = vpack.c.bf16 %v670_v6, %v668_v5  ;;  %v683_v3 = vld [vmem:[#allocation5 + $0x10a0] sm:$0xff]  ;;  %v685_v5 = vld [vmem:[#allocation5 + $0x10b0] sm:$0xff]  ;;  %v368_v6 = vld [vmem:[#allocation5 + $0x6c8] sm:$0xff] }
 0x158   :  { %2505 = vmatpush1.bf16.msra.mxu1 %v2504_v15  ;;  %v352_v15 = vld [vmem:[#allocation5 + $0x648] sm:$0xff] }
 0x159   :  { %2825 = vmatpush1.bf16.msra.mxu0 %v2824_v16  ;;  %2507 = vmatprep.subr.bf16.mxu1 %v2506_v17  ;;  %v354_v16 = vld [vmem:[#allocation5 + $0x658] sm:$0xff]  ;;  %v970_v17 = vcombine.high %v3684_v56, %v3684_v56 }
 0x15a   :  { %2827 = vmatprep.subr.bf16.mxu0 %v2826_v21  ;;  %v2524_v21 = vpack.c.bf16 %v349_v12, %v347_v10  ;;  %v2526_v24 = vpack.c.bf16 %v354_v16, %v352_v15  ;;  %v2860_v12 = vpack.c.bf16 %v685_v5, %v683_v3  ;;  %v687_v15 = vld [vmem:[#allocation5 + $0x10c0] sm:$0xff]  ;;  %v385_v3 = vld [vmem:[#allocation5 + $0x750] sm:$0xff] }
 0x15c   :  { %2509 = vmatpush1.bf16.msra.mxu1 %v2508_v29  ;;  %v2846_v29 = vpack.c.bf16 %v674_v19, %v672_v18  ;;  %v372_v18 = vld [vmem:[#allocation5 + $0x6e8] sm:$0xff]  ;;  %v374_v19 = vld [vmem:[#allocation5 + $0x6f8] sm:$0xff] }
 0x15d   :  { %2829 = vmatpush1.bf16.msra.mxu0 %v2828_v30  ;;  %2511 = vmatprep.subr.bf16.mxu1 %v2510_v31  ;;  %v673_v30 = vld [vmem:[#allocation5 + $0x1050] sm:$0xff]  ;;  %v358_v31 = vld [vmem:[#allocation5 + $0x678] sm:$0xff]  ;;  %v2546_v26 = vpack.c.bf16 %v374_v19, %v372_v18  ;;  %v392_v19 = vld [vmem:[#allocation5 + $0x788] sm:$0xff] }
 0x15e   :  { %2831 = vmatprep.subr.bf16.mxu0 %v2830_v35  ;;  %v709_v18 = vld [vmem:[#allocation5 + $0x1170] sm:$0xff] }
 0x160   :  { %2513 = vmatpush1.bf16.msra.mxu1 %v2512_v42  ;;  %v360_v42 = vld [vmem:[#allocation5 + $0x688] sm:$0xff] }
 0x161   :  { %2833 = vmatpush1.bf16.msra.mxu0 %v2832_v44  ;;  %2515 = vmatprep.subr.bf16.mxu1 %v2514_v45  ;;  %v362_v44 = vld [vmem:[#allocation5 + $0x698] sm:$0xff]  ;;  %v680_v45 = vld [vmem:[#allocation5 + $0x1088] sm:$0xff] }
 0x162   :  { %2835 = vmatprep.subr.bf16.mxu0 %v2834_v50  ;;  %v2534_v50 = vpack.c.bf16 %v362_v44, %v360_v42  ;;  %v2854_v54 = vpack.c.bf16 %v682_v47, %v680_v45  ;;  %v697_v42 = vld [vmem:[#allocation5 + $0x1110] sm:$0xff]  ;;  %v380_v44 = vld [vmem:[#allocation5 + $0x728] sm:$0xff]  ;;  %v382_v45 = vld [vmem:[#allocation5 + $0x738] sm:$0xff] }
 0x163   :  { %v700_v47 = vld [vmem:[#allocation5 + $0x1128] sm:$0xff]  ;;  %v2554_v43 = vpack.c.bf16 %v382_v45, %v380_v44  ;;  %v717_v44 = vld [vmem:[#allocation5 + $0x11b0] sm:$0xff] }
 0x164   :  { %2517 = vmatpush1.bf16.msra.mxu1 %v2516_v57  ;;  %v366_v57 = vld [vmem:[#allocation5 + $0x6b8] sm:$0xff]  ;;  %v400_v45 = vld [vmem:[#allocation5 + $0x7c8] sm:$0xff] }
 0x165   :  { %2837 = vmatpush1.bf16.msra.mxu0 %v2836_v58  ;;  %2519 = vmatprep.subr.bf16.mxu1 %v2518_v59  ;;  %v684_v58 = vld [vmem:[#allocation5 + $0x10a8] sm:$0xff]  ;;  %v686_v59 = vld [vmem:[#allocation5 + $0x10b8] sm:$0xff]  ;;  %v2538_v0 = vpack.c.bf16 %v366_v57, %v364_v25  ;;  %v701_v25 = vld [vmem:[#allocation5 + $0x1130] sm:$0xff] }
 0x166   :  { %2839 = vmatprep.subr.bf16.mxu0 %v2838_v1  ;;  %v363_v1 = vld [vmem:[#allocation5 + $0x6a0] sm:$0xff]  ;;  %v2858_v4 = vpack.c.bf16 %v686_v59, %v684_v58  ;;  %v384_v57 = vld [vmem:[#allocation5 + $0x748] sm:$0xff]  ;;  %v386_v58 = vld [vmem:[#allocation5 + $0x758] sm:$0xff] }
 0x167   :  { %1270 = vmatmul.mubr.f32.vlgmr.msra.gmra.mrb[0].mxu1 %v3671_v60  ;;  %v356_v60 = vld [vmem:[#allocation5 + $0x668] sm:$0xff]  ;;  %v2540_v10 = vpack.c.bf16 %v365_v2, %v363_v1  ;;  %v2558_v1 = vpack.c.bf16 %v386_v58, %v384_v57  ;;  %v383_v2 = vld [vmem:[#allocation5 + $0x740] sm:$0xff]  ;;  %v721_v57 = vld [vmem:[#allocation5 + $0x11d0] sm:$0xff] }
 0x168   :  { %2521 = vmatpush1.bf16.msra.mxu1 %v2520_v22  ;;  %1625 = vmatmul.mubr.f32.vlgmr.msra.gmra.mrb[0].mxu0 %v3665_v51  ;;  %v2848_v51 = vpack.c.bf16 %v673_v30, %v671_v28  ;;  %v2530_v35 = vpack.c.bf16 %v358_v31, %v356_v60  ;;  %v370_v22 = vld [vmem:[#allocation5 + $0x6d8] sm:$0xff]  ;;  %v373_v28 = vld [vmem:[#allocation5 + $0x6f0] sm:$0xff]  ;;  %v376_v31 = vld [vmem:[#allocation5 + $0x708] sm:$0xff] }
 0x169   :  { %2841 = vmatpush1.bf16.msra.mxu0 %v2840_v8  ;;  %2523 = vmatprep.subr.bf16.mxu1 %v2522_v9  ;;  %v688_v8 = vld [vmem:[#allocation5 + $0x10c8] sm:$0xff]  ;;  %v690_v9 = vld [vmem:[#allocation5 + $0x10d8] sm:$0xff]  ;;  %v2542_v13 = vpack.c.bf16 %v370_v22, %v368_v6  ;;  %v693_v60 = vld [vmem:[#allocation5 + $0x10f0] sm:$0xff]  ;;  %v2550_v36 = vpack.c.bf16 %v378_v32, %v376_v31 }
 0x16a   :  { %2843 = vmatprep.subr.bf16.mxu0 %v2842_v46  ;;  %1340 = vmatprep.mubr.f32.mxu1 %v970_v17  ;;  %v367_v46 = vld [vmem:[#allocation5 + $0x6c0] sm:$0xff]  ;;  %v2862_v16 = vpack.c.bf16 %v690_v9, %v688_v8  ;;  %v689_v17 = vld [vmem:[#allocation5 + $0x10d0] sm:$0xff]  ;;  %v704_v59 = vld [vmem:[#allocation5 + $0x1148] sm:$0xff] }
 0x16b   :  { %1695 = vmatprep.mubr.f32.mxu0 %v1020_v20  ;;  %v692_v20 = vld [vmem:[#allocation5 + $0x10e8] sm:$0xff]  ;;  %v705_v6 = vld [vmem:[#allocation5 + $0x1150] sm:$0xff]  ;;  %v390_v8 = vld [vmem:[#allocation5 + $0x778] sm:$0xff] }
 0x16c   :  { %2525 = vmatpush1.bf16.msra.mxu1 %v2524_v21  ;;  %v694_v21 = vld [vmem:[#allocation5 + $0x10f8] sm:$0xff]  ;;  %v388_v22 = vld [vmem:[#allocation5 + $0x768] sm:$0xff]  ;;  %v713_v31 = vld [vmem:[#allocation5 + $0x1190] sm:$0xff] }
 0x16d   :  { %2845 = vmatpush1.bf16.msra.mxu0 %v2844_v23  ;;  %2527 = vmatprep.subr.bf16.mxu1 %v2526_v24  ;;  %v2544_v23 = vpack.c.bf16 %v369_v14, %v367_v46  ;;  %v2864_v24 = vpack.c.bf16 %v689_v17, %v687_v15  ;;  %v2866_v30 = vpack.c.bf16 %v694_v21, %v692_v20  ;;  %v708_v9 = vld [vmem:[#allocation5 + $0x1168] sm:$0xff]  ;;  %v387_v14 = vld [vmem:[#allocation5 + $0x760] sm:$0xff]  ;;  %v389_v15 = vld [vmem:[#allocation5 + $0x770] sm:$0xff] }
 0x16e   :  { %2847 = vmatprep.subr.bf16.mxu0 %v2846_v29  ;;  %v691_v29 = vld [vmem:[#allocation5 + $0x10e0] sm:$0xff]  ;;  %v2562_v46 = vpack.c.bf16 %v390_v8, %v388_v22  ;;  %v394_v20 = vld [vmem:[#allocation5 + $0x798] sm:$0xff]  ;;  %v712_v21 = vld [vmem:[#allocation5 + $0x1188] sm:$0xff] }
 0x16f   :  { %v396_v32 = vld [vmem:[#allocation5 + $0x7a8] sm:$0xff]  ;;  %v725_v22 = vld [vmem:[#allocation5 + $0x11f0] sm:$0xff] }
 0x170   :  { %2529 = vmatpush1.bf16.msra.mxu1 %v2528_v34  ;;  %v698_v34 = vld [vmem:[#allocation5 + $0x1118] sm:$0xff]  ;;  %v404_v58 = vld [vmem:[#allocation5 + $0x7e8] sm:$0xff] }
 0x171   :  { %2849 = vmatpush1.bf16.msra.mxu0 %v2848_v51  ;;  %2531 = vmatprep.subr.bf16.mxu1 %v2530_v35  ;;  %v2548_v51 = vpack.c.bf16 %v373_v28, %v371_v27  ;;  %v2868_v35 = vpack.c.bf16 %v693_v60, %v691_v29  ;;  %v2870_v41 = vpack.c.bf16 %v698_v34, %v696_v33  ;;  %v391_v28 = vld [vmem:[#allocation5 + $0x780] sm:$0xff]  ;;  %v393_v29 = vld [vmem:[#allocation5 + $0x790] sm:$0xff]  ;;  %v398_v33 = vld [vmem:[#allocation5 + $0x7b8] sm:$0xff] }
 0x172   :  { %2851 = vmatprep.subr.bf16.mxu0 %v2850_v40  ;;  %v695_v40 = vld [vmem:[#allocation5 + $0x1100] sm:$0xff]  ;;  %v2566_v27 = vpack.c.bf16 %v394_v20, %v392_v19  ;;  %v716_v34 = vld [vmem:[#allocation5 + $0x11a8] sm:$0xff]  ;;  %v729_v20 = vld [vmem:[#allocation5 + $0x1210] sm:$0xff] }
 0x173   :  { %v408_v8 = vld [vmem:[#allocation5 + $0x808] sm:$0xff] }
 0x174   :  { %2533 = vmatpush1.bf16.msra.mxu1 %v2532_v48  ;;  %v702_v48 = vld [vmem:[#allocation5 + $0x1138] sm:$0xff] }
 0x175   :  { %2853 = vmatpush1.bf16.msra.mxu0 %v2852_v49  ;;  %2535 = vmatprep.subr.bf16.mxu1 %v2534_v50  ;;  %v2552_v49 = vpack.c.bf16 %v377_v38, %v375_v37  ;;  %v2872_v50 = vpack.c.bf16 %v697_v42, %v695_v40  ;;  %v2874_v55 = vpack.c.bf16 %v702_v48, %v700_v47  ;;  %v395_v38 = vld [vmem:[#allocation5 + $0x7a0] sm:$0xff]  ;;  %v397_v40 = vld [vmem:[#allocation5 + $0x7b0] sm:$0xff]  ;;  %v402_v47 = vld [vmem:[#allocation5 + $0x7d8] sm:$0xff] }
 0x176   :  { %2855 = vmatprep.subr.bf16.mxu0 %v2854_v54  ;;  %v699_v54 = vld [vmem:[#allocation5 + $0x1120] sm:$0xff]  ;;  %v2570_v37 = vpack.c.bf16 %v398_v33, %v396_v32  ;;  %v720_v48 = vld [vmem:[#allocation5 + $0x11c8] sm:$0xff] }
 0x177   :  { %v731_v32 = vld [vmem:[#allocation5 + $0x1220] sm:$0xff] }
 0x178   :  { %2537 = vmatpush1.bf16.msra.mxu1 %v2536_v62  ;;  %v706_v62 = vld [vmem:[#allocation5 + $0x1158] sm:$0xff] }
 0x179   :  { %2857 = vmatpush1.bf16.msra.mxu0 %v2856_v63  ;;  %2539 = vmatprep.subr.bf16.mxu1 %v2538_v0  ;;  %v2556_v63 = vpack.c.bf16 %v381_v53, %v379_v52  ;;  %v2876_v0 = vpack.c.bf16 %v701_v25, %v699_v54  ;;  %v2878_v5 = vpack.c.bf16 %v706_v62, %v704_v59  ;;  %v399_v53 = vld [vmem:[#allocation5 + $0x7c0] sm:$0xff]  ;;  %v401_v54 = vld [vmem:[#allocation5 + $0x7d0] sm:$0xff]  ;;  %v406_v59 = vld [vmem:[#allocation5 + $0x7f8] sm:$0xff] }
 0x17a   :  { %2859 = vmatprep.subr.bf16.mxu0 %v2858_v4  ;;  %v703_v4 = vld [vmem:[#allocation5 + $0x1140] sm:$0xff]  ;;  %v2574_v52 = vpack.c.bf16 %v402_v47, %v400_v45  ;;  %v724_v62 = vld [vmem:[#allocation5 + $0x11e8] sm:$0xff]  ;;  %v417_v47 = vld [vmem:[#allocation5 + $0x850] sm:$0xff] }
 0x17b   :  { %v415_v45 = vld [vmem:[#allocation5 + $0x840] sm:$0xff] }
 0x17c   :  { %2541 = vmatpush1.bf16.msra.mxu1 %v2540_v10  ;;  %v710_v10 = vld [vmem:[#allocation5 + $0x1178] sm:$0xff] }
 0x17d   :  { %2861 = vmatpush1.bf16.msra.mxu0 %v2860_v12  ;;  %2543 = vmatprep.subr.bf16.mxu1 %v2542_v13  ;;  %v2560_v12 = vpack.c.bf16 %v385_v3, %v383_v2  ;;  %v2880_v13 = vpack.c.bf16 %v705_v6, %v703_v4  ;;  %v2882_v17 = vpack.c.bf16 %v710_v10, %v708_v9  ;;  %v403_v3 = vld [vmem:[#allocation5 + $0x7e0] sm:$0xff]  ;;  %v405_v4 = vld [vmem:[#allocation5 + $0x7f0] sm:$0xff]  ;;  %v410_v9 = vld [vmem:[#allocation5 + $0x818] sm:$0xff] }
 0x17e   :  { %2863 = vmatprep.subr.bf16.mxu0 %v2862_v16  ;;  %v707_v16 = vld [vmem:[#allocation5 + $0x1160] sm:$0xff]  ;;  %v2578_v2 = vpack.c.bf16 %v406_v59, %v404_v58  ;;  %v728_v10 = vld [vmem:[#allocation5 + $0x1208] sm:$0xff] }
 0x17f   :  { %v739_v58 = vld [vmem:[#allocation5 + $0x1260] sm:$0xff] }
 0x180   :  { %2545 = vmatpush1.bf16.msra.mxu1 %v2544_v23  ;;  %v714_v23 = vld [vmem:[#allocation5 + $0x1198] sm:$0xff] }
 0x181   :  { %2865 = vmatpush1.bf16.msra.mxu0 %v2864_v24  ;;  %2547 = vmatprep.subr.bf16.mxu1 %v2546_v26  ;;  %v2564_v24 = vpack.c.bf16 %v389_v15, %v387_v14  ;;  %v2884_v26 = vpack.c.bf16 %v709_v18, %v707_v16  ;;  %v2886_v60 = vpack.c.bf16 %v714_v23, %v712_v21  ;;  %v407_v16 = vld [vmem:[#allocation5 + $0x800] sm:$0xff]  ;;  %v412_v21 = vld [vmem:[#allocation5 + $0x828] sm:$0xff]  ;;  %v414_v23 = vld [vmem:[#allocation5 + $0x838] sm:$0xff] }
 0x182   :  { %2867 = vmatprep.subr.bf16.mxu0 %v2866_v30  ;;  %v711_v30 = vld [vmem:[#allocation5 + $0x1180] sm:$0xff]  ;;  %v2582_v15 = vpack.c.bf16 %v410_v9, %v408_v8 }
 0x183   :  { %v727_v18 = vld [vmem:[#allocation5 + $0x1200] sm:$0xff] }
 0x184   :  { %2549 = vmatpush1.bf16.msra.mxu1 %v2548_v51  ;;  %v718_v51 = vld [vmem:[#allocation5 + $0x11b8] sm:$0xff]  ;;  %v743_v8 = vld [vmem:[#allocation5 + $0x1280] sm:$0xff] }
 0x185   :  { %2869 = vmatpush1.bf16.msra.mxu0 %v2868_v35  ;;  %2551 = vmatprep.subr.bf16.mxu1 %v2550_v36  ;;  %v2568_v35 = vpack.c.bf16 %v393_v29, %v391_v28  ;;  %v2888_v36 = vpack.c.bf16 %v713_v31, %v711_v30  ;;  %v2890_v42 = vpack.c.bf16 %v718_v51, %v716_v34  ;;  %v413_v31 = vld [vmem:[#allocation5 + $0x830] sm:$0xff]  ;;  %v416_v51 = vld [vmem:[#allocation5 + $0x848] sm:$0xff] }
 0x186   :  { %2871 = vmatprep.subr.bf16.mxu0 %v2870_v41  ;;  %v715_v41 = vld [vmem:[#allocation5 + $0x11a0] sm:$0xff]  ;;  %v2904_v29 = vpack.c.bf16 %v729_v20, %v727_v18  ;;  %v2586_v30 = vpack.c.bf16 %v414_v23, %v412_v21  ;;  %v733_v34 = vld [vmem:[#allocation5 + $0x1230] sm:$0xff] }
 0x187   :  { %v427_v18 = vld [vmem:[#allocation5 + $0x8a0] sm:$0xff]  ;;  %v749_v23 = vld [vmem:[#allocation5 + $0x12b0] sm:$0xff] }
 0x188   :  { %2553 = vmatpush1.bf16.msra.mxu1 %v2552_v49  ;;  %v722_v49 = vld [vmem:[#allocation5 + $0x11d8] sm:$0xff]  ;;  %v747_v20 = vld [vmem:[#allocation5 + $0x12a0] sm:$0xff] }
 0x189   :  { %2873 = vmatpush1.bf16.msra.mxu0 %v2872_v50  ;;  %2555 = vmatprep.subr.bf16.mxu1 %v2554_v43  ;;  %v2572_v50 = vpack.c.bf16 %v397_v40, %v395_v38  ;;  %v2892_v43 = vpack.c.bf16 %v717_v44, %v715_v41  ;;  %v2894_v25 = vpack.c.bf16 %v722_v49, %v720_v48  ;;  %v738_v38 = vld [vmem:[#allocation5 + $0x1258] sm:$0xff]  ;;  %v735_v48 = vld [vmem:[#allocation5 + $0x1240] sm:$0xff] }
 0x18a   :  { %2875 = vmatprep.subr.bf16.mxu0 %v2874_v55  ;;  %v719_v55 = vld [vmem:[#allocation5 + $0x11c0] sm:$0xff] }
 0x18c   :  { %2557 = vmatpush1.bf16.msra.mxu1 %v2556_v63  ;;  %v726_v63 = vld [vmem:[#allocation5 + $0x11f8] sm:$0xff] }
 0x18d   :  { %2877 = vmatpush1.bf16.msra.mxu0 %v2876_v0  ;;  %2559 = vmatprep.subr.bf16.mxu1 %v2558_v1  ;;  %v2576_v0 = vpack.c.bf16 %v401_v54, %v399_v53  ;;  %v2896_v1 = vpack.c.bf16 %v721_v57, %v719_v55  ;;  %v2898_v6 = vpack.c.bf16 %v726_v63, %v724_v62  ;;  %v742_v53 = vld [vmem:[#allocation5 + $0x1278] sm:$0xff]  ;;  %v421_v57 = vld [vmem:[#allocation5 + $0x870] sm:$0xff]  ;;  %v424_v63 = vld [vmem:[#allocation5 + $0x888] sm:$0xff] }
 0x18e   :  { %2879 = vmatprep.subr.bf16.mxu0 %v2878_v5  ;;  %v723_v5 = vld [vmem:[#allocation5 + $0x11e0] sm:$0xff]  ;;  %v2592_v54 = vpack.c.bf16 %v417_v47, %v415_v45  ;;  %v741_v62 = vld [vmem:[#allocation5 + $0x1270] sm:$0xff] }
 0x18f   :  { %v2900_v14 = vpack.c.bf16 %v725_v22, %v723_v5  ;;  %v425_v22 = vld [vmem:[#allocation5 + $0x890] sm:$0xff]  ;;  %v435_v45 = vld [vmem:[#allocation5 + $0x8e0] sm:$0xff] }
 0x190   :  { %2561 = vmatpush1.bf16.msra.mxu1 %v2560_v12  ;;  %v730_v12 = vld [vmem:[#allocation5 + $0x1218] sm:$0xff]  ;;  %v437_v47 = vld [vmem:[#allocation5 + $0x8f0] sm:$0xff] }
 0x191   :  { %2881 = vmatpush1.bf16.msra.mxu0 %v2880_v13  ;;  %2563 = vmatprep.subr.bf16.mxu1 %v2562_v46  ;;  %v1005_v13 = vcombine.high %v3681_v39, %v3681_v39  ;;  %v2580_v46 = vpack.c.bf16 %v405_v4, %v403_v3  ;;  %v2902_v19 = vpack.c.bf16 %v730_v12, %v728_v10  ;;  %v745_v10 = vld [vmem:[#allocation5 + $0x1290] sm:$0xff]  ;;  %v428_v12 = vld [vmem:[#allocation5 + $0x8a8] sm:$0xff] }
 0x192   :  { %2883 = vmatprep.subr.bf16.mxu0 %v2882_v17  ;;  %v409_v17 = vld [vmem:[#allocation5 + $0x810] sm:$0xff]  ;;  %v2916_v4 = vpack.c.bf16 %v741_v62, %v739_v58  ;;  %v759_v58 = vld [vmem:[#allocation5 + $0x1300] sm:$0xff] }
 0x193   :  { %v3701_v39 = vrot.slane %v1005_v13, %v3630_v11  ;;  %v2584_v28 = vpack.c.bf16 %v409_v17, %v407_v16  ;;  %v430_v13 = vld [vmem:[#allocation5 + $0x8b8] sm:$0xff]  ;;  %v2920_v16 = vpack.c.bf16 %v745_v10, %v743_v8  ;;  %v761_v62 = vld [vmem:[#allocation5 + $0x1310] sm:$0xff]  ;;  %v763_v8 = vld [vmem:[#allocation5 + $0x1320] sm:$0xff] }
 0x194   :  { %2565 = vmatpush1.bf16.msra.mxu1 %v2564_v24  ;;  %v3698_v24 = vld.sshfl [vmem:[#allocation2 + $0x10] sm:$0xff pattern:$0x76325410]  ;;  %v2602_v17 = vpack.c.bf16 %v430_v13, %v428_v12  ;;  %v765_v10 = vld [vmem:[#allocation5 + $0x1330] sm:$0xff]  ;;  %v448_v12 = vld [vmem:[#allocation5 + $0x948] sm:$0xff] }
 0x195   :  { %2885 = vmatpush1.bf16.msra.mxu0 %v2884_v26  ;;  %2567 = vmatprep.subr.bf16.mxu1 %v2566_v27  ;;  %v732_v26 = vld [vmem:[#allocation5 + $0x1228] sm:$0xff]  ;;  %v734_v27 = vld [vmem:[#allocation5 + $0x1238] sm:$0xff]  ;;  %v1021_v40 = vcombine.high %v3701_v39, %v3701_v39 }
 0x196   :  { %2887 = vmatprep.subr.bf16.mxu0 %v2886_v60  ;;  %v411_v60 = vld [vmem:[#allocation5 + $0x820] sm:$0xff]  ;;  %v2906_v33 = vpack.c.bf16 %v734_v27, %v732_v26  ;;  %v432_v26 = vld [vmem:[#allocation5 + $0x8c8] sm:$0xff]  ;;  %v434_v27 = vld [vmem:[#allocation5 + $0x8d8] sm:$0xff] }
 0x197   :  { %v2588_v41 = vpack.c.bf16 %v413_v31, %v411_v60  ;;  %v2924_v60 = vpack.c.bf16 %v749_v23, %v747_v20  ;;  %v2606_v31 = vpack.c.bf16 %v434_v27, %v432_v26  ;;  %v450_v13 = vld [vmem:[#allocation5 + $0x958] sm:$0xff]  ;;  %v767_v20 = vld [vmem:[#allocation5 + $0x1340] sm:$0xff]  ;;  %v769_v23 = vld [vmem:[#allocation5 + $0x1350] sm:$0xff] }
 0x198   :  { %2569 = vmatpush1.bf16.msra.mxu1 %v2568_v35  ;;  %v418_v35 = vld [vmem:[#allocation5 + $0x858] sm:$0xff]  ;;  %v452_v26 = vld [vmem:[#allocation5 + $0x968] sm:$0xff] }
 0x199   :  { %2889 = vmatpush1.bf16.msra.mxu0 %v2888_v36  ;;  %2571 = vmatprep.subr.bf16.mxu1 %v2570_v37  ;;  %v986_v36 = vcombine.high %v3698_v24, %v3698_v24  ;;  %v736_v37 = vld [vmem:[#allocation5 + $0x1248] sm:$0xff]  ;;  %v2590_v44 = vpack.c.bf16 %v418_v35, %v416_v51  ;;  %v753_v35 = vld [vmem:[#allocation5 + $0x12d0] sm:$0xff]  ;;  %v454_v27 = vld [vmem:[#allocation5 + $0x978] sm:$0xff] }
 0x19a   :  { %2891 = vmatprep.subr.bf16.mxu0 %v2890_v42  ;;  %v2908_v42 = vpack.c.bf16 %v733_v34, %v731_v32  ;;  %v2910_v49 = vpack.c.bf16 %v738_v38, %v736_v37  ;;  %v431_v32 = vld [vmem:[#allocation5 + $0x8c0] sm:$0xff]  ;;  %v438_v37 = vld [vmem:[#allocation5 + $0x8f8] sm:$0xff]  ;;  %v756_v38 = vld [vmem:[#allocation5 + $0x12e8] sm:$0xff] }
 0x19b   :  { %v751_v34 = vld [vmem:[#allocation5 + $0x12c0] sm:$0xff] }
 0x19c   :  { %2573 = vmatpush1.bf16.msra.mxu1 %v2572_v50  ;;  %v737_v50 = vld [vmem:[#allocation5 + $0x1250] sm:$0xff] }
 0x19d   :  { %2893 = vmatpush1.bf16.msra.mxu0 %v2892_v43  ;;  %2575 = vmatprep.subr.bf16.mxu1 %v2574_v52  ;;  %v422_v43 = vld [vmem:[#allocation5 + $0x878] sm:$0xff]  ;;  %v740_v52 = vld [vmem:[#allocation5 + $0x1268] sm:$0xff] }
 0x19e   :  { %2895 = vmatprep.subr.bf16.mxu0 %v2894_v25  ;;  %v419_v25 = vld [vmem:[#allocation5 + $0x860] sm:$0xff]  ;;  %v2914_v59 = vpack.c.bf16 %v742_v53, %v740_v52  ;;  %v760_v52 = vld [vmem:[#allocation5 + $0x1308] sm:$0xff]  ;;  %v762_v53 = vld [vmem:[#allocation5 + $0x1318] sm:$0xff] }
 0x19f   :  { %v2596_v3 = vpack.c.bf16 %v421_v57, %v419_v25  ;;  %v439_v25 = vld [vmem:[#allocation5 + $0x900] sm:$0xff]  ;;  %v441_v57 = vld [vmem:[#allocation5 + $0x910] sm:$0xff] }
 0x1a0   :  { %2577 = vmatpush1.bf16.msra.mxu1 %v2576_v0  ;;  %v426_v0 = vld [vmem:[#allocation5 + $0x898] sm:$0xff] }
 0x1a1   :  { %2897 = vmatpush1.bf16.msra.mxu0 %v2896_v1  ;;  %2579 = vmatprep.subr.bf16.mxu1 %v2578_v2  ;;  %v744_v1 = vld [vmem:[#allocation5 + $0x1288] sm:$0xff]  ;;  %v746_v2 = vld [vmem:[#allocation5 + $0x1298] sm:$0xff]  ;;  %v2598_v5 = vpack.c.bf16 %v426_v0, %v424_v63 }
 0x1a2   :  { %2899 = vmatprep.subr.bf16.mxu0 %v2898_v6  ;;  %v423_v6 = vld [vmem:[#allocation5 + $0x880] sm:$0xff]  ;;  %v2918_v9 = vpack.c.bf16 %v746_v2, %v744_v1  ;;  %v444_v63 = vld [vmem:[#allocation5 + $0x928] sm:$0xff]  ;;  %v446_v0 = vld [vmem:[#allocation5 + $0x938] sm:$0xff] }
 0x1a3   :  { %v764_v1 = vld [vmem:[#allocation5 + $0x1328] sm:$0xff]  ;;  %v766_v2 = vld [vmem:[#allocation5 + $0x1338] sm:$0xff] }
 0x1a4   :  { %2581 = vmatpush1.bf16.msra.mxu1 %v2580_v46  ;;  %v748_v46 = vld [vmem:[#allocation5 + $0x12a8] sm:$0xff] }
 0x1a5   :  { %2901 = vmatpush1.bf16.msra.mxu0 %v2900_v14  ;;  %2583 = vmatprep.subr.bf16.mxu1 %v2582_v15  ;;  %v750_v14 = vld [vmem:[#allocation5 + $0x12b8] sm:$0xff]  ;;  %v2600_v15 = vpack.c.bf16 %v425_v22, %v423_v6  ;;  %v443_v6 = vld [vmem:[#allocation5 + $0x920] sm:$0xff]  ;;  %v445_v22 = vld [vmem:[#allocation5 + $0x930] sm:$0xff] }
 0x1a6   :  { %2903 = vmatprep.subr.bf16.mxu0 %v2902_v19  ;;  %v429_v19 = vld [vmem:[#allocation5 + $0x8b0] sm:$0xff]  ;;  %v2922_v21 = vpack.c.bf16 %v750_v14, %v748_v46  ;;  %v768_v46 = vld [vmem:[#allocation5 + $0x1348] sm:$0xff]  ;;  %v770_v14 = vld [vmem:[#allocation5 + $0x1358] sm:$0xff] }
 0x1a7   :  { %1341 = vmatmul.mubr.f32.vlgmr.msra.gmra.mrb[0].mxu1 %v3684_v56  ;;  %v420_v56 = vld [vmem:[#allocation5 + $0x868] sm:$0xff] }
 0x1a8   :  { %2585 = vmatpush1.bf16.msra.mxu1 %v2584_v28  ;;  %1696 = vmatmul.mubr.f32.vlgmr.msra.gmra.mrb[0].mxu0 %v3688_v7  ;;  %v2912_v7 = vpack.c.bf16 %v737_v50, %v735_v48  ;;  %v2594_v55 = vpack.c.bf16 %v422_v43, %v420_v56  ;;  %v752_v28 = vld [vmem:[#allocation5 + $0x12c8] sm:$0xff]  ;;  %v755_v48 = vld [vmem:[#allocation5 + $0x12e0] sm:$0xff]  ;;  %v757_v50 = vld [vmem:[#allocation5 + $0x12f0] sm:$0xff] }
 0x1a9   :  { %2905 = vmatpush1.bf16.msra.mxu0 %v2904_v29  ;;  %2587 = vmatprep.subr.bf16.mxu1 %v2586_v30  ;;  %v754_v29 = vld [vmem:[#allocation5 + $0x12d8] sm:$0xff]  ;;  %v2604_v30 = vpack.c.bf16 %v429_v19, %v427_v18  ;;  %v440_v56 = vld [vmem:[#allocation5 + $0x908] sm:$0xff]  ;;  %v447_v18 = vld [vmem:[#allocation5 + $0x940] sm:$0xff] }
 0x1aa   :  { %2907 = vmatprep.subr.bf16.mxu0 %v2906_v33  ;;  %1411 = vmatprep.mubr.f32.mxu1 %v986_v36  ;;  %v433_v33 = vld [vmem:[#allocation5 + $0x8d0] sm:$0xff]  ;;  %v2926_v51 = vpack.c.bf16 %v754_v29, %v752_v28  ;;  %v436_v36 = vld [vmem:[#allocation5 + $0x8e8] sm:$0xff]  ;;  %v442_v43 = vld [vmem:[#allocation5 + $0x918] sm:$0xff] }
 0x1ab   :  { %1766 = vmatprep.mubr.f32.mxu0 %v1021_v40  ;;  %v758_v40 = vld [vmem:[#allocation5 + $0x12f8] sm:$0xff]  ;;  %v449_v19 = vld [vmem:[#allocation5 + $0x950] sm:$0xff]  ;;  %v772_v28 = vld [vmem:[#allocation5 + $0x1368] sm:$0xff] }
 0x1ac   :  { %2589 = vmatpush1.bf16.msra.mxu1 %v2588_v41  ;;  %v2608_v41 = vpack.c.bf16 %v433_v33, %v431_v32  ;;  %v774_v29 = vld [vmem:[#allocation5 + $0x1378] sm:$0xff]  ;;  %v451_v32 = vld [vmem:[#allocation5 + $0x960] sm:$0xff]  ;;  %v453_v33 = vld [vmem:[#allocation5 + $0x970] sm:$0xff] }
 0x1ad   :  { %2909 = vmatpush1.bf16.msra.mxu0 %v2908_v42  ;;  %2591 = vmatprep.subr.bf16.mxu1 %v2590_v44  ;;  %v2928_v42 = vpack.c.bf16 %v753_v35, %v751_v34  ;;  %v2610_v44 = vpack.c.bf16 %v438_v37, %v436_v36  ;;  %v771_v34 = vld [vmem:[#allocation5 + $0x1360] sm:$0xff]  ;;  %v773_v35 = vld [vmem:[#allocation5 + $0x1370] sm:$0xff]  ;;  %v456_v36 = vld [vmem:[#allocation5 + $0x988] sm:$0xff] }
 0x1ae   :  { %2911 = vmatprep.subr.bf16.mxu0 %v2910_v49  ;;  %v2930_v49 = vpack.c.bf16 %v758_v40, %v756_v38  ;;  %v458_v37 = vld [vmem:[#allocation5 + $0x998] sm:$0xff]  ;;  %v776_v38 = vld [vmem:[#allocation5 + $0x1388] sm:$0xff] }
 0x1af   :  { %v778_v40 = vld [vmem:[#allocation5 + $0x1398] sm:$0xff] }
 0x1b0   :  { %2593 = vmatpush1.bf16.msra.mxu1 %v2592_v54  ;;  %v2612_v54 = vpack.c.bf16 %v437_v47, %v435_v45  ;;  %v455_v45 = vld [vmem:[#allocation5 + $0x980] sm:$0xff]  ;;  %v457_v47 = vld [vmem:[#allocation5 + $0x990] sm:$0xff] }
 0x1b1   :  { %2913 = vmatpush1.bf16.msra.mxu0 %v2912_v7  ;;  %2595 = vmatprep.subr.bf16.mxu1 %v2594_v55  ;;  %v2932_v7 = vpack.c.bf16 %v757_v50, %v755_v48  ;;  %v2614_v55 = vpack.c.bf16 %v442_v43, %v440_v56  ;;  %v775_v48 = vld [vmem:[#allocation5 + $0x1380] sm:$0xff]  ;;  %v777_v50 = vld [vmem:[#allocation5 + $0x1390] sm:$0xff]  ;;  %v460_v56 = vld [vmem:[#allocation5 + $0x9a8] sm:$0xff] }
 0x1b2   :  { %2915 = vmatprep.subr.bf16.mxu0 %v2914_v59  ;;  %v2934_v59 = vpack.c.bf16 %v762_v53, %v760_v52  ;;  %v462_v43 = vld [vmem:[#allocation5 + $0x9b8] sm:$0xff]  ;;  %v780_v52 = vld [vmem:[#allocation5 + $0x13a8] sm:$0xff] }
 0x1b3   :  { %v782_v53 = vld [vmem:[#allocation5 + $0x13b8] sm:$0xff] }
 0x1b4   :  { %2597 = vmatpush1.bf16.msra.mxu1 %v2596_v3  ;;  %v2616_v3 = vpack.c.bf16 %v441_v57, %v439_v25  ;;  %v459_v25 = vld [vmem:[#allocation5 + $0x9a0] sm:$0xff]  ;;  %v461_v57 = vld [vmem:[#allocation5 + $0x9b0] sm:$0xff] }
 0x1b5   :  { %2917 = vmatpush1.bf16.msra.mxu0 %v2916_v4  ;;  %2599 = vmatprep.subr.bf16.mxu1 %v2598_v5  ;;  %v2936_v4 = vpack.c.bf16 %v761_v62, %v759_v58  ;;  %v2618_v5 = vpack.c.bf16 %v446_v0, %v444_v63  ;;  %v779_v58 = vld [vmem:[#allocation5 + $0x13a0] sm:$0xff]  ;;  %v781_v62 = vld [vmem:[#allocation5 + $0x13b0] sm:$0xff]  ;;  %v464_v63 = vld [vmem:[#allocation5 + $0x9c8] sm:$0xff] }
 0x1b6   :  { %2919 = vmatprep.subr.bf16.mxu0 %v2918_v9  ;;  %v2938_v9 = vpack.c.bf16 %v766_v2, %v764_v1  ;;  %v466_v0 = vld [vmem:[#allocation5 + $0x9d8] sm:$0xff]  ;;  %v784_v1 = vld [vmem:[#allocation5 + $0x13c8] sm:$0xff] }
 0x1b7   :  { %v786_v2 = vld [vmem:[#allocation5 + $0x13d8] sm:$0xff] }
 0x1b8   :  { %2601 = vmatpush1.bf16.msra.mxu1 %v2600_v15  ;;  %v2620_v15 = vpack.c.bf16 %v445_v22, %v443_v6  ;;  %v463_v6 = vld [vmem:[#allocation5 + $0x9c0] sm:$0xff]  ;;  %v465_v22 = vld [vmem:[#allocation5 + $0x9d0] sm:$0xff] }
 0x1b9   :  { %2921 = vmatpush1.bf16.msra.mxu0 %v2920_v16  ;;  %2603 = vmatprep.subr.bf16.mxu1 %v2602_v17  ;;  %v2940_v16 = vpack.c.bf16 %v765_v10, %v763_v8  ;;  %v2622_v17 = vpack.c.bf16 %v450_v13, %v448_v12  ;;  %v783_v8 = vld [vmem:[#allocation5 + $0x13c0] sm:$0xff]  ;;  %v785_v10 = vld [vmem:[#allocation5 + $0x13d0] sm:$0xff]  ;;  %v468_v12 = vld [vmem:[#allocation5 + $0x9e8] sm:$0xff] }
 0x1ba   :  { %2923 = vmatprep.subr.bf16.mxu0 %v2922_v21  ;;  %v2942_v21 = vpack.c.bf16 %v770_v14, %v768_v46  ;;  %v470_v13 = vld [vmem:[#allocation5 + $0x9f8] sm:$0xff]  ;;  %v788_v46 = vld [vmem:[#allocation5 + $0x13e8] sm:$0xff] }
 0x1bb   :  { %v790_v14 = vld [vmem:[#allocation5 + $0x13f8] sm:$0xff] }
 0x1bc   :  { %2605 = vmatpush1.bf16.msra.mxu1 %v2604_v30  ;;  %v2624_v30 = vpack.c.bf16 %v449_v19, %v447_v18  ;;  %v467_v18 = vld [vmem:[#allocation5 + $0x9e0] sm:$0xff]  ;;  %v469_v19 = vld [vmem:[#allocation5 + $0x9f0] sm:$0xff] }
 0x1bd   :  { %2925 = vmatpush1.bf16.msra.mxu0 %v2924_v60  ;;  %2607 = vmatprep.subr.bf16.mxu1 %v2606_v31  ;;  %v2944_v60 = vpack.c.bf16 %v769_v23, %v767_v20  ;;  %v2626_v31 = vpack.c.bf16 %v454_v27, %v452_v26  ;;  %v2962_v20 = vpack.c.bf16 %v790_v14, %v788_v46  ;;  %v789_v23 = vld [vmem:[#allocation5 + $0x13f0] sm:$0xff]  ;;  %v3709_v26 = vld [vmem:[#allocation2 + $0x28] sm:$0xff]  ;;  %v792_v27 = vld [vmem:[#allocation5 + $0x1408] sm:$0xff] }
 0x1be   :  { %2927 = vmatprep.subr.bf16.mxu0 %v2926_v51  ;;  %v2946_v51 = vpack.c.bf16 %v774_v29, %v772_v28  ;;  %v794_v28 = vld [vmem:[#allocation5 + $0x1418] sm:$0xff]  ;;  %v2644_v29 = vpack.c.bf16 %v469_v19, %v467_v18  ;;  %v824_v46 = vld [vmem:[#allocation5 + $0x1508] sm:$0xff]  ;;  %v825_v18 = vld [vmem:[#allocation5 + $0x1510] sm:$0xff] }
 0x1bf   :  { %v826_v14 = vld [vmem:[#allocation5 + $0x1518] sm:$0xff]  ;;  %v828_v19 = vld [vmem:[#allocation5 + $0x1528] sm:$0xff] }
 0x1c0   :  { %2609 = vmatpush1.bf16.msra.mxu1 %v2608_v41  ;;  %v2628_v41 = vpack.c.bf16 %v453_v33, %v451_v32  ;;  %v791_v32 = vld [vmem:[#allocation5 + $0x1400] sm:$0xff]  ;;  %v793_v33 = vld [vmem:[#allocation5 + $0x1410] sm:$0xff] }
 0x1c1   :  { %2929 = vmatpush1.bf16.msra.mxu0 %v2928_v42  ;;  %2611 = vmatprep.subr.bf16.mxu1 %v2610_v44  ;;  %v2948_v42 = vpack.c.bf16 %v773_v35, %v771_v34  ;;  %v2630_v44 = vpack.c.bf16 %v458_v37, %v456_v36  ;;  %v796_v34 = vld [vmem:[#allocation5 + $0x1428] sm:$0xff]  ;;  %v2968_v35 = vpack.c.bf16 %v793_v33, %v791_v32  ;;  %v831_v33 = vld [vmem:[#allocation5 + $0x1540] sm:$0xff] }
 0x1c2   :  { %2931 = vmatprep.subr.bf16.mxu0 %v2930_v49  ;;  %v2950_v49 = vpack.c.bf16 %v778_v40, %v776_v38  ;;  %v795_v38 = vld [vmem:[#allocation5 + $0x1420] sm:$0xff]  ;;  %v797_v40 = vld [vmem:[#allocation5 + $0x1430] sm:$0xff] }
 0x1c4   :  { %2613 = vmatpush1.bf16.msra.mxu1 %v2612_v54  ;;  %v2632_v54 = vpack.c.bf16 %v457_v47, %v455_v45  ;;  %v799_v47 = vld [vmem:[#allocation5 + $0x1440] sm:$0xff] }
 0x1c5   :  { %2933 = vmatpush1.bf16.msra.mxu0 %v2932_v7  ;;  %2615 = vmatprep.subr.bf16.mxu1 %v2614_v55  ;;  %v2952_v7 = vpack.c.bf16 %v777_v50, %v775_v48  ;;  %v2634_v55 = vpack.c.bf16 %v462_v43, %v460_v56  ;;  %v801_v48 = vld [vmem:[#allocation5 + $0x1450] sm:$0xff]  ;;  %v806_v50 = vld [vmem:[#allocation5 + $0x1478] sm:$0xff] }
 0x1c6   :  { %2935 = vmatprep.subr.bf16.mxu0 %v2934_v59  ;;  %v2954_v59 = vpack.c.bf16 %v782_v53, %v780_v52  ;;  %v2976_v56 = vpack.c.bf16 %v801_v48, %v799_v47  ;;  %v803_v52 = vld [vmem:[#allocation5 + $0x1460] sm:$0xff]  ;;  %v805_v53 = vld [vmem:[#allocation5 + $0x1470] sm:$0xff] }
 0x1c7   :  { %v839_v47 = vld [vmem:[#allocation5 + $0x1580] sm:$0xff]  ;;  %v841_v48 = vld [vmem:[#allocation5 + $0x1590] sm:$0xff] }
 0x1c8   :  { %2617 = vmatpush1.bf16.msra.mxu1 %v2616_v3  ;;  %v2636_v3 = vpack.c.bf16 %v461_v57, %v459_v25  ;;  %v809_v25 = vld [vmem:[#allocation5 + $0x1490] sm:$0xff]  ;;  %v812_v57 = vld [vmem:[#allocation5 + $0x14a8] sm:$0xff] }
 0x1c9   :  { %2937 = vmatpush1.bf16.msra.mxu0 %v2936_v4  ;;  %2619 = vmatprep.subr.bf16.mxu1 %v2618_v5  ;;  %v2956_v4 = vpack.c.bf16 %v781_v62, %v779_v58  ;;  %v2638_v5 = vpack.c.bf16 %v466_v0, %v464_v63  ;;  %v814_v58 = vld [vmem:[#allocation5 + $0x14b8] sm:$0xff]  ;;  %v811_v63 = vld [vmem:[#allocation5 + $0x14a0] sm:$0xff]  ;;  %v813_v0 = vld [vmem:[#allocation5 + $0x14b0] sm:$0xff] }
 0x1ca   :  { %2939 = vmatprep.subr.bf16.mxu0 %v2938_v9  ;;  %v2958_v9 = vpack.c.bf16 %v786_v2, %v784_v1  ;;  %v2986_v62 = vpack.c.bf16 %v814_v58, %v812_v57  ;;  %v816_v1 = vld [vmem:[#allocation5 + $0x14c8] sm:$0xff]  ;;  %v818_v2 = vld [vmem:[#allocation5 + $0x14d8] sm:$0xff] }
 0x1cb   :  { %v852_v57 = vld [vmem:[#allocation5 + $0x15e8] sm:$0xff]  ;;  %v854_v58 = vld [vmem:[#allocation5 + $0x15f8] sm:$0xff] }
 0x1cc   :  { %2621 = vmatpush1.bf16.msra.mxu1 %v2620_v15  ;;  %v2640_v15 = vpack.c.bf16 %v465_v22, %v463_v6  ;;  %v817_v6 = vld [vmem:[#allocation5 + $0x14d0] sm:$0xff]  ;;  %v820_v22 = vld [vmem:[#allocation5 + $0x14e8] sm:$0xff] }
 0x1cd   :  { %2941 = vmatpush1.bf16.msra.mxu0 %v2940_v16  ;;  %2623 = vmatprep.subr.bf16.mxu1 %v2622_v17  ;;  %v2960_v16 = vpack.c.bf16 %v785_v10, %v783_v8  ;;  %v2642_v17 = vpack.c.bf16 %v470_v13, %v468_v12  ;;  %v822_v8 = vld [vmem:[#allocation5 + $0x14f8] sm:$0xff]  ;;  %v819_v12 = vld [vmem:[#allocation5 + $0x14e0] sm:$0xff]  ;;  %v821_v13 = vld [vmem:[#allocation5 + $0x14f0] sm:$0xff] }
 0x1ce   :  { %2943 = vmatprep.subr.bf16.mxu0 %v2942_v21  ;;  %v787_v21 = vld [vmem:[#allocation5 + $0x13e0] sm:$0xff]  ;;  %v2994_v10 = vpack.c.bf16 %v822_v8, %v820_v22  ;;  %v857_v8 = vld [vmem:[#allocation5 + $0x1610] sm:$0xff] }
 0x1cf   :  { %v855_v22 = vld [vmem:[#allocation5 + $0x1600] sm:$0xff] }
 0x1d0   :  { %2625 = vmatpush1.bf16.msra.mxu1 %v2624_v30  ;;  %v2964_v30 = vpack.c.bf16 %v789_v23, %v787_v21 }
 0x1d1   :  { %2945 = vmatpush1.bf16.msra.mxu0 %v2944_v60  ;;  %2627 = vmatprep.subr.bf16.mxu1 %v2626_v31  ;;  %v3713_v60 = vrot.slane %v3709_v26, %v3630_v11  ;;  %v2966_v31 = vpack.c.bf16 %v794_v28, %v792_v27  ;;  %v827_v27 = vld [vmem:[#allocation5 + $0x1520] sm:$0xff]  ;;  %v829_v28 = vld [vmem:[#allocation5 + $0x1530] sm:$0xff] }
 0x1d2   :  { %2947 = vmatprep.subr.bf16.mxu0 %v2946_v51  ;;  %v798_v51 = vld [vmem:[#allocation5 + $0x1438] sm:$0xff] }
 0x1d3   :  { %v1037_v36 = vcombine.high %v3713_v60, %v3713_v60  ;;  %v2970_v37 = vpack.c.bf16 %v798_v51, %v796_v34  ;;  %v833_v34 = vld [vmem:[#allocation5 + $0x1550] sm:$0xff]  ;;  %v836_v51 = vld [vmem:[#allocation5 + $0x1568] sm:$0xff] }
 0x1d4   :  { %2629 = vmatpush1.bf16.msra.mxu1 %v2628_v41  ;;  %v800_v41 = vld [vmem:[#allocation5 + $0x1448] sm:$0xff] }
 0x1d5   :  { %2949 = vmatpush1.bf16.msra.mxu0 %v2948_v42  ;;  %2631 = vmatprep.subr.bf16.mxu1 %v2630_v44  ;;  %v802_v42 = vld [vmem:[#allocation5 + $0x1458] sm:$0xff]  ;;  %v2972_v44 = vpack.c.bf16 %v797_v40, %v795_v38  ;;  %v835_v38 = vld [vmem:[#allocation5 + $0x1560] sm:$0xff]  ;;  %v837_v40 = vld [vmem:[#allocation5 + $0x1570] sm:$0xff] }
 0x1d6   :  { %2951 = vmatprep.subr.bf16.mxu0 %v2950_v49  ;;  %v2974_v45 = vpack.c.bf16 %v802_v42, %v800_v41  ;;  %v804_v49 = vld [vmem:[#allocation5 + $0x1468] sm:$0xff]  ;;  %v842_v42 = vld [vmem:[#allocation5 + $0x1598] sm:$0xff] }
 0x1d7   :  { %v2978_v43 = vpack.c.bf16 %v806_v50, %v804_v49  ;;  %v840_v41 = vld [vmem:[#allocation5 + $0x1588] sm:$0xff]  ;;  %v846_v50 = vld [vmem:[#allocation5 + $0x15b8] sm:$0xff] }
 0x1d8   :  { %2633 = vmatpush1.bf16.msra.mxu1 %v2632_v54  ;;  %v810_v54 = vld [vmem:[#allocation5 + $0x1498] sm:$0xff]  ;;  %v844_v49 = vld [vmem:[#allocation5 + $0x15a8] sm:$0xff] }
 0x1d9   :  { %2953 = vmatpush1.bf16.msra.mxu0 %v2952_v7  ;;  %2635 = vmatprep.subr.bf16.mxu1 %v2634_v55  ;;  %v2980_v7 = vpack.c.bf16 %v805_v53, %v803_v52  ;;  %v807_v55 = vld [vmem:[#allocation5 + $0x1480] sm:$0xff]  ;;  %v845_v53 = vld [vmem:[#allocation5 + $0x15b0] sm:$0xff] }
 0x1da   :  { %2955 = vmatprep.subr.bf16.mxu0 %v2954_v59  ;;  %v2984_v59 = vpack.c.bf16 %v809_v25, %v807_v55  ;;  %v843_v52 = vld [vmem:[#allocation5 + $0x15a0] sm:$0xff]  ;;  %v849_v25 = vld [vmem:[#allocation5 + $0x15d0] sm:$0xff] }
 0x1db   :  { %v847_v55 = vld [vmem:[#allocation5 + $0x15c0] sm:$0xff] }
 0x1dc   :  { %2637 = vmatpush1.bf16.msra.mxu1 %v2636_v3  ;;  %v2988_v3 = vpack.c.bf16 %v813_v0, %v811_v63  ;;  %v3026_v63 = vpack.c.bf16 %v854_v58, %v852_v57  ;;  %v851_v0 = vld [vmem:[#allocation5 + $0x15e0] sm:$0xff] }
 0x1dd   :  { %2957 = vmatpush1.bf16.msra.mxu0 %v2956_v4  ;;  %2639 = vmatprep.subr.bf16.mxu1 %v2638_v5  ;;  %v2990_v4 = vpack.c.bf16 %v818_v2, %v816_v1  ;;  %v815_v5 = vld [vmem:[#allocation5 + $0x14c0] sm:$0xff]  ;;  %v853_v1 = vld [vmem:[#allocation5 + $0x15f0] sm:$0xff]  ;;  %v856_v2 = vld [vmem:[#allocation5 + $0x1608] sm:$0xff] }
 0x1de   :  { %2959 = vmatprep.subr.bf16.mxu0 %v2958_v9  ;;  %v2992_v9 = vpack.c.bf16 %v817_v6, %v815_v5 }
 0x1e0   :  { %2641 = vmatpush1.bf16.msra.mxu1 %v2640_v15  ;;  %v2996_v15 = vpack.c.bf16 %v821_v13, %v819_v12  ;;  %v3032_v12 = vpack.c.bf16 %v857_v8, %v855_v22  ;;  %v887_v22 = vld [vmem:[#allocation5 + $0x1700] sm:$0xff] }
 0x1e1   :  { %2961 = vmatpush1.bf16.msra.mxu0 %v2960_v16  ;;  %2643 = vmatprep.subr.bf16.mxu1 %v2642_v17  ;;  %v2998_v16 = vpack.c.bf16 %v826_v14, %v824_v46  ;;  %v823_v17 = vld [vmem:[#allocation5 + $0x1500] sm:$0xff]  ;;  %v861_v14 = vld [vmem:[#allocation5 + $0x1630] sm:$0xff] }
 0x1e2   :  { %2963 = vmatprep.subr.bf16.mxu0 %v2962_v20  ;;  %v830_v20 = vld [vmem:[#allocation5 + $0x1538] sm:$0xff]  ;;  %v3000_v21 = vpack.c.bf16 %v825_v18, %v823_v17  ;;  %v859_v46 = vld [vmem:[#allocation5 + $0x1620] sm:$0xff] }
 0x1e3   :  { %v3002_v23 = vpack.c.bf16 %v830_v20, %v828_v19  ;;  %v863_v18 = vld [vmem:[#allocation5 + $0x1640] sm:$0xff]  ;;  %v865_v19 = vld [vmem:[#allocation5 + $0x1650] sm:$0xff]  ;;  %v868_v20 = vld [vmem:[#allocation5 + $0x1668] sm:$0xff] }
 0x1e4   :  { %2645 = vmatpush1.bf16.msra.mxu1 %v2644_v29  ;;  %v832_v29 = vld [vmem:[#allocation5 + $0x1548] sm:$0xff] }
 0x1e5   :  { %2965 = vmatpush1.bf16.msra.mxu0 %v2964_v30  ;;  %v834_v30 = vld [vmem:[#allocation5 + $0x1558] sm:$0xff] }
 0x1e6   :  { %2967 = vmatprep.subr.bf16.mxu0 %v2966_v31  ;;  %v3004_v31 = vpack.c.bf16 %v829_v28, %v827_v27  ;;  %v3006_v32 = vpack.c.bf16 %v834_v30, %v832_v29  ;;  %v867_v28 = vld [vmem:[#allocation5 + $0x1660] sm:$0xff]  ;;  %v869_v29 = vld [vmem:[#allocation5 + $0x1670] sm:$0xff]  ;;  %v872_v30 = vld [vmem:[#allocation5 + $0x1688] sm:$0xff] }
 0x1e7   :  { %1412 = vmatmul.mubr.f32.vlgmr.msra.gmra.mrb[0].mxu1 %v3698_v24  ;;  %v808_v24 = vld [vmem:[#allocation5 + $0x1488] sm:$0xff] }
 0x1e8   :  { %1767 = vmatmul.mubr.f32.vlgmr.msra.gmra.mrb[0].mxu0 %v3701_v39  ;;  %v2982_v39 = vpack.c.bf16 %v810_v54, %v808_v24  ;;  %v848_v24 = vld [vmem:[#allocation5 + $0x15c8] sm:$0xff]  ;;  %v850_v54 = vld [vmem:[#allocation5 + $0x15d8] sm:$0xff] }
 0x1e9   :  { %2969 = vmatpush1.bf16.msra.mxu0 %v2968_v35  ;;  %1837 = vmatprep.mubr.f32.mxu0 %v1037_v36  ;;  %v838_v35 = vld [vmem:[#allocation5 + $0x1578] sm:$0xff]  ;;  %v3008_v36 = vpack.c.bf16 %v833_v34, %v831_v33  ;;  %v871_v33 = vld [vmem:[#allocation5 + $0x1680] sm:$0xff]  ;;  %v873_v34 = vld [vmem:[#allocation5 + $0x1690] sm:$0xff] }
 0x1ea   :  { %2971 = vmatprep.subr.bf16.mxu0 %v2970_v37  ;;  %v3010_v37 = vpack.c.bf16 %v838_v35, %v836_v51  ;;  %v876_v51 = vld [vmem:[#allocation5 + $0x16a8] sm:$0xff]  ;;  %v878_v35 = vld [vmem:[#allocation5 + $0x16b8] sm:$0xff] }
 0x1ed   :  { %2973 = vmatpush1.bf16.msra.mxu0 %v2972_v44  ;;  %v3012_v44 = vpack.c.bf16 %v837_v40, %v835_v38  ;;  %v875_v38 = vld [vmem:[#allocation5 + $0x16a0] sm:$0xff]  ;;  %v877_v40 = vld [vmem:[#allocation5 + $0x16b0] sm:$0xff] }
 0x1ee   :  { %2975 = vmatprep.subr.bf16.mxu0 %v2974_v45  ;;  %v3014_v45 = vpack.c.bf16 %v842_v42, %v840_v41  ;;  %v880_v41 = vld [vmem:[#allocation5 + $0x16c8] sm:$0xff]  ;;  %v882_v42 = vld [vmem:[#allocation5 + $0x16d8] sm:$0xff] }
 0x1f1   :  { %2977 = vmatpush1.bf16.msra.mxu0 %v2976_v56  ;;  %v3016_v56 = vpack.c.bf16 %v841_v48, %v839_v47  ;;  %v879_v47 = vld [vmem:[#allocation5 + $0x16c0] sm:$0xff]  ;;  %v881_v48 = vld [vmem:[#allocation5 + $0x16d0] sm:$0xff] }
 0x1f2   :  { %2979 = vmatprep.subr.bf16.mxu0 %v2978_v43  ;;  %v3018_v43 = vpack.c.bf16 %v846_v50, %v844_v49  ;;  %v884_v49 = vld [vmem:[#allocation5 + $0x16e8] sm:$0xff]  ;;  %v886_v50 = vld [vmem:[#allocation5 + $0x16f8] sm:$0xff] }
 0x1f3   :  { %v3058_v57 = vpack.c.bf16 %v886_v50, %v884_v49  ;;  %v1928_v49 = vld [vmem:[#allocation8 + $0x58] sm:$0xff] }
 0x1f5   :  { %2981 = vmatpush1.bf16.msra.mxu0 %v2980_v7  ;;  %v3020_v7 = vpack.c.bf16 %v845_v53, %v843_v52  ;;  %v1933_v52 = vld [vmem:[#allocation8 + $0x80] sm:$0xff]  ;;  %v1934_v53 = vld [vmem:[#allocation8 + $0x88] sm:$0xff] }
 0x1f6   :  { %2983 = vmatprep.subr.bf16.mxu0 %v2982_v39  ;;  %v3022_v39 = vpack.c.bf16 %v850_v54, %v848_v24  ;;  %v1917_v24 = vld [vmem:[#allocation8] sm:$0xff]  ;;  %v3056_v54 = vpack.c.bf16 %v881_v48, %v879_v47  ;;  %v1927_v48 = vld [vmem:[#allocation8 + $0x50] sm:$0xff] }
 0x1f9   :  { %2985 = vmatpush1.bf16.msra.mxu0 %v2984_v59  ;;  %v3024_v59 = vpack.c.bf16 %v849_v25, %v847_v55  ;;  %v1935_v55 = vld [vmem:[#allocation8 + $0x90] sm:$0xff]  ;;  %v1936_v25 = vld [vmem:[#allocation8 + $0x98] sm:$0xff] }
 0x1fa   :  { %2987 = vmatprep.subr.bf16.mxu0 %v2986_v62  ;;  %v1022_v62 = vcombine.high %v3709_v26, %v3709_v26 }
 0x1fc   :  { %v3722_v5 = vrot.slane %v1022_v62, %v3630_v11  ;;  %v3036_v11 = vpack.c.bf16 %v861_v14, %v859_v46  ;;  %v1919_v62 = vld [vmem:[#allocation8 + $0x10] sm:$0xff]  ;;  %v1940_v46 = vld [vmem:[#allocation8 + $0xb8] sm:$0xff]  ;;  %v892_v14 = vld [vmem:[#allocation5 + $0x1728] sm:$0xff] }
 0x1fd   :  { %2989 = vmatpush1.bf16.msra.mxu0 %v2988_v3  ;;  %v858_v3 = vld [vmem:[#allocation5 + $0x1618] sm:$0xff] }
 0x1fe   :  { %2991 = vmatprep.subr.bf16.mxu0 %v2990_v4  ;;  %v3028_v4 = vpack.c.bf16 %v853_v1, %v851_v0  ;;  %v3030_v6 = vpack.c.bf16 %v858_v3, %v856_v2  ;;  %v1038_v26 = vcombine.high %v3722_v5, %v3722_v5  ;;  %v1937_v0 = vld [vmem:[#allocation8 + $0xa0] sm:$0xff]  ;;  %v890_v2 = vld [vmem:[#allocation5 + $0x1718] sm:$0xff]  ;;  %v1938_v3 = vld [vmem:[#allocation8 + $0xa8] sm:$0xff] }
 0x1ff   :  { %v888_v1 = vld [vmem:[#allocation5 + $0x1708] sm:$0xff]  ;;  %v3102_v8 = vpack.c.bf16 %v1938_v3, %v1937_v0  ;;  %v907_v0 = vld [vmem:[#allocation5 + $0x17a0] sm:$0xff]  ;;  %v914_v3 = vld [vmem:[#allocation5 + $0x17d8] sm:$0xff] }
 0x201   :  { %2993 = vmatpush1.bf16.msra.mxu0 %v2992_v9  ;;  %v860_v9 = vld [vmem:[#allocation5 + $0x1628] sm:$0xff] }
 0x202   :  { %2995 = vmatprep.subr.bf16.mxu0 %v2994_v10  ;;  %v862_v10 = vld [vmem:[#allocation5 + $0x1638] sm:$0xff] }
 0x203   :  { %v3034_v13 = vpack.c.bf16 %v862_v10, %v860_v9  ;;  %v1921_v9 = vld [vmem:[#allocation8 + $0x20] sm:$0xff]  ;;  %v1922_v10 = vld [vmem:[#allocation8 + $0x28] sm:$0xff] }
 0x205   :  { %2997 = vmatpush1.bf16.msra.mxu0 %v2996_v15  ;;  %v864_v15 = vld [vmem:[#allocation5 + $0x1648] sm:$0xff] }
 0x206   :  { %2999 = vmatprep.subr.bf16.mxu0 %v2998_v16  ;;  %v866_v16 = vld [vmem:[#allocation5 + $0x1658] sm:$0xff] }
 0x207   :  { %v3038_v17 = vpack.c.bf16 %v866_v16, %v864_v15  ;;  %v894_v15 = vld [vmem:[#allocation5 + $0x1738] sm:$0xff]  ;;  %v3104_v16 = vpack.c.bf16 %v1922_v10, %v1921_v9  ;;  %v916_v9 = vld [vmem:[#allocation5 + $0x17e8] sm:$0xff] }
 0x208   :  { %v918_v10 = vld [vmem:[#allocation5 + $0x17f8] sm:$0xff] }
 0x209   :  { %3001 = vmatpush1.bf16.msra.mxu0 %v3000_v21  ;;  %v870_v21 = vld [vmem:[#allocation5 + $0x1678] sm:$0xff] }
 0x20a   :  { %3003 = vmatprep.subr.bf16.mxu0 %v3002_v23  ;;  %v3040_v23 = vpack.c.bf16 %v865_v19, %v863_v18  ;;  %v3042_v27 = vpack.c.bf16 %v870_v21, %v868_v20  ;;  %v1923_v19 = vld [vmem:[#allocation8 + $0x30] sm:$0xff]  ;;  %v1924_v20 = vld [vmem:[#allocation8 + $0x38] sm:$0xff]  ;;  %v3066_v21 = vpack.c.bf16 %v894_v15, %v892_v14  ;;  %v1929_v15 = vld [vmem:[#allocation8 + $0x60] sm:$0xff] }
 0x20d   :  { %3005 = vmatpush1.bf16.msra.mxu0 %v3004_v31  ;;  %v874_v31 = vld [vmem:[#allocation5 + $0x1698] sm:$0xff] }
 0x20e   :  { %3007 = vmatprep.subr.bf16.mxu0 %v3006_v32  ;;  %v3044_v32 = vpack.c.bf16 %v869_v29, %v867_v28  ;;  %v1942_v28 = vld [vmem:[#allocation8 + $0xc8] sm:$0xff] }
 0x20f   :  { %v896_v29 = vld [vmem:[#allocation5 + $0x1748] sm:$0xff] }
 0x211   :  { %3009 = vmatpush1.bf16.msra.mxu0 %v3008_v36  ;;  %v3048_v36 = vpack.c.bf16 %v873_v34, %v871_v33  ;;  %v1925_v34 = vld [vmem:[#allocation8 + $0x40] sm:$0xff] }
 0x212   :  { %3011 = vmatprep.subr.bf16.mxu0 %v3010_v37  ;;  %v3050_v37 = vpack.c.bf16 %v878_v35, %v876_v51  ;;  %v1926_v51 = vld [vmem:[#allocation8 + $0x48] sm:$0xff] }
 0x215   :  { %3013 = vmatpush1.bf16.msra.mxu0 %v3012_v44  ;;  %v3052_v44 = vpack.c.bf16 %v877_v40, %v875_v38  ;;  %v1944_v38 = vld [vmem:[#allocation8 + $0xd8] sm:$0xff]  ;;  %v900_v40 = vld [vmem:[#allocation5 + $0x1768] sm:$0xff] }
 0x216   :  { %3015 = vmatprep.subr.bf16.mxu0 %v3014_v45  ;;  %v3054_v45 = vpack.c.bf16 %v882_v42, %v880_v41  ;;  %v902_v41 = vld [vmem:[#allocation5 + $0x1778] sm:$0xff]  ;;  %v3112_v42 = vpack.c.bf16 %v1926_v51, %v1925_v34 }
 0x217   :  { %v3074_v50 = vpack.c.bf16 %v902_v41, %v900_v40 }
 0x219   :  { %3017 = vmatpush1.bf16.msra.mxu0 %v3016_v56  ;;  %v883_v56 = vld [vmem:[#allocation5 + $0x16e0] sm:$0xff] }
 0x21a   :  { %3019 = vmatprep.subr.bf16.mxu0 %v3018_v43  ;;  %v885_v43 = vld [vmem:[#allocation5 + $0x16f0] sm:$0xff] }
 0x21d   :  { %3021 = vmatpush1.bf16.msra.mxu0 %v3020_v7  ;;  %v3094_v7 = vpack.c.bf16 %v1934_v53, %v1933_v52  ;;  %v1946_v52 = vld [vmem:[#allocation8 + $0xe8] sm:$0xff] }
 0x21e   :  { %3023 = vmatprep.subr.bf16.mxu0 %v3022_v39  ;;  %v1918_v39 = vld [vmem:[#allocation8 + $0x8] sm:$0xff] }
 0x21f   :  { %v3096_v58 = vpack.c.bf16 %v1918_v39, %v1917_v24  ;;  %3095 = vmatprep.subr.bf16.mxu1 %v3094_v7  ;;  %v904_v53 = vld [vmem:[#allocation5 + $0x1788] sm:$0xff]  ;;  %v906_v24 = vld [vmem:[#allocation5 + $0x1798] sm:$0xff] }
 0x221   :  { %3025 = vmatpush1.bf16.msra.mxu0 %v3024_v59  ;;  %v3098_v59 = vpack.c.bf16 %v1936_v25, %v1935_v55  ;;  %3097 = vmatpush3.bf16.msra.mxu1 %v3096_v58  ;;  %v3078_v55 = vpack.c.bf16 %v906_v24, %v904_v53  ;;  %v903_v25 = vld [vmem:[#allocation5 + $0x1780] sm:$0xff]  ;;  %v908_v58 = vld [vmem:[#allocation5 + $0x17a8] sm:$0xff] }
 0x222   :  { %3027 = vmatprep.subr.bf16.mxu0 %v3026_v63  ;;  %v1920_v63 = vld [vmem:[#allocation8 + $0x18] sm:$0xff]  ;;  %v2035_v53 = vld [vmem:[#allocation11 + $0x40] sm:$0xff]  ;;  %v2036_v24 = vld [vmem:[#allocation11 + $0x48] sm:$0xff] }
 0x223   :  { %3099 = vmatprep.subr.bf16.mxu1 %v3098_v59  ;;  %v910_v59 = vld [vmem:[#allocation5 + $0x17b8] sm:$0xff] }
 0x225   :  { %3029 = vmatpush1.bf16.msra.mxu0 %v3028_v4  ;;  %v3100_v4 = vpack.c.bf16 %v1920_v63, %v1919_v62  ;;  %v3082_v63 = vpack.c.bf16 %v910_v59, %v908_v58  ;;  %v2041_v59 = vld [vmem:[#allocation11 + $0x70] sm:$0xff] }
 0x226   :  { %3031 = vmatprep.subr.bf16.mxu0 %v3030_v6  ;;  %v3060_v6 = vpack.c.bf16 %v885_v43, %v883_v56  ;;  %v901_v56 = vld [vmem:[#allocation5 + $0x1770] sm:$0xff]  ;;  %v1945_v43 = vld [vmem:[#allocation8 + $0xe0] sm:$0xff] }
 0x227   :  { %3101 = vmatpush3.bf16.msra.mxu1 %v3100_v4  ;;  %v3118_v39 = vpack.c.bf16 %v1946_v52, %v1945_v43  ;;  %v2034_v43 = vld [vmem:[#allocation11 + $0x38] sm:$0xff] }
 0x228   :  { %1838 = vmatmul.mubr.f32.vlgmr.msra.gmra.mrb[0].mxu0 %v3713_v60  ;;  %v3046_v60 = vpack.c.bf16 %v874_v31, %v872_v30  ;;  %3103 = vmatprep.subr.bf16.mxu1 %v3102_v8  ;;  %v898_v30 = vld [vmem:[#allocation5 + $0x1758] sm:$0xff]  ;;  %v3108_v31 = vpack.c.bf16 %v1924_v20, %v1923_v19  ;;  %v913_v8 = vld [vmem:[#allocation5 + $0x17d0] sm:$0xff] }
 0x229   :  { %3033 = vmatpush1.bf16.msra.mxu0 %v3032_v12  ;;  %1908 = vmatprep.mubr.f32.mxu0 %v1038_v26  ;;  %v3062_v12 = vpack.c.bf16 %v890_v2, %v888_v1  ;;  %v889_v26 = vld [vmem:[#allocation5 + $0x1710] sm:$0xff]  ;;  %v3070_v35 = vpack.c.bf16 %v898_v30, %v896_v29  ;;  %v912_v2 = vld [vmem:[#allocation5 + $0x17c8] sm:$0xff]  ;;  %v1948_v20 = vld [vmem:[#allocation8 + $0xf8] sm:$0xff]  ;;  %v3449_v29 = vmov 0.0|0.0   ;;  %v923_v30 = vsub.s32 0, %v3627_v61 }
 0x22a   :  { %3035 = vmatprep.subr.bf16.mxu0 %v3034_v13  ;;  %v1939_v13 = vld [vmem:[#allocation8 + $0xb0] sm:$0xff] }
 0x22b   :  { %v3106_v18 = vpack.c.bf16 %v1940_v46, %v1939_v13  ;;  %3105 = vmatpush3.bf16.msra.mxu1 %v3104_v16  ;;  %v909_v1 = vld [vmem:[#allocation5 + $0x17b0] sm:$0xff]  ;;  %v915_v13 = vld [vmem:[#allocation5 + $0x17e0] sm:$0xff] }
 0x22c   :  { %v3084_v4 = vpack.c.bf16 %v909_v1, %v907_v0  ;;  %v917_v46 = vld [vmem:[#allocation5 + $0x17f0] sm:$0xff]  ;;  %v3451_v0 = vmov 0.0  }
 0x22d   :  { %3037 = vmatpush1.bf16.msra.mxu0 %v3036_v11  ;;  %v3064_v11 = vpack.c.bf16 %v889_v26, %v887_v22  ;;  %3107 = vmatprep.subr.bf16.mxu1 %v3106_v18  ;;  %v911_v22 = vld [vmem:[#allocation5 + $0x17c0] sm:$0xff]  ;;  %v3090_v26 = vpack.c.bf16 %v918_v10, %v916_v9  ;;  %v3092_v14 = vpack.c.bf16 %v917_v46, %v915_v13  ;;  %v1930_v16 = vld [vmem:[#allocation8 + $0x68] sm:$0xff]  ;;  %v1947_v19 = vld [vmem:[#allocation8 + $0xf0] sm:$0xff] }
 0x22e   :  { %3039 = vmatprep.subr.bf16.mxu0 %v3038_v17  ;;  %v891_v17 = vld [vmem:[#allocation5 + $0x1720] sm:$0xff]  ;;  %v2122_v9 = vld [vmem:[#allocation14 + $0x8] sm:$0xff] }
 0x22f   :  { %3109 = vmatpush3.bf16.msra.mxu1 %v3108_v31  ;;  %v919_v31 = vld [vmem:[#allocation7] sm:$0x3] }
 0x231   :  { %3041 = vmatpush1.bf16.msra.mxu0 %v3040_v23  ;;  %v893_v23 = vld [vmem:[#allocation5 + $0x1730] sm:$0xff] }
 0x232   :  { %3043 = vmatprep.subr.bf16.mxu0 %v3042_v27  ;;  %v1941_v27 = vld [vmem:[#allocation8 + $0xc0] sm:$0xff] }
 0x233   :  { %v3110_v33 = vpack.c.bf16 %v1942_v28, %v1941_v27  ;;  %v1932_v27 = vld [vmem:[#allocation8 + $0x78] sm:$0xff] }
 0x235   :  { %3045 = vmatpush1.bf16.msra.mxu0 %v3044_v32  ;;  %v3068_v32 = vpack.c.bf16 %v893_v23, %v891_v17  ;;  %3111 = vmatprep.subr.bf16.mxu1 %v3110_v33  ;;  %v1931_v23 = vld [vmem:[#allocation8 + $0x70] sm:$0xff] }
 0x236   :  { %3047 = vmatprep.subr.bf16.mxu0 %v3046_v60  ;;  %v895_v60 = vld [vmem:[#allocation5 + $0x1740] sm:$0xff]  ;;  %3113 = vmatpush3.bf16.msra.mxu1 %v3112_v42  ;;  %v3124_v28 = vpack.c.bf16 %v1932_v27, %v1931_v23 }
 0x239   :  { %3049 = vmatpush1.bf16.msra.mxu0 %v3048_v36  ;;  %v897_v36 = vld [vmem:[#allocation5 + $0x1750] sm:$0xff] }
 0x23a   :  { %3051 = vmatprep.subr.bf16.mxu0 %v3050_v37  ;;  %v1943_v37 = vld [vmem:[#allocation8 + $0xd0] sm:$0xff] }
 0x23b   :  { %v3114_v47 = vpack.c.bf16 %v1944_v38, %v1943_v37  ;;  %v2027_v37 = vld [vmem:[#allocation11] sm:$0xff]  ;;  %v2028_v38 = vld [vmem:[#allocation11 + $0x8] sm:$0xff] }
 0x23c   :  { %v3127_v42 = vpack.c.bf16 %v2028_v38, %v2027_v37 }
 0x23d   :  { %3053 = vmatpush1.bf16.msra.mxu0 %v3052_v44  ;;  %v3072_v44 = vpack.c.bf16 %v897_v36, %v895_v60  ;;  %3115 = vmatprep.subr.bf16.mxu1 %v3114_v47  ;;  %v2030_v47 = vld [vmem:[#allocation11 + $0x18] sm:$0xff] }
 0x23e   :  { %3055 = vmatprep.subr.bf16.mxu0 %v3054_v45  ;;  %v899_v45 = vld [vmem:[#allocation5 + $0x1760] sm:$0xff] }
 0x23f   :  { %v3076_v7 = vpack.c.bf16 %v901_v56, %v899_v45  ;;  %v2029_v45 = vld [vmem:[#allocation11 + $0x10] sm:$0xff] }
 0x240   :  { %v2033_v56 = vld [vmem:[#allocation11 + $0x30] sm:$0xff] }
 0x241   :  { %3057 = vmatpush1.bf16.msra.mxu0 %v3056_v54  ;;  %v3116_v54 = vpack.c.bf16 %v1928_v49, %v1927_v48  ;;  %v3130_v48 = vpack.c.bf16 %v2030_v47, %v2029_v45  ;;  %v2032_v49 = vld [vmem:[#allocation11 + $0x28] sm:$0xff]  ;;  %v3136_v52 = vpack.c.bf16 %v2034_v43, %v2033_v56 }
 0x242   :  { %3059 = vmatprep.subr.bf16.mxu0 %v3058_v57  ;;  %v905_v57 = vld [vmem:[#allocation5 + $0x1790] sm:$0xff] }
 0x243   :  { %3117 = vmatpush3.bf16.msra.mxu1 %v3116_v54  ;;  %v3080_v62 = vpack.c.bf16 %v905_v57, %v903_v25  ;;  %v3139_v54 = vpack.c.bf16 %v2036_v24, %v2035_v53  ;;  %v2039_v25 = vld [vmem:[#allocation11 + $0x60] sm:$0xff]  ;;  %v2040_v57 = vld [vmem:[#allocation11 + $0x68] sm:$0xff] }
 0x244   :  { %3119 = vmatprep.subr.bf16.mxu1 %v3118_v39  ;;  %v2038_v39 = vld [vmem:[#allocation11 + $0x58] sm:$0xff]  ;;  %v3145_v58 = vpack.c.bf16 %v2040_v57, %v2039_v25 }
 0x245   :  { %3061 = vmatpush1.bf16.msra.mxu0 %v3060_v6  ;;  %v3086_v6 = vpack.c.bf16 %v914_v3, %v912_v2  ;;  %v2225_v2 = vld [vmem:[#allocation10] ss:$0 sm:$0xff] }
 0x246   :  { %3063 = vmatprep.subr.bf16.mxu0 %v3062_v12  ;;  %v3088_v12 = vpack.c.bf16 %v913_v8, %v911_v22  ;;  %v2121_v8 = vld [vmem:[#allocation14] sm:$0xff] }
 0x247   :  { %v3151_v10 = vpack.c.bf16 %v2122_v9, %v2121_v8 }
 0x249   :  { %3065 = vmatpush1.bf16.msra.mxu0 %v3064_v11  ;;  %v3120_v11 = vpack.c.bf16 %v1930_v16, %v1929_v15  ;;  %v2227_v15 = vld [vmem:[#allocation16] ss:$0 sm:$0xff] }
 0x24a   :  { %3067 = vmatprep.subr.bf16.mxu0 %v3066_v21  ;;  %v3122_v21 = vpack.c.bf16 %v1948_v20, %v1947_v19 }
 0x24b   :  { %3121 = vmatpush3.bf16.msra.mxu1 %v3120_v11 }
 0x24c   :  { %3123 = vmatprep.subr.bf16.mxu1 %v3122_v21 }
 0x24d   :  { %3069 = vmatpush1.bf16.msra.mxu0 %v3068_v32  ;;  %v924_v32 = vrot.slane %v919_v31, %v923_v30 }
 0x24e   :  { %3071 = vmatprep.subr.bf16.mxu0 %v3070_v35 }
 0x24f   :  { %3125 = vmatpush3.bf16.msra.mxu1 %v3124_v28 }
 0x250   :  { %3126 = vmatprep.subr.bf16.mxu1 %v3449_v29 }
 0x251   :  { %3073 = vmatpush1.bf16.msra.mxu0 %v3072_v44 }
 0x252   :  { %3075 = vmatprep.subr.bf16.mxu0 %v3074_v50 }
 0x255   :  { %3077 = vmatpush1.bf16.msra.mxu0 %v3076_v7  ;;  %v2037_v7 = vld [vmem:[#allocation11 + $0x50] sm:$0xff] }
 0x256   :  { %3079 = vmatprep.subr.bf16.mxu0 %v3078_v55  ;;  %v3142_v55 = vpack.c.bf16 %v2038_v39, %v2037_v7 }
 0x259   :  { %3081 = vmatpush1.bf16.msra.mxu0 %v3080_v62  ;;  %v2042_v62 = vld [vmem:[#allocation11 + $0x78] sm:$0xff] }
 0x25a   :  { %3083 = vmatprep.subr.bf16.mxu0 %v3082_v63  ;;  %v3148_v63 = vpack.c.bf16 %v2042_v62, %v2041_v59 }
 0x25d   :  { %3085 = vmatpush1.bf16.msra.mxu0 %v3084_v4 }
 0x25e   :  { %3087 = vmatprep.subr.bf16.mxu0 %v3086_v6 }
 0x261   :  { %3089 = vmatpush1.bf16.msra.mxu0 %v3088_v12  ;;  %v2226_v12 = vld [vmem:[#allocation13] ss:$0 sm:$0xff] }
 0x262   :  { %3091 = vmatprep.subr.bf16.mxu0 %v3090_v26 }
 0x265   :  { %3093 = vmatpush1.bf16.msra.mxu0 %v3092_v14 }
 0x268   :  { %1909 = vmatmul.mubr.f32.vlgmr.msra.gmra.mrb[0].mxu0 %v3722_v5  ;;  %v927_v5 = vsub.s32 1, %v3627_v61  ;;  %v2031_v61 = vld [vmem:[#allocation11 + $0x20] sm:$0xff] }
 0x269   :  { %v3133_v50 = vpack.c.bf16 %v2032_v49, %v2031_v61 }
 0x26a   :  { %v928_v60 = vrot.slane %v919_v31, %v927_v5 }
 0x2ba   :  { %v1413_v17 = vpop.f32.mrb[0].mxu1 }
 0x2bb   :  { %v1415_v18 = vpop.f32.mrb[1].mxu1  ;;  %v3153_v33 = vadd.f32 %v1413_v17, %v924_v32 }
 0x2bc   :  { %v3155_v34 = vadd.f32 %v1415_v18, %v928_v60 }
 0x33b   :  { %v1910_v51 = vpop.f32.mrb[0].mxu0 }
 0x33c   :  { %v3154_v35 = vadd.f32 %v3153_v33, %v1910_v51  ;;  %v1912_v36 = vpop.f32.mrb[1].mxu0 }
 0x33d   :  { %v3156_v40 = vadd.f32 %v3155_v34, %v1912_v36 }
 0x33e   :  { %v1915_v44 = vmax.f32 %v3154_v35, 0.0 }
 0x33f   :  { %v1916_v41 = vmax.f32 %v3156_v40, 0.0 }
 0x341   :  { %2020 = vmatprep.mubr.f32.mxu1 %v1916_v41 }
 0x342   :  { %2021 = vmatmul.mubr.f32.vlgmr.msra.gmra.mrb[2].mxu1 %v1915_v44 }
 0x343   :  { %3128 = vmatpush3.bf16.msra.mxu1 %v3127_v42  ;;  %2316 = vmatprep.mubr.msk.f32.mxu1 %vm3450_vm0, %v3451_v0 }
 0x344   :  { %3129 = vmatprep.subr.bf16.mxu1 %v3449_v29 }
 0x347   :  { %3131 = vmatpush3.bf16.msra.mxu1 %v3130_v48 }
 0x348   :  { %3132 = vmatprep.subr.bf16.mxu1 %v3449_v29 }
 0x34b   :  { %3134 = vmatpush3.bf16.msra.mxu1 %v3133_v50 }
 0x34c   :  { %3135 = vmatprep.subr.bf16.mxu1 %v3449_v29 }
 0x34f   :  { %3137 = vmatpush3.bf16.msra.mxu1 %v3136_v52 }
 0x350   :  { %3138 = vmatprep.subr.bf16.mxu1 %v3449_v29 }
 0x353   :  { %3140 = vmatpush3.bf16.msra.mxu1 %v3139_v54 }
 0x354   :  { %3141 = vmatprep.subr.bf16.mxu1 %v3449_v29 }
 0x357   :  { %3143 = vmatpush3.bf16.msra.mxu1 %v3142_v55 }
 0x358   :  { %3144 = vmatprep.subr.bf16.mxu1 %v3449_v29 }
 0x35b   :  { %3146 = vmatpush3.bf16.msra.mxu1 %v3145_v58 }
 0x35c   :  { %3147 = vmatprep.subr.bf16.mxu1 %v3449_v29 }
 0x35f   :  { %3149 = vmatpush3.bf16.msra.mxu1 %v3148_v63 }
 0x360   :  { %3150 = vmatprep.subr.bf16.mxu1 %v3449_v29 }
 0x415   :  { %v2261_v1 = vpop.f32.mrb[2].mxu1 }
 0x416   :  { %v2262_v3 = vpop.f32.mrb[3].mxu1 }
 0x417   :  { %v2263_v4 = vadd.f32 %v2262_v3, %v2261_v1 }
 0x419   :  { %v2023_v6 = vadd.f32 %v2263_v4, %v2225_v2 }
 0x41b   :  { %v2026_v22 = vmax.f32 %v2023_v6, 0.0 }
 0x41d   :  { %2317 = vmatmul.mubr.f32.vlgmr.msra.gmra.mrb[4].mxu1 %v2026_v22 }
 0x41e   :  { %2323 = vmatprep.mubr.msk.f32.mxu1 %vm3450_vm0, %v3451_v0  ;;  %3152 = vmatpush3.bf16.msra.mxu1 %v3151_v10 }
 0x4f0   :  { %v2116_v26 = vpop.f32.mrb[4].mxu1 }
 0x4f1   :  { %v2117_v13 = vadd.f32 %v2226_v12, %v2116_v26  ;;  %v2318_v46 = vpop.f32.mrb[5].mxu1 }
 0x4f3   :  { %v2120_v14 = vmax.f32 %v2117_v13, 0.0 }
 0x4f5   :  { %2324 = vmatmul.mubr.msk.f32.vlgmr.msra.gmra.mrb[6].mxu1 %vm2130_vm1, %v2120_v14 }
 0x5c8   :  { %v2200_v16 = vpop.f32.mrb[6].mxu1 }
 0x5c9   :  { %v2201_v11 = vadd.f32 %v2227_v15, %v2200_v16  ;;  %v2325_v17 = vpop.f32.mrb[7].mxu1 }
 0x5cb   :  { %2205 = vst.msk [vmem:[#allocation17] sm:$0x3] %vm2204_vm2, %v2201_v11 }
 0x5cc   :  { %3412 = shalt.err (!%p3409_p6)
}
 0x5cd   :  { %s3413_s7 = scalar_lea.hbm %s3751_s9, 32 }
 0x5ce   :  { %p3414_p7 = scmp.ne.s32.totalorder %s3751_s9, %s3413_s7  ;;  %p3417_p8 = scmp.lt.u32.totalorder %s3413_s7, %s3751_s9 }
 0x5d0   :  { %p3419_p9 = pnand %p3417_p8, %p3414_p7 }
 0x5d2   :  { %3422 = shalt.err (!%p3419_p9)
}
 0x5d3   :  { %2215 = dma.vmem_to_hbm [thread:$0]  %s2213_s24, 32, %s3751_s9, [#allocation4]  }
 0x5d4   :  { %3433 = dma.done.wait [#allocation4], 32  }
 0x5d5   :  { %3434 = vsyncadd [#allocation4], 4294967264 }
 0x5d6   :  { %2219 = vsyncpa [#allocation3], 1 }
 0x5d7   :  { %2220 = vsyncpa [#allocation6], 1 }
 0x5d8   :  { %2221 = vsyncpa [#allocation9], 1 }
 0x5d9   :  { %2222 = vsyncpa [#allocation12], 1 }
 0x5da   :  { %2223 = vsyncpa [#allocation15], 1 }
 0x5db   :  { %2224 = vsyncpa [#allocation4], 1 }

// kernel: saver_forward.2
= control target key start
LH: loop header
LB: loop body
LE: loop exit
PB: predicated region body
PF: predicated region fallthrough
CT: control target
= control target key end

     0   :  { %s13072_s0 = inlined_call_operand.hbm [shape: f32[192,1], index: 0, kind: input, shape index: {}]   ;;  %s13073_s1 = inlined_call_operand.hbm [shape: f32[192,3], index: 1, kind: input, shape index: {}]   ;;  %s13074_s2 = inlined_call_operand.hbm [shape: f32[1,32], index: 2, kind: input, shape index: {}]   ;;  %s13075_s3 = inlined_call_operand.hbm [shape: f32[3,32], index: 3, kind: input, shape index: {}]   ;;  %s13076_s4 = inlined_call_operand.hbm [shape: f32[1,32], index: 4, kind: input, shape index: {}]   ;;  %s13077_s5 = inlined_call_operand.hbm [shape: f32[96,32], index: 5, kind: input, shape index: {}]   ;;  %s13078_s6 = inlined_call_operand.hbm [shape: f32[2,2,3,32,16], index: 6, kind: input, shape index: {}]   ;;  %s13079_s7 = inlined_call_operand.hbm [shape: f32[2,2,3,1,16], index: 7, kind: input, shape index: {}]   ;;  %s13080_s8 = inlined_call_operand.hbm [shape: f32[2,2,16,32], index: 8, kind: input, shape index: {}]   ;;  %s13081_s9 = inlined_call_operand.hbm [shape: f32[2,6,32], index: 9, kind: input, shape index: {}]   ;;  %s13082_s10 = inlined_call_operand.hbm [shape: f32[2,32,64], index: 10, kind: input, shape index: {}]   ;;  %s13083_s11 = inlined_call_operand.hbm [shape: f32[2,1,64], index: 11, kind: input, shape index: {}]   ;;  %s13084_s12 = inlined_call_operand.hbm [shape: f32[2,64,32], index: 12, kind: input, shape index: {}]   ;;  %s13085_s13 = inlined_call_operand.hbm [shape: f32[192,32], index: 13, kind: output, shape index: {}]  }
   0x1   :  { %13098 = sst [smem:[#allocation34_spill]] %s13072_s0 }
   0x2   :  { %13099 = sst [smem:[#allocation35_spill]] %s13073_s1 }
   0x3   :  { %13100 = sst [smem:[#allocation36_spill]] %s13074_s2 }
   0x4   :  { %13101 = sst [smem:[#allocation37_spill]] %s13075_s3 }
   0x5   :  { %13102 = sst [smem:[#allocation38_spill]] %s13076_s4 }
   0x6   :  { %13103 = sst [smem:[#allocation39_spill]] %s13077_s5 }
   0x7   :  { %13104 = sst [smem:[#allocation40_spill]] %s13078_s6 }
   0x8   :  { %13105 = sst [smem:[#allocation41_spill]] %s13079_s7 }
   0x9   :  { %13106 = sst [smem:[#allocation42_spill]] %s13080_s8 }
   0xa   :  { %13107 = sst [smem:[#allocation43_spill]] %s13085_s13 }
   0xb   :  { %18 = vsyncpa [#allocation3], 0 }
   0xc   :  { %20 = vsyncpa [#allocation3 + $0x1], 0 }
   0xd   :  { %21 = vsyncpa [#allocation6], 0 }
   0xe   :  { %23 = vsyncpa [#allocation6 + $0x1], 0 }
   0xf   :  { %24 = vsyncpa [#allocation9], 0 }
  0x10   :  { %25 = vsyncpa [#allocation12], 0 }
  0x11   :  { %26 = vsyncpa [#allocation15], 0 }
  0x12   :  { %27 = vsyncpa [#allocation18], 0 }
  0x13   :  { %28 = vsyncpa [#allocation21], 0 }
  0x14   :  { %29 = vsyncpa [#allocation4], 0 }
  0x15   :  { %31 = vsyncpa [#allocation4 + $0x1], 0  ;;  %s10456_s25 = smov 0   ;;  %s10458_s26 = smov 0  }
  0x16   :  { %s10460_s27 = smov 0   ;;  %s10462_s28 = smov 0  }
  0x17 LB: > { %s10365_s29 = smov [#allocation7]   ;;  %s10477_s14 = sadd.s32 4294967295, %s10363_s28   ;;  %s10363_s28 = sphi %s10462_s28, %s13154_s28   ;;  %s10359_s27 = sphi %s10460_s27, %s13153_s27   ;;  %s10355_s26 = sphi %s10458_s26, %s13152_s26   ;;  %s10351_s25 = sphi %s10456_s25, %s13151_s25  }
  0x18   : > { %s364_s30 = sshll.u32 %s10365_s29, 4  ;;  %p7165_p0 = scmp.ge.s32.totalorder %s10363_s28, 1  ;;  %s10482_s30 = int_to_ptr.vmem [resolvable:$true] %s364_s30 }
  0x19   : > { %p13089_p1 = scmp.eq.s32.totalorder %s10477_s14, 0  ;;  %p351_p2 = scmp.lt.s32.totalorder %s10363_s28, 3 }
  0x1a   : > { %s10366_s16 = smov [#allocation8]   ;;  %s10367_s18 = smov [#allocation11]  }
  0x1b   : > { %p10484_p3 = pnand %p7165_p0, %p351_p2  ;;  %s375_s17 = sshll.u32 %s10366_s16, 4  ;;  %s10491_s17 = int_to_ptr.vmem [resolvable:$true] %s375_s17 }
  0x1c   : > { %s396_s19 = sshll.u32 %s10367_s18, 4  ;;  %s13111_s2 = sld [smem:[#allocation36_spill]]  ;;  %s10499_s19 = int_to_ptr.vmem [resolvable:$true] %s396_s19 }
  0x1d   : > { %s13108_s15 = scalar_select %p10484_p3, 1, 0 }
  0x1e   : > { %p9491_p5 = pneg %p10484_p3 }
  0x1f   : > { %13109 = sst [smem:[#allocation33_spill]] %s13108_s15 }
  0x20   : > { %p10495_p6 = pnand %p9491_p5, %p13089_p1 }
  0x22   : > { %s9901_s23 = scalar_lea.hbm %s13111_s2, 16  ;;  %p10509_p8 = pneg %p10495_p6 }
  0x23   : > { %p9902_p7 = scmp.ne.s32.totalorder %s13111_s2, %s9901_s23  ;;  %p9908_p11 = scmp.lt.u32.totalorder %s9901_s23, %s13111_s2 }
  0x25   : > { %p9904_p9 = pnand %p10509_p8, %p9902_p7 }
  0x27   : > { %p9905_p10 = pneg %p9904_p9 }
  0x29   : > { %p9910_p12 = pnand %p9908_p11, %p9905_p10 }
  0x2b   : > { %9913 = shalt.err (!%p9910_p12)
}
  0x2c   : > { %s9914_s21 = scalar_lea.vmem %s10482_s30, 16  ;;  %s9921_s22 = scalar_lea.vmem %s10482_s30, 32 }
  0x2d   : > { %p9915_p13 = scmp.ne.s32.totalorder %s10482_s30, %s9914_s21  ;;  %p9922_p5 = scmp.lt.s32.totalorder %s10482_s30, %s10482_s30 }
  0x2e   : > { %p9923_p7 = scmp.lt.s32.totalorder %s9921_s22, %s9914_s21 }
  0x2f   : > { %p9917_p0 = pnand %p9915_p13, %p10509_p8 }
  0x30   : > { %p9924_p9 = por %p9923_p7, %p9922_p5 }
  0x31   : > { %p9918_p2 = pneg %p9917_p0 }
  0x33   : > { %p9925_p4 = pnand %p9924_p9, %p9918_p2 }
  0x35   : > { %9928 = shalt.err (!%p9925_p4)
}
  0x36   : > { %9494 = dma.hbm_to_vmem [thread:$0]  (!%p10495_p6), %s13111_s2, 16, %s10482_s30, [#allocation6]  }
  0x37   : > { %s13113_s3 = sld [smem:[#allocation37_spill]] }
  0x3d   : > { %s9929_s18 = scalar_lea.hbm %s13113_s3, 64 }
  0x3e   : > { %p9930_p10 = scmp.ne.s32.totalorder %s13113_s3, %s9929_s18  ;;  %p9936_p4 = scmp.lt.u32.totalorder %s9929_s18, %s13113_s3 }
  0x40   : > { %p9932_p11 = pnand %p9930_p10, %p10509_p8 }
  0x42   : > { %p9933_p12 = pneg %p9932_p11 }
  0x44   : > { %p9938_p13 = pnand %p9936_p4, %p9933_p12 }
  0x46   : > { %9941 = shalt.err (!%p9938_p13)
}
  0x47   : > { %s9942_s30 = scalar_lea.vmem %s10491_s17, 64  ;;  %p9950_p7 = scmp.lt.s32.totalorder %s10491_s17, %s10491_s17 }
  0x48   : > { %p9943_p0 = scmp.ne.s32.totalorder %s10491_s17, %s9942_s30  ;;  %p9951_p9 = scmp.lt.s32.totalorder %s9942_s30, %s9942_s30 }
  0x4a   : > { %p9945_p2 = pnand %p9943_p0, %p10509_p8  ;;  %p9952_p10 = por %p9951_p9, %p9950_p7 }
  0x4c   : > { %p9946_p5 = pneg %p9945_p2 }
  0x4e   : > { %p9953_p11 = pnand %p9952_p10, %p9946_p5 }
  0x50   : > { %9956 = shalt.err (!%p9953_p11)
}
  0x51   : > { %9497 = dma.hbm_to_vmem [thread:$0]  (!%p10495_p6), %s13113_s3, 64, %s10491_s17, [#allocation9]  }
  0x52   : > { %s13114_s5 = sld [smem:[#allocation39_spill]] }
  0x58   : > { %s9957_s24 = scalar_lea.hbm %s13114_s5, 1536 }
  0x59   : > { %p9958_p12 = scmp.ne.s32.totalorder %s13114_s5, %s9957_s24  ;;  %p9964_p0 = scmp.lt.u32.totalorder %s9957_s24, %s13114_s5 }
  0x5b   : > { %p9960_p4 = pnand %p9958_p12, %p10509_p8 }
  0x5d   : > { %p9961_p13 = pneg %p9960_p4 }
  0x5f   : > { %p9966_p2 = pnand %p9964_p0, %p9961_p13 }
  0x61   : > { %9969 = shalt.err (!%p9966_p2)
}
  0x62   : > { %s9970_s17 = scalar_lea.vmem %s10499_s19, 1536  ;;  %p9978_p10 = scmp.lt.s32.totalorder %s10499_s19, %s10499_s19 }
  0x63   : > { %p9971_p5 = scmp.ne.s32.totalorder %s10499_s19, %s9970_s17  ;;  %p9979_p11 = scmp.lt.s32.totalorder %s9970_s17, %s9970_s17 }
  0x65   : > { %p9973_p7 = pnand %p9971_p5, %p10509_p8  ;;  %p9980_p12 = por %p9979_p11, %p9978_p10 }
  0x67   : > { %p9974_p9 = pneg %p9973_p7 }
  0x69   : > { %p9981_p4 = pnand %p9980_p12, %p9974_p9 }
  0x6b   : > { %9984 = shalt.err (!%p9981_p4)
}
  0x6c   : > { %s13091_s30 = smov 128   ;;  %s13093_s1 = smov 8  }
  0x6d   : > { %9503 = dma.hbm_to_vmem [thread:$0]  (!%p10495_p6), %s13114_s5, 1536, %s10499_s19, [#allocation12], %s13091_s30, %s13091_s30, %s13093_s1  }
  0x6e   : > { %s10370_s23 = smov [#allocation14]   ;;  %s13115_s7 = sld [smem:[#allocation41_spill]] }
  0x6f   : > { %s422_s24 = sshll.u32 %s10370_s23, 4  ;;  %s423_s24 = int_to_ptr.vmem [resolvable:$true] %s422_s24 }
  0x74   : > { %s9985_s21 = scalar_lea.hbm %s13115_s7, 192 }
  0x75   : > { %p9986_p13 = scmp.ne.s32.totalorder %s13115_s7, %s9985_s21  ;;  %p9992_p5 = scmp.lt.u32.totalorder %s9985_s21, %s13115_s7 }
  0x77   : > { %p9988_p0 = pnand %p9986_p13, %p10509_p8 }
  0x79   : > { %p9989_p2 = pneg %p9988_p0 }
  0x7b   : > { %p9994_p7 = pnand %p9992_p5, %p9989_p2 }
  0x7d   : > { %9997 = shalt.err (!%p9994_p7)
}
  0x7e   : > { %s9998_s19 = scalar_lea.vmem %s423_s24, 192  ;;  %p10006_p12 = scmp.lt.s32.totalorder %s423_s24, %s423_s24 }
  0x7f   : > { %p9999_p9 = scmp.ne.s32.totalorder %s423_s24, %s9998_s19  ;;  %p10007_p4 = scmp.lt.s32.totalorder %s9998_s19, %s9998_s19 }
  0x81   : > { %p10001_p10 = pnand %p9999_p9, %p10509_p8  ;;  %p10008_p1 = por %p10007_p4, %p10006_p12 }
  0x83   : > { %p10002_p11 = pneg %p10001_p10 }
  0x85   : > { %p10009_p3 = pnand %p10008_p1, %p10002_p11 }
  0x87   : > { %10012 = shalt.err (!%p10009_p3)
}
  0x88   : > { %s13095_s15 = smov 16   ;;  %s10372_s13 = smov 1  }
  0x89   : > { %9509 = dma.hbm_to_vmem [thread:$0]  (!%p10495_p6), %s13115_s7, 192, %s423_s24, [#allocation15], %s13095_s15, %s13095_s15, %s10372_s13  }
  0x8a   : > { %s10373_s23 = smov [#allocation17]   ;;  %s10374_s18 = smov [#allocation20]  }
  0x8b   : > { %s448_s29 = sshll.u32 %s10373_s23, 4  ;;  %s474_s21 = sshll.u32 %s10374_s18, 4  ;;  %s449_s29 = int_to_ptr.vmem [resolvable:$true] %s448_s29  ;;  %s10601_s21 = int_to_ptr.vmem [resolvable:$true] %s474_s21 }
  0x8c   : > { %s10013_s19 = scalar_lea.hbm %s13081_s9, 256 }
  0x8d   : > { %p10014_p1 = scmp.ne.s32.totalorder %s13081_s9, %s10013_s19  ;;  %p10020_p0 = scmp.lt.u32.totalorder %s10013_s19, %s13081_s9 }
  0x8f   : > { %p10016_p3 = pnand %p10014_p1, %p10509_p8 }
  0x91   : > { %p10017_p13 = pneg %p10016_p3 }
  0x93   : > { %p10022_p2 = pnand %p10020_p0, %p10017_p13 }
  0x95   : > { %10025 = shalt.err (!%p10022_p2)
}
  0x96   : > { %s10026_s3 = scalar_lea.vmem %s449_s29, 256  ;;  %p10034_p10 = scmp.lt.s32.totalorder %s449_s29, %s449_s29 }
  0x97   : > { %p10027_p5 = scmp.ne.s32.totalorder %s449_s29, %s10026_s3  ;;  %p10035_p11 = scmp.lt.s32.totalorder %s10026_s3, %s10026_s3 }
  0x99   : > { %p10029_p7 = pnand %p10027_p5, %p10509_p8  ;;  %p10036_p12 = por %p10035_p11, %p10034_p10 }
  0x9b   : > { %p10030_p9 = pneg %p10029_p7 }
  0x9d   : > { %p10037_p4 = pnand %p10036_p12, %p10030_p9 }
  0x9f   : > { %10040 = shalt.err (!%p10037_p4)
}
  0xa0   : > { %s13116_s30 = smov 8   ;;  %s13117_s1 = smov 128  }
  0xa1   : > { %9515 = dma.hbm_to_vmem [thread:$0]  (!%p10495_p6), %s13081_s9, 256, %s449_s29, [#allocation18], %s13117_s1, %s13117_s1, %s13116_s30  }
  0xa2   : > { %s10041_s19 = scalar_lea.hbm %s13083_s11, 32 }
  0xa3   : > { %p10042_p1 = scmp.ne.s32.totalorder %s13083_s11, %s10041_s19  ;;  %p10048_p0 = scmp.lt.u32.totalorder %s10041_s19, %s13083_s11 }
  0xa5   : > { %p10044_p3 = pnand %p10042_p1, %p10509_p8 }
  0xa7   : > { %p10045_p13 = pneg %p10044_p3 }
  0xa9   : > { %p10050_p2 = pnand %p10048_p0, %p10045_p13 }
  0xab   : > { %10053 = shalt.err (!%p10050_p2)
}
  0xac   : > { %s10054_s29 = scalar_lea.vmem %s10601_s21, 32  ;;  %p10062_p10 = scmp.lt.s32.totalorder %s10601_s21, %s10601_s21 }
  0xad   : > { %p10055_p5 = scmp.ne.s32.totalorder %s10601_s21, %s10054_s29  ;;  %p10063_p11 = scmp.lt.s32.totalorder %s10054_s29, %s10054_s29 }
  0xaf   : > { %p10057_p7 = pnand %p10055_p5, %p10509_p8  ;;  %p10064_p12 = por %p10063_p11, %p10062_p10 }
  0xb1   : > { %p10058_p9 = pneg %p10057_p7 }
  0xb3   : > { %p10065_p4 = pnand %p10064_p12, %p10058_p9 }
  0xb5   : > { %10068 = shalt.err (!%p10065_p4)
}
  0xb6   : > { %s13118_s15 = smov 16   ;;  %s10375_s22 = smov [#allocation10]  }
  0xb7   : > { %9521 = dma.hbm_to_vmem [thread:$0]  (!%p10495_p6), %s13083_s11, 32, %s10601_s21, [#allocation21], %s13118_s15, %s13118_s15, %s10372_s13  }
  0xb8   : > { %s386_s17 = sshll.u32 %s10375_s22, 4  ;;  %s10376_s19 = smov [#allocation13]   ;;  %s387_s17 = int_to_ptr.vmem [resolvable:$true] %s386_s17 }
  0xb9   : > { %s409_s2 = sshll.u32 %s10376_s19, 4  ;;  %s13119_s4 = sld [smem:[#allocation38_spill]]  ;;  %s10650_s2 = int_to_ptr.vmem [resolvable:$true] %s409_s2 }
  0xbf   : > { %s10069_s29 = scalar_lea.hbm %s13119_s4, 16 }
  0xc0   : > { %p10070_p1 = scmp.ne.s32.totalorder %s13119_s4, %s10069_s29  ;;  %p10076_p0 = scmp.lt.u32.totalorder %s10069_s29, %s13119_s4 }
  0xc2   : > { %p10072_p3 = pnand %p10070_p1, %p10509_p8 }
  0xc4   : > { %p10073_p13 = pneg %p10072_p3 }
  0xc6   : > { %p10078_p2 = pnand %p10076_p0, %p10073_p13 }
  0xc8   : > { %10081 = shalt.err (!%p10078_p2)
}
  0xc9   : > { %s10082_s21 = scalar_lea.vmem %s387_s17, 16  ;;  %s10089_s15 = scalar_lea.vmem %s387_s17, 32 }
  0xca   : > { %p10083_p5 = scmp.ne.s32.totalorder %s387_s17, %s10082_s21  ;;  %p10090_p10 = scmp.lt.s32.totalorder %s387_s17, %s387_s17 }
  0xcb   : > { %p10091_p11 = scmp.lt.s32.totalorder %s10089_s15, %s10082_s21 }
  0xcc   : > { %p10085_p7 = pnand %p10083_p5, %p10509_p8 }
  0xcd   : > { %p10092_p12 = por %p10091_p11, %p10090_p10 }
  0xce   : > { %p10086_p9 = pneg %p10085_p7 }
  0xd0   : > { %p10093_p4 = pnand %p10092_p12, %p10086_p9 }
  0xd2   : > { %10096 = shalt.err (!%p10093_p4)
}
  0xd3   : > { %9500 = dma.hbm_to_vmem [thread:$0]  (!%p10495_p6), %s13119_s4, 16, %s387_s17, [#allocation9]  }
  0xd4   : > { %s13120_s6 = sld [smem:[#allocation40_spill]] }
  0xda   : > { %s10097_s19 = scalar_lea.hbm %s13120_s6, 6144 }
  0xdb   : > { %p10098_p1 = scmp.ne.s32.totalorder %s13120_s6, %s10097_s19  ;;  %p10104_p0 = scmp.lt.u32.totalorder %s10097_s19, %s13120_s6 }
  0xdd   : > { %p10100_p3 = pnand %p10098_p1, %p10509_p8 }
  0xdf   : > { %p10101_p13 = pneg %p10100_p3 }
  0xe1   : > { %p10106_p2 = pnand %p10104_p0, %p10101_p13 }
  0xe3   : > { %10109 = shalt.err (!%p10106_p2)
}
  0xe4   : > { %s10110_s17 = scalar_lea.vmem %s10650_s2, 6144  ;;  %p10118_p10 = scmp.lt.s32.totalorder %s10650_s2, %s10650_s2 }
  0xe5   : > { %p10111_p5 = scmp.ne.s32.totalorder %s10650_s2, %s10110_s17  ;;  %p10119_p11 = scmp.lt.s32.totalorder %s10110_s17, %s10110_s17 }
  0xe7   : > { %p10113_p7 = pnand %p10111_p5, %p10509_p8  ;;  %p10120_p12 = por %p10119_p11, %p10118_p10 }
  0xe9   : > { %p10114_p9 = pneg %p10113_p7 }
  0xeb   : > { %p10121_p4 = pnand %p10120_p12, %p10114_p9 }
  0xed   : > { %10124 = shalt.err (!%p10121_p4)
}
  0xee   : > { %9506 = dma.hbm_to_vmem [thread:$0]  (!%p10495_p6), %s13120_s6, 6144, %s10650_s2, [#allocation12], %s13117_s1, %s13117_s1, %s13116_s30  }
  0xef   : > { %s10377_s15 = smov [#allocation16]   ;;  %s10378_s7 = smov [#allocation19]  }
  0xf0   : > { %s435_s5 = sshll.u32 %s10377_s15, 4  ;;  %s461_s18 = sshll.u32 %s10378_s7, 4  ;;  %s436_s5 = int_to_ptr.vmem [resolvable:$true] %s435_s5  ;;  %s10696_s18 = int_to_ptr.vmem [resolvable:$true] %s461_s18 }
  0xf1   : > { %s13121_s8 = sld [smem:[#allocation42_spill]] }
  0xf7   : > { %s10125_s24 = scalar_lea.hbm %s13121_s8, 1024 }
  0xf8   : > { %p10126_p1 = scmp.ne.s32.totalorder %s13121_s8, %s10125_s24  ;;  %p10132_p0 = scmp.lt.u32.totalorder %s10125_s24, %s13121_s8 }
  0xfa   : > { %p10128_p3 = pnand %p10126_p1, %p10509_p8 }
  0xfc   : > { %p10129_p13 = pneg %p10128_p3 }
  0xfe   : > { %p10134_p2 = pnand %p10132_p0, %p10129_p13 }
 0x100   : > { %10137 = shalt.err (!%p10134_p2)
}
 0x101   : > { %s10138_s17 = scalar_lea.vmem %s436_s5, 1024  ;;  %p10146_p10 = scmp.lt.s32.totalorder %s436_s5, %s436_s5 }
 0x102   : > { %p10139_p5 = scmp.ne.s32.totalorder %s436_s5, %s10138_s17  ;;  %p10147_p11 = scmp.lt.s32.totalorder %s10138_s17, %s10138_s17 }
 0x104   : > { %p10141_p7 = pnand %p10139_p5, %p10509_p8  ;;  %p10148_p12 = por %p10147_p11, %p10146_p10 }
 0x106   : > { %p10142_p9 = pneg %p10141_p7 }
 0x108   : > { %p10149_p4 = pnand %p10148_p12, %p10142_p9 }
 0x10a   : > { %10152 = shalt.err (!%p10149_p4)
}
 0x10b   : > { %9512 = dma.hbm_to_vmem [thread:$0]  (!%p10495_p6), %s13121_s8, 1024, %s436_s5, [#allocation15], %s13117_s1, %s13117_s1, %s13116_s30  }
 0x10c   : > { %s10153_s22 = scalar_lea.hbm %s13082_s10, 1024 }
 0x10d   : > { %p10154_p1 = scmp.ne.s32.totalorder %s13082_s10, %s10153_s22  ;;  %p10160_p0 = scmp.lt.u32.totalorder %s10153_s22, %s13082_s10 }
 0x10f   : > { %p10156_p3 = pnand %p10154_p1, %p10509_p8 }
 0x111   : > { %p10157_p13 = pneg %p10156_p3 }
 0x113   : > { %p10162_p2 = pnand %p10160_p0, %p10157_p13 }
 0x115   : > { %10165 = shalt.err (!%p10162_p2)
}
 0x116   : > { %s10166_s5 = scalar_lea.vmem %s10696_s18, 1024  ;;  %p10174_p10 = scmp.lt.s32.totalorder %s10696_s18, %s10696_s18 }
 0x117   : > { %p10167_p5 = scmp.ne.s32.totalorder %s10696_s18, %s10166_s5  ;;  %p10175_p11 = scmp.lt.s32.totalorder %s10166_s5, %s10166_s5 }
 0x119   : > { %p10169_p7 = pnand %p10167_p5, %p10509_p8  ;;  %p10176_p12 = por %p10175_p11, %p10174_p10 }
 0x11b   : > { %p10170_p9 = pneg %p10169_p7 }
 0x11d   : > { %p10177_p4 = pnand %p10176_p12, %p10170_p9 }
 0x11f   : > { %10180 = shalt.err (!%p10177_p4)
}
 0x120   : > { %9518 = dma.hbm_to_vmem [thread:$0]  (!%p10495_p6), %s13082_s10, 1024, %s10696_s18, [#allocation18], %s13117_s1, %s13117_s1, %s13116_s30  }
 0x121   : > { %s10379_s17 = smov [#allocation22]   ;;  %s10181_s7 = scalar_lea.hbm %s13084_s12, 2048 }
 0x122   : > { %s487_s13 = sshll.u32 %s10379_s17, 4  ;;  %p10182_p1 = scmp.ne.s32.totalorder %s13084_s12, %s10181_s7  ;;  %s488_s13 = int_to_ptr.vmem [resolvable:$true] %s487_s13 }
 0x123   : > { %p10188_p0 = scmp.lt.u32.totalorder %s10181_s7, %s13084_s12 }
 0x124   : > { %p10184_p3 = pnand %p10182_p1, %p10509_p8 }
 0x126   : > { %p10185_p13 = pneg %p10184_p3 }
 0x128   : > { %p10190_p2 = pnand %p10188_p0, %p10185_p13 }
 0x12a   : > { %10193 = shalt.err (!%p10190_p2)
}
 0x12b   : > { %s10194_s18 = scalar_lea.vmem %s488_s13, 2048  ;;  %p10202_p10 = scmp.lt.s32.totalorder %s488_s13, %s488_s13 }
 0x12c   : > { %p10195_p5 = scmp.ne.s32.totalorder %s488_s13, %s10194_s18  ;;  %p10203_p11 = scmp.lt.s32.totalorder %s10194_s18, %s10194_s18 }
 0x12e   : > { %p10197_p7 = pnand %p10195_p5, %p10509_p8  ;;  %p10204_p12 = por %p10203_p11, %p10202_p10 }
 0x130   : > { %p10198_p9 = pneg %p10197_p7 }
 0x132   : > { %p10205_p4 = pnand %p10204_p12, %p10198_p9 }
 0x134   : > { %10208 = shalt.err (!%p10205_p4)
}
 0x135   : > { %9524 = dma.hbm_to_vmem [thread:$0]  (!%p10495_p6), %s13084_s12, 2048, %s488_s13, [#allocation21], %s13117_s1, %s13117_s1, %s13116_s30  }
 0x136   : > { %s7164_s20 = sadd.s32 4294967294, %s10363_s28   ;;  %s10768_s16 = sadd.s32 1, %s10363_s28  }
 0x137   : > { %s44_s23 = sadd.s32 1, %s10359_s27  ;;  %s41_s2 = ssub.s32 %s10363_s28, %s10768_s16 }
 0x138   : > { %p51_p8 = scmp.ne.s32.totalorder %s10359_s27, %s10355_s26  ;;  %p42_p1 = scmp.eq.s32.totalorder %s41_s2, 0 }
 0x139   : > { %p52_p3 = scmp.eq.s32.totalorder %s10363_s28, 0  ;;  %p57_p13 = scmp.ne.s32.totalorder %s10355_s26, %s10351_s25 }
 0x13a   : > { %p338_p0 = scmp.eq.s32.totalorder %s10477_s14, 1  ;;  %p13122_p5 = scmp.eq.s32.totalorder %s10477_s14, 0 }
 0x13b   : > { %s10780_s17 = scalar_select %p42_p1, %s10359_s27, %s44_s23  }
 0x13c   : > { %p53_p2 = por %p52_p3, %p51_p8  ;;  %p10784_p6 = por %p13122_p5, %p57_p13 }
 0x13d   : > { %p10788_p7 = por %p338_p0, %p51_p8  ;;  %p344_p9 = scmp.eq.s32.totalorder %s7164_s20, 1 }
 0x13e   : > { %p9547_p10 = scmp.lt.s32.totalorder %s10363_s28, 2  ;;  %s501_s15 = sand.u32 1, %s10359_s27  }
 0x13f   : > { %s13124_s21 = scalar_select %p10788_p7, 1, 0 }
 0x140   : > { %p10794_p11 = por %p344_p9, %p57_p13  ;;  %s10798_s22 = smul.u32 96, %s501_s15 }
 0x141   : > { %p10800_p12 = pnand %p9547_p10, %p53_p2  ;;  %s13096_s24 = smul.u32 1536, %s10363_s28 }
 0x142   : > { %s13125_s7 = scalar_select %p10794_p11, 1, 0 }
 0x143   : > { %s13127_s0 = sld [smem:[#allocation34_spill]]  ;;  %s505_s20 = scalar_lea.vmem [#allocation2], %s10798_s22 }
 0x144   : > { %s512_s23 = sshll.u32 %s505_s20, 4  ;;  %s10816_s2 = scalar_lea.sflag [#allocation3], %s501_s15  ;;  %s10814_s23 = int_to_ptr.vmem [resolvable:$true] %s512_s23 }
 0x145   : > { %p10211_p8 = pneg %p10800_p12 }
 0x149   : > { %s10811_s5 = scalar_lea.hbm %s13127_s0, %s13096_s24  ;;  %s10214_s3 = scalar_lea.hbm %s13127_s0, 3072 }
 0x14a   : > { %s10209_s4 = scalar_lea.hbm %s10811_s5, 1536  ;;  %p10215_p13 = scmp.lt.u32.totalorder %s10811_s5, %s13127_s0 }
 0x14b   : > { %p10210_p4 = scmp.ne.s32.totalorder %s10811_s5, %s10209_s4  ;;  %p10216_p0 = scmp.lt.u32.totalorder %s10214_s3, %s10209_s4 }
 0x14c   : > { %p10218_p5 = scmp.lt.u32.totalorder %s10209_s4, %s10811_s5 }
 0x14d   : > { %p10212_p1 = pnand %p10211_p8, %p10210_p4  ;;  %p10217_p2 = por %p10216_p0, %p10215_p13 }
 0x14f   : > { %p10213_p3 = pneg %p10212_p1  ;;  %p10219_p9 = por %p10218_p5, %p10217_p2 }
 0x151   : > { %p10220_p10 = pnand %p10219_p9, %p10213_p3 }
 0x153   : > { %10223 = shalt.err (!%p10220_p10)
}
 0x154   : > { %s10224_s15 = scalar_lea.vmem %s10814_s23, 1536  ;;  %s10380_s20 = smov [#allocation2]  }
 0x155   : > { %p10225_p4 = scmp.ne.s32.totalorder %s10814_s23, %s10224_s15  ;;  %s10229_s18 = sshll.u32 %s10380_s20, 4  ;;  %s10230_s18 = int_to_ptr.vmem [resolvable:$false] %s10229_s18 }
 0x156   : > { %s10231_s6 = scalar_lea.vmem %s10230_s18, 3072  ;;  %p10232_p7 = scmp.lt.s32.totalorder %s10814_s23, %s10230_s18 }
 0x157   : > { %p10227_p1 = pnand %p10225_p4, %p10211_p8  ;;  %p10233_p13 = scmp.lt.s32.totalorder %s10231_s6, %s10224_s15 }
 0x159   : > { %p10228_p11 = pneg %p10227_p1  ;;  %p10234_p0 = por %p10233_p13, %p10232_p7 }
 0x15b   : > { %p10235_p2 = pnand %p10234_p0, %p10228_p11 }
 0x15d   : > { %10238 = shalt.err (!%p10235_p2)
}
 0x15e   : > { %9528 = dma.hbm_to_vmem [thread:$0]  (!%p10800_p12), %s10811_s5, 1536, %s10814_s23, %s10816_s2, %s13117_s1, %s13117_s1, %s13116_s30  }
 0x15f   : > { %s13128_s4 = smul.u32 1536, %s10363_s28  ;;  %s13129_s29 = sld [smem:[#allocation35_spill]] }
 0x160   : > { %s526_s20 = scalar_lea.vmem [#allocation5], %s10798_s22  ;;  %s13130_s6 = sand.u32 1, %s10363_s28  }
 0x161   : > { %s533_s18 = sshll.u32 %s526_s20, 4  ;;  %s10859_s0 = scalar_lea.sflag [#allocation6], %s13130_s6  ;;  %s10855_s18 = int_to_ptr.vmem [resolvable:$true] %s533_s18 }
 0x165   : > { %s10852_s15 = scalar_lea.hbm %s13129_s29, %s13128_s4  ;;  %s10244_s2 = scalar_lea.hbm %s13129_s29, 3072 }
 0x166   : > { %s10239_s8 = scalar_lea.hbm %s10852_s15, 1536  ;;  %p10245_p5 = scmp.lt.u32.totalorder %s10852_s15, %s13129_s29 }
 0x167   : > { %p10240_p7 = scmp.ne.s32.totalorder %s10852_s15, %s10239_s8  ;;  %p10246_p9 = scmp.lt.u32.totalorder %s10244_s2, %s10239_s8 }
 0x168   : > { %p10248_p4 = scmp.lt.u32.totalorder %s10239_s8, %s10852_s15 }
 0x169   : > { %p10242_p11 = pnand %p10240_p7, %p10211_p8  ;;  %p10247_p10 = por %p10246_p9, %p10245_p5 }
 0x16b   : > { %p10243_p3 = pneg %p10242_p11  ;;  %p10249_p1 = por %p10248_p4, %p10247_p10 }
 0x16d   : > { %p10250_p13 = pnand %p10249_p1, %p10243_p3 }
 0x16f   : > { %10253 = shalt.err (!%p10250_p13)
}
 0x170   : > { %s10254_s22 = scalar_lea.vmem %s10855_s18, 1536  ;;  %s10381_s3 = smov [#allocation5]  }
 0x171   : > { %p10255_p0 = scmp.ne.s32.totalorder %s10855_s18, %s10254_s22  ;;  %s10259_s20 = sshll.u32 %s10381_s3, 4  ;;  %s10260_s20 = int_to_ptr.vmem [resolvable:$false] %s10259_s20 }
 0x172   : > { %s10261_s6 = scalar_lea.vmem %s10260_s20, 3072  ;;  %p10262_p11 = scmp.lt.s32.totalorder %s10855_s18, %s10260_s20 }
 0x173   : > { %p10257_p2 = pnand %p10255_p0, %p10211_p8  ;;  %p10263_p5 = scmp.lt.s32.totalorder %s10261_s6, %s10254_s22 }
 0x175   : > { %p10258_p7 = pneg %p10257_p2  ;;  %p10264_p9 = por %p10263_p5, %p10262_p11 }
 0x177   : > { %p10265_p10 = pnand %p10264_p9, %p10258_p7 }
 0x179   : > { %10268 = shalt.err (!%p10265_p10)
}
 0x17a   : > { %9531 = dma.hbm_to_vmem [thread:$0]  (!%p10800_p12), %s10852_s15, 1536, %s10855_s18, %s10859_s0, %s13117_s1, %s13117_s1, %s13116_s30  }
 0x17b   : > { %s13131_s8 = sld [smem:[#allocation33_spill]] }
 0x181   : > { %p13132_p8 = scmp.ne.s32.totalorder %s13131_s8, 0 }
 0x182   : > { %s10891_s5 = sand.u32 (!%p13132_p8), 1, %s10355_s26  }
 0x183   : > { %545 = sbr.rel (%p13132_p8) target bundleno = 6847 (0x1abf), region = 72  ;;  %s548_s19 = scalar_lea.sflag (!%p13132_p8), [#allocation3], %s10891_s5 }
 0x184   : > { %s10894_s23 = smul.u32 (!%p13132_p8), 96, %s10891_s5 }
 0x186   : > { %s10898_s2 = scalar_lea.vmem (!%p13132_p8), [#allocation2], %s10894_s23 }
 0x18a   : > { %10314 = dma.done.wait (%p10784_p6), %s548_s19, 1536  }
 0x18b   : > { %10316 = vsyncadd (%p10784_p6), %s548_s19, 4294965760  ;;  %s556_s0 = sand.u32 1, %s10477_s14   ;;  %s10906_s1 = scalar_lea.vmem [#allocation5], %s10894_s23 }
 0x18c   : > { %s557_s30 = scalar_lea.sflag [#allocation6], %s556_s0 }
 0x18d   : > { %10318 = dma.done.wait (%p10784_p6), %s557_s30, 1536  }
 0x18e   : > { %10320 = vsyncadd (%p10784_p6), %s557_s30, 4294965760  ;;  %p13133_p12 = scmp.eq.s32.totalorder %s10477_s14, 0 }
 0x190   : > { %10322 = dma.done.wait (%p13133_p12), [#allocation6], 16   ;;  %p13134_p3 = pmov %p13133_p12 }
 0x192   : > { %10324 = vsyncadd (%p13134_p3), [#allocation6], 4294967280  ;;  %p13135_p4 = pmov %p13134_p3 }
 0x193   : > { %p13136_p1 = pmov %p13134_p3 }
 0x194   : > { %10326 = dma.done.wait (%p13135_p4), [#allocation9], 80  }
 0x195   : > { %10328 = vsyncadd (%p13136_p1), [#allocation9], 4294967216  ;;  %p13137_p13 = pmov %p13136_p1 }
 0x196   : > { %p13138_p0 = pmov %p13136_p1 }
 0x197   : > { %10330 = dma.done.wait (%p13137_p13), [#allocation12], 7680  }
 0x198   : > { %10332 = vsyncadd (%p13138_p0), [#allocation12], 4294959616  ;;  %p13139_p6 = pmov %p13138_p0 }
 0x199   : > { %p13140_p2 = pmov %p13138_p0 }
 0x19a   : > { %10334 = dma.done.wait (%p13139_p6), [#allocation15], 1216  }
 0x19b   : > { %10336 = vsyncadd (%p13140_p2), [#allocation15], 4294966080  ;;  %p13141_p7 = pmov %p13138_p0 }
 0x19c   : > { %p13142_p11 = pmov %p13138_p0 }
 0x19d   : > { %10338 = dma.done.wait (%p13141_p7), [#allocation18], 1280  }
 0x19e   : > { %10340 = vsyncadd (%p13142_p11), [#allocation18], 4294966016  ;;  %p13143_p5 = pmov %p13138_p0 }
 0x19f   : > { %p13144_p9 = pmov %p13138_p0 }
 0x1a0   : > { %10342 = dma.done.wait (%p13143_p5), [#allocation21], 2080  }
 0x1a1   : > { %10344 = vsyncadd (%p13144_p9), [#allocation21], 4294965216  ;;  %v10382_v0 = vmov 0   ;;  %vm796_vm0 = vcmask 1042432   ;;  %v758_v1 = vld [vmem:[#allocation8] sm:$0x7] }
 0x1a2   : > { %9610 = vset.pattern.permute.xlu0 %v10382_v0  ;;  %9611 = vset.pattern.permute.xlu1 %v10382_v0  ;;  %v746_v2 = vld [vmem:[%s10906_s1] sm:$0xff]  ;;  %vm759_vm1 = vcmask 23552   ;;  %v752_v3 = vld [vmem:[%s10906_s1 + $0x30] sm:$0xff]  ;;  %v747_v4 = vld [vmem:[%s10906_s1 + $0x8] sm:$0xff]  ;;  %vm1018_vm2 = vcmask 261120   ;;  %vm1442_vm3 = vcmask 130048  }
 0x1a3   : > { %8136 = vmatprep.subr.msk.mxu0 %vm796_vm0, %v758_v1  ;;  %9412 = vmatprep.subr.msk.mxu1 %vm796_vm0, %v758_v1  ;;  %v753_v5 = vld [vmem:[%s10906_s1 + $0x38] sm:$0xff]  ;;  %v748_v6 = vld [vmem:[%s10906_s1 + $0x10] sm:$0xff]  ;;  %v754_v7 = vld [vmem:[%s10906_s1 + $0x40] sm:$0xff]  ;;  %vm1652_vm5 = vcmask 785408   ;;  %vm3602_vm6 = vcmask 523264   ;;  %s12967_s13 = scalar_lea.vmem [#allocation23], %s10894_s23 }
 0x1a4   : > { %8137 = vmatpush3.msk.msra.mxu0 %vm796_vm0, %v758_v1  ;;  %9413 = vmatpush3.msk.msra.mxu1 %vm796_vm0, %v758_v1  ;;  %v655_v8 = vld [vmem:[%s10898_s2] sm:$0xff]  ;;  %v749_v9 = vld [vmem:[%s10906_s1 + $0x18] sm:$0xff]  ;;  %v755_v10 = vld [vmem:[%s10906_s1 + $0x48] sm:$0xff]  ;;  %s7610_s15 = smul.u32 1536, %s10477_s14  ;;  %s6964_s18 = sshll.u32 %s12967_s13, 4  ;;  %s13023_s18 = int_to_ptr.vmem [resolvable:$true] %s6964_s18 }
 0x1a5   : > { %8138 = vmatprep.mubr.msk.f32.mxu0 %vm759_vm1, %v746_v2  ;;  %8147 = vmatprep.mubr.msk.f32.mxu1 %vm759_vm1, %v752_v3  ;;  %v657_v11 = vld [vmem:[%s10898_s2 + $0x10] sm:$0xff]  ;;  %v750_v12 = vld [vmem:[%s10906_s1 + $0x20] sm:$0xff]  ;;  %v656_v14 = vld [vmem:[%s10898_s2 + $0x8] sm:$0xff]  ;;  %s13147_s22 = sld [smem:[#allocation43_spill]]  ;;  %s6951_s3 = scalar_lea.sflag [#allocation4], %s10891_s5 }
 0x1a6   : > { %8139 = vmatmul.mubr.msk.f32.vlgmr.msra.gmra.mrb[0].mxu0 %vm759_vm1, %v747_v4  ;;  %8148 = vmatmul.mubr.msk.f32.vlgmr.msra.gmra.mrb[0].mxu1 %vm759_vm1, %v753_v5  ;;  %v756_v13 = vld [vmem:[%s10906_s1 + $0x50] sm:$0xff]  ;;  %v658_v15 = vld [vmem:[%s10898_s2 + $0x18] sm:$0xff]  ;;  %v751_v16 = vld [vmem:[%s10906_s1 + $0x28] sm:$0xff]  ;;  %s10269_s20 = scalar_lea.vmem %s13023_s18, 1536  ;;  %p13148_p8 = scmp.ne.s32.totalorder %s13124_s21, 0 }
 0x1a7   : > { %8141 = vmatprep.mubr.msk.f32.mxu0 %vm759_vm1, %v748_v6  ;;  %8150 = vmatprep.mubr.msk.f32.mxu1 %vm759_vm1, %v754_v7  ;;  %v757_v17 = vld [vmem:[%s10906_s1 + $0x58] sm:$0xff]  ;;  %v659_v18 = vld [vmem:[%s10898_s2 + $0x20] sm:$0xff]  ;;  %v660_v19 = vld [vmem:[%s10898_s2 + $0x28] sm:$0xff]  ;;  %p10270_p10 = scmp.ne.s32.totalorder %s13023_s18, %s10269_s20  ;;  %s10383_s6 = smov [#allocation23]  }
 0x1a8   : > { %670 = vperm.xlu0 %9610, %v655_v8   ;;  %680 = vperm.xlu1 %9611, %v657_v11   ;;  %v661_v20 = vld [vmem:[%s10898_s2 + $0x30] sm:$0xff]  ;;  %v662_v21 = vld [vmem:[%s10898_s2 + $0x38] sm:$0xff]  ;;  %v663_v22 = vld [vmem:[%s10898_s2 + $0x40] sm:$0xff]  ;;  %s10273_s8 = sshll.u32 %s10383_s6, 4  ;;  %s10274_s8 = int_to_ptr.vmem [resolvable:$false] %s10273_s8 }
 0x1a9   : > { %v664_v23 = vld [vmem:[%s10898_s2 + $0x48] sm:$0xff]  ;;  %v665_v24 = vld [vmem:[%s10898_s2 + $0x50] sm:$0xff]  ;;  %v666_v25 = vld [vmem:[%s10898_s2 + $0x58] sm:$0xff]  ;;  %p10271_p12 = pnand %p10270_p10, %p13148_p8  ;;  %s10275_s23 = scalar_lea.vmem %s10274_s8, 3072 }
 0x1aa   : > { %8142 = vmatmul.mubr.msk.f32.gmra.mrb[2].mxu0 %vm759_vm1, %v749_v9  ;;  %8151 = vmatmul.mubr.msk.f32.gmra.mrb[2].mxu1 %vm759_vm1, %v755_v10  ;;  %v998_v26 = vld [vmem:[#allocation13 + $0x20] sm:$0xff]  ;;  %v999_v27 = vld [vmem:[#allocation13 + $0x28] sm:$0xff]  ;;  %v1000_v32 = vld [vmem:[#allocation13 + $0x30] sm:$0xff]  ;;  %p10276_p4 = scmp.lt.s32.totalorder %s13023_s18, %s10274_s8  ;;  %p10277_p1 = scmp.lt.s32.totalorder %s10275_s23, %s10269_s20 }
 0x1ab   : > { %8144 = vmatprep.mubr.msk.f32.mxu0 %vm759_vm1, %v750_v12  ;;  %8153 = vmatprep.mubr.msk.f32.mxu1 %vm759_vm1, %v756_v13  ;;  %v9020_v28 = vpack.c.bf16 %v999_v27, %v998_v26  ;;  %v993_v29 = vld [vmem:[#allocation13] sm:$0xff]  ;;  %v994_v30 = vld [vmem:[#allocation13 + $0x8] sm:$0xff]  ;;  %v1001_v33 = vld [vmem:[#allocation13 + $0x38] sm:$0xff]  ;;  %s13021_s14 = scalar_lea.hbm %s13147_s22, %s7610_s15  ;;  %p10272_p3 = pneg %p10271_p12 }
 0x1ac   : > { %675 = vperm.xlu0 %9610, %v656_v14   ;;  %685 = vperm.xlu1 %9611, %v658_v15   ;;  %v9012_v31 = vpack.c.bf16 %v994_v30, %v993_v29  ;;  %v995_v34 = vld [vmem:[#allocation13 + $0x10] sm:$0xff]  ;;  %v9024_v35 = vpack.c.bf16 %v1001_v33, %v1000_v32  ;;  %v996_v36 = vld [vmem:[#allocation13 + $0x18] sm:$0xff]  ;;  %v1003_v38 = vld [vmem:[#allocation13 + $0x40] sm:$0xff]  ;;  %p10278_p13 = por %p10277_p1, %p10276_p4 }
 0x1ad   : > { %9021 = vmatprep.subr.bf16.mxu0 %v9020_v28  ;;  %v9016_v37 = vpack.c.bf16 %v996_v36, %v995_v34  ;;  %v1004_v39 = vld [vmem:[#allocation13 + $0x48] sm:$0xff]  ;;  %v10975_v48 = vld [vmem:[#allocation7] ss:$0 sm:$0xff]  ;;  %v10979_v54 = vld [vmem:[#allocation10] ss:$0 sm:$0xff] }
 0x1ae   : > { %8145 = vmatmul.mubr.msk.f32.gmra.mrb[4].mxu0 %vm759_vm1, %v751_v16  ;;  %8154 = vmatmul.mubr.msk.f32.gmra.mrb[4].mxu1 %vm759_vm1, %v757_v17  ;;  %v10972_v40 = vpack.c.bf16 %v1004_v39, %v1003_v38  ;;  %v968_v5 = vld [vmem:[#allocation11] sm:$0xff]  ;;  %v969_v9 = vld [vmem:[#allocation11 + $0x8] sm:$0xff]  ;;  %v1006_v26 = vld [vmem:[#allocation13 + $0x58] sm:$0xff]  ;;  %p10279_p0 = pnand %p10278_p13, %p10272_p3 }
 0x1af   : > { %9023 = vmatpush3.bf16.msra.mxu0 %v9020_v28  ;;  %9013 = vmatprep.subr.bf16.mxu1 %v9012_v31  ;;  %v970_v30 = vld [vmem:[#allocation11 + $0x10] sm:$0xff]  ;;  %vm11110_vm4 = vmpackc.low %vm1442_vm3, %vm1442_vm3 }
 0x1b0   : > { %690 = vperm.xlu0 %9610, %v659_v18   ;;  %695 = vperm.xlu1 %9611, %v660_v19  }
 0x1b1   : > { %9015 = vmatpush3.bf16.msra.mxu1 %v9012_v31  ;;  %9025 = vmatprep.subr.bf16.mxu0 %v9024_v35 }
 0x1b2   : > { %9017 = vmatprep.subr.bf16.mxu1 %v9016_v37 }
 0x1b3   : > { %9027 = vmatpush3.bf16.msra.mxu0 %v9024_v35 }
 0x1b4   : > { %700 = vperm.xlu0 %9610, %v661_v20   ;;  %705 = vperm.xlu1 %9611, %v662_v21   ;;  %v971_v21 = vld [vmem:[#allocation11 + $0x18] sm:$0xff] }
 0x1b5   : > { %9019 = vmatpush3.bf16.msra.mxu1 %v9016_v37 }
 0x1b6   : > { %9029 = vmatprep.subr.bf16.mxu1 %v10972_v40 }
 0x1b8   : > { %710 = vperm.xlu0 %9610, %v663_v22   ;;  %715 = vperm.xlu1 %9611, %v664_v23  }
 0x1bc   : > { %720 = vperm.xlu0 %9610, %v665_v24   ;;  %725 = vperm.xlu1 %9611, %v666_v25   ;;  %v1005_v25 = vld [vmem:[#allocation13 + $0x50] sm:$0xff] }
 0x227   : > { %v671_v41 = vpop.permute.xlu0 %670  ;;  %v681_v43 = vpop.permute.xlu1 %680 }
 0x228   : > { %v734_v52 = vmul.f32 %v10975_v48, %v671_v41  ;;  %v736_v60 = vmul.f32 %v10975_v48, %v681_v43  ;;  %v9032_v41 = vpack.c.bf16 %v1006_v26, %v1005_v25 }
 0x22b   : > { %v676_v42 = vpop.permute.xlu0 %675  ;;  %v686_v45 = vpop.permute.xlu1 %685 }
 0x22c   : > { %v735_v49 = vmul.f32 %v10975_v48, %v676_v42  ;;  %v737_v56 = vmul.f32 %v10975_v48, %v686_v45 }
 0x22f   : > { %v691_v44 = vpop.permute.xlu0 %690  ;;  %v696_v47 = vpop.permute.xlu1 %695 }
 0x230   : > { %v738_v14 = vmul.f32 %v10975_v48, %v691_v44  ;;  %v739_v15 = vmul.f32 %v10975_v48, %v696_v47 }
 0x233   : > { %v701_v46 = vpop.permute.xlu0 %700  ;;  %v706_v51 = vpop.permute.xlu1 %705 }
 0x234   : > { %v740_v63 = vmul.f32 %v10975_v48, %v701_v46  ;;  %v741_v3 = vmul.f32 %v10975_v48, %v706_v51 }
 0x237   : > { %v711_v50 = vpop.permute.xlu0 %710  ;;  %v716_v10 = vpop.permute.xlu1 %715 }
 0x238   : > { %v742_v18 = vmul.f32 %v10975_v48, %v711_v50  ;;  %v743_v19 = vmul.f32 %v10975_v48, %v716_v10  ;;  %v972_v50 = vld [vmem:[#allocation11 + $0x20] sm:$0xff] }
 0x23b   : > { %v721_v16 = vpop.permute.xlu0 %720  ;;  %v726_v43 = vpop.permute.xlu1 %725 }
 0x23c   : > { %v744_v42 = vmul.f32 %v10975_v48, %v721_v16 }
 0x279   : > { %v8140_v53 = vpop.f32.mrb[0].mxu0  ;;  %v8149_v55 = vpop.f32.mrb[0].mxu1 }
 0x27a   : > { %v926_v57 = vadd.f32 %v8140_v53, %v735_v49  ;;  %v866_v58 = vpop.f32.mrb[1].mxu0  ;;  %v896_v59 = vpop.f32.mrb[1].mxu1  ;;  %v932_v28 = vadd.f32 %v8149_v55, %v741_v3  ;;  %v973_v53 = vld [vmem:[#allocation11 + $0x28] sm:$0xff] }
 0x27b   : > { %v925_v61 = vadd.f32 %v866_v58, %v734_v52  ;;  %v931_v12 = vadd.f32 %v896_v59, %v740_v63  ;;  %v745_v58 = vmul.f32 %v10975_v48, %v726_v43  ;;  %v975_v63 = vld [vmem:[#allocation11 + $0x38] sm:$0xff] }
 0x27c   : > { %v945_v62 = vadd.f32 %v10979_v54, %v926_v57  ;;  %v951_v46 = vadd.f32 %v10979_v54, %v932_v28  ;;  %v974_v57 = vld [vmem:[#allocation11 + $0x30] sm:$0xff] }
 0x27d   : > { %v944_v0 = vadd.f32 %v10979_v54, %v925_v61  ;;  %v8143_v1 = vpop.f32.mrb[2].mxu0  ;;  %v8152_v2 = vpop.f32.mrb[2].mxu1  ;;  %v950_v34 = vadd.f32 %v10979_v54, %v931_v12 }
 0x27e   : > { %v957_v4 = vmul.f32 5.656854, %v945_v62  ;;  %v928_v6 = vadd.f32 %v8143_v1, %v737_v56  ;;  %v876_v7 = vpop.f32.mrb[3].mxu0  ;;  %v906_v8 = vpop.f32.mrb[3].mxu1  ;;  %v934_v47 = vadd.f32 %v8152_v2, %v743_v19  ;;  %v963_v59 = vmul.f32 5.656854, %v951_v46 }
 0x27f   : > { %v956_v11 = vmul.f32 5.656854, %v944_v0  ;;  %v927_v13 = vadd.f32 %v876_v7, %v736_v60  ;;  %v933_v36 = vadd.f32 %v906_v8, %v742_v18  ;;  %v962_v51 = vmul.f32 5.656854, %v950_v34  ;;  %v976_v2 = vld [vmem:[#allocation11 + $0x40] sm:$0xff] }
 0x280   : > { %v947_v17 = vadd.f32 %v10979_v54, %v928_v6  ;;  %v10995_v27 = vadd.f32 %v969_v9, %v957_v4  ;;  %v953_v60 = vadd.f32 %v10979_v54, %v934_v47  ;;  %v11043_v3 = vadd.f32 %v975_v63, %v963_v59  ;;  %v977_v6 = vld [vmem:[#allocation11 + $0x48] sm:$0xff]  ;;  %v978_v9 = vld [vmem:[#allocation11 + $0x50] sm:$0xff] }
 0x281   : > { %v10992_v20 = vadd.f32 %v968_v5, %v956_v11  ;;  %v946_v22 = vadd.f32 %v10979_v54, %v927_v13  ;;  %v8146_v23 = vpop.f32.mrb[4].mxu0  ;;  %v8155_v24 = vpop.f32.mrb[4].mxu1  ;;  %v952_v52 = vadd.f32 %v10979_v54, %v933_v36  ;;  %v11030_v0 = vadd.f32 %v974_v57, %v962_v51  ;;  %v979_v11 = vld [vmem:[#allocation11 + $0x58] sm:$0xff] }
 0x282   : > { %v959_v29 = vmul.f32 5.656854, %v947_v17  ;;  %v930_v31 = vadd.f32 %v8146_v23, %v739_v15  ;;  %v886_v32 = vpop.f32.mrb[5].mxu0  ;;  %v916_v33 = vpop.f32.mrb[5].mxu1  ;;  %v936_v62 = vadd.f32 %v8155_v24, %v745_v58  ;;  %v965_v4 = vmul.f32 5.656854, %v953_v60 }
 0x283   : > { %v958_v35 = vmul.f32 5.656854, %v946_v22  ;;  %v929_v37 = vadd.f32 %v886_v32, %v738_v14  ;;  %8164 = vmatprep.mubr.msk.f32.mxu1 %vm1018_vm2, %v10992_v20  ;;  %8190 = vmatprep.mubr.msk.f32.mxu0 %vm1018_vm2, %v10992_v20  ;;  %v935_v56 = vadd.f32 %v916_v33, %v744_v42  ;;  %v964_v48 = vmul.f32 5.656854, %v952_v52  ;;  %v11100_v14 = vld [vmem:[#allocation14] ss:$0 sm:$0xff] }
 0x284   : > { %v11002_v38 = vadd.f32 %v971_v21, %v959_v29  ;;  %v949_v39 = vadd.f32 %v10979_v54, %v930_v31  ;;  %8165 = vmatmul.mubr.msk.f32.vlgmr.msra.gmra.mrb[6].mxu1 %vm1018_vm2, %v10995_v27  ;;  %8191 = vmatmul.mubr.msk.f32.vlgmr.msra.gmra.mrb[6].mxu0 %vm1018_vm2, %v10995_v27  ;;  %v955_v5 = vadd.f32 %v10979_v54, %v936_v62  ;;  %v7220_v15 = vld [vmem:[#allocation14 + $0x1] ss:$0 sm:$0xff] }
 0x285   : > { %v11008_v44 = vadd.f32 %v970_v30, %v958_v35  ;;  %v948_v45 = vadd.f32 %v10979_v54, %v929_v37  ;;  %9031 = vmatpush3.bf16.msra.mxu1 %v10972_v40  ;;  %v954_v1 = vadd.f32 %v10979_v54, %v935_v56  ;;  %v11048_v7 = vadd.f32 %v976_v2, %v964_v48 }
 0x286   : > { %v961_v49 = vmul.f32 5.656854, %v949_v39  ;;  %9033 = vmatprep.subr.bf16.mxu1 %v9032_v41  ;;  %v11056_v10 = vadd.f32 %v977_v6, %v965_v4  ;;  %v967_v54 = vmul.f32 5.656854, %v955_v5 }
 0x287   : > { %v960_v55 = vmul.f32 5.656854, %v948_v45  ;;  %8167 = vmatprep.mubr.msk.f32.mxu1 %vm1018_vm2, %v11008_v44  ;;  %8193 = vmatprep.mubr.msk.f32.mxu0 %vm1018_vm2, %v11008_v44  ;;  %v966_v8 = vmul.f32 5.656854, %v954_v1 }
 0x288   : > { %8168 = vmatmul.mubr.msk.f32.gmra.mrb[8].mxu1 %vm1018_vm2, %v11002_v38  ;;  %8194 = vmatmul.mubr.msk.f32.gmra.mrb[8].mxu0 %vm1018_vm2, %v11002_v38  ;;  %v11028_v61 = vadd.f32 %v973_v53, %v961_v49  ;;  %v11068_v13 = vadd.f32 %v979_v11, %v967_v54 }
 0x289   : > { %v11023_v40 = vadd.f32 %v972_v50, %v960_v55  ;;  %9035 = vmatpush3.bf16.msra.mxu1 %v9032_v41  ;;  %v11060_v12 = vadd.f32 %v978_v9, %v966_v8  ;;  %v7233_v8 = vld [vmem:[#allocation14 + $0x2] ss:$0 sm:$0xff] }
 0x28b   : > { %8170 = vmatprep.mubr.msk.f32.mxu1 %vm1018_vm2, %v11023_v40  ;;  %8196 = vmatprep.mubr.msk.f32.mxu0 %vm1018_vm2, %v11023_v40 }
 0x28c   : > { %8171 = vmatmul.mubr.msk.f32.gmra.mrb[10].mxu1 %vm1018_vm2, %v11028_v61  ;;  %8197 = vmatmul.mubr.msk.f32.gmra.mrb[10].mxu0 %vm1018_vm2, %v11028_v61 }
 0x28d   : > { %8173 = vmatprep.mubr.msk.f32.mxu1 %vm1018_vm2, %v11030_v0  ;;  %8199 = vmatprep.mubr.msk.f32.mxu0 %vm1018_vm2, %v11030_v0 }
 0x290   : > { %8174 = vmatmul.mubr.msk.f32.gmra.mrb[12].mxu1 %vm1018_vm2, %v11043_v3  ;;  %8200 = vmatmul.mubr.msk.f32.gmra.mrb[12].mxu0 %vm1018_vm2, %v11043_v3 }
 0x291   : > { %8176 = vmatprep.mubr.msk.f32.mxu1 %vm1018_vm2, %v11048_v7  ;;  %8202 = vmatprep.mubr.msk.f32.mxu0 %vm1018_vm2, %v11048_v7 }
 0x294   : > { %8177 = vmatmul.mubr.msk.f32.gmra.mrb[14].mxu1 %vm1018_vm2, %v11056_v10  ;;  %8203 = vmatmul.mubr.msk.f32.gmra.mrb[14].mxu0 %vm1018_vm2, %v11056_v10 }
 0x295   : > { %8179 = vmatprep.mubr.msk.f32.mxu1 %vm1018_vm2, %v11060_v12  ;;  %8205 = vmatprep.mubr.msk.f32.mxu0 %vm1018_vm2, %v11060_v12 }
 0x298   : > { %8180 = vmatmul.mubr.msk.f32.gmra.mrb[16].mxu1 %vm1018_vm2, %v11068_v13  ;;  %8206 = vmatmul.mubr.msk.f32.gmra.mrb[16].mxu0 %vm1018_vm2, %v11068_v13 }
 0x299   : > { %8216 = vmatprep.mubr.msk.f32.mxu1 %vm1018_vm2, %v10992_v20 }
 0x29c   : > { %8217 = vmatmul.mubr.msk.f32.vlgmr.msra.gmra.mrb[18].mxu1 %vm1018_vm2, %v10995_v27 }
 0x29d   : > { %8219 = vmatprep.mubr.msk.f32.mxu1 %vm1018_vm2, %v11008_v44 }
 0x2a0   : > { %8220 = vmatmul.mubr.msk.f32.gmra.mrb[20].mxu1 %vm1018_vm2, %v11002_v38 }
 0x2a1   : > { %8222 = vmatprep.mubr.msk.f32.mxu1 %vm1018_vm2, %v11023_v40 }
 0x2a4   : > { %8223 = vmatmul.mubr.msk.f32.gmra.mrb[22].mxu1 %vm1018_vm2, %v11028_v61 }
 0x2a5   : > { %8225 = vmatprep.mubr.msk.f32.mxu1 %vm1018_vm2, %v11030_v0 }
 0x2a8   : > { %8226 = vmatmul.mubr.msk.f32.gmra.mrb[24].mxu1 %vm1018_vm2, %v11043_v3 }
 0x2a9   : > { %8228 = vmatprep.mubr.msk.f32.mxu1 %vm1018_vm2, %v11048_v7 }
 0x2ac   : > { %8229 = vmatmul.mubr.msk.f32.gmra.mrb[26].mxu1 %vm1018_vm2, %v11056_v10 }
 0x2ad   : > { %8231 = vmatprep.mubr.msk.f32.mxu1 %vm1018_vm2, %v11060_v12 }
 0x2b0   : > { %8232 = vmatmul.mubr.msk.f32.gmra.mrb[28].mxu1 %vm1018_vm2, %v11068_v13 }
 0x357   : > { %v11102_v16 = vpop.f32.mrb[6].mxu1  ;;  %v8192_v17 = vpop.f32.mrb[6].mxu0 }
 0x358   : > { %v1121_v18 = vpop.f32.mrb[7].mxu1  ;;  %v1258_v19 = vadd.f32 %v8192_v17, %v7220_v15  ;;  %v1252_v22 = vpop.f32.mrb[7].mxu0 }
 0x359   : > { %v1122_v21 = vadd.f32 %v11100_v14, %v1121_v18  ;;  %v1253_v23 = vadd.f32 %v7220_v15, %v1252_v22 }
 0x35b   : > { %v11105_v24 = vpop.f32.mrb[8].mxu1  ;;  %8258 = vmatprep.mubr.msk.f32.mxu0 %vm1442_vm3, %v1122_v21  ;;  %v9036_v26 = vpack.c.bf16 %v1258_v19, %v1253_v23  ;;  %v8195_v28 = vpop.f32.mrb[8].mxu0 }
 0x35c   : > { %v11114_v29 = vpop.f32.mrb[9].mxu1  ;;  %v1268_v30 = vadd.f32 %v8195_v28, %v7220_v15  ;;  %v1262_v31 = vpop.f32.mrb[9].mxu0 }
 0x35d   : > { %v1263_v32 = vadd.f32 %v7220_v15, %v1262_v31  ;;  %9038 = vmatprep.subr.msk.bf16.mxu0 %vm11110_vm4, %v9036_v26 }
 0x35e   : > { %9041 = vmatpush3.bf16.xpose.msk.msra.mxu0 %vm11110_vm4, %v9036_v26 }
 0x35f   : > { %v11120_v33 = vpop.f32.mrb[10].mxu1  ;;  %v9042_v34 = vpack.c.bf16 %v1268_v30, %v1263_v32  ;;  %v8198_v35 = vpop.f32.mrb[10].mxu0 }
 0x360   : > { %v11122_v36 = vpop.f32.mrb[11].mxu1  ;;  %v1278_v37 = vadd.f32 %v8198_v35, %v7220_v15  ;;  %v1272_v39 = vpop.f32.mrb[11].mxu0 }
 0x361   : > { %v1273_v41 = vadd.f32 %v7220_v15, %v1272_v39  ;;  %9044 = vmatprep.subr.msk.bf16.mxu0 %vm11110_vm4, %v9042_v34 }
 0x363   : > { %v11126_v42 = vpop.f32.mrb[12].mxu1  ;;  %v9048_v43 = vpack.c.bf16 %v1278_v37, %v1273_v41  ;;  %v8201_v45 = vpop.f32.mrb[12].mxu0 }
 0x364   : > { %v11128_v46 = vpop.f32.mrb[13].mxu1  ;;  %v1288_v47 = vadd.f32 %v8201_v45, %v7220_v15  ;;  %v1282_v49 = vpop.f32.mrb[13].mxu0 }
 0x365   : > { %v1283_v50 = vadd.f32 %v7220_v15, %v1282_v49 }
 0x366   : > { %9047 = vmatpush3.bf16.xpose.msk.msra.mxu0 %vm11110_vm4, %v9042_v34 }
 0x367   : > { %v8178_v51 = vpop.f32.mrb[14].mxu1  ;;  %v9054_v52 = vpack.c.bf16 %v1288_v47, %v1283_v50  ;;  %v8204_v55 = vpop.f32.mrb[14].mxu0  ;;  %9050 = vmatprep.subr.msk.bf16.mxu0 %vm11110_vm4, %v9048_v43 }
 0x368   : > { %v11133_v53 = vadd.f32 %v8178_v51, %v11100_v14  ;;  %v1161_v56 = vpop.f32.mrb[15].mxu1  ;;  %v1298_v57 = vadd.f32 %v8204_v55, %v7220_v15  ;;  %v1292_v59 = vpop.f32.mrb[15].mxu0  ;;  %v1955_v55 = vld [vmem:[#allocation13 + $0x88] sm:$0xff] }
 0x369   : > { %v11138_v58 = vadd.f32 %v11100_v14, %v1161_v56  ;;  %v1293_v60 = vadd.f32 %v7220_v15, %v1292_v59 }
 0x36b   : > { %v8181_v62 = vpop.f32.mrb[16].mxu1  ;;  %v9060_v63 = vpack.c.bf16 %v1298_v57, %v1293_v60  ;;  %v8207_v1 = vpop.f32.mrb[16].mxu0 }
 0x36c   : > { %v11141_v48 = vadd.f32 %v8181_v62, %v11100_v14  ;;  %v1171_v2 = vpop.f32.mrb[17].mxu1  ;;  %v1308_v4 = vadd.f32 %v8207_v1, %v7220_v15  ;;  %v1302_v6 = vpop.f32.mrb[17].mxu0 }
 0x36d   : > { %v11144_v5 = vadd.f32 %v11100_v14, %v1171_v2  ;;  %v1303_v9 = vadd.f32 %v7220_v15, %v1302_v6  ;;  %v1956_v2 = vld [vmem:[#allocation13 + $0x90] sm:$0xff]  ;;  %v1127_v6 = vadd.f32 %v11102_v16, %v11100_v14  ;;  %v1147_v16 = vadd.f32 %v11120_v33, %v11100_v14 }
 0x36e   : > { %9053 = vmatpush3.bf16.xpose.msk.msra.mxu0 %vm11110_vm4, %v9048_v43 }
 0x36f   : > { %v8218_v54 = vpop.f32.mrb[18].mxu1  ;;  %v9066_v11 = vpack.c.bf16 %v1308_v4, %v1303_v9  ;;  %9056 = vmatprep.subr.msk.bf16.mxu0 %vm11110_vm4, %v9054_v52  ;;  %v1957_v4 = vld [vmem:[#allocation13 + $0x98] sm:$0xff] }
 0x370   : > { %v1389_v17 = vadd.f32 %v8218_v54, %v7233_v8  ;;  %v1383_v18 = vpop.f32.mrb[19].mxu1  ;;  %v9108_v9 = vpack.c.bf16 %v1957_v4, %v1956_v2  ;;  %v1132_v54 = vadd.f32 %v11100_v14, %v11114_v29  ;;  %v1152_v29 = vadd.f32 %v11100_v14, %v11128_v46 }
 0x371   : > { %v1384_v19 = vadd.f32 %v7233_v8, %v1383_v18 }
 0x373   : > { %v9072_v21 = vpack.c.bf16 %v1389_v17, %v1384_v19  ;;  %v8221_v22 = vpop.f32.mrb[20].mxu1 }
 0x374   : > { %v1399_v23 = vadd.f32 %v8221_v22, %v7233_v8  ;;  %v1393_v26 = vpop.f32.mrb[21].mxu1 }
 0x375   : > { %v1394_v28 = vadd.f32 %v7233_v8, %v1393_v26  ;;  %9073 = vmatprep.subr.bf16.mxu1 %v9072_v21 }
 0x376   : > { %9075 = vmatpush3.bf16.msra.mxu1 %v9072_v21  ;;  %9059 = vmatpush3.bf16.xpose.msk.msra.mxu0 %vm11110_vm4, %v9054_v52  ;;  %v1954_v52 = vld [vmem:[#allocation13 + $0x80] sm:$0xff] }
 0x377   : > { %v9076_v30 = vpack.c.bf16 %v1399_v23, %v1394_v28  ;;  %v8224_v15 = vpop.f32.mrb[22].mxu1  ;;  %9062 = vmatprep.subr.msk.bf16.mxu0 %vm11110_vm4, %v9060_v63  ;;  %v9104_v62 = vpack.c.bf16 %v1955_v55, %v1954_v52  ;;  %v7295_v52 = vld [vmem:[#allocation14 + $0x4] ss:$0 sm:$0xff] }
 0x378   : > { %v1409_v31 = vadd.f32 %v8224_v15, %v7233_v8  ;;  %v1403_v32 = vpop.f32.mrb[23].mxu1 }
 0x379   : > { %v1404_v34 = vadd.f32 %v7233_v8, %v1403_v32  ;;  %9077 = vmatprep.subr.bf16.mxu1 %v9076_v30 }
 0x37a   : > { %9079 = vmatpush3.bf16.msra.mxu1 %v9076_v30 }
 0x37b   : > { %v9080_v35 = vpack.c.bf16 %v1409_v31, %v1404_v34  ;;  %v8227_v37 = vpop.f32.mrb[24].mxu1 }
 0x37c   : > { %v1419_v39 = vadd.f32 %v8227_v37, %v7233_v8  ;;  %v1413_v41 = vpop.f32.mrb[25].mxu1 }
 0x37d   : > { %v1414_v43 = vadd.f32 %v7233_v8, %v1413_v41  ;;  %9081 = vmatprep.subr.bf16.mxu1 %v9080_v35 }
 0x37e   : > { %9083 = vmatpush3.bf16.msra.mxu1 %v9080_v35  ;;  %9065 = vmatpush3.bf16.xpose.msk.msra.mxu0 %vm11110_vm4, %v9060_v63 }
 0x37f   : > { %v9084_v45 = vpack.c.bf16 %v1419_v39, %v1414_v43  ;;  %v8230_v47 = vpop.f32.mrb[26].mxu1  ;;  %9068 = vmatprep.subr.msk.bf16.mxu0 %vm11110_vm4, %v9066_v11 }
 0x380   : > { %v1429_v49 = vadd.f32 %v8230_v47, %v7233_v8  ;;  %v1423_v50 = vpop.f32.mrb[27].mxu1 }
 0x381   : > { %v1424_v51 = vadd.f32 %v7233_v8, %v1423_v50  ;;  %9085 = vmatprep.subr.bf16.mxu1 %v9084_v45 }
 0x382   : > { %9087 = vmatpush3.bf16.msra.mxu1 %v9084_v45 }
 0x383   : > { %v9088_v56 = vpack.c.bf16 %v1429_v49, %v1424_v51  ;;  %v8233_v57 = vpop.f32.mrb[28].mxu1 }
 0x384   : > { %v1439_v59 = vadd.f32 %v8233_v57, %v7233_v8  ;;  %v1433_v60 = vpop.f32.mrb[29].mxu1 }
 0x385   : > { %v1434_v1 = vadd.f32 %v7233_v8, %v1433_v60  ;;  %9089 = vmatprep.subr.bf16.mxu1 %v9088_v56  ;;  %v1137_v8 = vadd.f32 %v11105_v24, %v11100_v14  ;;  %v1157_v24 = vadd.f32 %v11126_v42, %v11100_v14 }
 0x386   : > { %9091 = vmatpush3.bf16.msra.mxu1 %v9088_v56  ;;  %9071 = vmatpush3.bf16.xpose.msk.msra.mxu0 %vm11110_vm4, %v9066_v11  ;;  %v1142_v11 = vadd.f32 %v11100_v14, %v11122_v36 }
 0x387   : > { %v9092_v63 = vpack.c.bf16 %v1439_v59, %v1434_v1  ;;  %9105 = vmatprep.subr.bf16.mxu0 %v9104_v62 }
 0x389   : > { %9093 = vmatprep.subr.bf16.mxu1 %v9092_v63 }
 0x38a   : > { %9095 = vmatpush3.bf16.msra.mxu1 %v9092_v63 }
 0x38d   : > { %8259 = vmatmul.mubr.msk.f32.vlgmr.msra.gmra.mrb[18].mxu0 %vm1442_vm3, %v1127_v6 }
 0x38e   : > { %8261 = vmatprep.mubr.msk.f32.mxu0 %vm1442_vm3, %v1132_v54  ;;  %9107 = vmatpush3.bf16.msra.mxu0 %v9104_v62 }
 0x38f   : > { %9109 = vmatprep.subr.bf16.mxu0 %v9108_v9 }
 0x391   : > { %8262 = vmatmul.mubr.msk.f32.gmra.mrb[20].mxu0 %vm1442_vm3, %v1137_v8 }
 0x392   : > { %8264 = vmatprep.mubr.msk.f32.mxu0 %vm1442_vm3, %v1142_v11  ;;  %9111 = vmatpush3.bf16.msra.mxu0 %v9108_v9 }
 0x395   : > { %8265 = vmatmul.mubr.msk.f32.gmra.mrb[22].mxu0 %vm1442_vm3, %v1147_v16 }
 0x396   : > { %8267 = vmatprep.mubr.msk.f32.mxu0 %vm1442_vm3, %v1152_v29 }
 0x399   : > { %8268 = vmatmul.mubr.msk.f32.gmra.mrb[24].mxu0 %vm1442_vm3, %v1157_v24 }
 0x39a   : > { %8270 = vmatprep.mubr.msk.f32.mxu0 %vm1442_vm3, %v11138_v58 }
 0x39d   : > { %8271 = vmatmul.mubr.msk.f32.gmra.mrb[26].mxu0 %vm1442_vm3, %v11133_v53 }
 0x39e   : > { %8273 = vmatprep.mubr.msk.f32.mxu0 %vm1442_vm3, %v11144_v5 }
 0x3a1   : > { %8274 = vmatmul.mubr.msk.f32.gmra.mrb[28].mxu0 %vm1442_vm3, %v11141_v48 }
 0x3a2   : > { %8352 = vmatprep.mubr.msk.f32.mxu0 %vm1018_vm2, %v10992_v20 }
 0x3a5   : > { %8353 = vmatmul.mubr.msk.f32.vlgmr.msra.gmra.mrb[30].mxu0 %vm1018_vm2, %v10995_v27 }
 0x3a6   : > { %8355 = vmatprep.mubr.msk.f32.mxu0 %vm1018_vm2, %v11008_v44 }
 0x3a9   : > { %8356 = vmatmul.mubr.msk.f32.gmra.mrb[32].mxu0 %vm1018_vm2, %v11002_v38 }
 0x3aa   : > { %8358 = vmatprep.mubr.msk.f32.mxu0 %vm1018_vm2, %v11023_v40 }
 0x3ad   : > { %8359 = vmatmul.mubr.msk.f32.gmra.mrb[34].mxu0 %vm1018_vm2, %v11028_v61 }
 0x3ae   : > { %8361 = vmatprep.mubr.msk.f32.mxu0 %vm1018_vm2, %v11030_v0 }
 0x3b1   : > { %8362 = vmatmul.mubr.msk.f32.gmra.mrb[36].mxu0 %vm1018_vm2, %v11043_v3 }
 0x3b2   : > { %8364 = vmatprep.mubr.msk.f32.mxu0 %vm1018_vm2, %v11048_v7 }
 0x3b5   : > { %8365 = vmatmul.mubr.msk.f32.gmra.mrb[38].mxu0 %vm1018_vm2, %v11056_v10 }
 0x3b6   : > { %8367 = vmatprep.mubr.msk.f32.mxu0 %vm1018_vm2, %v11060_v12 }
 0x3b9   : > { %8368 = vmatmul.mubr.msk.f32.gmra.mrb[40].mxu0 %vm1018_vm2, %v11068_v13 }
 0x460   : > { %v8260_v14 = vpop.f32.mrb[18].mxu0 }
 0x461   : > { %v11213_v33 = vmul.f32 0.25, %v8260_v14  ;;  %v1581_v36 = vpop.f32.mrb[19].mxu0 }
 0x462   : > { %v11215_v42 = vmul.f32 0.25, %v1581_v36 }
 0x463   : > { %v1656_v46 = vsel %vm1652_vm5, %v11213_v33, -inf }
 0x464   : > { %1657 = vmax.xlane.f32.xlu1 %v1656_v46  ;;  %v8263_v53 = vpop.f32.mrb[20].mxu0  ;;  %v1653_v58 = vsel %vm1652_vm5, %v11215_v42, -inf }
 0x465   : > { %1654 = vmax.xlane.f32.xlu0 %v1653_v58  ;;  %v1591_v48 = vpop.f32.mrb[21].mxu0  ;;  %v11223_v17 = vmul.f32 0.25, %v8263_v53 }
 0x466   : > { %v11221_v5 = vmul.f32 0.25, %v1591_v48 }
 0x467   : > { %v1662_v28 = vsel %vm1652_vm5, %v11223_v17, -inf }
 0x468   : > { %v8266_v18 = vpop.f32.mrb[22].mxu0  ;;  %v1659_v19 = vsel %vm1652_vm5, %v11221_v5, -inf }
 0x469   : > { %1660 = vmax.xlane.f32.xlu0 %v1659_v19  ;;  %v1601_v21 = vpop.f32.mrb[23].mxu0  ;;  %v11229_v23 = vmul.f32 0.25, %v8266_v18 }
 0x46a   : > { %v11227_v22 = vmul.f32 0.25, %v1601_v21 }
 0x46b   : > { %v1668_v35 = vsel %vm1652_vm5, %v11229_v23, -inf }
 0x46c   : > { %v8269_v26 = vpop.f32.mrb[24].mxu0  ;;  %v1665_v30 = vsel %vm1652_vm5, %v11227_v22, -inf }
 0x46d   : > { %1663 = vmax.xlane.f32.xlu0 %v1662_v28  ;;  %1666 = vmax.xlane.f32.xlu1 %v1665_v30  ;;  %v1611_v15 = vpop.f32.mrb[25].mxu0  ;;  %v11237_v32 = vmul.f32 0.25, %v8269_v26 }
 0x46e   : > { %v11235_v31 = vmul.f32 0.25, %v1611_v15 }
 0x46f   : > { %v1674_v47 = vsel %vm1652_vm5, %v11237_v32, -inf }
 0x470   : > { %v8272_v34 = vpop.f32.mrb[26].mxu0  ;;  %v1671_v37 = vsel %vm1652_vm5, %v11235_v31, -inf }
 0x471   : > { %1669 = vmax.xlane.f32.xlu0 %v1668_v35  ;;  %1672 = vmax.xlane.f32.xlu1 %v1671_v37  ;;  %v1621_v39 = vpop.f32.mrb[27].mxu0  ;;  %v11245_v43 = vmul.f32 0.25, %v8272_v34 }
 0x472   : > { %v11243_v41 = vmul.f32 0.25, %v1621_v39 }
 0x473   : > { %v1680_v57 = vsel %vm1652_vm5, %v11245_v43, -inf }
 0x474   : > { %v8275_v45 = vpop.f32.mrb[28].mxu0  ;;  %v1677_v49 = vsel %vm1652_vm5, %v11243_v41, -inf }
 0x475   : > { %1675 = vmax.xlane.f32.xlu0 %v1674_v47  ;;  %1678 = vmax.xlane.f32.xlu1 %v1677_v49  ;;  %v1631_v50 = vpop.f32.mrb[29].mxu0  ;;  %v11253_v55 = vmul.f32 0.25, %v8275_v45 }
 0x476   : > { %v11251_v51 = vmul.f32 0.25, %v1631_v50 }
 0x477   : > { %v1686_v4 = vsel %vm1652_vm5, %v11253_v55, -inf }
 0x478   : > { %v8354_v56 = vpop.f32.mrb[30].mxu0  ;;  %v1683_v59 = vsel %vm1652_vm5, %v11251_v51, -inf }
 0x479   : > { %v2178_v60 = vadd.f32 %v8354_v56, %v7295_v52  ;;  %1681 = vmax.xlane.f32.xlu0 %v1680_v57  ;;  %v2172_v62 = vpop.f32.mrb[31].mxu0  ;;  %1684 = vmax.xlane.f32.xlu1 %v1683_v59 }
 0x47a   : > { %v2173_v1 = vadd.f32 %v7295_v52, %v2172_v62 }
 0x47c   : > { %v9120_v63 = vpack.c.bf16 %v2178_v60, %v2173_v1  ;;  %v8357_v2 = vpop.f32.mrb[32].mxu0 }
 0x47d   : > { %v2188_v6 = vadd.f32 %v8357_v2, %v7295_v52  ;;  %1687 = vmax.xlane.f32.xlu0 %v1686_v4  ;;  %v2182_v9 = vpop.f32.mrb[33].mxu0 }
 0x47e   : > { %v2183_v54 = vadd.f32 %v7295_v52, %v2182_v9  ;;  %9122 = vmatprep.subr.msk.bf16.mxu0 %vm11110_vm4, %v9120_v63 }
 0x47f   : > { %9125 = vmatpush3.bf16.xpose.msk.msra.mxu0 %vm11110_vm4, %v9120_v63 }
 0x480   : > { %v9126_v8 = vpack.c.bf16 %v2188_v6, %v2183_v54  ;;  %v8360_v11 = vpop.f32.mrb[34].mxu0 }
 0x481   : > { %v2198_v16 = vadd.f32 %v8360_v11, %v7295_v52  ;;  %v2192_v29 = vpop.f32.mrb[35].mxu0 }
 0x482   : > { %v2193_v24 = vadd.f32 %v7295_v52, %v2192_v29  ;;  %9128 = vmatprep.subr.msk.bf16.mxu0 %vm11110_vm4, %v9126_v8 }
 0x484   : > { %v9132_v14 = vpack.c.bf16 %v2198_v16, %v2193_v24  ;;  %v8363_v36 = vpop.f32.mrb[36].mxu0 }
 0x485   : > { %v2208_v46 = vadd.f32 %v8363_v36, %v7295_v52  ;;  %v2202_v53 = vpop.f32.mrb[37].mxu0 }
 0x486   : > { %v2203_v58 = vadd.f32 %v7295_v52, %v2202_v53 }
 0x487   : > { %9131 = vmatpush3.bf16.xpose.msk.msra.mxu0 %vm11110_vm4, %v9126_v8 }
 0x488   : > { %v9138_v48 = vpack.c.bf16 %v2208_v46, %v2203_v58  ;;  %v8366_v18 = vpop.f32.mrb[38].mxu0  ;;  %9134 = vmatprep.subr.msk.bf16.mxu0 %vm11110_vm4, %v9132_v14 }
 0x489   : > { %v2218_v19 = vadd.f32 %v8366_v18, %v7295_v52  ;;  %v2212_v21 = vpop.f32.mrb[39].mxu0 }
 0x48a   : > { %v2213_v26 = vadd.f32 %v7295_v52, %v2212_v21 }
 0x48c   : > { %v9144_v28 = vpack.c.bf16 %v2218_v19, %v2213_v26  ;;  %v8369_v30 = vpop.f32.mrb[40].mxu0 }
 0x48d   : > { %v2228_v15 = vadd.f32 %v8369_v30, %v7295_v52  ;;  %v2222_v34 = vpop.f32.mrb[41].mxu0 }
 0x48e   : > { %v2223_v35 = vadd.f32 %v7295_v52, %v2222_v34 }
 0x48f   : > { %9137 = vmatpush3.bf16.xpose.msk.msra.mxu0 %vm11110_vm4, %v9132_v14 }
 0x490   : > { %v9150_v37 = vpack.c.bf16 %v2228_v15, %v2223_v35  ;;  %9140 = vmatprep.subr.msk.bf16.mxu0 %vm11110_vm4, %v9138_v48 }
 0x497   : > { %9143 = vmatpush3.bf16.xpose.msk.msra.mxu0 %vm11110_vm4, %v9138_v48 }
 0x498   : > { %9146 = vmatprep.subr.msk.bf16.mxu0 %vm11110_vm4, %v9144_v28 }
 0x49f   : > { %9149 = vmatpush3.bf16.xpose.msk.msra.mxu0 %vm11110_vm4, %v9144_v28 }
 0x4a0   : > { %9152 = vmatprep.subr.msk.bf16.mxu0 %vm11110_vm4, %v9150_v37 }
 0x4a7   : > { %9155 = vmatpush3.bf16.xpose.msk.msra.mxu0 %vm11110_vm4, %v9150_v37 }
 0x4f1   : > { %v1658_v39 = vpop.xlane.xlu1 %1657 }
 0x4f2   : > { %v1690_v45 = vsub.f32 %v11213_v33, %v1658_v39  ;;  %v1655_v47 = vpop.xlane.xlu0 %1654 }
 0x4f3   : > { %v1689_v49 = vsub.f32 %v11215_v42, %v1655_v47 }
 0x4f4   : > { %v1703_v50 = vmul.f32 1.442695, %v1690_v45 }
 0x4f5   : > { %v1701_v52 = vmul.f32 1.442695, %v1689_v49 }
 0x4f6   : > { %9612 = vpow2.f32 %v1703_v50  ;;  %v1661_v56 = vpop.xlane.xlu0 %1660 }
 0x4f7   : > { %9614 = vpow2.f32 %v1701_v52  ;;  %v1691_v57 = vsub.f32 %v11221_v5, %v1661_v56 }
 0x4f9   : > { %v1705_v59 = vmul.f32 1.442695, %v1691_v57 }
 0x4fa   : > { %v1664_v60 = vpop.xlane.xlu0 %1663  ;;  %v1667_v62 = vpop.xlane.xlu1 %1666 }
 0x4fb   : > { %9616 = vpow2.f32 %v1705_v59  ;;  %v1692_v1 = vsub.f32 %v11223_v17, %v1664_v60  ;;  %v1693_v63 = vsub.f32 %v11227_v22, %v1667_v62  ;;  %v1949_v60 = vld [vmem:[#allocation13 + $0x60] sm:$0xff]  ;;  %v1950_v62 = vld [vmem:[#allocation13 + $0x68] sm:$0xff] }
 0x4fd   : > { %v1707_v2 = vmul.f32 1.442695, %v1692_v1  ;;  %v1709_v33 = vmul.f32 1.442695, %v1693_v63  ;;  %v9096_v1 = vpack.c.bf16 %v1950_v62, %v1949_v60 }
 0x4fe   : > { %v1670_v4 = vpop.xlane.xlu0 %1669  ;;  %v1673_v6 = vpop.xlane.xlu1 %1672 }
 0x4ff   : > { %9618 = vpow2.f32 %v1707_v2  ;;  %v1694_v42 = vsub.f32 %v11229_v23, %v1670_v4  ;;  %v1695_v9 = vsub.f32 %v11235_v31, %v1673_v6  ;;  %9097 = vmatprep.subr.bf16.mxu1 %v9096_v1 }
 0x500   : > { %v11292_v54 = vpop.eup %9612  ;;  %9620 = vpow2.f32 %v1709_v33 }
 0x501   : > { %v11294_v5 = vpop.eup %9614  ;;  %v1711_v8 = vmul.f32 1.442695, %v1694_v42  ;;  %v1713_v11 = vmul.f32 1.442695, %v1695_v9  ;;  %v1728_v17 = vsel %vm1652_vm5, %v11292_v54, 0.0  ;;  %v1951_v9 = vld [vmem:[#allocation13 + $0x70] sm:$0xff] }
 0x502   : > { %v1676_v22 = vpop.xlane.xlu0 %1675  ;;  %v1679_v16 = vpop.xlane.xlu1 %1678  ;;  %1729 = vadd.xlane.f32.xlu0 %v1728_v17  ;;  %v1725_v29 = vsel %vm1652_vm5, %v11294_v5, 0.0 }
 0x503   : > { %9622 = vpow2.f32 %v1711_v8  ;;  %v1696_v23 = vsub.f32 %v11237_v32, %v1676_v22  ;;  %v1697_v31 = vsub.f32 %v11243_v41, %v1679_v16  ;;  %1726 = vadd.xlane.f32.xlu1 %v1725_v29  ;;  %v1952_v8 = vld [vmem:[#allocation13 + $0x78] sm:$0xff] }
 0x504   : > { %9624 = vpow2.f32 %v1713_v11 }
 0x505   : > { %v11302_v24 = vpop.eup %9616  ;;  %v1715_v14 = vmul.f32 1.442695, %v1696_v23  ;;  %v1717_v36 = vmul.f32 1.442695, %v1697_v31  ;;  %v9100_v23 = vpack.c.bf16 %v1952_v8, %v1951_v9  ;;  %v1959_v31 = vld [vmem:[#allocation13 + $0xa0] sm:$0xff] }
 0x506   : > { %v1682_v46 = vpop.xlane.xlu0 %1681  ;;  %v1685_v53 = vpop.xlane.xlu1 %1684  ;;  %v1731_v58 = vsel %vm1652_vm5, %v11302_v24, 0.0  ;;  %v7282_v9 = vld [vmem:[#allocation14 + $0x3] ss:$0 sm:$0xff] }
 0x507   : > { %9626 = vpow2.f32 %v1715_v14  ;;  %v1698_v48 = vsub.f32 %v11245_v43, %v1682_v46  ;;  %v1699_v18 = vsub.f32 %v11251_v51, %v1685_v53  ;;  %1732 = vadd.xlane.f32.xlu1 %v1731_v58  ;;  %v1960_v14 = vld [vmem:[#allocation13 + $0xa8] sm:$0xff] }
 0x508   : > { %9628 = vpow2.f32 %v1717_v36 }
 0x509   : > { %v11308_v32 = vpop.eup %9618  ;;  %v1719_v41 = vmul.f32 1.442695, %v1698_v48  ;;  %v1721_v19 = vmul.f32 1.442695, %v1699_v18 }
 0x50a   : > { %v11310_v21 = vpop.eup %9620  ;;  %v1688_v26 = vpop.xlane.xlu0 %1687  ;;  %v1734_v28 = vsel %vm1652_vm5, %v11308_v32, 0.0 }
 0x50b   : > { %9630 = vpow2.f32 %v1719_v41  ;;  %v1700_v30 = vsub.f32 %v11253_v55, %v1688_v26  ;;  %1735 = vadd.xlane.f32.xlu0 %v1734_v28  ;;  %v1737_v43 = vsel %vm1652_vm5, %v11310_v21, 0.0 }
 0x50c   : > { %9632 = vpow2.f32 %v1721_v19  ;;  %1738 = vadd.xlane.f32.xlu1 %v1737_v43 }
 0x50d   : > { %v11317_v51 = vpop.eup %9622  ;;  %v1723_v15 = vmul.f32 1.442695, %v1700_v30 }
 0x50e   : > { %v11319_v34 = vpop.eup %9624  ;;  %v1740_v35 = vsel %vm1652_vm5, %v11317_v51, 0.0 }
 0x50f   : > { %9634 = vpow2.f32 %v1723_v15  ;;  %1741 = vadd.xlane.f32.xlu0 %v1740_v35  ;;  %v1743_v37 = vsel %vm1652_vm5, %v11319_v34, 0.0 }
 0x510   : > { %1744 = vadd.xlane.f32.xlu1 %v1743_v37 }
 0x511   : > { %v11325_v55 = vpop.eup %9626 }
 0x512   : > { %v11327_v39 = vpop.eup %9628  ;;  %v1746_v45 = vsel %vm1652_vm5, %v11325_v55, 0.0 }
 0x513   : > { %1747 = vadd.xlane.f32.xlu0 %v1746_v45  ;;  %v1749_v47 = vsel %vm1652_vm5, %v11327_v39, 0.0 }
 0x514   : > { %1750 = vadd.xlane.f32.xlu1 %v1749_v47 }
 0x515   : > { %v11333_v49 = vpop.eup %9630 }
 0x516   : > { %v11335_v50 = vpop.eup %9632  ;;  %v1752_v52 = vsel %vm1652_vm5, %v11333_v49, 0.0 }
 0x517   : > { %1753 = vadd.xlane.f32.xlu0 %v1752_v52  ;;  %v1755_v56 = vsel %vm1652_vm5, %v11335_v50, 0.0 }
 0x518   : > { %1756 = vadd.xlane.f32.xlu1 %v1755_v56 }
 0x519   : > { %v11341_v57 = vpop.eup %9634 }
 0x51a   : > { %v1758_v59 = vsel %vm1652_vm5, %v11341_v57, 0.0 }
 0x51b   : > { %1759 = vadd.xlane.f32.xlu0 %v1758_v59  ;;  %v1962_v59 = vld [vmem:[#allocation13 + $0xb8] sm:$0xff] }
 0x58f   : > { %v1730_v63 = vpop.xlane.xlu0 %1729 }
 0x590   : > { %9636 = vrcp.f32 %v1730_v63  ;;  %v1727_v2 = vpop.xlane.xlu1 %1726 }
 0x591   : > { %9638 = vrcp.f32 %v1727_v2 }
 0x594   : > { %v1733_v33 = vpop.xlane.xlu1 %1732 }
 0x595   : > { %9640 = vrcp.f32 %v1733_v33 }
 0x598   : > { %v1736_v4 = vpop.xlane.xlu0 %1735 }
 0x599   : > { %9642 = vrcp.f32 %v1736_v4  ;;  %v1739_v6 = vpop.xlane.xlu1 %1738 }
 0x59a   : > { %v9637_v42 = vpop.eup %9636  ;;  %9644 = vrcp.f32 %v1739_v6 }
 0x59b   : > { %v9639_v11 = vpop.eup %9638  ;;  %v1764_v16 = vmul.f32 %v9637_v42, %v11292_v54 }
 0x59c   : > { %v1742_v17 = vpop.xlane.xlu0 %1741  ;;  %v1762_v22 = vmul.f32 %v9639_v11, %v11294_v5  ;;  %v9112_v5 = vpack.c.bf16 %v1960_v14, %v1959_v31 }
 0x59d   : > { %9646 = vrcp.f32 %v1742_v17  ;;  %v1745_v29 = vpop.xlane.xlu1 %1744 }
 0x59e   : > { %9648 = vrcp.f32 %v1745_v29  ;;  %8300 = vmatprep.mubr.msk.f32.mxu1 %vm1652_vm5, %v1762_v22 }
 0x59f   : > { %v9641_v36 = vpop.eup %9640  ;;  %8301 = vmatmul.mubr.msk.f32.vlgmr.msra.gmra.mrb[30].mxu1 %vm1652_vm5, %v1764_v16 }
 0x5a0   : > { %v1748_v46 = vpop.xlane.xlu0 %1747  ;;  %v1766_v53 = vmul.f32 %v9641_v36, %v11302_v24  ;;  %9099 = vmatpush3.bf16.msra.mxu1 %v9096_v1 }
 0x5a1   : > { %9650 = vrcp.f32 %v1748_v46  ;;  %v1751_v58 = vpop.xlane.xlu1 %1750  ;;  %9101 = vmatprep.subr.bf16.mxu1 %v9100_v23 }
 0x5a2   : > { %9652 = vrcp.f32 %v1751_v58  ;;  %8303 = vmatprep.mubr.msk.f32.mxu1 %vm1652_vm5, %v1766_v53 }
 0x5a3   : > { %v9643_v54 = vpop.eup %9642 }
 0x5a4   : > { %v9645_v48 = vpop.eup %9644  ;;  %v1754_v18 = vpop.xlane.xlu0 %1753  ;;  %v1768_v41 = vmul.f32 %v9643_v54, %v11308_v32  ;;  %9103 = vmatpush3.bf16.msra.mxu1 %v9100_v23 }
 0x5a5   : > { %9654 = vrcp.f32 %v1754_v18  ;;  %v1757_v19 = vpop.xlane.xlu1 %1756  ;;  %v1770_v26 = vmul.f32 %v9645_v48, %v11310_v21  ;;  %9113 = vmatprep.subr.bf16.mxu1 %v9112_v5 }
 0x5a6   : > { %9656 = vrcp.f32 %v1757_v19  ;;  %8304 = vmatmul.mubr.msk.f32.gmra.mrb[32].mxu1 %vm1652_vm5, %v1768_v41 }
 0x5a7   : > { %v9647_v24 = vpop.eup %9646  ;;  %8306 = vmatprep.mubr.msk.f32.mxu1 %vm1652_vm5, %v1770_v26 }
 0x5a8   : > { %v9649_v28 = vpop.eup %9648  ;;  %v1760_v30 = vpop.xlane.xlu0 %1759  ;;  %v1772_v43 = vmul.f32 %v9647_v24, %v11317_v51 }
 0x5a9   : > { %9658 = vrcp.f32 %v1760_v30  ;;  %v1774_v15 = vmul.f32 %v9649_v28, %v11319_v34 }
 0x5aa   : > { %8307 = vmatmul.mubr.msk.f32.gmra.mrb[34].mxu1 %vm1652_vm5, %v1772_v43  ;;  %v7308_v43 = vld [vmem:[#allocation14 + $0x5] ss:$0 sm:$0xff] }
 0x5ab   : > { %v9651_v32 = vpop.eup %9650  ;;  %8309 = vmatprep.mubr.msk.f32.mxu1 %vm1652_vm5, %v1774_v15 }
 0x5ac   : > { %v9653_v21 = vpop.eup %9652  ;;  %v1776_v35 = vmul.f32 %v9651_v32, %v11325_v55  ;;  %v1961_v55 = vld [vmem:[#allocation13 + $0xb0] sm:$0xff] }
 0x5ad   : > { %v1778_v37 = vmul.f32 %v9653_v21, %v11327_v39  ;;  %v9116_v39 = vpack.c.bf16 %v1962_v59, %v1961_v55 }
 0x5ae   : > { %8310 = vmatmul.mubr.msk.f32.gmra.mrb[36].mxu1 %vm1652_vm5, %v1776_v35 }
 0x5af   : > { %v9655_v45 = vpop.eup %9654  ;;  %8312 = vmatprep.mubr.msk.f32.mxu1 %vm1652_vm5, %v1778_v37 }
 0x5b0   : > { %v9657_v47 = vpop.eup %9656  ;;  %v1780_v51 = vmul.f32 %v9655_v45, %v11333_v49 }
 0x5b1   : > { %v1782_v34 = vmul.f32 %v9657_v47, %v11335_v50 }
 0x5b2   : > { %8313 = vmatmul.mubr.msk.f32.gmra.mrb[38].mxu1 %vm1652_vm5, %v1780_v51 }
 0x5b3   : > { %v9659_v52 = vpop.eup %9658  ;;  %8315 = vmatprep.mubr.msk.f32.mxu1 %vm1652_vm5, %v1782_v34 }
 0x5b4   : > { %v1784_v56 = vmul.f32 %v9659_v52, %v11341_v57 }
 0x5b6   : > { %8316 = vmatmul.mubr.msk.f32.gmra.mrb[40].mxu1 %vm1652_vm5, %v1784_v56 }
 0x5b7   : > { %8326 = vmatprep.mubr.msk.f32.mxu1 %vm1018_vm2, %v10992_v20 }
 0x5ba   : > { %8327 = vmatmul.mubr.msk.f32.vlgmr.msra.gmra.mrb[42].mxu1 %vm1018_vm2, %v10995_v27 }
 0x5bb   : > { %8329 = vmatprep.mubr.msk.f32.mxu1 %vm1018_vm2, %v11008_v44  ;;  %9115 = vmatpush3.bf16.msra.mxu1 %v9112_v5 }
 0x5bc   : > { %9117 = vmatprep.subr.bf16.mxu1 %v9116_v39 }
 0x5be   : > { %8330 = vmatmul.mubr.msk.f32.gmra.mrb[44].mxu1 %vm1018_vm2, %v11002_v38 }
 0x5bf   : > { %8332 = vmatprep.mubr.msk.f32.mxu1 %vm1018_vm2, %v11023_v40  ;;  %9119 = vmatpush3.bf16.msra.mxu1 %v9116_v39 }
 0x5c2   : > { %8333 = vmatmul.mubr.msk.f32.gmra.mrb[46].mxu1 %vm1018_vm2, %v11028_v61 }
 0x5c3   : > { %8335 = vmatprep.mubr.msk.f32.mxu1 %vm1018_vm2, %v11030_v0 }
 0x5c6   : > { %8336 = vmatmul.mubr.msk.f32.gmra.mrb[48].mxu1 %vm1018_vm2, %v11043_v3 }
 0x5c7   : > { %8338 = vmatprep.mubr.msk.f32.mxu1 %vm1018_vm2, %v11048_v7 }
 0x5ca   : > { %8339 = vmatmul.mubr.msk.f32.gmra.mrb[50].mxu1 %vm1018_vm2, %v11056_v10 }
 0x5cb   : > { %8341 = vmatprep.mubr.msk.f32.mxu1 %vm1018_vm2, %v11060_v12 }
 0x5ce   : > { %8342 = vmatmul.mubr.msk.f32.gmra.mrb[52].mxu1 %vm1018_vm2, %v11068_v13 }
 0x5cf   : > { %8378 = vmatprep.mubr.msk.f32.mxu1 %vm1018_vm2, %v10992_v20 }
 0x5d2   : > { %8379 = vmatmul.mubr.msk.f32.vlgmr.msra.gmra.mrb[54].mxu1 %vm1018_vm2, %v10995_v27 }
 0x5d3   : > { %8381 = vmatprep.mubr.msk.f32.mxu1 %vm1018_vm2, %v11008_v44 }
 0x5d6   : > { %8382 = vmatmul.mubr.msk.f32.gmra.mrb[56].mxu1 %vm1018_vm2, %v11002_v38 }
 0x5d7   : > { %8384 = vmatprep.mubr.msk.f32.mxu1 %vm1018_vm2, %v11023_v40 }
 0x5da   : > { %8385 = vmatmul.mubr.msk.f32.gmra.mrb[58].mxu1 %vm1018_vm2, %v11028_v61 }
 0x5db   : > { %8387 = vmatprep.mubr.msk.f32.mxu1 %vm1018_vm2, %v11030_v0 }
 0x5de   : > { %8388 = vmatmul.mubr.msk.f32.gmra.mrb[60].mxu1 %vm1018_vm2, %v11043_v3 }
 0x5df   : > { %8390 = vmatprep.mubr.msk.f32.mxu1 %vm1018_vm2, %v11048_v7 }
 0x5e2   : > { %8391 = vmatmul.mubr.msk.f32.gmra.mrb[62].mxu1 %vm1018_vm2, %v11056_v10 }
 0x5e3   : > { %8393 = vmatprep.mubr.msk.f32.mxu1 %vm1018_vm2, %v11060_v12 }
 0x5e6   : > { %8394 = vmatmul.mubr.msk.f32.gmra.mrb[64].mxu1 %vm1018_vm2, %v11068_v13 }
 0x672   : > { %v11417_v49 = vpop.f32.mrb[30].mxu1 }
 0x673   : > { %v11419_v50 = vpop.f32.mrb[31].mxu1 }
 0x679   : > { %v11421_v57 = vpop.f32.mrb[32].mxu1 }
 0x67a   : > { %v11423_v60 = vpop.f32.mrb[33].mxu1 }
 0x67d   : > { %v11425_v62 = vpop.f32.mrb[34].mxu1 }
 0x67e   : > { %v11427_v1 = vpop.f32.mrb[35].mxu1 }
 0x681   : > { %v11429_v63 = vpop.f32.mrb[36].mxu1 }
 0x682   : > { %v11431_v2 = vpop.f32.mrb[37].mxu1 }
 0x685   : > { %v11433_v33 = vpop.f32.mrb[38].mxu1 }
 0x686   : > { %v11435_v4 = vpop.f32.mrb[39].mxu1 }
 0x689   : > { %v11437_v6 = vpop.f32.mrb[40].mxu1 }
 0x68a   : > { %v11439_v42 = vpop.f32.mrb[41].mxu1 }
 0x68d   : > { %v8328_v8 = vpop.f32.mrb[42].mxu1 }
 0x68e   : > { %v2041_v11 = vpop.f32.mrb[43].mxu1  ;;  %v2047_v22 = vadd.f32 %v8328_v8, %v7282_v9 }
 0x68f   : > { %v2042_v17 = vadd.f32 %v7282_v9, %v2041_v11 }
 0x691   : > { %v8331_v16 = vpop.f32.mrb[44].mxu1  ;;  %8420 = vmatprep.mubr.msk.f32.mxu0 %vm1442_vm3, %v2042_v17 }
 0x692   : > { %v2051_v29 = vpop.f32.mrb[45].mxu1  ;;  %8421 = vmatmul.mubr.msk.f32.vlgmr.msra.gmra.mrb[42].mxu0 %vm1442_vm3, %v2047_v22  ;;  %v2057_v31 = vadd.f32 %v8331_v16, %v7282_v9 }
 0x693   : > { %v2052_v23 = vadd.f32 %v7282_v9, %v2051_v29 }
 0x695   : > { %v8334_v14 = vpop.f32.mrb[46].mxu1  ;;  %8423 = vmatprep.mubr.msk.f32.mxu0 %vm1442_vm3, %v2052_v23 }
 0x696   : > { %v2061_v36 = vpop.f32.mrb[47].mxu1  ;;  %8424 = vmatmul.mubr.msk.f32.gmra.mrb[44].mxu0 %vm1442_vm3, %v2057_v31  ;;  %v2067_v53 = vadd.f32 %v8334_v14, %v7282_v9 }
 0x697   : > { %v2062_v46 = vadd.f32 %v7282_v9, %v2061_v36 }
 0x699   : > { %v8337_v58 = vpop.f32.mrb[48].mxu1  ;;  %8426 = vmatprep.mubr.msk.f32.mxu0 %vm1442_vm3, %v2062_v46 }
 0x69a   : > { %v2071_v5 = vpop.f32.mrb[49].mxu1  ;;  %8427 = vmatmul.mubr.msk.f32.gmra.mrb[46].mxu0 %vm1442_vm3, %v2067_v53  ;;  %v2077_v48 = vadd.f32 %v8337_v58, %v7282_v9 }
 0x69b   : > { %v2072_v54 = vadd.f32 %v7282_v9, %v2071_v5 }
 0x69d   : > { %v8340_v18 = vpop.f32.mrb[50].mxu1  ;;  %8429 = vmatprep.mubr.msk.f32.mxu0 %vm1442_vm3, %v2072_v54 }
 0x69e   : > { %v2081_v41 = vpop.f32.mrb[51].mxu1  ;;  %8430 = vmatmul.mubr.msk.f32.gmra.mrb[48].mxu0 %vm1442_vm3, %v2077_v48  ;;  %v2087_v26 = vadd.f32 %v8340_v18, %v7282_v9 }
 0x69f   : > { %v2082_v19 = vadd.f32 %v7282_v9, %v2081_v41 }
 0x6a1   : > { %v8343_v24 = vpop.f32.mrb[52].mxu1  ;;  %8432 = vmatprep.mubr.msk.f32.mxu0 %vm1442_vm3, %v2082_v19 }
 0x6a2   : > { %v2091_v28 = vpop.f32.mrb[53].mxu1  ;;  %8433 = vmatmul.mubr.msk.f32.gmra.mrb[50].mxu0 %vm1442_vm3, %v2087_v26  ;;  %v2097_v15 = vadd.f32 %v8343_v24, %v7282_v9 }
 0x6a3   : > { %v2092_v30 = vadd.f32 %v7282_v9, %v2091_v28 }
 0x6a5   : > { %v8380_v32 = vpop.f32.mrb[54].mxu1  ;;  %8435 = vmatprep.mubr.msk.f32.mxu0 %vm1442_vm3, %v2092_v30 }
 0x6a6   : > { %v2309_v21 = vadd.f32 %v8380_v32, %v7308_v43  ;;  %v2303_v35 = vpop.f32.mrb[55].mxu1  ;;  %8436 = vmatmul.mubr.msk.f32.gmra.mrb[52].mxu0 %vm1442_vm3, %v2097_v15 }
 0x6a7   : > { %v2304_v37 = vadd.f32 %v7308_v43, %v2303_v35 }
 0x6a9   : > { %v9156_v45 = vpack.c.bf16 %v2309_v21, %v2304_v37  ;;  %v8383_v47 = vpop.f32.mrb[56].mxu1 }
 0x6aa   : > { %v2319_v51 = vadd.f32 %v8383_v47, %v7308_v43  ;;  %v2313_v34 = vpop.f32.mrb[57].mxu1 }
 0x6ab   : > { %v2314_v52 = vadd.f32 %v7308_v43, %v2313_v34  ;;  %9157 = vmatprep.subr.bf16.mxu1 %v9156_v45 }
 0x6ac   : > { %9159 = vmatpush3.bf16.msra.mxu1 %v9156_v45 }
 0x6ad   : > { %v9160_v56 = vpack.c.bf16 %v2319_v51, %v2314_v52  ;;  %v8386_v55 = vpop.f32.mrb[58].mxu1 }
 0x6ae   : > { %v2329_v59 = vadd.f32 %v8386_v55, %v7308_v43  ;;  %v2323_v39 = vpop.f32.mrb[59].mxu1 }
 0x6af   : > { %v2324_v9 = vadd.f32 %v7308_v43, %v2323_v39  ;;  %9161 = vmatprep.subr.bf16.mxu1 %v9160_v56 }
 0x6b0   : > { %9163 = vmatpush3.bf16.msra.mxu1 %v9160_v56 }
 0x6b1   : > { %v9164_v8 = vpack.c.bf16 %v2329_v59, %v2324_v9  ;;  %v8389_v11 = vpop.f32.mrb[60].mxu1 }
 0x6b2   : > { %v2339_v17 = vadd.f32 %v8389_v11, %v7308_v43  ;;  %v2333_v22 = vpop.f32.mrb[61].mxu1 }
 0x6b3   : > { %v2334_v16 = vadd.f32 %v7308_v43, %v2333_v22  ;;  %9165 = vmatprep.subr.bf16.mxu1 %v9164_v8 }
 0x6b4   : > { %9167 = vmatpush3.bf16.msra.mxu1 %v9164_v8 }
 0x6b5   : > { %v9168_v29 = vpack.c.bf16 %v2339_v17, %v2334_v16  ;;  %v8392_v23 = vpop.f32.mrb[62].mxu1 }
 0x6b6   : > { %v2349_v31 = vadd.f32 %v8392_v23, %v7308_v43  ;;  %v2343_v14 = vpop.f32.mrb[63].mxu1 }
 0x6b7   : > { %v2344_v36 = vadd.f32 %v7308_v43, %v2343_v14  ;;  %9169 = vmatprep.subr.bf16.mxu1 %v9168_v29 }
 0x6b8   : > { %9171 = vmatpush3.bf16.msra.mxu1 %v9168_v29 }
 0x6b9   : > { %v9172_v46 = vpack.c.bf16 %v2349_v31, %v2344_v36  ;;  %v8395_v53 = vpop.f32.mrb[64].mxu1 }
 0x6ba   : > { %v2359_v58 = vadd.f32 %v8395_v53, %v7308_v43  ;;  %v2353_v5 = vpop.f32.mrb[65].mxu1 }
 0x6bb   : > { %v2354_v54 = vadd.f32 %v7308_v43, %v2353_v5  ;;  %9173 = vmatprep.subr.bf16.mxu1 %v9172_v46 }
 0x6bc   : > { %9175 = vmatpush3.bf16.msra.mxu1 %v9172_v46 }
 0x6bd   : > { %v9176_v48 = vpack.c.bf16 %v2359_v58, %v2354_v54 }
 0x6bf   : > { %9177 = vmatprep.subr.bf16.mxu1 %v9176_v48 }
 0x6c0   : > { %9179 = vmatpush3.bf16.msra.mxu1 %v9176_v48 }
 0x765   : > { %v8422_v18 = vpop.f32.mrb[42].mxu0 }
 0x766   : > { %v2560_v41 = vmul.f32 0.25, %v8422_v18  ;;  %v2500_v19 = vpop.f32.mrb[43].mxu0 }
 0x767   : > { %v2559_v26 = vmul.f32 0.25, %v2500_v19 }
 0x768   : > { %v2574_v24 = vsel %vm1652_vm5, %v2560_v41, -inf }
 0x769   : > { %2575 = vmax.xlane.f32.xlu0 %v2574_v24  ;;  %v8425_v28 = vpop.f32.mrb[44].mxu0  ;;  %v2571_v30 = vsel %vm1652_vm5, %v2559_v26, -inf }
 0x76a   : > { %v2562_v15 = vmul.f32 0.25, %v8425_v28  ;;  %2572 = vmax.xlane.f32.xlu1 %v2571_v30  ;;  %v2510_v32 = vpop.f32.mrb[45].mxu0 }
 0x76b   : > { %v2561_v21 = vmul.f32 0.25, %v2510_v32 }
 0x76c   : > { %v2580_v43 = vsel %vm1652_vm5, %v2562_v15, -inf }
 0x76d   : > { %2581 = vmax.xlane.f32.xlu0 %v2580_v43  ;;  %v8428_v35 = vpop.f32.mrb[46].mxu0  ;;  %v2577_v37 = vsel %vm1652_vm5, %v2561_v21, -inf }
 0x76e   : > { %v2564_v45 = vmul.f32 0.25, %v8428_v35  ;;  %2578 = vmax.xlane.f32.xlu1 %v2577_v37  ;;  %v2520_v47 = vpop.f32.mrb[47].mxu0 }
 0x76f   : > { %v2563_v51 = vmul.f32 0.25, %v2520_v47 }
 0x770   : > { %v2586_v34 = vsel %vm1652_vm5, %v2564_v45, -inf }
 0x771   : > { %2587 = vmax.xlane.f32.xlu0 %v2586_v34  ;;  %v8431_v52 = vpop.f32.mrb[48].mxu0  ;;  %v2583_v56 = vsel %vm1652_vm5, %v2563_v51, -inf }
 0x772   : > { %v2566_v55 = vmul.f32 0.25, %v8431_v52  ;;  %2584 = vmax.xlane.f32.xlu1 %v2583_v56  ;;  %v2530_v59 = vpop.f32.mrb[49].mxu0 }
 0x773   : > { %v2565_v39 = vmul.f32 0.25, %v2530_v59 }
 0x774   : > { %v2592_v9 = vsel %vm1652_vm5, %v2566_v55, -inf }
 0x775   : > { %2593 = vmax.xlane.f32.xlu0 %v2592_v9  ;;  %v8434_v8 = vpop.f32.mrb[50].mxu0  ;;  %v2589_v11 = vsel %vm1652_vm5, %v2565_v39, -inf }
 0x776   : > { %v2568_v17 = vmul.f32 0.25, %v8434_v8  ;;  %2590 = vmax.xlane.f32.xlu1 %v2589_v11  ;;  %v2540_v22 = vpop.f32.mrb[51].mxu0 }
 0x777   : > { %v2567_v16 = vmul.f32 0.25, %v2540_v22 }
 0x778   : > { %v2598_v29 = vsel %vm1652_vm5, %v2568_v17, -inf }
 0x779   : > { %2599 = vmax.xlane.f32.xlu0 %v2598_v29  ;;  %v8437_v23 = vpop.f32.mrb[52].mxu0  ;;  %v2595_v31 = vsel %vm1652_vm5, %v2567_v16, -inf }
 0x77a   : > { %v11463_v14 = vmul.f32 0.25, %v8437_v23  ;;  %2596 = vmax.xlane.f32.xlu1 %v2595_v31  ;;  %v2550_v36 = vpop.f32.mrb[53].mxu0 }
 0x77b   : > { %v11465_v46 = vmul.f32 0.25, %v2550_v36 }
 0x77c   : > { %v2604_v53 = vsel %vm1652_vm5, %v11463_v14, -inf }
 0x77d   : > { %2605 = vmax.xlane.f32.xlu0 %v2604_v53  ;;  %v2601_v58 = vsel %vm1652_vm5, %v11465_v46, -inf }
 0x77e   : > { %2602 = vmax.xlane.f32.xlu1 %v2601_v58 }
 0x7f6   : > { %v2576_v5 = vpop.xlane.xlu0 %2575 }
 0x7f7   : > { %v2608_v54 = vsub.f32 %v2560_v41, %v2576_v5  ;;  %v2573_v48 = vpop.xlane.xlu1 %2572 }
 0x7f8   : > { %v2607_v18 = vsub.f32 %v2559_v26, %v2573_v48 }
 0x7f9   : > { %v2621_v19 = vmul.f32 1.442695, %v2608_v54 }
 0x7fa   : > { %v2619_v24 = vmul.f32 1.442695, %v2607_v18  ;;  %v2582_v28 = vpop.xlane.xlu0 %2581 }
 0x7fb   : > { %9660 = vpow2.f32 %v2621_v19  ;;  %v2610_v30 = vsub.f32 %v2562_v15, %v2582_v28  ;;  %v2579_v32 = vpop.xlane.xlu1 %2578 }
 0x7fc   : > { %9662 = vpow2.f32 %v2619_v24  ;;  %v2609_v43 = vsub.f32 %v2561_v21, %v2579_v32 }
 0x7fd   : > { %v2625_v35 = vmul.f32 1.442695, %v2610_v30 }
 0x7fe   : > { %v2623_v37 = vmul.f32 1.442695, %v2609_v43  ;;  %v2588_v47 = vpop.xlane.xlu0 %2587 }
 0x7ff   : > { %9664 = vpow2.f32 %v2625_v35  ;;  %v2612_v34 = vsub.f32 %v2564_v45, %v2588_v47  ;;  %v2585_v52 = vpop.xlane.xlu1 %2584 }
 0x800   : > { %9666 = vpow2.f32 %v2623_v37  ;;  %v2611_v56 = vsub.f32 %v2563_v51, %v2585_v52 }
 0x801   : > { %v2629_v59 = vmul.f32 1.442695, %v2612_v34 }
 0x802   : > { %v2627_v41 = vmul.f32 1.442695, %v2611_v56  ;;  %v2594_v9 = vpop.xlane.xlu0 %2593 }
 0x803   : > { %9668 = vpow2.f32 %v2629_v59  ;;  %v2614_v26 = vsub.f32 %v2566_v55, %v2594_v9  ;;  %v2591_v8 = vpop.xlane.xlu1 %2590 }
 0x804   : > { %9670 = vpow2.f32 %v2627_v41  ;;  %v2613_v11 = vsub.f32 %v2565_v39, %v2591_v8 }
 0x805   : > { %v11471_v15 = vpop.eup %9660  ;;  %v2633_v22 = vmul.f32 1.442695, %v2614_v26 }
 0x806   : > { %v11473_v21 = vpop.eup %9662  ;;  %v2631_v29 = vmul.f32 1.442695, %v2613_v11  ;;  %v2600_v23 = vpop.xlane.xlu0 %2599  ;;  %v2646_v45 = vsel %vm1652_vm5, %v11471_v15, 0.0  ;;  %v2865_v11 = vld [vmem:[#allocation16 + $0x10] sm:$0xff] }
 0x807   : > { %9672 = vpow2.f32 %v2633_v22  ;;  %v2616_v51 = vsub.f32 %v2568_v17, %v2600_v23  ;;  %v2597_v31 = vpop.xlane.xlu1 %2596  ;;  %2647 = vadd.xlane.f32.xlu0 %v2646_v45  ;;  %v2643_v55 = vsel %vm1652_vm5, %v11473_v21, 0.0  ;;  %v2866_v22 = vld [vmem:[#allocation16 + $0x18] sm:$0xff] }
 0x808   : > { %9674 = vpow2.f32 %v2631_v29  ;;  %v2615_v36 = vsub.f32 %v2567_v16, %v2597_v31  ;;  %2644 = vadd.xlane.f32.xlu1 %v2643_v55  ;;  %v9180_v29 = vpack.c.bf16 %v2866_v22, %v2865_v11 }
 0x809   : > { %v11479_v39 = vpop.eup %9664  ;;  %v2637_v53 = vmul.f32 1.442695, %v2616_v51 }
 0x80a   : > { %v11481_v58 = vpop.eup %9666  ;;  %v2635_v5 = vmul.f32 1.442695, %v2615_v36  ;;  %v2606_v54 = vpop.xlane.xlu0 %2605  ;;  %v2652_v48 = vsel %vm1652_vm5, %v11479_v39, 0.0  ;;  %9181 = vmatprep.subr.bf16.mxu1 %v9180_v29 }
 0x80b   : > { %9676 = vpow2.f32 %v2637_v53  ;;  %v2618_v17 = vsub.f32 %v11463_v14, %v2606_v54  ;;  %2653 = vadd.xlane.f32.xlu0 %v2652_v48  ;;  %v2603_v18 = vpop.xlane.xlu1 %2602  ;;  %v2649_v19 = vsel %vm1652_vm5, %v11481_v58, 0.0 }
 0x80c   : > { %9678 = vpow2.f32 %v2635_v5  ;;  %v2617_v16 = vsub.f32 %v11465_v46, %v2603_v18  ;;  %2650 = vadd.xlane.f32.xlu1 %v2649_v19 }
 0x80d   : > { %v11489_v24 = vpop.eup %9668  ;;  %v2641_v28 = vmul.f32 1.442695, %v2618_v17 }
 0x80e   : > { %v11491_v30 = vpop.eup %9670  ;;  %v2639_v32 = vmul.f32 1.442695, %v2617_v16  ;;  %v2658_v43 = vsel %vm1652_vm5, %v11489_v24, 0.0 }
 0x80f   : > { %9680 = vpow2.f32 %v2641_v28  ;;  %2659 = vadd.xlane.f32.xlu0 %v2658_v43  ;;  %v2655_v14 = vsel %vm1652_vm5, %v11491_v30, 0.0 }
 0x810   : > { %9682 = vpow2.f32 %v2639_v32  ;;  %2656 = vadd.xlane.f32.xlu1 %v2655_v14 }
 0x811   : > { %v11497_v35 = vpop.eup %9672 }
 0x812   : > { %v11499_v46 = vpop.eup %9674  ;;  %v2664_v37 = vsel %vm1652_vm5, %v11497_v35, 0.0 }
 0x813   : > { %2665 = vadd.xlane.f32.xlu0 %v2664_v37  ;;  %v2661_v47 = vsel %vm1652_vm5, %v11499_v46, 0.0 }
 0x814   : > { %2662 = vadd.xlane.f32.xlu1 %v2661_v47 }
 0x815   : > { %v11505_v34 = vpop.eup %9676 }
 0x816   : > { %v11507_v52 = vpop.eup %9678  ;;  %v2670_v56 = vsel %vm1652_vm5, %v11505_v34, 0.0 }
 0x817   : > { %2671 = vadd.xlane.f32.xlu0 %v2670_v56  ;;  %v2667_v59 = vsel %vm1652_vm5, %v11507_v52, 0.0 }
 0x818   : > { %2668 = vadd.xlane.f32.xlu1 %v2667_v59 }
 0x819   : > { %v11513_v41 = vpop.eup %9680 }
 0x81a   : > { %v11515_v9 = vpop.eup %9682  ;;  %v2676_v26 = vsel %vm1652_vm5, %v11513_v41, 0.0 }
 0x81b   : > { %2677 = vadd.xlane.f32.xlu0 %v2676_v26  ;;  %v2673_v8 = vsel %vm1652_vm5, %v11515_v9, 0.0 }
 0x81c   : > { %2674 = vadd.xlane.f32.xlu1 %v2673_v8 }
 0x894   : > { %v2648_v23 = vpop.xlane.xlu0 %2647 }
 0x895   : > { %9684 = vrcp.f32 %v2648_v23  ;;  %v2645_v45 = vpop.xlane.xlu1 %2644 }
 0x896   : > { %9686 = vrcp.f32 %v2645_v45  ;;  %v1946_v45 = vld [vmem:[#allocation16] sm:$0xff] }
 0x898   : > { %v2654_v51 = vpop.xlane.xlu0 %2653 }
 0x899   : > { %9688 = vrcp.f32 %v2654_v51  ;;  %v2651_v31 = vpop.xlane.xlu1 %2650  ;;  %v1947_v51 = vld [vmem:[#allocation16 + $0x8] sm:$0xff] }
 0x89a   : > { %9690 = vrcp.f32 %v2651_v31  ;;  %v9184_v31 = vpack.c.bf16 %v1947_v51, %v1946_v45 }
 0x89c   : > { %v2660_v55 = vpop.xlane.xlu0 %2659 }
 0x89d   : > { %9692 = vrcp.f32 %v2660_v55  ;;  %v2657_v36 = vpop.xlane.xlu1 %2656 }
 0x89e   : > { %9694 = vrcp.f32 %v2657_v36 }
 0x89f   : > { %v9685_v53 = vpop.eup %9684 }
 0x8a0   : > { %v9687_v5 = vpop.eup %9686  ;;  %v2666_v54 = vpop.xlane.xlu0 %2665  ;;  %v2682_v18 = vmul.f32 %v9685_v53, %v11471_v15 }
 0x8a1   : > { %9696 = vrcp.f32 %v2666_v54  ;;  %v2663_v48 = vpop.xlane.xlu1 %2662  ;;  %v2680_v17 = vmul.f32 %v9687_v5, %v11473_v21 }
 0x8a2   : > { %9698 = vrcp.f32 %v2663_v48 }
 0x8a3   : > { %v9689_v19 = vpop.eup %9688  ;;  %8462 = vmatprep.mubr.msk.f32.mxu1 %vm1652_vm5, %v2680_v17 }
 0x8a4   : > { %v9691_v16 = vpop.eup %9690  ;;  %v2672_v28 = vpop.xlane.xlu0 %2671  ;;  %8463 = vmatmul.mubr.msk.f32.vlgmr.msra.gmra.mrb[66].mxu1 %vm1652_vm5, %v2682_v18  ;;  %v2686_v14 = vmul.f32 %v9689_v19, %v11479_v39 }
 0x8a5   : > { %9700 = vrcp.f32 %v2672_v28  ;;  %v2669_v32 = vpop.xlane.xlu1 %2668  ;;  %v2684_v43 = vmul.f32 %v9691_v16, %v11481_v58  ;;  %9183 = vmatpush3.bf16.msra.mxu1 %v9180_v29 }
 0x8a6   : > { %9702 = vrcp.f32 %v2669_v32  ;;  %9185 = vmatprep.subr.bf16.mxu1 %v9184_v31 }
 0x8a7   : > { %v9693_v37 = vpop.eup %9692  ;;  %8465 = vmatprep.mubr.msk.f32.mxu1 %vm1652_vm5, %v2684_v43 }
 0x8a8   : > { %v9695_v15 = vpop.eup %9694  ;;  %v2678_v21 = vpop.xlane.xlu0 %2677  ;;  %8466 = vmatmul.mubr.msk.f32.gmra.mrb[68].mxu1 %vm1652_vm5, %v2686_v14  ;;  %v2690_v59 = vmul.f32 %v9693_v37, %v11489_v24 }
 0x8a9   : > { %9704 = vrcp.f32 %v2678_v21  ;;  %v2675_v47 = vpop.xlane.xlu1 %2674  ;;  %v2688_v56 = vmul.f32 %v9695_v15, %v11491_v30 }
 0x8aa   : > { %9706 = vrcp.f32 %v2675_v47 }
 0x8ab   : > { %v9697_v26 = vpop.eup %9696  ;;  %8468 = vmatprep.mubr.msk.f32.mxu1 %vm1652_vm5, %v2688_v56 }
 0x8ac   : > { %v9699_v58 = vpop.eup %9698  ;;  %8469 = vmatmul.mubr.msk.f32.gmra.mrb[70].mxu1 %vm1652_vm5, %v2690_v59  ;;  %v2694_v8 = vmul.f32 %v9697_v26, %v11497_v35 }
 0x8ad   : > { %v2692_v39 = vmul.f32 %v9699_v58, %v11499_v46 }
 0x8af   : > { %v9701_v11 = vpop.eup %9700  ;;  %8471 = vmatprep.mubr.msk.f32.mxu1 %vm1652_vm5, %v2692_v39 }
 0x8b0   : > { %v9703_v22 = vpop.eup %9702  ;;  %8472 = vmatmul.mubr.msk.f32.gmra.mrb[72].mxu1 %vm1652_vm5, %v2694_v8  ;;  %v2698_v24 = vmul.f32 %v9701_v11, %v11505_v34 }
 0x8b1   : > { %v2696_v30 = vmul.f32 %v9703_v22, %v11507_v52 }
 0x8b3   : > { %v9705_v29 = vpop.eup %9704  ;;  %8474 = vmatprep.mubr.msk.f32.mxu1 %vm1652_vm5, %v2696_v30 }
 0x8b4   : > { %v9707_v23 = vpop.eup %9706  ;;  %8475 = vmatmul.mubr.msk.f32.gmra.mrb[74].mxu1 %vm1652_vm5, %v2698_v24  ;;  %v2702_v35 = vmul.f32 %v9705_v29, %v11513_v41 }
 0x8b5   : > { %v2700_v46 = vmul.f32 %v9707_v23, %v11515_v9 }
 0x8b7   : > { %8477 = vmatprep.mubr.msk.f32.mxu1 %vm1652_vm5, %v2700_v46 }
 0x8b8   : > { %8478 = vmatmul.mubr.msk.f32.gmra.mrb[76].mxu1 %vm1652_vm5, %v2702_v35 }
 0x977   : > { %v8464_v52 = vpop.f32.mrb[66].mxu1 }
 0x978   : > { %v2805_v34 = vpop.f32.mrb[67].mxu1 }
 0x979   : > { %8484 = vmatprep.mubr.msk.f32.mxu1 %vm1442_vm3, %v2805_v34 }
 0x97a   : > { %8485 = vmatmul.mubr.msk.f32.vlgmr.msra.gmra.mrb[78].mxu1 %vm1442_vm3, %v8464_v52 }
 0x97b   : > { %9187 = vmatpush3.bf16.msra.mxu1 %v9184_v31  ;;  %v8467_v55 = vpop.f32.mrb[68].mxu1 }
 0x97c   : > { %v2815_v36 = vpop.f32.mrb[69].mxu1 }
 0x97d   : > { %8487 = vmatprep.mubr.msk.f32.mxu1 %vm1442_vm3, %v2815_v36  ;;  %v3406_v36 = vld [vmem:[#allocation19] sm:$0xff] }
 0x97e   : > { %8488 = vmatmul.mubr.msk.f32.gmra.mrb[80].mxu1 %vm1442_vm3, %v8467_v55 }
 0x97f   : > { %v8470_v41 = vpop.f32.mrb[70].mxu1 }
 0x980   : > { %v2825_v9 = vpop.f32.mrb[71].mxu1 }
 0x981   : > { %8490 = vmatprep.mubr.msk.f32.mxu1 %vm1442_vm3, %v2825_v9 }
 0x982   : > { %8491 = vmatmul.mubr.msk.f32.gmra.mrb[82].mxu1 %vm1442_vm3, %v8470_v41  ;;  %v3407_v41 = vld [vmem:[#allocation19 + $0x8] sm:$0xff] }
 0x983   : > { %v8473_v53 = vpop.f32.mrb[72].mxu1 }
 0x984   : > { %v2835_v5 = vpop.f32.mrb[73].mxu1 }
 0x985   : > { %8493 = vmatprep.mubr.msk.f32.mxu1 %vm1442_vm3, %v2835_v5 }
 0x986   : > { %8494 = vmatmul.mubr.msk.f32.gmra.mrb[84].mxu1 %vm1442_vm3, %v8473_v53 }
 0x987   : > { %v8476_v54 = vpop.f32.mrb[74].mxu1 }
 0x988   : > { %v2845_v48 = vpop.f32.mrb[75].mxu1 }
 0x989   : > { %8496 = vmatprep.mubr.msk.f32.mxu1 %vm1442_vm3, %v2845_v48 }
 0x98a   : > { %8497 = vmatmul.mubr.msk.f32.gmra.mrb[86].mxu1 %vm1442_vm3, %v8476_v54 }
 0x98b   : > { %v8479_v17 = vpop.f32.mrb[76].mxu1 }
 0x98c   : > { %v2855_v18 = vpop.f32.mrb[77].mxu1 }
 0x98d   : > { %8499 = vmatprep.mubr.msk.f32.mxu1 %vm1442_vm3, %v2855_v18 }
 0x98e   : > { %8500 = vmatmul.mubr.msk.f32.gmra.mrb[88].mxu1 %vm1442_vm3, %v8479_v17 }
 0x98f   : > { %8506 = vmatprep.mubr.msk.f32.mxu1 %vm1442_vm3, %v11419_v50 }
 0x992   : > { %8507 = vmatmul.mubr.msk.f32.vlgmr.msra.gmra.mrb[78].mxu1 %vm1442_vm3, %v11417_v49  ;;  %v3201_v49 = vlaneseq }
 0x993   : > { %8509 = vmatprep.mubr.msk.f32.mxu1 %vm1442_vm3, %v11423_v60  ;;  %v11584_v60 = vld [vmem:[#allocation17] sm:$0x3f] }
 0x994   : > { %v11581_v50 = vshrl.u32 %v3201_v49, 7 }
 0x996   : > { %8510 = vmatmul.mubr.msk.f32.gmra.mrb[80].mxu1 %vm1442_vm3, %v11421_v57  ;;  %v3203_v57 = vsub.s32 0, %v11581_v50 }
 0x997   : > { %8512 = vmatprep.mubr.msk.f32.mxu1 %vm1442_vm3, %v11427_v1 }
 0x99a   : > { %8513 = vmatmul.mubr.msk.f32.gmra.mrb[82].mxu1 %vm1442_vm3, %v11425_v62  ;;  %v3204_v62 = vrot.slane %v11584_v60, %v3203_v57 }
 0x99b   : > { %8515 = vmatprep.mubr.msk.f32.mxu1 %vm1442_vm3, %v11431_v2 }
 0x99e   : > { %8516 = vmatmul.mubr.msk.f32.gmra.mrb[84].mxu1 %vm1442_vm3, %v11429_v63 }
 0x99f   : > { %8518 = vmatprep.mubr.msk.f32.mxu1 %vm1442_vm3, %v11435_v4 }
 0x9a2   : > { %8519 = vmatmul.mubr.msk.f32.gmra.mrb[86].mxu1 %vm1442_vm3, %v11433_v33 }
 0x9a3   : > { %8521 = vmatprep.mubr.msk.f32.mxu1 %vm1442_vm3, %v11439_v42 }
 0x9a6   : > { %8522 = vmatmul.mubr.msk.f32.gmra.mrb[88].mxu1 %vm1442_vm3, %v11437_v6 }
 0xa65   : > { %v8508_v1 = vpop.f32.mrb[78].mxu1 }
 0xa66   : > { %v3190_v63 = vadd.f32 %v8508_v1, %v10995_v27  ;;  %v3130_v2 = vpop.f32.mrb[79].mxu1 }
 0xa67   : > { %v3189_v33 = vadd.f32 %v3130_v2, %v10992_v20 }
 0xa68   : > { %v11591_v4 = vadd.f32 %v3204_v62, %v3190_v63 }
 0xa69   : > { %v8511_v6 = vpop.f32.mrb[80].mxu1  ;;  %v11593_v42 = vadd.f32 %v3204_v62, %v3189_v33 }
 0xa6a   : > { %v3192_v19 = vadd.f32 %v8511_v6, %v11002_v38  ;;  %v3140_v16 = vpop.f32.mrb[81].mxu1  ;;  %v3220_v28 = vsel %vm1018_vm2, %v11591_v4, 0.0 }
 0xa6b   : > { %v3191_v32 = vadd.f32 %v3140_v16, %v11008_v44  ;;  %3221 = vadd.xlane.f32.xlu0 %v3220_v28  ;;  %v3217_v27 = vsel %vm1018_vm2, %v11593_v42, 0.0 }
 0xa6c   : > { %3218 = vadd.xlane.f32.xlu1 %v3217_v27  ;;  %v11601_v43 = vadd.f32 %v3204_v62, %v3192_v19 }
 0xa6d   : > { %v8514_v20 = vpop.f32.mrb[82].mxu1  ;;  %v11603_v14 = vadd.f32 %v3204_v62, %v3191_v32 }
 0xa6e   : > { %v3194_v37 = vadd.f32 %v8514_v20, %v11028_v61  ;;  %v3150_v15 = vpop.f32.mrb[83].mxu1  ;;  %v3226_v38 = vsel %vm1018_vm2, %v11601_v43, 0.0 }
 0xa6f   : > { %v3193_v21 = vadd.f32 %v3150_v15, %v11023_v40  ;;  %3227 = vadd.xlane.f32.xlu0 %v3226_v38  ;;  %v3223_v44 = vsel %vm1018_vm2, %v11603_v14, 0.0 }
 0xa70   : > { %3224 = vadd.xlane.f32.xlu1 %v3223_v44  ;;  %v11611_v47 = vadd.f32 %v3204_v62, %v3194_v37 }
 0xa71   : > { %v8517_v56 = vpop.f32.mrb[84].mxu1  ;;  %v11613_v59 = vadd.f32 %v3204_v62, %v3193_v21 }
 0xa72   : > { %v3196_v26 = vadd.f32 %v8517_v56, %v11043_v3  ;;  %v3160_v58 = vpop.f32.mrb[85].mxu1  ;;  %v3232_v61 = vsel %vm1018_vm2, %v11611_v47, 0.0 }
 0xa73   : > { %v3195_v39 = vadd.f32 %v3160_v58, %v11030_v0  ;;  %3233 = vadd.xlane.f32.xlu0 %v3232_v61  ;;  %v3229_v40 = vsel %vm1018_vm2, %v11613_v59, 0.0 }
 0xa74   : > { %3230 = vadd.xlane.f32.xlu1 %v3229_v40  ;;  %v11621_v8 = vadd.f32 %v3204_v62, %v3196_v26 }
 0xa75   : > { %v8520_v11 = vpop.f32.mrb[86].mxu1  ;;  %v11623_v22 = vadd.f32 %v3204_v62, %v3195_v39 }
 0xa76   : > { %v3198_v30 = vadd.f32 %v8520_v11, %v11056_v10  ;;  %v3170_v24 = vpop.f32.mrb[87].mxu1  ;;  %v3238_v3 = vsel %vm1018_vm2, %v11621_v8, 0.0 }
 0xa77   : > { %v3197_v29 = vadd.f32 %v3170_v24, %v11048_v7  ;;  %3239 = vadd.xlane.f32.xlu0 %v3238_v3  ;;  %v3235_v0 = vsel %vm1018_vm2, %v11623_v22, 0.0 }
 0xa78   : > { %3236 = vadd.xlane.f32.xlu1 %v3235_v0  ;;  %v11631_v23 = vadd.f32 %v3204_v62, %v3198_v30 }
 0xa79   : > { %v8523_v46 = vpop.f32.mrb[88].mxu1  ;;  %v11633_v35 = vadd.f32 %v3204_v62, %v3197_v29 }
 0xa7a   : > { %v3200_v45 = vadd.f32 %v8523_v46, %v11068_v13  ;;  %v3180_v51 = vpop.f32.mrb[89].mxu1  ;;  %v3244_v10 = vsel %vm1018_vm2, %v11631_v23, 0.0 }
 0xa7b   : > { %v3199_v31 = vadd.f32 %v3180_v51, %v11060_v12  ;;  %3245 = vadd.xlane.f32.xlu0 %v3244_v10  ;;  %v3241_v7 = vsel %vm1018_vm2, %v11633_v35, 0.0  ;;  %v9188_v12 = vpack.c.bf16 %v3407_v41, %v3406_v36 }
 0xa7c   : > { %3242 = vadd.xlane.f32.xlu1 %v3241_v7  ;;  %v11641_v52 = vadd.f32 %v3204_v62, %v3200_v45 }
 0xa7d   : > { %v11643_v34 = vadd.f32 %v3204_v62, %v3199_v31  ;;  %9189 = vmatprep.subr.bf16.mxu0 %v9188_v12 }
 0xa7e   : > { %v3250_v55 = vsel %vm1018_vm2, %v11641_v52, 0.0  ;;  %9191 = vmatpush3.bf16.msra.mxu0 %v9188_v12 }
 0xa7f   : > { %3251 = vadd.xlane.f32.xlu0 %v3250_v55  ;;  %v3247_v13 = vsel %vm1018_vm2, %v11643_v34, 0.0 }
 0xa80   : > { %3248 = vadd.xlane.f32.xlu1 %v3247_v13 }
 0xaf8   : > { %v3222_v9 = vpop.xlane.xlu0 %3221 }
 0xaf9   : > { %v3255_v53 = vmul.f32 0.03125, %v3222_v9  ;;  %v3219_v5 = vpop.xlane.xlu1 %3218 }
 0xafa   : > { %v3254_v54 = vmul.f32 0.03125, %v3219_v5  ;;  %v3409_v5 = vld [vmem:[#allocation19 + $0x18] sm:$0xff] }
 0xafb   : > { %v11650_v48 = vsub.f32 %v11591_v4, %v3255_v53  ;;  %v3408_v53 = vld [vmem:[#allocation19 + $0x10] sm:$0xff] }
 0xafc   : > { %v11653_v17 = vsub.f32 %v11593_v42, %v3254_v54  ;;  %v3228_v18 = vpop.xlane.xlu0 %3227  ;;  %v3590_v54 = vld [vmem:[#allocation22] sm:$0xff] }
 0xafd   : > { %v3257_v49 = vmul.f32 0.03125, %v3228_v18  ;;  %v3225_v62 = vpop.xlane.xlu1 %3224  ;;  %v3279_v1 = vmul.f32 %v11650_v48, %v11650_v48  ;;  %v3591_v18 = vld [vmem:[#allocation22 + $0x8] sm:$0xff] }
 0xafe   : > { %v3256_v63 = vmul.f32 0.03125, %v3225_v62  ;;  %v3278_v2 = vmul.f32 %v11653_v17, %v11653_v17 }
 0xaff   : > { %v11660_v33 = vsub.f32 %v11601_v43, %v3257_v49  ;;  %v3293_v6 = vsel %vm1018_vm2, %v3279_v1, 0.0  ;;  %v11721_v49 = vpack.c.bf16 %v3591_v18, %v3590_v54 }
 0xb00   : > { %v11664_v4 = vsub.f32 %v11603_v14, %v3256_v63  ;;  %v3234_v42 = vpop.xlane.xlu0 %3233  ;;  %3294 = vadd.xlane.f32.xlu0 %v3293_v6  ;;  %v3290_v19 = vsel %vm1018_vm2, %v3278_v2, 0.0 }
 0xb01   : > { %v3259_v16 = vmul.f32 0.03125, %v3234_v42  ;;  %v3231_v28 = vpop.xlane.xlu1 %3230  ;;  %3291 = vadd.xlane.f32.xlu1 %v3290_v19  ;;  %v3281_v32 = vmul.f32 %v11660_v33, %v11660_v33 }
 0xb02   : > { %v3258_v27 = vmul.f32 0.03125, %v3231_v28  ;;  %v3280_v43 = vmul.f32 %v11664_v4, %v11664_v4 }
 0xb03   : > { %v11672_v20 = vsub.f32 %v11611_v47, %v3259_v16  ;;  %v3299_v14 = vsel %vm1018_vm2, %v3281_v32, 0.0 }
 0xb04   : > { %v11676_v37 = vsub.f32 %v11613_v59, %v3258_v27  ;;  %v3240_v15 = vpop.xlane.xlu0 %3239  ;;  %3300 = vadd.xlane.f32.xlu0 %v3299_v14  ;;  %v3296_v38 = vsel %vm1018_vm2, %v3280_v43, 0.0 }
 0xb05   : > { %v3261_v21 = vmul.f32 0.03125, %v3240_v15  ;;  %v3237_v44 = vpop.xlane.xlu1 %3236  ;;  %3297 = vadd.xlane.f32.xlu1 %v3296_v38  ;;  %v3283_v56 = vmul.f32 %v11672_v20, %v11672_v20 }
 0xb06   : > { %v3260_v26 = vmul.f32 0.03125, %v3237_v44  ;;  %v3282_v47 = vmul.f32 %v11676_v37, %v11676_v37 }
 0xb07   : > { %v11684_v58 = vsub.f32 %v11621_v8, %v3261_v21  ;;  %v3305_v59 = vsel %vm1018_vm2, %v3283_v56, 0.0  ;;  %v3376_v21 = vsub.s32 1, %v11581_v50 }
 0xb08   : > { %v11688_v61 = vsub.f32 %v11623_v22, %v3260_v26  ;;  %v3246_v39 = vpop.xlane.xlu0 %3245  ;;  %3306 = vadd.xlane.f32.xlu0 %v3305_v59  ;;  %v3302_v40 = vsel %vm1018_vm2, %v3282_v47, 0.0 }
 0xb09   : > { %v3263_v11 = vmul.f32 0.03125, %v3246_v39  ;;  %v3243_v30 = vpop.xlane.xlu1 %3242  ;;  %3303 = vadd.xlane.f32.xlu1 %v3302_v40  ;;  %v3285_v24 = vmul.f32 %v11684_v58, %v11684_v58  ;;  %v3392_v40 = vsub.s32 2, %v11581_v50 }
 0xb0a   : > { %v3262_v3 = vmul.f32 0.03125, %v3243_v30  ;;  %v3284_v8 = vmul.f32 %v11688_v61, %v11688_v61 }
 0xb0b   : > { %v11696_v29 = vsub.f32 %v11631_v23, %v3263_v11  ;;  %v3311_v22 = vsel %vm1018_vm2, %v3285_v24, 0.0  ;;  %v11729_v11 = vrot.slane %v11584_v60, %v3376_v21 }
 0xb0c   : > { %v11700_v0 = vsub.f32 %v11633_v35, %v3262_v3  ;;  %3312 = vadd.xlane.f32.xlu0 %v3311_v22  ;;  %v3252_v46 = vpop.xlane.xlu0 %3251  ;;  %v3308_v45 = vsel %vm1018_vm2, %v3284_v8, 0.0 }
 0xb0d   : > { %v3265_v51 = vmul.f32 0.03125, %v3252_v46  ;;  %3309 = vadd.xlane.f32.xlu1 %v3308_v45  ;;  %v3249_v10 = vpop.xlane.xlu1 %3248  ;;  %v3287_v31 = vmul.f32 %v11696_v29, %v11696_v29 }
 0xb0e   : > { %v3264_v7 = vmul.f32 0.03125, %v3249_v10  ;;  %v3286_v23 = vmul.f32 %v11700_v0, %v11700_v0 }
 0xb0f   : > { %v11708_v55 = vsub.f32 %v11641_v52, %v3265_v51  ;;  %v3317_v35 = vsel %vm1018_vm2, %v3287_v31, 0.0 }
 0xb10   : > { %v11712_v13 = vsub.f32 %v11643_v34, %v3264_v7  ;;  %3318 = vadd.xlane.f32.xlu0 %v3317_v35  ;;  %v3314_v36 = vsel %vm1018_vm2, %v3286_v23, 0.0  ;;  %v9192_v34 = vpack.c.bf16 %v3409_v5, %v3408_v53  ;;  %v11736_v7 = vrot.slane %v11584_v60, %v3392_v40  ;;  %v3592_v23 = vld [vmem:[#allocation22 + $0x10] sm:$0xff]  ;;  %v3593_v35 = vld [vmem:[#allocation22 + $0x18] sm:$0xff] }
 0xb11   : > { %3315 = vadd.xlane.f32.xlu1 %v3314_v36  ;;  %v3289_v41 = vmul.f32 %v11708_v55, %v11708_v55 }
 0xb12   : > { %v3288_v12 = vmul.f32 %v11712_v13, %v11712_v13  ;;  %9193 = vmatprep.subr.bf16.mxu0 %v9192_v34 }
 0xb13   : > { %v3323_v9 = vsel %vm1018_vm2, %v3289_v41, 0.0  ;;  %9195 = vmatpush3.bf16.msra.mxu0 %v9192_v34  ;;  %v9200_v34 = vpack.c.bf16 %v3593_v35, %v3592_v23 }
 0xb14   : > { %3324 = vadd.xlane.f32.xlu0 %v3323_v9  ;;  %v3320_v52 = vsel %vm1018_vm2, %v3288_v12, 0.0  ;;  %9197 = vmatprep.subr.bf16.mxu0 %v11721_v49 }
 0xb15   : > { %3321 = vadd.xlane.f32.xlu1 %v3320_v52 }
 0xb8d   : > { %v3295_v62 = vpop.xlane.xlu0 %3294 }
 0xb8e   : > { %v3327_v1 = vmul.f32 0.03125, %v3295_v62  ;;  %v3292_v63 = vpop.xlane.xlu1 %3291 }
 0xb8f   : > { %v3326_v2 = vmul.f32 0.03125, %v3292_v63 }
 0xb90   : > { %v3339_v6 = vadd.f32 1e-05, %v3327_v1 }
 0xb91   : > { %v3338_v42 = vadd.f32 1e-05, %v3326_v2  ;;  %v3301_v19 = vpop.xlane.xlu0 %3300 }
 0xb92   : > { %9708 = vrsqrt.f32 %v3339_v6  ;;  %v3329_v16 = vmul.f32 0.03125, %v3301_v19  ;;  %v3298_v28 = vpop.xlane.xlu1 %3297 }
 0xb93   : > { %9710 = vrsqrt.f32 %v3338_v42  ;;  %v3328_v32 = vmul.f32 0.03125, %v3298_v28  ;;  %v3595_v28 = vld [vmem:[#allocation22 + $0x28] sm:$0xff] }
 0xb94   : > { %v3341_v27 = vadd.f32 1e-05, %v3329_v16  ;;  %v3594_v16 = vld [vmem:[#allocation22 + $0x20] sm:$0xff] }
 0xb95   : > { %v3340_v43 = vadd.f32 1e-05, %v3328_v32  ;;  %v3307_v14 = vpop.xlane.xlu0 %3306 }
 0xb96   : > { %9712 = vrsqrt.f32 %v3341_v27  ;;  %v3331_v15 = vmul.f32 0.03125, %v3307_v14  ;;  %v3304_v38 = vpop.xlane.xlu1 %3303 }
 0xb97   : > { %9714 = vrsqrt.f32 %v3340_v43  ;;  %v3330_v44 = vmul.f32 0.03125, %v3304_v38 }
 0xb98   : > { %v3343_v56 = vadd.f32 1e-05, %v3331_v15 }
 0xb99   : > { %v3342_v26 = vadd.f32 1e-05, %v3330_v44  ;;  %v3313_v47 = vpop.xlane.xlu0 %3312  ;;  %v9204_v44 = vpack.c.bf16 %v3595_v28, %v3594_v16 }
 0xb9a   : > { %9716 = vrsqrt.f32 %v3343_v56  ;;  %v3333_v59 = vmul.f32 0.03125, %v3313_v47  ;;  %v3310_v39 = vpop.xlane.xlu1 %3309 }
 0xb9b   : > { %9718 = vrsqrt.f32 %v3342_v26  ;;  %v3332_v30 = vmul.f32 0.03125, %v3310_v39 }
 0xb9c   : > { %v9709_v24 = vpop.eup %9708  ;;  %v3345_v3 = vadd.f32 1e-05, %v3333_v59 }
 0xb9d   : > { %v9711_v8 = vpop.eup %9710  ;;  %v3363_v22 = vmul.f32 %v9709_v24, %v11650_v48  ;;  %v3344_v46 = vadd.f32 1e-05, %v3332_v30  ;;  %v3319_v45 = vpop.xlane.xlu0 %3318 }
 0xb9e   : > { %9720 = vrsqrt.f32 %v3345_v3  ;;  %v3335_v51 = vmul.f32 0.03125, %v3319_v45  ;;  %v3316_v10 = vpop.xlane.xlu1 %3315  ;;  %v3362_v31 = vmul.f32 %v9711_v8, %v11653_v17 }
 0xb9f   : > { %v3379_v36 = vmul.f32 %v11729_v11, %v3363_v22  ;;  %9722 = vrsqrt.f32 %v3344_v46  ;;  %v3334_v41 = vmul.f32 0.03125, %v3316_v10 }
 0xba0   : > { %v9713_v12 = vpop.eup %9712  ;;  %v3347_v48 = vadd.f32 1e-05, %v3335_v51  ;;  %v3378_v9 = vmul.f32 %v11729_v11, %v3362_v31 }
 0xba1   : > { %v9715_v52 = vpop.eup %9714  ;;  %v3346_v53 = vadd.f32 1e-05, %v3334_v41  ;;  %v3325_v5 = vpop.xlane.xlu0 %3324  ;;  %v3365_v17 = vmul.f32 %v9713_v12, %v11660_v33  ;;  %v11746_v2 = vadd.f32 %v11736_v7, %v3379_v36  ;;  %v3597_v12 = vld [vmem:[#allocation22 + $0x38] sm:$0xff] }
 0xba2   : > { %9724 = vrsqrt.f32 %v3347_v48  ;;  %v3337_v54 = vmul.f32 0.03125, %v3325_v5  ;;  %v3322_v18 = vpop.xlane.xlu1 %3321  ;;  %v11742_v62 = vadd.f32 %v11736_v7, %v3378_v9  ;;  %v3364_v1 = vmul.f32 %v9715_v52, %v11664_v4 }
 0xba3   : > { %9726 = vrsqrt.f32 %v3346_v53  ;;  %v3336_v63 = vmul.f32 0.03125, %v3322_v18  ;;  %v3381_v6 = vmul.f32 %v11729_v11, %v3365_v17 }
 0xba4   : > { %v9717_v42 = vpop.eup %9716  ;;  %v3349_v19 = vadd.f32 1e-05, %v3337_v54  ;;  %8532 = vmatprep.mubr.msk.f32.mxu0 %vm1018_vm2, %v11742_v62  ;;  %v3380_v33 = vmul.f32 %v11729_v11, %v3364_v1 }
 0xba5   : > { %v9719_v32 = vpop.eup %9718  ;;  %v3348_v27 = vadd.f32 1e-05, %v3336_v63  ;;  %8533 = vmatmul.mubr.msk.f32.vlgmr.msra.gmra.mrb[54].mxu0 %vm1018_vm2, %v11746_v2  ;;  %v3367_v4 = vmul.f32 %v9717_v42, %v11672_v20  ;;  %v11761_v15 = vadd.f32 %v11736_v7, %v3381_v6 }
 0xba6   : > { %9728 = vrsqrt.f32 %v3349_v19  ;;  %v11756_v43 = vadd.f32 %v11736_v7, %v3380_v33  ;;  %v3366_v14 = vmul.f32 %v9719_v32, %v11676_v37  ;;  %9199 = vmatpush3.bf16.msra.mxu0 %v11721_v49 }
 0xba7   : > { %9730 = vrsqrt.f32 %v3348_v27  ;;  %v3383_v38 = vmul.f32 %v11729_v11, %v3367_v4  ;;  %9201 = vmatprep.subr.bf16.mxu0 %v9200_v34 }
 0xba8   : > { %v9721_v56 = vpop.eup %9720  ;;  %8535 = vmatprep.mubr.msk.f32.mxu0 %vm1018_vm2, %v11756_v43  ;;  %v3382_v20 = vmul.f32 %v11729_v11, %v3366_v14 }
 0xba9   : > { %v9723_v26 = vpop.eup %9722  ;;  %8536 = vmatmul.mubr.msk.f32.gmra.mrb[56].mxu0 %vm1018_vm2, %v11761_v15  ;;  %v3369_v37 = vmul.f32 %v9721_v56, %v11684_v58  ;;  %v11775_v59 = vadd.f32 %v11736_v7, %v3383_v38 }
 0xbaa   : > { %v11771_v49 = vadd.f32 %v11736_v7, %v3382_v20  ;;  %v3368_v47 = vmul.f32 %v9723_v26, %v11688_v61  ;;  %9203 = vmatpush3.bf16.msra.mxu0 %v9200_v34 }
 0xbab   : > { %v3385_v39 = vmul.f32 %v11729_v11, %v3369_v37  ;;  %9205 = vmatprep.subr.bf16.mxu0 %v9204_v44 }
 0xbac   : > { %v9725_v30 = vpop.eup %9724  ;;  %8538 = vmatprep.mubr.msk.f32.mxu0 %vm1018_vm2, %v11771_v49  ;;  %v3384_v24 = vmul.f32 %v11729_v11, %v3368_v47 }
 0xbad   : > { %v9727_v3 = vpop.eup %9726  ;;  %8539 = vmatmul.mubr.msk.f32.gmra.mrb[58].mxu0 %vm1018_vm2, %v11775_v59  ;;  %v3371_v58 = vmul.f32 %v9725_v30, %v11696_v29  ;;  %v11789_v22 = vadd.f32 %v11736_v7, %v3385_v39 }
 0xbae   : > { %v11785_v61 = vadd.f32 %v11736_v7, %v3384_v24  ;;  %v3370_v8 = vmul.f32 %v9727_v3, %v11700_v0  ;;  %9207 = vmatpush3.bf16.msra.mxu0 %v9204_v44 }
 0xbaf   : > { %v3387_v46 = vmul.f32 %v11729_v11, %v3371_v58 }
 0xbb0   : > { %v9729_v45 = vpop.eup %9728  ;;  %8541 = vmatprep.mubr.msk.f32.mxu0 %vm1018_vm2, %v11785_v61  ;;  %v3386_v51 = vmul.f32 %v11729_v11, %v3370_v8 }
 0xbb1   : > { %v9731_v10 = vpop.eup %9730  ;;  %8542 = vmatmul.mubr.msk.f32.gmra.mrb[60].mxu0 %vm1018_vm2, %v11789_v22  ;;  %v3373_v29 = vmul.f32 %v9729_v45, %v11708_v55  ;;  %v11803_v23 = vadd.f32 %v11736_v7, %v3387_v46 }
 0xbb2   : > { %v11799_v0 = vadd.f32 %v11736_v7, %v3386_v51  ;;  %v3372_v31 = vmul.f32 %v9731_v10, %v11712_v13  ;;  %v3596_v13 = vld [vmem:[#allocation22 + $0x30] sm:$0xff]  ;;  %v3600_v51 = vsub.s32 3, %v11581_v50 }
 0xbb3   : > { %v3389_v35 = vmul.f32 %v11729_v11, %v3373_v29  ;;  %v9208_v48 = vpack.c.bf16 %v3597_v12, %v3596_v13 }
 0xbb4   : > { %8544 = vmatprep.mubr.msk.f32.mxu0 %vm1018_vm2, %v11799_v0  ;;  %v3388_v36 = vmul.f32 %v11729_v11, %v3372_v31  ;;  %v7381_v11 = vld [vmem:[#allocation20] ss:$0 sm:$0xff]  ;;  %v3601_v10 = vrot.slane %v11584_v60, %v3600_v51 }
 0xbb5   : > { %8545 = vmatmul.mubr.msk.f32.gmra.mrb[62].mxu0 %vm1018_vm2, %v11803_v23  ;;  %v11815_v41 = vadd.f32 %v11736_v7, %v3389_v35  ;;  %9209 = vmatprep.subr.bf16.mxu0 %v9208_v48 }
 0xbb6   : > { %v11812_v55 = vadd.f32 %v11736_v7, %v3388_v36  ;;  %9211 = vmatpush3.bf16.msra.mxu0 %v9208_v48 }
 0xbb8   : > { %8547 = vmatprep.mubr.msk.f32.mxu0 %vm1018_vm2, %v11812_v55 }
 0xbb9   : > { %8548 = vmatmul.mubr.msk.f32.gmra.mrb[64].mxu0 %vm1018_vm2, %v11815_v41 }
 0xc78   : > { %v8534_v9 = vpop.f32.mrb[54].mxu0 }
 0xc79   : > { %v3525_v52 = vadd.f32 %v8534_v9, %v7381_v11  ;;  %v3519_v53 = vpop.f32.mrb[55].mxu0 }
 0xc7a   : > { %v3520_v5 = vadd.f32 %v7381_v11, %v3519_v53 }
 0xc7b   : > { %v3579_v34 = vmax.f32 %v3525_v52, 0.0 }
 0xc7c   : > { %v3578_v17 = vmax.f32 %v3520_v5, 0.0  ;;  %v8537_v7 = vpop.f32.mrb[56].mxu0 }
 0xc7d   : > { %v3535_v54 = vadd.f32 %v8537_v7, %v7381_v11  ;;  %v3529_v18 = vpop.f32.mrb[57].mxu0 }
 0xc7e   : > { %v3530_v1 = vadd.f32 %v7381_v11, %v3529_v18  ;;  %8566 = vmatprep.mubr.msk.f32.mxu0 %vm3602_vm6, %v3578_v17 }
 0xc7f   : > { %8567 = vmatmul.mubr.msk.f32.vlgmr.msra.gmra.mrb[66].mxu0 %vm3602_vm6, %v3579_v34  ;;  %v3581_v42 = vmax.f32 %v3535_v54, 0.0 }
 0xc80   : > { %v3580_v63 = vmax.f32 %v3530_v1, 0.0  ;;  %v8540_v6 = vpop.f32.mrb[58].mxu0 }
 0xc81   : > { %v3545_v19 = vadd.f32 %v8540_v6, %v7381_v11  ;;  %v3539_v33 = vpop.f32.mrb[59].mxu0 }
 0xc82   : > { %v3540_v16 = vadd.f32 %v7381_v11, %v3539_v33  ;;  %8569 = vmatprep.mubr.msk.f32.mxu0 %vm3602_vm6, %v3580_v63 }
 0xc83   : > { %8570 = vmatmul.mubr.msk.f32.gmra.mrb[68].mxu0 %vm3602_vm6, %v3581_v42  ;;  %v3583_v27 = vmax.f32 %v3545_v19, 0.0 }
 0xc84   : > { %v3582_v28 = vmax.f32 %v3540_v16, 0.0  ;;  %v8543_v32 = vpop.f32.mrb[60].mxu0 }
 0xc85   : > { %v3555_v4 = vadd.f32 %v8543_v32, %v7381_v11  ;;  %v3549_v14 = vpop.f32.mrb[61].mxu0 }
 0xc86   : > { %v3550_v38 = vadd.f32 %v7381_v11, %v3549_v14  ;;  %8572 = vmatprep.mubr.msk.f32.mxu0 %vm3602_vm6, %v3582_v28 }
 0xc87   : > { %8573 = vmatmul.mubr.msk.f32.gmra.mrb[70].mxu0 %vm3602_vm6, %v3583_v27  ;;  %v3585_v20 = vmax.f32 %v3555_v4, 0.0 }
 0xc88   : > { %v3584_v44 = vmax.f32 %v3550_v38, 0.0  ;;  %v8546_v56 = vpop.f32.mrb[62].mxu0 }
 0xc89   : > { %v3565_v26 = vadd.f32 %v8546_v56, %v7381_v11  ;;  %v3559_v37 = vpop.f32.mrb[63].mxu0 }
 0xc8a   : > { %v3560_v47 = vadd.f32 %v7381_v11, %v3559_v37  ;;  %8575 = vmatprep.mubr.msk.f32.mxu0 %vm3602_vm6, %v3584_v44 }
 0xc8b   : > { %8576 = vmatmul.mubr.msk.f32.gmra.mrb[72].mxu0 %vm3602_vm6, %v3585_v20  ;;  %v3587_v24 = vmax.f32 %v3565_v26, 0.0 }
 0xc8c   : > { %v3586_v39 = vmax.f32 %v3560_v47, 0.0  ;;  %v8549_v30 = vpop.f32.mrb[64].mxu0 }
 0xc8d   : > { %v3575_v3 = vadd.f32 %v8549_v30, %v7381_v11  ;;  %v3569_v58 = vpop.f32.mrb[65].mxu0  ;;  %v3972_v30 = vld [vmem:[#allocation13 + $0xe0] sm:$0xff] }
 0xc8e   : > { %v3570_v8 = vadd.f32 %v7381_v11, %v3569_v58  ;;  %8578 = vmatprep.mubr.msk.f32.mxu0 %vm3602_vm6, %v3586_v39 }
 0xc8f   : > { %8579 = vmatmul.mubr.msk.f32.gmra.mrb[74].mxu0 %vm3602_vm6, %v3587_v24  ;;  %v3589_v45 = vmax.f32 %v3575_v3, 0.0  ;;  %v3973_v24 = vld [vmem:[#allocation13 + $0xe8] sm:$0xff] }
 0xc90   : > { %v3588_v46 = vmax.f32 %v3570_v8, 0.0  ;;  %v9220_v3 = vpack.c.bf16 %v3973_v24, %v3972_v30 }
 0xc92   : > { %8581 = vmatprep.mubr.msk.f32.mxu0 %vm3602_vm6, %v3588_v46  ;;  %9221 = vmatprep.subr.bf16.mxu0 %v9220_v3 }
 0xc93   : > { %8582 = vmatmul.mubr.msk.f32.gmra.mrb[76].mxu0 %vm3602_vm6, %v3589_v45 }
 0xc94   : > { %9223 = vmatpush3.bf16.msra.mxu0 %v9220_v3 }
 0xd52   : > { %v8568_v29 = vpop.f32.mrb[66].mxu0 }
 0xd53   : > { %v3711_v31 = vadd.f32 %v8568_v29, %v3601_v10  ;;  %v3705_v35 = vpop.f32.mrb[67].mxu0 }
 0xd54   : > { %v3706_v36 = vadd.f32 %v3705_v35, %v3601_v10 }
 0xd55   : > { %v11838_v13 = vadd.f32 %v3711_v31, %v11746_v2 }
 0xd56   : > { %v8571_v12 = vpop.f32.mrb[68].mxu0  ;;  %v11841_v48 = vadd.f32 %v3706_v36, %v11742_v62 }
 0xd57   : > { %v3721_v11 = vadd.f32 %v8571_v12, %v3601_v10  ;;  %v3715_v9 = vpop.f32.mrb[69].mxu0  ;;  %v3779_v52 = vsel %vm1018_vm2, %v11838_v13, 0.0 }
 0xd58   : > { %v3716_v53 = vadd.f32 %v3715_v9, %v3601_v10  ;;  %3780 = vadd.xlane.f32.xlu0 %v3779_v52  ;;  %v3776_v60 = vsel %vm1018_vm2, %v11841_v48, 0.0 }
 0xd59   : > { %3777 = vadd.xlane.f32.xlu1 %v3776_v60  ;;  %v11848_v5 = vadd.f32 %v3721_v11, %v11761_v15 }
 0xd5a   : > { %v8574_v2 = vpop.f32.mrb[70].mxu0  ;;  %v11851_v17 = vadd.f32 %v3716_v53, %v11756_v43 }
 0xd5b   : > { %v3731_v62 = vadd.f32 %v8574_v2, %v3601_v10  ;;  %v3725_v7 = vpop.f32.mrb[71].mxu0  ;;  %v3785_v34 = vsel %vm1018_vm2, %v11848_v5, 0.0 }
 0xd5c   : > { %v3726_v54 = vadd.f32 %v3725_v7, %v3601_v10  ;;  %3786 = vadd.xlane.f32.xlu0 %v3785_v34  ;;  %v3782_v18 = vsel %vm1018_vm2, %v11851_v17, 0.0 }
 0xd5d   : > { %3783 = vadd.xlane.f32.xlu1 %v3782_v18  ;;  %v11858_v1 = vadd.f32 %v3731_v62, %v11775_v59 }
 0xd5e   : > { %v8577_v15 = vpop.f32.mrb[72].mxu0  ;;  %v11861_v63 = vadd.f32 %v3726_v54, %v11771_v49 }
 0xd5f   : > { %v3741_v43 = vadd.f32 %v8577_v15, %v3601_v10  ;;  %v3735_v6 = vpop.f32.mrb[73].mxu0  ;;  %v3791_v42 = vsel %vm1018_vm2, %v11858_v1, 0.0 }
 0xd60   : > { %v3736_v19 = vadd.f32 %v3735_v6, %v3601_v10  ;;  %3792 = vadd.xlane.f32.xlu0 %v3791_v42  ;;  %v3788_v33 = vsel %vm1018_vm2, %v11861_v63, 0.0 }
 0xd61   : > { %3789 = vadd.xlane.f32.xlu1 %v3788_v33  ;;  %v11868_v16 = vadd.f32 %v3741_v43, %v11789_v22 }
 0xd62   : > { %v8580_v59 = vpop.f32.mrb[74].mxu0  ;;  %v11871_v28 = vadd.f32 %v3736_v19, %v11785_v61 }
 0xd63   : > { %v3751_v49 = vadd.f32 %v8580_v59, %v3601_v10  ;;  %v3745_v32 = vpop.f32.mrb[75].mxu0  ;;  %v3797_v27 = vsel %vm1018_vm2, %v11868_v16, 0.0 }
 0xd64   : > { %v3746_v4 = vadd.f32 %v3745_v32, %v3601_v10  ;;  %3798 = vadd.xlane.f32.xlu0 %v3797_v27  ;;  %v3794_v14 = vsel %vm1018_vm2, %v11871_v28, 0.0 }
 0xd65   : > { %3795 = vadd.xlane.f32.xlu1 %v3794_v14  ;;  %v11878_v38 = vadd.f32 %v3751_v49, %v11803_v23 }
 0xd66   : > { %v8583_v22 = vpop.f32.mrb[76].mxu0  ;;  %v11881_v44 = vadd.f32 %v3746_v4, %v11799_v0 }
 0xd67   : > { %v3761_v61 = vadd.f32 %v8583_v22, %v3601_v10  ;;  %v3755_v56 = vpop.f32.mrb[77].mxu0  ;;  %v3803_v20 = vsel %vm1018_vm2, %v11878_v38, 0.0 }
 0xd68   : > { %v3756_v26 = vadd.f32 %v3755_v56, %v3601_v10  ;;  %3804 = vadd.xlane.f32.xlu0 %v3803_v20  ;;  %v3800_v37 = vsel %vm1018_vm2, %v11881_v44, 0.0 }
 0xd69   : > { %3801 = vadd.xlane.f32.xlu1 %v3800_v37  ;;  %v11888_v47 = vadd.f32 %v3761_v61, %v11815_v41 }
 0xd6a   : > { %v11891_v23 = vadd.f32 %v3756_v26, %v11812_v55 }
 0xd6b   : > { %v3809_v0 = vsel %vm1018_vm2, %v11888_v47, 0.0 }
 0xd6c   : > { %3810 = vadd.xlane.f32.xlu0 %v3809_v0  ;;  %v3806_v39 = vsel %vm1018_vm2, %v11891_v23, 0.0 }
 0xd6d   : > { %3807 = vadd.xlane.f32.xlu1 %v3806_v39 }
 0xde5   : > { %v3781_v58 = vpop.xlane.xlu0 %3780 }
 0xde6   : > { %v3813_v8 = vmul.f32 0.03125, %v3781_v58  ;;  %v3778_v41 = vpop.xlane.xlu1 %3777 }
 0xde7   : > { %v3812_v46 = vmul.f32 0.03125, %v3778_v41 }
 0xde8   : > { %v11898_v55 = vsub.f32 %v11838_v13, %v3813_v8 }
 0xde9   : > { %v11901_v45 = vsub.f32 %v11841_v48, %v3812_v46  ;;  %v3787_v10 = vpop.xlane.xlu0 %3786  ;;  %v3967_v46 = vld [vmem:[#allocation13 + $0xc0] sm:$0xff] }
 0xdea   : > { %v3815_v29 = vmul.f32 0.03125, %v3787_v10  ;;  %v3784_v31 = vpop.xlane.xlu1 %3783  ;;  %v3837_v35 = vmul.f32 %v11898_v55, %v11898_v55  ;;  %v3968_v10 = vld [vmem:[#allocation13 + $0xc8] sm:$0xff] }
 0xdeb   : > { %v3814_v36 = vmul.f32 0.03125, %v3784_v31  ;;  %v3836_v12 = vmul.f32 %v11901_v45, %v11901_v45  ;;  %v3975_v31 = vld [vmem:[#allocation13 + $0xf8] sm:$0xff] }
 0xdec   : > { %v11908_v11 = vsub.f32 %v11848_v5, %v3815_v29  ;;  %v3851_v9 = vsel %vm1018_vm2, %v3837_v35, 0.0  ;;  %v3974_v29 = vld [vmem:[#allocation13 + $0xf0] sm:$0xff] }
 0xded   : > { %v11912_v13 = vsub.f32 %v11851_v17, %v3814_v36  ;;  %v3793_v48 = vpop.xlane.xlu0 %3792  ;;  %3852 = vadd.xlane.f32.xlu0 %v3851_v9  ;;  %v3848_v52 = vsel %vm1018_vm2, %v3836_v12, 0.0  ;;  %v3969_v35 = vld [vmem:[#allocation13 + $0xd0] sm:$0xff]  ;;  %v9224_v36 = vpack.c.bf16 %v3975_v31, %v3974_v29  ;;  %v3970_v12 = vld [vmem:[#allocation13 + $0xd8] sm:$0xff] }
 0xdee   : > { %v3817_v53 = vmul.f32 0.03125, %v3793_v48  ;;  %v3790_v60 = vpop.xlane.xlu1 %3789  ;;  %3849 = vadd.xlane.f32.xlu1 %v3848_v52  ;;  %v3839_v2 = vmul.f32 %v11908_v11, %v11908_v11  ;;  %v9216_v9 = vpack.c.bf16 %v3970_v12, %v3969_v35  ;;  %v3977_v48 = vld [vmem:[#allocation13 + $0x100] sm:$0xff]  ;;  %v3978_v52 = vld [vmem:[#allocation13 + $0x108] sm:$0xff]  ;;  %v3980_v29 = vld [vmem:[#allocation13 + $0x118] sm:$0xff] }
 0xdef   : > { %v3816_v62 = vmul.f32 0.03125, %v3790_v60  ;;  %v3838_v5 = vmul.f32 %v11912_v13, %v11912_v13  ;;  %9225 = vmatprep.subr.bf16.mxu0 %v9224_v36 }
 0xdf0   : > { %v11920_v7 = vsub.f32 %v11858_v1, %v3817_v53  ;;  %v3857_v17 = vsel %vm1018_vm2, %v3839_v2, 0.0  ;;  %9227 = vmatpush3.bf16.msra.mxu0 %v9224_v36  ;;  %v11969_v53 = vpack.c.bf16 %v3978_v52, %v3977_v48 }
 0xdf1   : > { %v11924_v34 = vsub.f32 %v11861_v63, %v3816_v62  ;;  %v3799_v54 = vpop.xlane.xlu0 %3798  ;;  %3858 = vadd.xlane.f32.xlu0 %v3857_v17  ;;  %v3854_v18 = vsel %vm1018_vm2, %v3838_v5, 0.0 }
 0xdf2   : > { %v3819_v15 = vmul.f32 0.03125, %v3799_v54  ;;  %v3796_v43 = vpop.xlane.xlu1 %3795  ;;  %3855 = vadd.xlane.f32.xlu1 %v3854_v18  ;;  %v3841_v6 = vmul.f32 %v11920_v7, %v11920_v7 }
 0xdf3   : > { %v3818_v42 = vmul.f32 0.03125, %v3796_v43  ;;  %v3840_v1 = vmul.f32 %v11924_v34, %v11924_v34 }
 0xdf4   : > { %v11932_v19 = vsub.f32 %v11868_v16, %v3819_v15  ;;  %v3863_v63 = vsel %vm1018_vm2, %v3841_v6, 0.0 }
 0xdf5   : > { %v11936_v33 = vsub.f32 %v11871_v28, %v3818_v42  ;;  %v3805_v59 = vpop.xlane.xlu0 %3804  ;;  %3864 = vadd.xlane.f32.xlu0 %v3863_v63  ;;  %v3860_v49 = vsel %vm1018_vm2, %v3840_v1, 0.0 }
 0xdf6   : > { %v3821_v32 = vmul.f32 0.03125, %v3805_v59  ;;  %v3802_v27 = vpop.xlane.xlu1 %3801  ;;  %3861 = vadd.xlane.f32.xlu1 %v3860_v49  ;;  %v3843_v4 = vmul.f32 %v11932_v19, %v11932_v19 }
 0xdf7   : > { %v3820_v14 = vmul.f32 0.03125, %v3802_v27  ;;  %v3842_v16 = vmul.f32 %v11936_v33, %v11936_v33 }
 0xdf8   : > { %v11944_v22 = vsub.f32 %v11878_v38, %v3821_v32  ;;  %v3869_v28 = vsel %vm1018_vm2, %v3843_v4, 0.0  ;;  %v3934_v32 = vsub.s32 4, %v11581_v50 }
 0xdf9   : > { %v11948_v61 = vsub.f32 %v11881_v44, %v3820_v14  ;;  %3870 = vadd.xlane.f32.xlu0 %v3869_v28  ;;  %v3811_v56 = vpop.xlane.xlu0 %3810  ;;  %v3866_v20 = vsel %vm1018_vm2, %v3842_v16, 0.0  ;;  %v3950_v28 = vsub.s32 5, %v11581_v50 }
 0xdfa   : > { %v3823_v26 = vmul.f32 0.03125, %v3811_v56  ;;  %3867 = vadd.xlane.f32.xlu1 %v3866_v20  ;;  %v3808_v37 = vpop.xlane.xlu1 %3807  ;;  %v3845_v0 = vmul.f32 %v11944_v22, %v11944_v22 }
 0xdfb   : > { %v3822_v39 = vmul.f32 0.03125, %v3808_v37  ;;  %v3844_v38 = vmul.f32 %v11948_v61, %v11948_v61 }
 0xdfc   : > { %v11956_v30 = vsub.f32 %v11888_v47, %v3823_v26  ;;  %v3875_v44 = vsel %vm1018_vm2, %v3845_v0, 0.0  ;;  %v9900_v26 = vld [vmem:[#allocation17] sm:$0x3f] }
 0xdfd   : > { %v11960_v24 = vsub.f32 %v11891_v23, %v3822_v39  ;;  %3876 = vadd.xlane.f32.xlu0 %v3875_v44  ;;  %v3872_v3 = vsel %vm1018_vm2, %v3844_v38, 0.0  ;;  %v9212_v23 = vpack.c.bf16 %v3968_v10, %v3967_v46  ;;  %v11976_v37 = vrot.slane %v9900_v26, %v3934_v32 }
 0xdfe   : > { %3873 = vadd.xlane.f32.xlu1 %v3872_v3  ;;  %v3847_v58 = vmul.f32 %v11956_v30, %v11956_v30 }
 0xdff   : > { %v3846_v8 = vmul.f32 %v11960_v24, %v11960_v24  ;;  %9213 = vmatprep.subr.bf16.mxu1 %v9212_v23 }
 0xe00   : > { %v3881_v41 = vsel %vm1018_vm2, %v3847_v58, 0.0  ;;  %9215 = vmatpush3.bf16.msra.mxu1 %v9212_v23  ;;  %v3979_v23 = vld [vmem:[#allocation13 + $0x110] sm:$0xff] }
 0xe01   : > { %3882 = vadd.xlane.f32.xlu0 %v3881_v41  ;;  %v3878_v47 = vsel %vm1018_vm2, %v3846_v8, 0.0  ;;  %9217 = vmatprep.subr.bf16.mxu1 %v9216_v9  ;;  %v11981_v41 = vrot.slane %v9900_v26, %v3950_v28 }
 0xe02   : > { %3879 = vadd.xlane.f32.xlu1 %v3878_v47 }
 0xe04   : > { %9219 = vmatpush3.bf16.msra.mxu1 %v9216_v9 }
 0xe05   : > { %9229 = vmatprep.subr.bf16.mxu1 %v11969_v53 }
 0xe7a   : > { %v3853_v60 = vpop.xlane.xlu0 %3852 }
 0xe7b   : > { %v3885_v2 = vmul.f32 0.03125, %v3853_v60  ;;  %v3850_v62 = vpop.xlane.xlu1 %3849 }
 0xe7c   : > { %v3884_v5 = vmul.f32 0.03125, %v3850_v62 }
 0xe7d   : > { %v3897_v17 = vadd.f32 1e-05, %v3885_v2  ;;  %v9232_v2 = vpack.c.bf16 %v3980_v29, %v3979_v23 }
 0xe7e   : > { %v3896_v54 = vadd.f32 1e-05, %v3884_v5  ;;  %v3859_v18 = vpop.xlane.xlu0 %3858 }
 0xe7f   : > { %9732 = vrsqrt.f32 %v3897_v17  ;;  %v3887_v15 = vmul.f32 0.03125, %v3859_v18  ;;  %v3856_v43 = vpop.xlane.xlu1 %3855 }
 0xe80   : > { %9734 = vrsqrt.f32 %v3896_v54  ;;  %v3886_v6 = vmul.f32 0.03125, %v3856_v43 }
 0xe81   : > { %v3899_v42 = vadd.f32 1e-05, %v3887_v15 }
 0xe82   : > { %v3898_v1 = vadd.f32 1e-05, %v3886_v6  ;;  %v3865_v63 = vpop.xlane.xlu0 %3864 }
 0xe83   : > { %9736 = vrsqrt.f32 %v3899_v42  ;;  %v3889_v59 = vmul.f32 0.03125, %v3865_v63  ;;  %v3862_v49 = vpop.xlane.xlu1 %3861 }
 0xe84   : > { %9738 = vrsqrt.f32 %v3898_v1  ;;  %v3888_v27 = vmul.f32 0.03125, %v3862_v49 }
 0xe85   : > { %v3901_v4 = vadd.f32 1e-05, %v3889_v59 }
 0xe86   : > { %v3900_v14 = vadd.f32 1e-05, %v3888_v27  ;;  %v3871_v16 = vpop.xlane.xlu0 %3870 }
 0xe87   : > { %9740 = vrsqrt.f32 %v3901_v4  ;;  %v3891_v56 = vmul.f32 0.03125, %v3871_v16  ;;  %v3868_v20 = vpop.xlane.xlu1 %3867 }
 0xe88   : > { %9742 = vrsqrt.f32 %v3900_v14  ;;  %v3890_v0 = vmul.f32 0.03125, %v3868_v20 }
 0xe89   : > { %v9733_v39 = vpop.eup %9732  ;;  %v3903_v38 = vadd.f32 1e-05, %v3891_v56 }
 0xe8a   : > { %v9735_v44 = vpop.eup %9734  ;;  %v3921_v3 = vmul.f32 %v9733_v39, %v11898_v55  ;;  %v3902_v58 = vadd.f32 1e-05, %v3890_v0  ;;  %v3877_v8 = vpop.xlane.xlu0 %3876 }
 0xe8b   : > { %v3920_v47 = vmul.f32 %v9735_v44, %v11901_v45  ;;  %9744 = vrsqrt.f32 %v3903_v38  ;;  %v3893_v46 = vmul.f32 0.03125, %v3877_v8  ;;  %v3874_v10 = vpop.xlane.xlu1 %3873 }
 0xe8c   : > { %v3937_v31 = vmul.f32 %v11976_v37, %v3921_v3  ;;  %9746 = vrsqrt.f32 %v3902_v58  ;;  %v3892_v35 = vmul.f32 0.03125, %v3874_v10 }
 0xe8d   : > { %v9737_v36 = vpop.eup %9736  ;;  %v3936_v55 = vmul.f32 %v11976_v37, %v3920_v47  ;;  %v3905_v12 = vadd.f32 1e-05, %v3893_v46 }
 0xe8e   : > { %v9739_v9 = vpop.eup %9738  ;;  %v3923_v48 = vmul.f32 %v9737_v36, %v11908_v11  ;;  %v3904_v52 = vadd.f32 1e-05, %v3892_v35  ;;  %v3883_v60 = vpop.xlane.xlu0 %3882  ;;  %v11992_v54 = vadd.f32 %v11981_v41, %v3937_v31 }
 0xe8f   : > { %v11988_v45 = vadd.f32 %v11981_v41, %v3936_v55  ;;  %v3922_v62 = vmul.f32 %v9739_v9, %v11912_v13  ;;  %9748 = vrsqrt.f32 %v3905_v12  ;;  %v3895_v5 = vmul.f32 0.03125, %v3883_v60  ;;  %v3880_v17 = vpop.xlane.xlu1 %3879 }
 0xe90   : > { %v3939_v18 = vmul.f32 %v11976_v37, %v3923_v48  ;;  %9750 = vrsqrt.f32 %v3904_v52  ;;  %v3894_v15 = vmul.f32 0.03125, %v3880_v17 }
 0xe91   : > { %v9741_v43 = vpop.eup %9740  ;;  %v3938_v11 = vmul.f32 %v11976_v37, %v3922_v62  ;;  %v3907_v6 = vadd.f32 1e-05, %v3895_v5  ;;  %8592 = vmatprep.mubr.msk.f32.mxu1 %vm1018_vm2, %v11988_v45  ;;  %8618 = vmatprep.mubr.msk.f32.mxu0 %vm1018_vm2, %v11988_v45 }
 0xe92   : > { %v9743_v13 = vpop.eup %9742  ;;  %v3925_v42 = vmul.f32 %v9741_v43, %v11920_v7  ;;  %v3906_v1 = vadd.f32 1e-05, %v3894_v15  ;;  %8593 = vmatmul.mubr.msk.f32.vlgmr.msra.gmra.mrb[90].mxu1 %vm1018_vm2, %v11992_v54  ;;  %8619 = vmatmul.mubr.msk.f32.vlgmr.msra.gmra.mrb[78].mxu0 %vm1018_vm2, %v11992_v54  ;;  %v12011_v49 = vadd.f32 %v11981_v41, %v3939_v18 }
 0xe93   : > { %v12006_v63 = vadd.f32 %v11981_v41, %v3938_v11  ;;  %v3924_v59 = vmul.f32 %v9743_v13, %v11924_v34  ;;  %9752 = vrsqrt.f32 %v3907_v6  ;;  %9231 = vmatpush3.bf16.msra.mxu1 %v11969_v53 }
 0xe94   : > { %v3941_v7 = vmul.f32 %v11976_v37, %v3925_v42  ;;  %9754 = vrsqrt.f32 %v3906_v1  ;;  %9233 = vmatprep.subr.bf16.mxu1 %v9232_v2 }
 0xe95   : > { %v9745_v27 = vpop.eup %9744  ;;  %v3940_v4 = vmul.f32 %v11976_v37, %v3924_v59  ;;  %8595 = vmatprep.mubr.msk.f32.mxu1 %vm1018_vm2, %v12006_v63  ;;  %8621 = vmatprep.mubr.msk.f32.mxu0 %vm1018_vm2, %v12006_v63 }
 0xe96   : > { %v9747_v34 = vpop.eup %9746  ;;  %v3927_v14 = vmul.f32 %v9745_v27, %v11932_v19  ;;  %8596 = vmatmul.mubr.msk.f32.gmra.mrb[92].mxu1 %vm1018_vm2, %v12011_v49  ;;  %8622 = vmatmul.mubr.msk.f32.gmra.mrb[80].mxu0 %vm1018_vm2, %v12011_v49  ;;  %v12029_v56 = vadd.f32 %v11981_v41, %v3941_v7 }
 0xe97   : > { %v12025_v53 = vadd.f32 %v11981_v41, %v3940_v4  ;;  %v3926_v16 = vmul.f32 %v9747_v34, %v11936_v33  ;;  %9235 = vmatpush3.bf16.msra.mxu1 %v9232_v2 }
 0xe98   : > { %v3943_v20 = vmul.f32 %v11976_v37, %v3927_v14 }
 0xe99   : > { %v9749_v26 = vpop.eup %9748  ;;  %v3942_v19 = vmul.f32 %v11976_v37, %v3926_v16  ;;  %8598 = vmatprep.mubr.msk.f32.mxu1 %vm1018_vm2, %v12025_v53  ;;  %8624 = vmatprep.mubr.msk.f32.mxu0 %vm1018_vm2, %v12025_v53 }
 0xe9a   : > { %v9751_v0 = vpop.eup %9750  ;;  %v3929_v39 = vmul.f32 %v9749_v26, %v11944_v22  ;;  %8599 = vmatmul.mubr.msk.f32.gmra.mrb[94].mxu1 %vm1018_vm2, %v12029_v56  ;;  %8625 = vmatmul.mubr.msk.f32.gmra.mrb[82].mxu0 %vm1018_vm2, %v12029_v56  ;;  %v12047_v44 = vadd.f32 %v11981_v41, %v3943_v20 }
 0xe9b   : > { %v12043_v33 = vadd.f32 %v11981_v41, %v3942_v19  ;;  %v3928_v38 = vmul.f32 %v9751_v0, %v11948_v61 }
 0xe9c   : > { %v3945_v3 = vmul.f32 %v11976_v37, %v3929_v39 }
 0xe9d   : > { %v9753_v58 = vpop.eup %9752  ;;  %v3944_v8 = vmul.f32 %v11976_v37, %v3928_v38  ;;  %8601 = vmatprep.mubr.msk.f32.mxu1 %vm1018_vm2, %v12043_v33  ;;  %8627 = vmatprep.mubr.msk.f32.mxu0 %vm1018_vm2, %v12043_v33 }
 0xe9e   : > { %v9755_v22 = vpop.eup %9754  ;;  %v3931_v47 = vmul.f32 %v9753_v58, %v11956_v30  ;;  %8602 = vmatmul.mubr.msk.f32.gmra.mrb[96].mxu1 %vm1018_vm2, %v12047_v44  ;;  %8628 = vmatmul.mubr.msk.f32.gmra.mrb[84].mxu0 %vm1018_vm2, %v12047_v44  ;;  %v12065_v10 = vadd.f32 %v11981_v41, %v3945_v3 }
 0xe9f   : > { %v12061_v61 = vadd.f32 %v11981_v41, %v3944_v8  ;;  %v3930_v46 = vmul.f32 %v9755_v22, %v11960_v24 }
 0xea0   : > { %v3947_v23 = vmul.f32 %v11976_v37, %v3931_v47 }
 0xea1   : > { %v3946_v29 = vmul.f32 %v11976_v37, %v3930_v46  ;;  %8604 = vmatprep.mubr.msk.f32.mxu1 %vm1018_vm2, %v12061_v61  ;;  %8630 = vmatprep.mubr.msk.f32.mxu0 %vm1018_vm2, %v12061_v61  ;;  %v7419_v37 = vld [vmem:[#allocation14 + $0x7] ss:$0 sm:$0xff] }
 0xea2   : > { %8605 = vmatmul.mubr.msk.f32.gmra.mrb[98].mxu1 %vm1018_vm2, %v12065_v10  ;;  %8631 = vmatmul.mubr.msk.f32.gmra.mrb[86].mxu0 %vm1018_vm2, %v12065_v10  ;;  %v12081_v24 = vadd.f32 %v11981_v41, %v3947_v23 }
 0xea3   : > { %v12078_v30 = vadd.f32 %v11981_v41, %v3946_v29  ;;  %v12115_v41 = vld [vmem:[#allocation14 + $0x6] ss:$0 sm:$0xff] }
 0xea5   : > { %8607 = vmatprep.mubr.msk.f32.mxu1 %vm1018_vm2, %v12078_v30  ;;  %8633 = vmatprep.mubr.msk.f32.mxu0 %vm1018_vm2, %v12078_v30 }
 0xea6   : > { %8608 = vmatmul.mubr.msk.f32.gmra.mrb[100].mxu1 %vm1018_vm2, %v12081_v24  ;;  %8634 = vmatmul.mubr.msk.f32.gmra.mrb[88].mxu0 %vm1018_vm2, %v12081_v24 }
 0xea7   : > { %8644 = vmatprep.mubr.msk.f32.mxu1 %vm1018_vm2, %v11988_v45 }
 0xeaa   : > { %8645 = vmatmul.mubr.msk.f32.vlgmr.msra.gmra.mrb[102].mxu1 %vm1018_vm2, %v11992_v54 }
 0xeab   : > { %8647 = vmatprep.mubr.msk.f32.mxu1 %vm1018_vm2, %v12006_v63 }
 0xeae   : > { %8648 = vmatmul.mubr.msk.f32.gmra.mrb[104].mxu1 %vm1018_vm2, %v12011_v49 }
 0xeaf   : > { %8650 = vmatprep.mubr.msk.f32.mxu1 %vm1018_vm2, %v12025_v53 }
 0xeb2   : > { %8651 = vmatmul.mubr.msk.f32.gmra.mrb[106].mxu1 %vm1018_vm2, %v12029_v56 }
 0xeb3   : > { %8653 = vmatprep.mubr.msk.f32.mxu1 %vm1018_vm2, %v12043_v33 }
 0xeb6   : > { %8654 = vmatmul.mubr.msk.f32.gmra.mrb[108].mxu1 %vm1018_vm2, %v12047_v44 }
 0xeb7   : > { %8656 = vmatprep.mubr.msk.f32.mxu1 %vm1018_vm2, %v12061_v61 }
 0xeba   : > { %8657 = vmatmul.mubr.msk.f32.gmra.mrb[110].mxu1 %vm1018_vm2, %v12065_v10 }
 0xebb   : > { %8659 = vmatprep.mubr.msk.f32.mxu1 %vm1018_vm2, %v12078_v30 }
 0xebe   : > { %8660 = vmatmul.mubr.msk.f32.gmra.mrb[112].mxu1 %vm1018_vm2, %v12081_v24 }
 0xf65   : > { %v12117_v31 = vpop.f32.mrb[90].mxu1  ;;  %v8620_v35 = vpop.f32.mrb[78].mxu0 }
 0xf66   : > { %v4232_v36 = vadd.f32 %v8620_v35, %v7419_v37  ;;  %v4095_v55 = vpop.f32.mrb[91].mxu1  ;;  %v4226_v12 = vpop.f32.mrb[79].mxu0 }
 0xf67   : > { %v4096_v9 = vadd.f32 %v12115_v41, %v4095_v55  ;;  %v4227_v48 = vadd.f32 %v7419_v37, %v4226_v12  ;;  %v7432_v12 = vld [vmem:[#allocation14 + $0x8] ss:$0 sm:$0xff] }
 0xf69   : > { %v9236_v52 = vpack.c.bf16 %v4232_v36, %v4227_v48  ;;  %v12120_v60 = vpop.f32.mrb[92].mxu1  ;;  %v8623_v2 = vpop.f32.mrb[80].mxu0  ;;  %8686 = vmatprep.mubr.msk.f32.mxu0 %vm1442_vm3, %v4096_v9 }
 0xf6a   : > { %v4242_v62 = vadd.f32 %v8623_v2, %v7419_v37  ;;  %v12123_v5 = vpop.f32.mrb[93].mxu1  ;;  %v4236_v17 = vpop.f32.mrb[81].mxu0 }
 0xf6b   : > { %v4237_v18 = vadd.f32 %v7419_v37, %v4236_v17  ;;  %9238 = vmatprep.subr.msk.bf16.mxu0 %vm11110_vm4, %v9236_v52 }
 0xf6c   : > { %9241 = vmatpush3.bf16.xpose.msk.msra.mxu0 %vm11110_vm4, %v9236_v52 }
 0xf6d   : > { %v9242_v15 = vpack.c.bf16 %v4242_v62, %v4237_v18  ;;  %v12129_v43 = vpop.f32.mrb[94].mxu1  ;;  %v8626_v11 = vpop.f32.mrb[82].mxu0 }
 0xf6e   : > { %v4252_v6 = vadd.f32 %v8626_v11, %v7419_v37  ;;  %v12131_v13 = vpop.f32.mrb[95].mxu1  ;;  %v4246_v42 = vpop.f32.mrb[83].mxu0 }
 0xf6f   : > { %v4247_v1 = vadd.f32 %v7419_v37, %v4246_v42  ;;  %9244 = vmatprep.subr.msk.bf16.mxu0 %vm11110_vm4, %v9242_v15 }
 0xf71   : > { %v9248_v59 = vpack.c.bf16 %v4252_v6, %v4247_v1  ;;  %v12135_v7 = vpop.f32.mrb[96].mxu1  ;;  %v8629_v27 = vpop.f32.mrb[84].mxu0 }
 0xf72   : > { %v4262_v4 = vadd.f32 %v8629_v27, %v7419_v37  ;;  %v12137_v34 = vpop.f32.mrb[97].mxu1  ;;  %v4256_v14 = vpop.f32.mrb[85].mxu0 }
 0xf73   : > { %v4257_v16 = vadd.f32 %v7419_v37, %v4256_v14 }
 0xf74   : > { %9247 = vmatpush3.bf16.xpose.msk.msra.mxu0 %vm11110_vm4, %v9242_v15 }
 0xf75   : > { %v9254_v20 = vpack.c.bf16 %v4262_v4, %v4257_v16  ;;  %v8606_v26 = vpop.f32.mrb[98].mxu1  ;;  %v8632_v19 = vpop.f32.mrb[86].mxu0  ;;  %9250 = vmatprep.subr.msk.bf16.mxu0 %vm11110_vm4, %v9248_v59 }
 0xf76   : > { %v12144_v0 = vadd.f32 %v8606_v26, %v12115_v41  ;;  %v4272_v39 = vadd.f32 %v8632_v19, %v7419_v37  ;;  %v12146_v38 = vpop.f32.mrb[99].mxu1  ;;  %v4266_v3 = vpop.f32.mrb[87].mxu0 }
 0xf77   : > { %v4267_v58 = vadd.f32 %v7419_v37, %v4266_v3 }
 0xf79   : > { %v9260_v8 = vpack.c.bf16 %v4272_v39, %v4267_v58  ;;  %v8609_v22 = vpop.f32.mrb[100].mxu1  ;;  %v8635_v47 = vpop.f32.mrb[88].mxu0 }
 0xf7a   : > { %v12149_v46 = vadd.f32 %v8609_v22, %v12115_v41  ;;  %v4282_v23 = vadd.f32 %v8635_v47, %v7419_v37  ;;  %v4145_v29 = vpop.f32.mrb[101].mxu1  ;;  %v4276_v35 = vpop.f32.mrb[89].mxu0  ;;  %v4927_v22 = vld [vmem:[#allocation13 + $0x140] sm:$0xff]  ;;  %v4928_v47 = vld [vmem:[#allocation13 + $0x148] sm:$0xff] }
 0xf7b   : > { %v12152_v36 = vadd.f32 %v12115_v41, %v4145_v29  ;;  %v4277_v55 = vadd.f32 %v7419_v37, %v4276_v35 }
 0xf7c   : > { %9253 = vmatpush3.bf16.xpose.msk.msra.mxu0 %vm11110_vm4, %v9248_v59 }
 0xf7d   : > { %v9266_v9 = vpack.c.bf16 %v4282_v23, %v4277_v55  ;;  %v8646_v48 = vpop.f32.mrb[102].mxu1  ;;  %9256 = vmatprep.subr.msk.bf16.mxu0 %vm11110_vm4, %v9254_v20  ;;  %v9304_v55 = vpack.c.bf16 %v4928_v47, %v4927_v22 }
 0xf7e   : > { %v4363_v52 = vadd.f32 %v8646_v48, %v7432_v12  ;;  %v4357_v2 = vpop.f32.mrb[103].mxu1 }
 0xf7f   : > { %v4358_v62 = vadd.f32 %v7432_v12, %v4357_v2 }
 0xf81   : > { %v9272_v17 = vpack.c.bf16 %v4363_v52, %v4358_v62  ;;  %v8649_v18 = vpop.f32.mrb[104].mxu1  ;;  %v4929_v62 = vld [vmem:[#allocation13 + $0x150] sm:$0xff] }
 0xf82   : > { %v4373_v15 = vadd.f32 %v8649_v18, %v7432_v12  ;;  %v4367_v11 = vpop.f32.mrb[105].mxu1  ;;  %v4101_v18 = vadd.f32 %v12117_v31, %v12115_v41  ;;  %v4121_v31 = vadd.f32 %v12129_v43, %v12115_v41 }
 0xf83   : > { %v4368_v6 = vadd.f32 %v7432_v12, %v4367_v11  ;;  %9273 = vmatprep.subr.bf16.mxu1 %v9272_v17  ;;  %v4106_v11 = vadd.f32 %v12115_v41, %v12123_v5  ;;  %v4126_v5 = vadd.f32 %v12115_v41, %v12137_v34 }
 0xf84   : > { %9259 = vmatpush3.bf16.xpose.msk.msra.mxu0 %vm11110_vm4, %v9254_v20  ;;  %9275 = vmatpush3.bf16.msra.mxu1 %v9272_v17  ;;  %v4930_v17 = vld [vmem:[#allocation13 + $0x158] sm:$0xff] }
 0xf85   : > { %v9276_v37 = vpack.c.bf16 %v4373_v15, %v4368_v6  ;;  %v8652_v42 = vpop.f32.mrb[106].mxu1  ;;  %9262 = vmatprep.subr.msk.bf16.mxu0 %vm11110_vm4, %v9260_v8  ;;  %v9308_v15 = vpack.c.bf16 %v4930_v17, %v4929_v62  ;;  %v7494_v17 = vld [vmem:[#allocation14 + $0xa] ss:$0 sm:$0xff] }
 0xf86   : > { %v4383_v1 = vadd.f32 %v8652_v42, %v7432_v12  ;;  %v4377_v59 = vpop.f32.mrb[107].mxu1 }
 0xf87   : > { %v4378_v27 = vadd.f32 %v7432_v12, %v4377_v59  ;;  %9277 = vmatprep.subr.bf16.mxu1 %v9276_v37 }
 0xf88   : > { %9279 = vmatpush3.bf16.msra.mxu1 %v9276_v37 }
 0xf89   : > { %v9280_v4 = vpack.c.bf16 %v4383_v1, %v4378_v27  ;;  %v8655_v14 = vpop.f32.mrb[108].mxu1 }
 0xf8a   : > { %v4393_v16 = vadd.f32 %v8655_v14, %v7432_v12  ;;  %v4387_v26 = vpop.f32.mrb[109].mxu1 }
 0xf8b   : > { %v4388_v19 = vadd.f32 %v7432_v12, %v4387_v26  ;;  %9281 = vmatprep.subr.bf16.mxu1 %v9280_v4 }
 0xf8c   : > { %9265 = vmatpush3.bf16.xpose.msk.msra.mxu0 %vm11110_vm4, %v9260_v8  ;;  %9283 = vmatpush3.bf16.msra.mxu1 %v9280_v4 }
 0xf8d   : > { %v9284_v20 = vpack.c.bf16 %v4393_v16, %v4388_v19  ;;  %v8658_v39 = vpop.f32.mrb[110].mxu1  ;;  %9268 = vmatprep.subr.msk.bf16.mxu0 %vm11110_vm4, %v9266_v9 }
 0xf8e   : > { %v4403_v3 = vadd.f32 %v8658_v39, %v7432_v12  ;;  %v4397_v58 = vpop.f32.mrb[111].mxu1 }
 0xf8f   : > { %v4398_v23 = vadd.f32 %v7432_v12, %v4397_v58  ;;  %9285 = vmatprep.subr.bf16.mxu1 %v9284_v20 }
 0xf90   : > { %9287 = vmatpush3.bf16.msra.mxu1 %v9284_v20 }
 0xf91   : > { %v9288_v29 = vpack.c.bf16 %v4403_v3, %v4398_v23  ;;  %v8661_v35 = vpop.f32.mrb[112].mxu1 }
 0xf92   : > { %v4413_v48 = vadd.f32 %v8661_v35, %v7432_v12  ;;  %v4407_v52 = vpop.f32.mrb[113].mxu1 }
 0xf93   : > { %v4408_v2 = vadd.f32 %v7432_v12, %v4407_v52  ;;  %9289 = vmatprep.subr.bf16.mxu1 %v9288_v29  ;;  %v4111_v12 = vadd.f32 %v12120_v60, %v12115_v41  ;;  %v4131_v60 = vadd.f32 %v12135_v7, %v12115_v41 }
 0xf94   : > { %9271 = vmatpush3.bf16.xpose.msk.msra.mxu0 %vm11110_vm4, %v9266_v9  ;;  %9291 = vmatpush3.bf16.msra.mxu1 %v9288_v29  ;;  %v4116_v9 = vadd.f32 %v12115_v41, %v12131_v13  ;;  %v4136_v13 = vadd.f32 %v12115_v41, %v12146_v38 }
 0xf95   : > { %v9292_v8 = vpack.c.bf16 %v4413_v48, %v4408_v2  ;;  %9305 = vmatprep.subr.bf16.mxu0 %v9304_v55 }
 0xf97   : > { %9293 = vmatprep.subr.bf16.mxu1 %v9292_v8 }
 0xf98   : > { %9295 = vmatpush3.bf16.msra.mxu1 %v9292_v8 }
 0xf9b   : > { %8687 = vmatmul.mubr.msk.f32.vlgmr.msra.gmra.mrb[90].mxu0 %vm1442_vm3, %v4101_v18 }
 0xf9c   : > { %8689 = vmatprep.mubr.msk.f32.mxu0 %vm1442_vm3, %v4106_v11  ;;  %9307 = vmatpush3.bf16.msra.mxu0 %v9304_v55 }
 0xf9d   : > { %9309 = vmatprep.subr.bf16.mxu0 %v9308_v15 }
 0xf9f   : > { %8690 = vmatmul.mubr.msk.f32.gmra.mrb[92].mxu0 %vm1442_vm3, %v4111_v12 }
 0xfa0   : > { %8692 = vmatprep.mubr.msk.f32.mxu0 %vm1442_vm3, %v4116_v9  ;;  %9311 = vmatpush3.bf16.msra.mxu0 %v9308_v15 }
 0xfa3   : > { %8693 = vmatmul.mubr.msk.f32.gmra.mrb[94].mxu0 %vm1442_vm3, %v4121_v31 }
 0xfa4   : > { %8695 = vmatprep.mubr.msk.f32.mxu0 %vm1442_vm3, %v4126_v5 }
 0xfa7   : > { %8696 = vmatmul.mubr.msk.f32.gmra.mrb[96].mxu0 %vm1442_vm3, %v4131_v60 }
 0xfa8   : > { %8698 = vmatprep.mubr.msk.f32.mxu0 %vm1442_vm3, %v4136_v13 }
 0xfab   : > { %8699 = vmatmul.mubr.msk.f32.gmra.mrb[98].mxu0 %vm1442_vm3, %v12144_v0 }
 0xfac   : > { %8701 = vmatprep.mubr.msk.f32.mxu0 %vm1442_vm3, %v12152_v36 }
 0xfaf   : > { %8702 = vmatmul.mubr.msk.f32.gmra.mrb[100].mxu0 %vm1442_vm3, %v12149_v46 }
 0xfb0   : > { %8780 = vmatprep.mubr.msk.f32.mxu0 %vm1018_vm2, %v11988_v45 }
 0xfb3   : > { %8781 = vmatmul.mubr.msk.f32.vlgmr.msra.gmra.mrb[102].mxu0 %vm1018_vm2, %v11992_v54 }
 0xfb4   : > { %8783 = vmatprep.mubr.msk.f32.mxu0 %vm1018_vm2, %v12006_v63 }
 0xfb7   : > { %8784 = vmatmul.mubr.msk.f32.gmra.mrb[104].mxu0 %vm1018_vm2, %v12011_v49 }
 0xfb8   : > { %8786 = vmatprep.mubr.msk.f32.mxu0 %vm1018_vm2, %v12025_v53 }
 0xfbb   : > { %8787 = vmatmul.mubr.msk.f32.gmra.mrb[106].mxu0 %vm1018_vm2, %v12029_v56 }
 0xfbc   : > { %8789 = vmatprep.mubr.msk.f32.mxu0 %vm1018_vm2, %v12043_v33 }
 0xfbf   : > { %8790 = vmatmul.mubr.msk.f32.gmra.mrb[108].mxu0 %vm1018_vm2, %v12047_v44 }
 0xfc0   : > { %8792 = vmatprep.mubr.msk.f32.mxu0 %vm1018_vm2, %v12061_v61 }
 0xfc3   : > { %8793 = vmatmul.mubr.msk.f32.gmra.mrb[110].mxu0 %vm1018_vm2, %v12065_v10 }
 0xfc4   : > { %8795 = vmatprep.mubr.msk.f32.mxu0 %vm1018_vm2, %v12078_v30 }
 0xfc7   : > { %8796 = vmatmul.mubr.msk.f32.gmra.mrb[112].mxu0 %vm1018_vm2, %v12081_v24 }
0x106e   : > { %v8688_v41 = vpop.f32.mrb[90].mxu0 }
0x106f   : > { %v12222_v43 = vmul.f32 0.25, %v8688_v41  ;;  %v4554_v7 = vpop.f32.mrb[91].mxu0 }
0x1070   : > { %v12224_v34 = vmul.f32 0.25, %v4554_v7 }
0x1071   : > { %v4628_v0 = vsel %vm1652_vm5, %v12222_v43, -inf }
0x1072   : > { %4629 = vmax.xlane.f32.xlu0 %v4628_v0  ;;  %v8691_v38 = vpop.f32.mrb[92].mxu0  ;;  %v4625_v46 = vsel %vm1652_vm5, %v12224_v34, -inf }
0x1073   : > { %v12230_v36 = vmul.f32 0.25, %v8691_v38  ;;  %4626 = vmax.xlane.f32.xlu1 %v4625_v46  ;;  %v4564_v6 = vpop.f32.mrb[93].mxu0 }
0x1074   : > { %v12232_v37 = vmul.f32 0.25, %v4564_v6 }
0x1075   : > { %v4634_v42 = vsel %vm1652_vm5, %v12230_v36, -inf }
0x1076   : > { %4635 = vmax.xlane.f32.xlu0 %v4634_v42  ;;  %v8694_v1 = vpop.f32.mrb[94].mxu0  ;;  %v4631_v59 = vsel %vm1652_vm5, %v12232_v37, -inf }
0x1077   : > { %v12238_v27 = vmul.f32 0.25, %v8694_v1  ;;  %4632 = vmax.xlane.f32.xlu1 %v4631_v59  ;;  %v4574_v4 = vpop.f32.mrb[95].mxu0 }
0x1078   : > { %v12240_v14 = vmul.f32 0.25, %v4574_v4 }
0x1079   : > { %v4640_v16 = vsel %vm1652_vm5, %v12238_v27, -inf }
0x107a   : > { %4641 = vmax.xlane.f32.xlu0 %v4640_v16  ;;  %v8697_v26 = vpop.f32.mrb[96].mxu0  ;;  %v4637_v19 = vsel %vm1652_vm5, %v12240_v14, -inf }
0x107b   : > { %v12246_v20 = vmul.f32 0.25, %v8697_v26  ;;  %4638 = vmax.xlane.f32.xlu1 %v4637_v19  ;;  %v4584_v39 = vpop.f32.mrb[97].mxu0 }
0x107c   : > { %v12248_v3 = vmul.f32 0.25, %v4584_v39 }
0x107d   : > { %v4646_v58 = vsel %vm1652_vm5, %v12246_v20, -inf }
0x107e   : > { %4647 = vmax.xlane.f32.xlu0 %v4646_v58  ;;  %v8700_v22 = vpop.f32.mrb[98].mxu0  ;;  %v4643_v47 = vsel %vm1652_vm5, %v12248_v3, -inf }
0x107f   : > { %v12254_v23 = vmul.f32 0.25, %v8700_v22  ;;  %4644 = vmax.xlane.f32.xlu1 %v4643_v47  ;;  %v4594_v29 = vpop.f32.mrb[99].mxu0 }
0x1080   : > { %v12256_v35 = vmul.f32 0.25, %v4594_v29 }
0x1081   : > { %v4652_v55 = vsel %vm1652_vm5, %v12254_v23, -inf }
0x1082   : > { %4653 = vmax.xlane.f32.xlu0 %v4652_v55  ;;  %v8703_v48 = vpop.f32.mrb[100].mxu0  ;;  %v4649_v52 = vsel %vm1652_vm5, %v12256_v35, -inf }
0x1083   : > { %v12262_v2 = vmul.f32 0.25, %v8703_v48  ;;  %4650 = vmax.xlane.f32.xlu1 %v4649_v52  ;;  %v4604_v8 = vpop.f32.mrb[101].mxu0 }
0x1084   : > { %v12264_v62 = vmul.f32 0.25, %v4604_v8 }
0x1085   : > { %v4658_v18 = vsel %vm1652_vm5, %v12262_v2, -inf }
0x1086   : > { %4659 = vmax.xlane.f32.xlu0 %v4658_v18  ;;  %v8782_v15 = vpop.f32.mrb[102].mxu0  ;;  %v4655_v11 = vsel %vm1652_vm5, %v12264_v62, -inf }
0x1087   : > { %v5151_v12 = vadd.f32 %v8782_v15, %v7494_v17  ;;  %v5145_v9 = vpop.f32.mrb[103].mxu0  ;;  %4656 = vmax.xlane.f32.xlu1 %v4655_v11 }
0x1088   : > { %v5146_v31 = vadd.f32 %v7494_v17, %v5145_v9 }
0x108a   : > { %v9320_v5 = vpack.c.bf16 %v5151_v12, %v5146_v31  ;;  %v8785_v60 = vpop.f32.mrb[104].mxu0 }
0x108b   : > { %v5161_v13 = vadd.f32 %v8785_v60, %v7494_v17  ;;  %v5155_v41 = vpop.f32.mrb[105].mxu0 }
0x108c   : > { %v5156_v7 = vadd.f32 %v7494_v17, %v5155_v41  ;;  %9322 = vmatprep.subr.msk.bf16.mxu0 %vm11110_vm4, %v9320_v5 }
0x108d   : > { %9325 = vmatpush3.bf16.xpose.msk.msra.mxu0 %vm11110_vm4, %v9320_v5 }
0x108e   : > { %v9326_v0 = vpack.c.bf16 %v5161_v13, %v5156_v7  ;;  %v8788_v38 = vpop.f32.mrb[106].mxu0 }
0x108f   : > { %v5171_v46 = vadd.f32 %v8788_v38, %v7494_v17  ;;  %v5165_v6 = vpop.f32.mrb[107].mxu0 }
0x1090   : > { %v5166_v42 = vadd.f32 %v7494_v17, %v5165_v6  ;;  %9328 = vmatprep.subr.msk.bf16.mxu0 %vm11110_vm4, %v9326_v0 }
0x1092   : > { %v9332_v1 = vpack.c.bf16 %v5171_v46, %v5166_v42  ;;  %v8791_v59 = vpop.f32.mrb[108].mxu0 }
0x1093   : > { %v5181_v4 = vadd.f32 %v8791_v59, %v7494_v17  ;;  %v5175_v16 = vpop.f32.mrb[109].mxu0 }
0x1094   : > { %v5176_v26 = vadd.f32 %v7494_v17, %v5175_v16 }
0x1095   : > { %9331 = vmatpush3.bf16.xpose.msk.msra.mxu0 %vm11110_vm4, %v9326_v0 }
0x1096   : > { %v9338_v19 = vpack.c.bf16 %v5181_v4, %v5176_v26  ;;  %v8794_v39 = vpop.f32.mrb[110].mxu0  ;;  %9334 = vmatprep.subr.msk.bf16.mxu0 %vm11110_vm4, %v9332_v1 }
0x1097   : > { %v5191_v58 = vadd.f32 %v8794_v39, %v7494_v17  ;;  %v5185_v22 = vpop.f32.mrb[111].mxu0 }
0x1098   : > { %v5186_v47 = vadd.f32 %v7494_v17, %v5185_v22 }
0x109a   : > { %v9344_v29 = vpack.c.bf16 %v5191_v58, %v5186_v47  ;;  %v8797_v55 = vpop.f32.mrb[112].mxu0 }
0x109b   : > { %v5201_v48 = vadd.f32 %v8797_v55, %v7494_v17  ;;  %v5195_v52 = vpop.f32.mrb[113].mxu0 }
0x109c   : > { %v5196_v8 = vadd.f32 %v7494_v17, %v5195_v52 }
0x109d   : > { %9337 = vmatpush3.bf16.xpose.msk.msra.mxu0 %vm11110_vm4, %v9332_v1 }
0x109e   : > { %v9350_v18 = vpack.c.bf16 %v5201_v48, %v5196_v8  ;;  %9340 = vmatprep.subr.msk.bf16.mxu0 %vm11110_vm4, %v9338_v19 }
0x10a5   : > { %9343 = vmatpush3.bf16.xpose.msk.msra.mxu0 %vm11110_vm4, %v9338_v19 }
0x10a6   : > { %9346 = vmatprep.subr.msk.bf16.mxu0 %vm11110_vm4, %v9344_v29 }
0x10ad   : > { %9349 = vmatpush3.bf16.xpose.msk.msra.mxu0 %vm11110_vm4, %v9344_v29 }
0x10ae   : > { %9352 = vmatprep.subr.msk.bf16.mxu0 %vm11110_vm4, %v9350_v18 }
0x10b5   : > { %9355 = vmatpush3.bf16.xpose.msk.msra.mxu0 %vm11110_vm4, %v9350_v18 }
0x10ff   : > { %v4630_v17 = vpop.xlane.xlu0 %4629 }
0x1100   : > { %v4662_v15 = vsub.f32 %v12222_v43, %v4630_v17  ;;  %v4627_v11 = vpop.xlane.xlu1 %4626 }
0x1101   : > { %v4661_v12 = vsub.f32 %v12224_v34, %v4627_v11 }
0x1102   : > { %v4675_v9 = vmul.f32 1.442695, %v4662_v15 }
0x1103   : > { %v4673_v31 = vmul.f32 1.442695, %v4661_v12  ;;  %v4636_v5 = vpop.xlane.xlu0 %4635 }
0x1104   : > { %9756 = vpow2.f32 %v4675_v9  ;;  %v4664_v60 = vsub.f32 %v12230_v36, %v4636_v5  ;;  %v4633_v13 = vpop.xlane.xlu1 %4632 }
0x1105   : > { %9758 = vpow2.f32 %v4673_v31  ;;  %v4663_v41 = vsub.f32 %v12232_v37, %v4633_v13 }
0x1106   : > { %v4679_v7 = vmul.f32 1.442695, %v4664_v60 }
0x1107   : > { %v4677_v0 = vmul.f32 1.442695, %v4663_v41  ;;  %v4642_v25 = vpop.xlane.xlu0 %4641 }
0x1108   : > { %9760 = vpow2.f32 %v4679_v7  ;;  %v4666_v38 = vsub.f32 %v12238_v27, %v4642_v25  ;;  %v4639_v43 = vpop.xlane.xlu1 %4638 }
0x1109   : > { %9762 = vpow2.f32 %v4677_v0  ;;  %v4665_v34 = vsub.f32 %v12240_v14, %v4639_v43 }
0x110a   : > { %v4683_v46 = vmul.f32 1.442695, %v4666_v38 }
0x110b   : > { %v4681_v6 = vmul.f32 1.442695, %v4665_v34  ;;  %v4648_v42 = vpop.xlane.xlu0 %4647  ;;  %v4922_v34 = vld [vmem:[#allocation13 + $0x120] sm:$0xff] }
0x110c   : > { %9764 = vpow2.f32 %v4683_v46  ;;  %v4668_v36 = vsub.f32 %v12246_v20, %v4648_v42  ;;  %v4645_v1 = vpop.xlane.xlu1 %4644  ;;  %v4923_v46 = vld [vmem:[#allocation13 + $0x128] sm:$0xff] }
0x110d   : > { %9766 = vpow2.f32 %v4681_v6  ;;  %v4667_v37 = vsub.f32 %v12248_v3, %v4645_v1  ;;  %v9296_v6 = vpack.c.bf16 %v4923_v46, %v4922_v34 }
0x110e   : > { %v12302_v59 = vpop.eup %9756  ;;  %v4687_v4 = vmul.f32 1.442695, %v4668_v36 }
0x110f   : > { %v12304_v16 = vpop.eup %9758  ;;  %v4685_v27 = vmul.f32 1.442695, %v4667_v37  ;;  %v4654_v26 = vpop.xlane.xlu0 %4653  ;;  %v4700_v14 = vsel %vm1652_vm5, %v12302_v59, 0.0  ;;  %9297 = vmatprep.subr.bf16.mxu1 %v9296_v6 }
0x1110   : > { %9768 = vpow2.f32 %v4687_v4  ;;  %v4670_v19 = vsub.f32 %v12254_v23, %v4654_v26  ;;  %v4651_v39 = vpop.xlane.xlu1 %4650  ;;  %4701 = vadd.xlane.f32.xlu0 %v4700_v14  ;;  %v4697_v20 = vsel %vm1652_vm5, %v12304_v16, 0.0  ;;  %v4924_v14 = vld [vmem:[#allocation13 + $0x130] sm:$0xff] }
0x1111   : > { %9770 = vpow2.f32 %v4685_v27  ;;  %v4669_v3 = vsub.f32 %v12256_v35, %v4651_v39  ;;  %4698 = vadd.xlane.f32.xlu1 %v4697_v20 }
0x1112   : > { %v12312_v58 = vpop.eup %9760  ;;  %v4691_v22 = vmul.f32 1.442695, %v4670_v19  ;;  %v4925_v19 = vld [vmem:[#allocation13 + $0x138] sm:$0xff] }
0x1113   : > { %v12314_v47 = vpop.eup %9762  ;;  %v4689_v29 = vmul.f32 1.442695, %v4669_v3  ;;  %v4660_v55 = vpop.xlane.xlu0 %4659  ;;  %v4706_v48 = vsel %vm1652_vm5, %v12312_v58, 0.0 }
0x1114   : > { %9772 = vpow2.f32 %v4691_v22  ;;  %v4672_v23 = vsub.f32 %v12262_v2, %v4660_v55  ;;  %4707 = vadd.xlane.f32.xlu0 %v4706_v48  ;;  %v4657_v52 = vpop.xlane.xlu1 %4656  ;;  %v4703_v8 = vsel %vm1652_vm5, %v12314_v47, 0.0  ;;  %v9300_v55 = vpack.c.bf16 %v4925_v19, %v4924_v14 }
0x1115   : > { %9774 = vpow2.f32 %v4689_v29  ;;  %v4671_v35 = vsub.f32 %v12264_v62, %v4657_v52  ;;  %4704 = vadd.xlane.f32.xlu1 %v4703_v8  ;;  %v4933_v52 = vld [vmem:[#allocation13 + $0x168] sm:$0xff] }
0x1116   : > { %v12322_v18 = vpop.eup %9764  ;;  %v4695_v17 = vmul.f32 1.442695, %v4672_v23  ;;  %v4932_v23 = vld [vmem:[#allocation13 + $0x160] sm:$0xff] }
0x1117   : > { %v12324_v15 = vpop.eup %9766  ;;  %v4693_v11 = vmul.f32 1.442695, %v4671_v35  ;;  %v4712_v12 = vsel %vm1652_vm5, %v12322_v18, 0.0 }
0x1118   : > { %9776 = vpow2.f32 %v4695_v17  ;;  %4713 = vadd.xlane.f32.xlu0 %v4712_v12  ;;  %v4709_v2 = vsel %vm1652_vm5, %v12324_v15, 0.0 }
0x1119   : > { %9778 = vpow2.f32 %v4693_v11  ;;  %4710 = vadd.xlane.f32.xlu1 %v4709_v2 }
0x111a   : > { %v12330_v9 = vpop.eup %9768 }
0x111b   : > { %v12332_v62 = vpop.eup %9770  ;;  %v4718_v31 = vsel %vm1652_vm5, %v12330_v9, 0.0 }
0x111c   : > { %4719 = vadd.xlane.f32.xlu0 %v4718_v31  ;;  %v4715_v5 = vsel %vm1652_vm5, %v12332_v62, 0.0 }
0x111d   : > { %4716 = vadd.xlane.f32.xlu1 %v4715_v5 }
0x111e   : > { %v12338_v60 = vpop.eup %9772 }
0x111f   : > { %v12340_v13 = vpop.eup %9774  ;;  %v4724_v41 = vsel %vm1652_vm5, %v12338_v60, 0.0 }
0x1120   : > { %4725 = vadd.xlane.f32.xlu0 %v4724_v41  ;;  %v4721_v7 = vsel %vm1652_vm5, %v12340_v13, 0.0 }
0x1121   : > { %4722 = vadd.xlane.f32.xlu1 %v4721_v7 }
0x1122   : > { %v12346_v0 = vpop.eup %9776 }
0x1123   : > { %v12348_v25 = vpop.eup %9778  ;;  %v4730_v38 = vsel %vm1652_vm5, %v12346_v0, 0.0 }
0x1124   : > { %4731 = vadd.xlane.f32.xlu0 %v4730_v38  ;;  %v4727_v43 = vsel %vm1652_vm5, %v12348_v25, 0.0 }
0x1125   : > { %4728 = vadd.xlane.f32.xlu1 %v4727_v43 }
0x119d   : > { %v4702_v42 = vpop.xlane.xlu0 %4701 }
0x119e   : > { %9780 = vrcp.f32 %v4702_v42  ;;  %v4699_v36 = vpop.xlane.xlu1 %4698 }
0x119f   : > { %9782 = vrcp.f32 %v4699_v36  ;;  %v4934_v36 = vld [vmem:[#allocation13 + $0x170] sm:$0xff] }
0x11a1   : > { %v4708_v1 = vpop.xlane.xlu0 %4707 }
0x11a2   : > { %9784 = vrcp.f32 %v4708_v1  ;;  %v4705_v37 = vpop.xlane.xlu1 %4704  ;;  %v4935_v1 = vld [vmem:[#allocation13 + $0x178] sm:$0xff] }
0x11a3   : > { %9786 = vrcp.f32 %v4705_v37 }
0x11a5   : > { %v4714_v4 = vpop.xlane.xlu0 %4713 }
0x11a6   : > { %9788 = vrcp.f32 %v4714_v4  ;;  %v4711_v27 = vpop.xlane.xlu1 %4710 }
0x11a7   : > { %9790 = vrcp.f32 %v4711_v27 }
0x11a8   : > { %v9781_v26 = vpop.eup %9780 }
0x11a9   : > { %v9783_v39 = vpop.eup %9782  ;;  %v4720_v20 = vpop.xlane.xlu0 %4719  ;;  %v4736_v29 = vmul.f32 %v9781_v26, %v12302_v59  ;;  %v9312_v59 = vpack.c.bf16 %v4933_v52, %v4932_v23 }
0x11aa   : > { %9792 = vrcp.f32 %v4720_v20  ;;  %v4717_v3 = vpop.xlane.xlu1 %4716  ;;  %v4734_v22 = vmul.f32 %v9783_v39, %v12304_v16 }
0x11ab   : > { %9794 = vrcp.f32 %v4717_v3 }
0x11ac   : > { %v9785_v48 = vpop.eup %9784  ;;  %8728 = vmatprep.mubr.msk.f32.mxu1 %vm1652_vm5, %v4734_v22  ;;  %v7481_v22 = vld [vmem:[#allocation14 + $0x9] ss:$0 sm:$0xff] }
0x11ad   : > { %v9787_v8 = vpop.eup %9786  ;;  %v4726_v35 = vpop.xlane.xlu0 %4725  ;;  %8729 = vmatmul.mubr.msk.f32.vlgmr.msra.gmra.mrb[114].mxu1 %vm1652_vm5, %v4736_v29  ;;  %v4740_v16 = vmul.f32 %v9785_v48, %v12312_v58 }
0x11ae   : > { %9796 = vrcp.f32 %v4726_v35  ;;  %9299 = vmatpush3.bf16.msra.mxu1 %v9296_v6  ;;  %v4723_v17 = vpop.xlane.xlu1 %4722  ;;  %v4738_v11 = vmul.f32 %v9787_v8, %v12314_v47 }
0x11af   : > { %9798 = vrcp.f32 %v4723_v17  ;;  %9301 = vmatprep.subr.bf16.mxu1 %v9300_v55 }
0x11b0   : > { %v9789_v12 = vpop.eup %9788  ;;  %8731 = vmatprep.mubr.msk.f32.mxu1 %vm1652_vm5, %v4738_v11 }
0x11b1   : > { %v9791_v2 = vpop.eup %9790  ;;  %v4732_v31 = vpop.xlane.xlu0 %4731  ;;  %8732 = vmatmul.mubr.msk.f32.gmra.mrb[116].mxu1 %vm1652_vm5, %v4740_v16  ;;  %v4744_v47 = vmul.f32 %v9789_v12, %v12322_v18 }
0x11b2   : > { %9800 = vrcp.f32 %v4732_v31  ;;  %v4729_v5 = vpop.xlane.xlu1 %4728  ;;  %v4742_v41 = vmul.f32 %v9791_v2, %v12324_v15  ;;  %9303 = vmatpush3.bf16.msra.mxu1 %v9300_v55 }
0x11b3   : > { %9802 = vrcp.f32 %v4729_v5  ;;  %9313 = vmatprep.subr.bf16.mxu1 %v9312_v59 }
0x11b4   : > { %v9793_v7 = vpop.eup %9792  ;;  %8734 = vmatprep.mubr.msk.f32.mxu1 %vm1652_vm5, %v4742_v41 }
0x11b5   : > { %v9795_v58 = vpop.eup %9794  ;;  %8735 = vmatmul.mubr.msk.f32.gmra.mrb[118].mxu1 %vm1652_vm5, %v4744_v47  ;;  %v4748_v43 = vmul.f32 %v9793_v7, %v12330_v9 }
0x11b6   : > { %v4746_v38 = vmul.f32 %v9795_v58, %v12332_v62 }
0x11b8   : > { %v9797_v34 = vpop.eup %9796  ;;  %8737 = vmatprep.mubr.msk.f32.mxu1 %vm1652_vm5, %v4746_v38 }
0x11b9   : > { %v9799_v46 = vpop.eup %9798  ;;  %8738 = vmatmul.mubr.msk.f32.gmra.mrb[120].mxu1 %vm1652_vm5, %v4748_v43  ;;  %v4752_v18 = vmul.f32 %v9797_v34, %v12338_v60  ;;  %v9316_v60 = vpack.c.bf16 %v4935_v1, %v4934_v36 }
0x11ba   : > { %v4750_v15 = vmul.f32 %v9799_v46, %v12340_v13 }
0x11bc   : > { %v9801_v6 = vpop.eup %9800  ;;  %8740 = vmatprep.mubr.msk.f32.mxu1 %vm1652_vm5, %v4750_v15  ;;  %v7507_v15 = vld [vmem:[#allocation14 + $0xb] ss:$0 sm:$0xff] }
0x11bd   : > { %v9803_v42 = vpop.eup %9802  ;;  %8741 = vmatmul.mubr.msk.f32.gmra.mrb[122].mxu1 %vm1652_vm5, %v4752_v18  ;;  %v4756_v9 = vmul.f32 %v9801_v6, %v12346_v0 }
0x11be   : > { %v4754_v62 = vmul.f32 %v9803_v42, %v12348_v25 }
0x11c0   : > { %8743 = vmatprep.mubr.msk.f32.mxu1 %vm1652_vm5, %v4754_v62 }
0x11c1   : > { %8744 = vmatmul.mubr.msk.f32.gmra.mrb[124].mxu1 %vm1652_vm5, %v4756_v9 }
0x11c2   : > { %8754 = vmatprep.mubr.msk.f32.mxu1 %vm1018_vm2, %v11988_v45 }
0x11c5   : > { %8755 = vmatmul.mubr.msk.f32.vlgmr.msra.gmra.mrb[126].mxu1 %vm1018_vm2, %v11992_v54 }
0x11c6   : > { %8757 = vmatprep.mubr.msk.f32.mxu1 %vm1018_vm2, %v12006_v63  ;;  %9315 = vmatpush3.bf16.msra.mxu1 %v9312_v59 }
0x11c7   : > { %9317 = vmatprep.subr.bf16.mxu1 %v9316_v60 }
0x11c9   : > { %8758 = vmatmul.mubr.msk.f32.gmra.mrb[128].mxu1 %vm1018_vm2, %v12011_v49 }
0x11ca   : > { %8760 = vmatprep.mubr.msk.f32.mxu1 %vm1018_vm2, %v12025_v53  ;;  %9319 = vmatpush3.bf16.msra.mxu1 %v9316_v60 }
0x11cd   : > { %8761 = vmatmul.mubr.msk.f32.gmra.mrb[130].mxu1 %vm1018_vm2, %v12029_v56 }
0x11ce   : > { %8763 = vmatprep.mubr.msk.f32.mxu1 %vm1018_vm2, %v12043_v33 }
0x11d1   : > { %8764 = vmatmul.mubr.msk.f32.gmra.mrb[132].mxu1 %vm1018_vm2, %v12047_v44 }
0x11d2   : > { %8766 = vmatprep.mubr.msk.f32.mxu1 %vm1018_vm2, %v12061_v61 }
0x11d5   : > { %8767 = vmatmul.mubr.msk.f32.gmra.mrb[134].mxu1 %vm1018_vm2, %v12065_v10 }
0x11d6   : > { %8769 = vmatprep.mubr.msk.f32.mxu1 %vm1018_vm2, %v12078_v30 }
0x11d9   : > { %8770 = vmatmul.mubr.msk.f32.gmra.mrb[136].mxu1 %vm1018_vm2, %v12081_v24 }
0x11da   : > { %8806 = vmatprep.mubr.msk.f32.mxu1 %vm1018_vm2, %v11988_v45 }
0x11dd   : > { %8807 = vmatmul.mubr.msk.f32.vlgmr.msra.gmra.mrb[138].mxu1 %vm1018_vm2, %v11992_v54 }
0x11de   : > { %8809 = vmatprep.mubr.msk.f32.mxu1 %vm1018_vm2, %v12006_v63 }
0x11e1   : > { %8810 = vmatmul.mubr.msk.f32.gmra.mrb[140].mxu1 %vm1018_vm2, %v12011_v49 }
0x11e2   : > { %8812 = vmatprep.mubr.msk.f32.mxu1 %vm1018_vm2, %v12025_v53 }
0x11e5   : > { %8813 = vmatmul.mubr.msk.f32.gmra.mrb[142].mxu1 %vm1018_vm2, %v12029_v56 }
0x11e6   : > { %8815 = vmatprep.mubr.msk.f32.mxu1 %vm1018_vm2, %v12043_v33 }
0x11e9   : > { %8816 = vmatmul.mubr.msk.f32.gmra.mrb[144].mxu1 %vm1018_vm2, %v12047_v44 }
0x11ea   : > { %8818 = vmatprep.mubr.msk.f32.mxu1 %vm1018_vm2, %v12061_v61 }
0x11ed   : > { %8819 = vmatmul.mubr.msk.f32.gmra.mrb[146].mxu1 %vm1018_vm2, %v12065_v10 }
0x11ee   : > { %8821 = vmatprep.mubr.msk.f32.mxu1 %vm1018_vm2, %v12078_v30 }
0x11f1   : > { %8822 = vmatmul.mubr.msk.f32.gmra.mrb[148].mxu1 %vm1018_vm2, %v12081_v24 }
0x1280   : > { %v12426_v13 = vpop.f32.mrb[114].mxu1 }
0x1281   : > { %v12428_v0 = vpop.f32.mrb[115].mxu1 }
0x1284   : > { %v12430_v25 = vpop.f32.mrb[116].mxu1 }
0x1285   : > { %v12432_v37 = vpop.f32.mrb[117].mxu1 }
0x1288   : > { %v12434_v4 = vpop.f32.mrb[118].mxu1 }
0x1289   : > { %v12436_v27 = vpop.f32.mrb[119].mxu1 }
0x128c   : > { %v12438_v26 = vpop.f32.mrb[120].mxu1 }
0x128d   : > { %v12440_v14 = vpop.f32.mrb[121].mxu1 }
0x1290   : > { %v12442_v19 = vpop.f32.mrb[122].mxu1 }
0x1291   : > { %v12444_v39 = vpop.f32.mrb[123].mxu1 }
0x1294   : > { %v12446_v20 = vpop.f32.mrb[124].mxu1 }
0x1295   : > { %v12448_v3 = vpop.f32.mrb[125].mxu1 }
0x1298   : > { %v8756_v29 = vpop.f32.mrb[126].mxu1 }
0x1299   : > { %v5014_v55 = vpop.f32.mrb[127].mxu1  ;;  %v5020_v23 = vadd.f32 %v8756_v29, %v7481_v22 }
0x129a   : > { %v5015_v48 = vadd.f32 %v7481_v22, %v5014_v55 }
0x129c   : > { %v8759_v52 = vpop.f32.mrb[128].mxu1  ;;  %8848 = vmatprep.mubr.msk.f32.mxu0 %vm1442_vm3, %v5015_v48 }
0x129d   : > { %v5024_v8 = vpop.f32.mrb[129].mxu1  ;;  %8849 = vmatmul.mubr.msk.f32.vlgmr.msra.gmra.mrb[114].mxu0 %vm1442_vm3, %v5020_v23  ;;  %v5030_v17 = vadd.f32 %v8759_v52, %v7481_v22 }
0x129e   : > { %v5025_v35 = vadd.f32 %v7481_v22, %v5024_v8 }
0x12a0   : > { %v8762_v11 = vpop.f32.mrb[130].mxu1  ;;  %8851 = vmatprep.mubr.msk.f32.mxu0 %vm1442_vm3, %v5025_v35 }
0x12a1   : > { %v5034_v16 = vpop.f32.mrb[131].mxu1  ;;  %8852 = vmatmul.mubr.msk.f32.gmra.mrb[116].mxu0 %vm1442_vm3, %v5030_v17  ;;  %v5040_v12 = vadd.f32 %v8762_v11, %v7481_v22 }
0x12a2   : > { %v5035_v59 = vadd.f32 %v7481_v22, %v5034_v16 }
0x12a4   : > { %v8765_v2 = vpop.f32.mrb[132].mxu1  ;;  %8854 = vmatprep.mubr.msk.f32.mxu0 %vm1442_vm3, %v5035_v59 }
0x12a5   : > { %v5044_v31 = vpop.f32.mrb[133].mxu1  ;;  %8855 = vmatmul.mubr.msk.f32.gmra.mrb[118].mxu0 %vm1442_vm3, %v5040_v12  ;;  %v5050_v41 = vadd.f32 %v8765_v2, %v7481_v22 }
0x12a6   : > { %v5045_v5 = vadd.f32 %v7481_v22, %v5044_v31 }
0x12a8   : > { %v8768_v47 = vpop.f32.mrb[134].mxu1  ;;  %8857 = vmatprep.mubr.msk.f32.mxu0 %vm1442_vm3, %v5045_v5 }
0x12a9   : > { %v5054_v7 = vpop.f32.mrb[135].mxu1  ;;  %8858 = vmatmul.mubr.msk.f32.gmra.mrb[120].mxu0 %vm1442_vm3, %v5050_v41  ;;  %v5060_v38 = vadd.f32 %v8768_v47, %v7481_v22 }
0x12aa   : > { %v5055_v58 = vadd.f32 %v7481_v22, %v5054_v7 }
0x12ac   : > { %v8771_v43 = vpop.f32.mrb[136].mxu1  ;;  %8860 = vmatprep.mubr.msk.f32.mxu0 %vm1442_vm3, %v5055_v58 }
0x12ad   : > { %v5064_v34 = vpop.f32.mrb[137].mxu1  ;;  %8861 = vmatmul.mubr.msk.f32.gmra.mrb[122].mxu0 %vm1442_vm3, %v5060_v38  ;;  %v5070_v18 = vadd.f32 %v8771_v43, %v7481_v22 }
0x12ae   : > { %v5065_v46 = vadd.f32 %v7481_v22, %v5064_v34 }
0x12b0   : > { %v8808_v6 = vpop.f32.mrb[138].mxu1  ;;  %8863 = vmatprep.mubr.msk.f32.mxu0 %vm1442_vm3, %v5065_v46 }
0x12b1   : > { %v5282_v42 = vadd.f32 %v8808_v6, %v7507_v15  ;;  %v5276_v62 = vpop.f32.mrb[139].mxu1  ;;  %8864 = vmatmul.mubr.msk.f32.gmra.mrb[124].mxu0 %vm1442_vm3, %v5070_v18 }
0x12b2   : > { %v5277_v9 = vadd.f32 %v7507_v15, %v5276_v62 }
0x12b4   : > { %v9356_v36 = vpack.c.bf16 %v5282_v42, %v5277_v9  ;;  %v8811_v1 = vpop.f32.mrb[140].mxu1 }
0x12b5   : > { %v5292_v60 = vadd.f32 %v8811_v1, %v7507_v15  ;;  %v5286_v29 = vpop.f32.mrb[141].mxu1 }
0x12b6   : > { %v5287_v55 = vadd.f32 %v7507_v15, %v5286_v29  ;;  %9357 = vmatprep.subr.bf16.mxu1 %v9356_v36 }
0x12b7   : > { %9359 = vmatpush3.bf16.msra.mxu1 %v9356_v36 }
0x12b8   : > { %v9360_v48 = vpack.c.bf16 %v5292_v60, %v5287_v55  ;;  %v8814_v23 = vpop.f32.mrb[142].mxu1 }
0x12b9   : > { %v5302_v52 = vadd.f32 %v8814_v23, %v7507_v15  ;;  %v5296_v8 = vpop.f32.mrb[143].mxu1 }
0x12ba   : > { %v5297_v22 = vadd.f32 %v7507_v15, %v5296_v8  ;;  %9361 = vmatprep.subr.bf16.mxu1 %v9360_v48 }
0x12bb   : > { %9363 = vmatpush3.bf16.msra.mxu1 %v9360_v48 }
0x12bc   : > { %v9364_v35 = vpack.c.bf16 %v5302_v52, %v5297_v22  ;;  %v8817_v17 = vpop.f32.mrb[144].mxu1 }
0x12bd   : > { %v5312_v11 = vadd.f32 %v8817_v17, %v7507_v15  ;;  %v5306_v16 = vpop.f32.mrb[145].mxu1 }
0x12be   : > { %v5307_v59 = vadd.f32 %v7507_v15, %v5306_v16  ;;  %9365 = vmatprep.subr.bf16.mxu1 %v9364_v35 }
0x12bf   : > { %9367 = vmatpush3.bf16.msra.mxu1 %v9364_v35 }
0x12c0   : > { %v9368_v12 = vpack.c.bf16 %v5312_v11, %v5307_v59  ;;  %v8820_v2 = vpop.f32.mrb[146].mxu1 }
0x12c1   : > { %v5322_v31 = vadd.f32 %v8820_v2, %v7507_v15  ;;  %v5316_v5 = vpop.f32.mrb[147].mxu1 }
0x12c2   : > { %v5317_v41 = vadd.f32 %v7507_v15, %v5316_v5  ;;  %9369 = vmatprep.subr.bf16.mxu1 %v9368_v12 }
0x12c3   : > { %9371 = vmatpush3.bf16.msra.mxu1 %v9368_v12 }
0x12c4   : > { %v9372_v47 = vpack.c.bf16 %v5322_v31, %v5317_v41  ;;  %v8823_v7 = vpop.f32.mrb[148].mxu1 }
0x12c5   : > { %v5332_v58 = vadd.f32 %v8823_v7, %v7507_v15  ;;  %v5326_v38 = vpop.f32.mrb[149].mxu1 }
0x12c6   : > { %v5327_v43 = vadd.f32 %v7507_v15, %v5326_v38  ;;  %9373 = vmatprep.subr.bf16.mxu1 %v9372_v47 }
0x12c7   : > { %9375 = vmatpush3.bf16.msra.mxu1 %v9372_v47 }
0x12c8   : > { %v9376_v34 = vpack.c.bf16 %v5332_v58, %v5327_v43 }
0x12ca   : > { %9377 = vmatprep.subr.bf16.mxu1 %v9376_v34 }
0x12cb   : > { %9379 = vmatpush3.bf16.msra.mxu1 %v9376_v34 }
0x1370   : > { %v8850_v46 = vpop.f32.mrb[114].mxu0 }
0x1371   : > { %v5533_v18 = vmul.f32 0.25, %v8850_v46  ;;  %v5473_v6 = vpop.f32.mrb[115].mxu0 }
0x1372   : > { %v5532_v42 = vmul.f32 0.25, %v5473_v6 }
0x1373   : > { %v5547_v62 = vsel %vm1652_vm5, %v5533_v18, -inf }
0x1374   : > { %5548 = vmax.xlane.f32.xlu0 %v5547_v62  ;;  %v8853_v9 = vpop.f32.mrb[116].mxu0  ;;  %v5544_v36 = vsel %vm1652_vm5, %v5532_v42, -inf }
0x1375   : > { %v5535_v1 = vmul.f32 0.25, %v8853_v9  ;;  %5545 = vmax.xlane.f32.xlu1 %v5544_v36  ;;  %v5483_v60 = vpop.f32.mrb[117].mxu0 }
0x1376   : > { %v5534_v29 = vmul.f32 0.25, %v5483_v60 }
0x1377   : > { %v5553_v15 = vsel %vm1652_vm5, %v5535_v1, -inf }
0x1378   : > { %5554 = vmax.xlane.f32.xlu0 %v5553_v15  ;;  %v8856_v55 = vpop.f32.mrb[118].mxu0  ;;  %v5550_v48 = vsel %vm1652_vm5, %v5534_v29, -inf }
0x1379   : > { %v5537_v23 = vmul.f32 0.25, %v8856_v55  ;;  %5551 = vmax.xlane.f32.xlu1 %v5550_v48  ;;  %v5493_v52 = vpop.f32.mrb[119].mxu0 }
0x137a   : > { %v5536_v8 = vmul.f32 0.25, %v5493_v52 }
0x137b   : > { %v5559_v22 = vsel %vm1652_vm5, %v5537_v23, -inf }
0x137c   : > { %5560 = vmax.xlane.f32.xlu0 %v5559_v22  ;;  %v8859_v35 = vpop.f32.mrb[120].mxu0  ;;  %v5556_v17 = vsel %vm1652_vm5, %v5536_v8, -inf }
0x137d   : > { %v5539_v11 = vmul.f32 0.25, %v8859_v35  ;;  %5557 = vmax.xlane.f32.xlu1 %v5556_v17  ;;  %v5503_v16 = vpop.f32.mrb[121].mxu0 }
0x137e   : > { %v5538_v59 = vmul.f32 0.25, %v5503_v16 }
0x137f   : > { %v5565_v12 = vsel %vm1652_vm5, %v5539_v11, -inf }
0x1380   : > { %5566 = vmax.xlane.f32.xlu0 %v5565_v12  ;;  %v8862_v2 = vpop.f32.mrb[122].mxu0  ;;  %v5562_v31 = vsel %vm1652_vm5, %v5538_v59, -inf }
0x1381   : > { %v5541_v5 = vmul.f32 0.25, %v8862_v2  ;;  %5563 = vmax.xlane.f32.xlu1 %v5562_v31  ;;  %v5513_v41 = vpop.f32.mrb[123].mxu0 }
0x1382   : > { %v5540_v47 = vmul.f32 0.25, %v5513_v41 }
0x1383   : > { %v5571_v7 = vsel %vm1652_vm5, %v5541_v5, -inf }
0x1384   : > { %5572 = vmax.xlane.f32.xlu0 %v5571_v7  ;;  %v8865_v58 = vpop.f32.mrb[124].mxu0  ;;  %v5568_v38 = vsel %vm1652_vm5, %v5540_v47, -inf }
0x1385   : > { %v12472_v43 = vmul.f32 0.25, %v8865_v58  ;;  %5569 = vmax.xlane.f32.xlu1 %v5568_v38  ;;  %v5523_v34 = vpop.f32.mrb[125].mxu0 }
0x1386   : > { %v12474_v46 = vmul.f32 0.25, %v5523_v34 }
0x1387   : > { %v5577_v6 = vsel %vm1652_vm5, %v12472_v43, -inf }
0x1388   : > { %5578 = vmax.xlane.f32.xlu0 %v5577_v6  ;;  %v5574_v62 = vsel %vm1652_vm5, %v12474_v46, -inf }
0x1389   : > { %5575 = vmax.xlane.f32.xlu1 %v5574_v62 }
0x1401   : > { %v5549_v9 = vpop.xlane.xlu0 %5548 }
0x1402   : > { %v5581_v36 = vsub.f32 %v5533_v18, %v5549_v9  ;;  %v5546_v60 = vpop.xlane.xlu1 %5545 }
0x1403   : > { %v5580_v15 = vsub.f32 %v5532_v42, %v5546_v60 }
0x1404   : > { %v5594_v55 = vmul.f32 1.442695, %v5581_v36 }
0x1405   : > { %v5592_v48 = vmul.f32 1.442695, %v5580_v15  ;;  %v5555_v52 = vpop.xlane.xlu0 %5554 }
0x1406   : > { %9804 = vpow2.f32 %v5594_v55  ;;  %v5583_v22 = vsub.f32 %v5535_v1, %v5555_v52  ;;  %v5552_v35 = vpop.xlane.xlu1 %5551 }
0x1407   : > { %9806 = vpow2.f32 %v5592_v48  ;;  %v5582_v17 = vsub.f32 %v5534_v29, %v5552_v35 }
0x1408   : > { %v5598_v16 = vmul.f32 1.442695, %v5583_v22 }
0x1409   : > { %v5596_v12 = vmul.f32 1.442695, %v5582_v17  ;;  %v5561_v2 = vpop.xlane.xlu0 %5560 }
0x140a   : > { %9808 = vpow2.f32 %v5598_v16  ;;  %v5585_v31 = vsub.f32 %v5537_v23, %v5561_v2  ;;  %v5558_v41 = vpop.xlane.xlu1 %5557 }
0x140b   : > { %9810 = vpow2.f32 %v5596_v12  ;;  %v5584_v7 = vsub.f32 %v5536_v8, %v5558_v41 }
0x140c   : > { %v5602_v58 = vmul.f32 1.442695, %v5585_v31 }
0x140d   : > { %v5600_v18 = vmul.f32 1.442695, %v5584_v7  ;;  %v5567_v38 = vpop.xlane.xlu0 %5566 }
0x140e   : > { %9812 = vpow2.f32 %v5602_v58  ;;  %v5587_v42 = vsub.f32 %v5539_v11, %v5567_v38  ;;  %v5564_v34 = vpop.xlane.xlu1 %5563 }
0x140f   : > { %9814 = vpow2.f32 %v5600_v18  ;;  %v5586_v6 = vsub.f32 %v5538_v59, %v5564_v34 }
0x1410   : > { %v12480_v1 = vpop.eup %9804  ;;  %v5606_v62 = vmul.f32 1.442695, %v5587_v42 }
0x1411   : > { %v12482_v29 = vpop.eup %9806  ;;  %v5604_v9 = vmul.f32 1.442695, %v5586_v6  ;;  %v5573_v36 = vpop.xlane.xlu0 %5572  ;;  %v5619_v23 = vsel %vm1652_vm5, %v12480_v1, 0.0 }
0x1412   : > { %9816 = vpow2.f32 %v5606_v62  ;;  %v5589_v8 = vsub.f32 %v5541_v5, %v5573_v36  ;;  %v5570_v60 = vpop.xlane.xlu1 %5569  ;;  %5620 = vadd.xlane.f32.xlu0 %v5619_v23  ;;  %v5616_v11 = vsel %vm1652_vm5, %v12482_v29, 0.0 }
0x1413   : > { %9818 = vpow2.f32 %v5604_v9  ;;  %v5588_v15 = vsub.f32 %v5540_v47, %v5570_v60  ;;  %5617 = vadd.xlane.f32.xlu1 %v5616_v11  ;;  %v5838_v60 = vld [vmem:[#allocation16 + $0x30] sm:$0xff]  ;;  %v5839_v11 = vld [vmem:[#allocation16 + $0x38] sm:$0xff] }
0x1414   : > { %v12488_v59 = vpop.eup %9808  ;;  %v5610_v55 = vmul.f32 1.442695, %v5589_v8 }
0x1415   : > { %v12490_v48 = vpop.eup %9810  ;;  %v5608_v52 = vmul.f32 1.442695, %v5588_v15  ;;  %v5579_v22 = vpop.xlane.xlu0 %5578  ;;  %v5625_v35 = vsel %vm1652_vm5, %v12488_v59, 0.0  ;;  %v9380_v15 = vpack.c.bf16 %v5839_v11, %v5838_v60 }
0x1416   : > { %9820 = vpow2.f32 %v5610_v55  ;;  %v5591_v5 = vsub.f32 %v12472_v43, %v5579_v22  ;;  %5626 = vadd.xlane.f32.xlu0 %v5625_v35  ;;  %v5576_v17 = vpop.xlane.xlu1 %5575  ;;  %v5622_v16 = vsel %vm1652_vm5, %v12490_v48, 0.0 }
0x1417   : > { %9822 = vpow2.f32 %v5608_v52  ;;  %v5590_v47 = vsub.f32 %v12474_v46, %v5576_v17  ;;  %5623 = vadd.xlane.f32.xlu1 %v5622_v16  ;;  %9381 = vmatprep.subr.bf16.mxu1 %v9380_v15 }
0x1418   : > { %v12498_v12 = vpop.eup %9812  ;;  %v5614_v2 = vmul.f32 1.442695, %v5591_v5 }
0x1419   : > { %v12500_v31 = vpop.eup %9814  ;;  %v5612_v41 = vmul.f32 1.442695, %v5590_v47  ;;  %v5631_v7 = vsel %vm1652_vm5, %v12498_v12, 0.0 }
0x141a   : > { %9824 = vpow2.f32 %v5614_v2  ;;  %5632 = vadd.xlane.f32.xlu0 %v5631_v7  ;;  %v5628_v43 = vsel %vm1652_vm5, %v12500_v31, 0.0 }
0x141b   : > { %9826 = vpow2.f32 %v5612_v41  ;;  %5629 = vadd.xlane.f32.xlu1 %v5628_v43 }
0x141c   : > { %v12506_v58 = vpop.eup %9816 }
0x141d   : > { %v12508_v46 = vpop.eup %9818  ;;  %v5637_v18 = vsel %vm1652_vm5, %v12506_v58, 0.0 }
0x141e   : > { %5638 = vadd.xlane.f32.xlu0 %v5637_v18  ;;  %v5634_v38 = vsel %vm1652_vm5, %v12508_v46, 0.0 }
0x141f   : > { %5635 = vadd.xlane.f32.xlu1 %v5634_v38 }
0x1420   : > { %v12514_v42 = vpop.eup %9820 }
0x1421   : > { %v12516_v34 = vpop.eup %9822  ;;  %v5643_v6 = vsel %vm1652_vm5, %v12514_v42, 0.0 }
0x1422   : > { %5644 = vadd.xlane.f32.xlu0 %v5643_v6  ;;  %v5640_v62 = vsel %vm1652_vm5, %v12516_v34, 0.0 }
0x1423   : > { %5641 = vadd.xlane.f32.xlu1 %v5640_v62 }
0x1424   : > { %v12522_v9 = vpop.eup %9824 }
0x1425   : > { %v12524_v36 = vpop.eup %9826  ;;  %v5649_v23 = vsel %vm1652_vm5, %v12522_v9, 0.0 }
0x1426   : > { %5650 = vadd.xlane.f32.xlu0 %v5649_v23  ;;  %v5646_v8 = vsel %vm1652_vm5, %v12524_v36, 0.0 }
0x1427   : > { %5647 = vadd.xlane.f32.xlu1 %v5646_v8 }
0x149f   : > { %v5621_v55 = vpop.xlane.xlu0 %5620 }
0x14a0   : > { %9828 = vrcp.f32 %v5621_v55  ;;  %v5618_v52 = vpop.xlane.xlu1 %5617 }
0x14a1   : > { %9830 = vrcp.f32 %v5618_v52 }
0x14a3   : > { %v5627_v22 = vpop.xlane.xlu0 %5626 }
0x14a4   : > { %9832 = vrcp.f32 %v5627_v22  ;;  %v5624_v35 = vpop.xlane.xlu1 %5623 }
0x14a5   : > { %9834 = vrcp.f32 %v5624_v35 }
0x14a7   : > { %v5633_v5 = vpop.xlane.xlu0 %5632 }
0x14a8   : > { %9836 = vrcp.f32 %v5633_v5  ;;  %v5630_v17 = vpop.xlane.xlu1 %5629 }
0x14a9   : > { %9838 = vrcp.f32 %v5630_v17 }
0x14aa   : > { %v9829_v16 = vpop.eup %9828 }
0x14ab   : > { %v9831_v47 = vpop.eup %9830  ;;  %v5639_v2 = vpop.xlane.xlu0 %5638  ;;  %v5655_v43 = vmul.f32 %v9829_v16, %v12480_v1 }
0x14ac   : > { %9840 = vrcp.f32 %v5639_v2  ;;  %v5636_v41 = vpop.xlane.xlu1 %5635  ;;  %v5653_v7 = vmul.f32 %v9831_v47, %v12482_v29  ;;  %v4919_v47 = vld [vmem:[#allocation16 + $0x20] sm:$0xff]  ;;  %v4920_v2 = vld [vmem:[#allocation16 + $0x28] sm:$0xff] }
0x14ad   : > { %9842 = vrcp.f32 %v5636_v41  ;;  %v9384_v41 = vpack.c.bf16 %v4920_v2, %v4919_v47 }
0x14ae   : > { %v9833_v18 = vpop.eup %9832  ;;  %8890 = vmatprep.mubr.msk.f32.mxu1 %vm1652_vm5, %v5653_v7 }
0x14af   : > { %v9835_v38 = vpop.eup %9834  ;;  %v5645_v6 = vpop.xlane.xlu0 %5644  ;;  %8891 = vmatmul.mubr.msk.f32.vlgmr.msra.gmra.mrb[150].mxu1 %vm1652_vm5, %v5655_v43  ;;  %v5659_v8 = vmul.f32 %v9833_v18, %v12488_v59 }
0x14b0   : > { %9844 = vrcp.f32 %v5645_v6  ;;  %v5642_v62 = vpop.xlane.xlu1 %5641  ;;  %v5657_v23 = vmul.f32 %v9835_v38, %v12490_v48  ;;  %9383 = vmatpush3.bf16.msra.mxu1 %v9380_v15 }
0x14b1   : > { %9846 = vrcp.f32 %v5642_v62  ;;  %9385 = vmatprep.subr.bf16.mxu1 %v9384_v41 }
0x14b2   : > { %v9837_v60 = vpop.eup %9836  ;;  %8893 = vmatprep.mubr.msk.f32.mxu1 %vm1652_vm5, %v5657_v23 }
0x14b3   : > { %v9839_v1 = vpop.eup %9838  ;;  %v5651_v29 = vpop.xlane.xlu0 %5650  ;;  %8894 = vmatmul.mubr.msk.f32.gmra.mrb[152].mxu1 %vm1652_vm5, %v5659_v8  ;;  %v5663_v52 = vmul.f32 %v9837_v60, %v12498_v12 }
0x14b4   : > { %9848 = vrcp.f32 %v5651_v29  ;;  %v5648_v11 = vpop.xlane.xlu1 %5647  ;;  %v5661_v55 = vmul.f32 %v9839_v1, %v12500_v31 }
0x14b5   : > { %9850 = vrcp.f32 %v5648_v11 }
0x14b6   : > { %v9841_v22 = vpop.eup %9840  ;;  %8896 = vmatprep.mubr.msk.f32.mxu1 %vm1652_vm5, %v5661_v55 }
0x14b7   : > { %v9843_v48 = vpop.eup %9842  ;;  %8897 = vmatmul.mubr.msk.f32.gmra.mrb[154].mxu1 %vm1652_vm5, %v5663_v52  ;;  %v5667_v15 = vmul.f32 %v9841_v22, %v12506_v58 }
0x14b8   : > { %v5665_v59 = vmul.f32 %v9843_v48, %v12508_v46 }
0x14ba   : > { %v9845_v35 = vpop.eup %9844  ;;  %8899 = vmatprep.mubr.msk.f32.mxu1 %vm1652_vm5, %v5665_v59 }
0x14bb   : > { %v9847_v5 = vpop.eup %9846  ;;  %8900 = vmatmul.mubr.msk.f32.gmra.mrb[156].mxu1 %vm1652_vm5, %v5667_v15  ;;  %v5671_v12 = vmul.f32 %v9845_v35, %v12514_v42 }
0x14bc   : > { %v5669_v31 = vmul.f32 %v9847_v5, %v12516_v34 }
0x14be   : > { %v9849_v17 = vpop.eup %9848  ;;  %8902 = vmatprep.mubr.msk.f32.mxu1 %vm1652_vm5, %v5669_v31 }
0x14bf   : > { %v9851_v16 = vpop.eup %9850  ;;  %8903 = vmatmul.mubr.msk.f32.gmra.mrb[158].mxu1 %vm1652_vm5, %v5671_v12  ;;  %v5675_v58 = vmul.f32 %v9849_v17, %v12522_v9 }
0x14c0   : > { %v5673_v46 = vmul.f32 %v9851_v16, %v12524_v36 }
0x14c2   : > { %8905 = vmatprep.mubr.msk.f32.mxu1 %vm1652_vm5, %v5673_v46 }
0x14c3   : > { %8906 = vmatmul.mubr.msk.f32.gmra.mrb[160].mxu1 %vm1652_vm5, %v5675_v58 }
0x1582   : > { %v8892_v34 = vpop.f32.mrb[150].mxu1 }
0x1583   : > { %v5778_v42 = vpop.f32.mrb[151].mxu1 }
0x1584   : > { %8912 = vmatprep.mubr.msk.f32.mxu1 %vm1442_vm3, %v5778_v42 }
0x1585   : > { %8913 = vmatmul.mubr.msk.f32.vlgmr.msra.gmra.mrb[162].mxu1 %vm1442_vm3, %v8892_v34 }
0x1586   : > { %9387 = vmatpush3.bf16.msra.mxu1 %v9384_v41  ;;  %v8895_v7 = vpop.f32.mrb[152].mxu1 }
0x1587   : > { %v5788_v43 = vpop.f32.mrb[153].mxu1 }
0x1588   : > { %8915 = vmatprep.mubr.msk.f32.mxu1 %vm1442_vm3, %v5788_v43 }
0x1589   : > { %8916 = vmatmul.mubr.msk.f32.gmra.mrb[164].mxu1 %vm1442_vm3, %v8895_v7 }
0x158a   : > { %v8898_v9 = vpop.f32.mrb[154].mxu1 }
0x158b   : > { %v5798_v36 = vpop.f32.mrb[155].mxu1 }
0x158c   : > { %8918 = vmatprep.mubr.msk.f32.mxu1 %vm1442_vm3, %v5798_v36  ;;  %v6379_v36 = vld [vmem:[#allocation19 + $0x20] sm:$0xff] }
0x158d   : > { %8919 = vmatmul.mubr.msk.f32.gmra.mrb[166].mxu1 %vm1442_vm3, %v8898_v9 }
0x158e   : > { %v8901_v18 = vpop.f32.mrb[156].mxu1 }
0x158f   : > { %v5808_v38 = vpop.f32.mrb[157].mxu1 }
0x1590   : > { %8921 = vmatprep.mubr.msk.f32.mxu1 %vm1442_vm3, %v5808_v38 }
0x1591   : > { %8922 = vmatmul.mubr.msk.f32.gmra.mrb[168].mxu1 %vm1442_vm3, %v8901_v18  ;;  %v6380_v18 = vld [vmem:[#allocation19 + $0x28] sm:$0xff] }
0x1592   : > { %v8904_v6 = vpop.f32.mrb[158].mxu1 }
0x1593   : > { %v5818_v62 = vpop.f32.mrb[159].mxu1 }
0x1594   : > { %8924 = vmatprep.mubr.msk.f32.mxu1 %vm1442_vm3, %v5818_v62 }
0x1595   : > { %8925 = vmatmul.mubr.msk.f32.gmra.mrb[170].mxu1 %vm1442_vm3, %v8904_v6 }
0x1596   : > { %v8907_v23 = vpop.f32.mrb[160].mxu1 }
0x1597   : > { %v5828_v8 = vpop.f32.mrb[161].mxu1 }
0x1598   : > { %8927 = vmatprep.mubr.msk.f32.mxu1 %vm1442_vm3, %v5828_v8 }
0x1599   : > { %8928 = vmatmul.mubr.msk.f32.gmra.mrb[172].mxu1 %vm1442_vm3, %v8907_v23 }
0x159a   : > { %8934 = vmatprep.mubr.msk.f32.mxu1 %vm1442_vm3, %v12428_v0 }
0x159d   : > { %8935 = vmatmul.mubr.msk.f32.vlgmr.msra.gmra.mrb[162].mxu1 %vm1442_vm3, %v12426_v13  ;;  %v12590_v13 = vld [vmem:[#allocation17 + $0x8] sm:$0x3f] }
0x159e   : > { %8937 = vmatprep.mubr.msk.f32.mxu1 %vm1442_vm3, %v12432_v37  ;;  %v6177_v0 = vrot.slane %v12590_v13, %v3203_v57 }
0x15a1   : > { %8938 = vmatmul.mubr.msk.f32.gmra.mrb[164].mxu1 %vm1442_vm3, %v12430_v25 }
0x15a2   : > { %8940 = vmatprep.mubr.msk.f32.mxu1 %vm1442_vm3, %v12436_v27 }
0x15a5   : > { %8941 = vmatmul.mubr.msk.f32.gmra.mrb[166].mxu1 %vm1442_vm3, %v12434_v4 }
0x15a6   : > { %8943 = vmatprep.mubr.msk.f32.mxu1 %vm1442_vm3, %v12440_v14 }
0x15a9   : > { %8944 = vmatmul.mubr.msk.f32.gmra.mrb[168].mxu1 %vm1442_vm3, %v12438_v26 }
0x15aa   : > { %8946 = vmatprep.mubr.msk.f32.mxu1 %vm1442_vm3, %v12444_v39 }
0x15ad   : > { %8947 = vmatmul.mubr.msk.f32.gmra.mrb[170].mxu1 %vm1442_vm3, %v12442_v19 }
0x15ae   : > { %8949 = vmatprep.mubr.msk.f32.mxu1 %vm1442_vm3, %v12448_v3 }
0x15b1   : > { %8950 = vmatmul.mubr.msk.f32.gmra.mrb[172].mxu1 %vm1442_vm3, %v12446_v20 }
0x1670   : > { %v8936_v25 = vpop.f32.mrb[162].mxu1 }
0x1671   : > { %v6163_v37 = vadd.f32 %v8936_v25, %v11992_v54  ;;  %v6103_v4 = vpop.f32.mrb[163].mxu1 }
0x1672   : > { %v6162_v27 = vadd.f32 %v6103_v4, %v11988_v45 }
0x1673   : > { %v12597_v26 = vadd.f32 %v6177_v0, %v6163_v37 }
0x1674   : > { %v12599_v14 = vadd.f32 %v6177_v0, %v6162_v27  ;;  %v8939_v19 = vpop.f32.mrb[164].mxu1 }
0x1675   : > { %v6165_v39 = vadd.f32 %v8939_v19, %v12011_v49  ;;  %v6113_v20 = vpop.f32.mrb[165].mxu1  ;;  %v6193_v3 = vsel %vm1018_vm2, %v12597_v26, 0.0 }
0x1676   : > { %v6164_v60 = vadd.f32 %v6113_v20, %v12006_v63  ;;  %6194 = vadd.xlane.f32.xlu0 %v6193_v3  ;;  %v6190_v57 = vsel %vm1018_vm2, %v12599_v14, 0.0 }
0x1677   : > { %v12607_v54 = vadd.f32 %v6177_v0, %v6165_v39  ;;  %6191 = vadd.xlane.f32.xlu1 %v6190_v57 }
0x1678   : > { %v12609_v45 = vadd.f32 %v6177_v0, %v6164_v60  ;;  %v8942_v1 = vpop.f32.mrb[166].mxu1 }
0x1679   : > { %v6167_v29 = vadd.f32 %v8942_v1, %v12029_v56  ;;  %v6123_v11 = vpop.f32.mrb[167].mxu1  ;;  %v6199_v49 = vsel %vm1018_vm2, %v12607_v54, 0.0 }
0x167a   : > { %v6166_v55 = vadd.f32 %v6123_v11, %v12025_v53  ;;  %6200 = vadd.xlane.f32.xlu0 %v6199_v49  ;;  %v6196_v63 = vsel %vm1018_vm2, %v12609_v45, 0.0 }
0x167b   : > { %v12617_v52 = vadd.f32 %v6177_v0, %v6167_v29  ;;  %6197 = vadd.xlane.f32.xlu1 %v6196_v63 }
0x167c   : > { %v12619_v22 = vadd.f32 %v6177_v0, %v6166_v55  ;;  %v8945_v48 = vpop.f32.mrb[168].mxu1 }
0x167d   : > { %v6169_v59 = vadd.f32 %v8945_v48, %v12047_v44  ;;  %v6133_v15 = vpop.f32.mrb[169].mxu1  ;;  %v6205_v56 = vsel %vm1018_vm2, %v12617_v52, 0.0 }
0x167e   : > { %v6168_v35 = vadd.f32 %v6133_v15, %v12043_v33  ;;  %6206 = vadd.xlane.f32.xlu0 %v6205_v56  ;;  %v6202_v53 = vsel %vm1018_vm2, %v12619_v22, 0.0 }
0x167f   : > { %v12627_v5 = vadd.f32 %v6177_v0, %v6169_v59  ;;  %6203 = vadd.xlane.f32.xlu1 %v6202_v53 }
0x1680   : > { %v12629_v31 = vadd.f32 %v6177_v0, %v6168_v35  ;;  %v8948_v12 = vpop.f32.mrb[170].mxu1 }
0x1681   : > { %v6171_v17 = vadd.f32 %v8948_v12, %v12065_v10  ;;  %v6143_v16 = vpop.f32.mrb[171].mxu1  ;;  %v6211_v44 = vsel %vm1018_vm2, %v12627_v5, 0.0 }
0x1682   : > { %v6170_v46 = vadd.f32 %v6143_v16, %v12061_v61  ;;  %6212 = vadd.xlane.f32.xlu0 %v6211_v44  ;;  %v6208_v33 = vsel %vm1018_vm2, %v12629_v31, 0.0 }
0x1683   : > { %v12637_v58 = vadd.f32 %v6177_v0, %v6171_v17  ;;  %6209 = vadd.xlane.f32.xlu1 %v6208_v33 }
0x1684   : > { %v12639_v47 = vadd.f32 %v6177_v0, %v6170_v46  ;;  %v8951_v2 = vpop.f32.mrb[172].mxu1 }
0x1685   : > { %v6173_v41 = vadd.f32 %v8951_v2, %v12081_v24  ;;  %v6153_v34 = vpop.f32.mrb[173].mxu1  ;;  %v6217_v10 = vsel %vm1018_vm2, %v12637_v58, 0.0 }
0x1686   : > { %v6172_v42 = vadd.f32 %v6153_v34, %v12078_v30  ;;  %6218 = vadd.xlane.f32.xlu0 %v6217_v10  ;;  %v6214_v61 = vsel %vm1018_vm2, %v12639_v47, 0.0  ;;  %v9388_v30 = vpack.c.bf16 %v6380_v18, %v6379_v36 }
0x1687   : > { %v12647_v7 = vadd.f32 %v6177_v0, %v6173_v41  ;;  %6215 = vadd.xlane.f32.xlu1 %v6214_v61 }
0x1688   : > { %v12649_v43 = vadd.f32 %v6177_v0, %v6172_v42  ;;  %9389 = vmatprep.subr.bf16.mxu0 %v9388_v30 }
0x1689   : > { %v6223_v9 = vsel %vm1018_vm2, %v12647_v7, 0.0  ;;  %9391 = vmatpush3.bf16.msra.mxu0 %v9388_v30 }
0x168a   : > { %6224 = vadd.xlane.f32.xlu0 %v6223_v9  ;;  %v6220_v24 = vsel %vm1018_vm2, %v12649_v43, 0.0 }
0x168b   : > { %6221 = vadd.xlane.f32.xlu1 %v6220_v24 }
0x1703   : > { %v6195_v38 = vpop.xlane.xlu0 %6194 }
0x1704   : > { %v6227_v6 = vmul.f32 0.03125, %v6195_v38  ;;  %v6192_v62 = vpop.xlane.xlu1 %6191 }
0x1705   : > { %v6226_v23 = vmul.f32 0.03125, %v6192_v62 }
0x1706   : > { %v12656_v8 = vsub.f32 %v12597_v26, %v6227_v6 }
0x1707   : > { %v12659_v0 = vsub.f32 %v12599_v14, %v6226_v23  ;;  %v6201_v25 = vpop.xlane.xlu0 %6200 }
0x1708   : > { %v6229_v37 = vmul.f32 0.03125, %v6201_v25  ;;  %v6198_v4 = vpop.xlane.xlu1 %6197  ;;  %v6251_v27 = vmul.f32 %v12656_v8, %v12656_v8  ;;  %v6381_v25 = vld [vmem:[#allocation19 + $0x30] sm:$0xff] }
0x1709   : > { %v6228_v19 = vmul.f32 0.03125, %v6198_v4  ;;  %v6250_v39 = vmul.f32 %v12659_v0, %v12659_v0  ;;  %v6565_v4 = vld [vmem:[#allocation22 + $0x40] sm:$0xff] }
0x170a   : > { %v12666_v20 = vsub.f32 %v12607_v54, %v6229_v37  ;;  %v6265_v3 = vsel %vm1018_vm2, %v6251_v27, 0.0  ;;  %v6382_v37 = vld [vmem:[#allocation19 + $0x38] sm:$0xff]  ;;  %v6566_v27 = vld [vmem:[#allocation22 + $0x48] sm:$0xff] }
0x170b   : > { %v12670_v26 = vsub.f32 %v12609_v45, %v6228_v19  ;;  %v6207_v14 = vpop.xlane.xlu0 %6206  ;;  %6266 = vadd.xlane.f32.xlu0 %v6265_v3  ;;  %v6262_v60 = vsel %vm1018_vm2, %v6250_v39, 0.0  ;;  %v12727_v19 = vpack.c.bf16 %v6566_v27, %v6565_v4 }
0x170c   : > { %v6231_v57 = vmul.f32 0.03125, %v6207_v14  ;;  %v6204_v1 = vpop.xlane.xlu1 %6203  ;;  %6263 = vadd.xlane.f32.xlu1 %v6262_v60  ;;  %v6253_v29 = vmul.f32 %v12666_v20, %v12666_v20 }
0x170d   : > { %v6230_v11 = vmul.f32 0.03125, %v6204_v1  ;;  %v6252_v54 = vmul.f32 %v12670_v26, %v12670_v26 }
0x170e   : > { %v12678_v49 = vsub.f32 %v12617_v52, %v6231_v57  ;;  %v6271_v45 = vsel %vm1018_vm2, %v6253_v29, 0.0 }
0x170f   : > { %v12682_v55 = vsub.f32 %v12619_v22, %v6230_v11  ;;  %v6213_v63 = vpop.xlane.xlu0 %6212  ;;  %6272 = vadd.xlane.f32.xlu0 %v6271_v45  ;;  %v6268_v48 = vsel %vm1018_vm2, %v6252_v54, 0.0 }
0x1710   : > { %v6233_v59 = vmul.f32 0.03125, %v6213_v63  ;;  %v6210_v15 = vpop.xlane.xlu1 %6209  ;;  %6269 = vadd.xlane.f32.xlu1 %v6268_v48  ;;  %v6255_v56 = vmul.f32 %v12678_v49, %v12678_v49 }
0x1711   : > { %v6232_v35 = vmul.f32 0.03125, %v6210_v15  ;;  %v6254_v52 = vmul.f32 %v12682_v55, %v12682_v55 }
0x1712   : > { %v12690_v53 = vsub.f32 %v12627_v5, %v6233_v59  ;;  %v6277_v22 = vsel %vm1018_vm2, %v6255_v56, 0.0 }
0x1713   : > { %v12694_v12 = vsub.f32 %v12629_v31, %v6232_v35  ;;  %v6219_v17 = vpop.xlane.xlu0 %6218  ;;  %6278 = vadd.xlane.f32.xlu0 %v6277_v22  ;;  %v6274_v16 = vsel %vm1018_vm2, %v6254_v52, 0.0 }
0x1714   : > { %v6235_v44 = vmul.f32 0.03125, %v6219_v17  ;;  %v6216_v46 = vpop.xlane.xlu1 %6215  ;;  %6275 = vadd.xlane.f32.xlu1 %v6274_v16  ;;  %v6257_v33 = vmul.f32 %v12690_v53, %v12690_v53 }
0x1715   : > { %v6234_v2 = vmul.f32 0.03125, %v6216_v46  ;;  %v6256_v5 = vmul.f32 %v12694_v12, %v12694_v12  ;;  %v12733_v46 = vrot.slane %v12590_v13, %v3376_v21 }
0x1716   : > { %v12702_v41 = vsub.f32 %v12637_v58, %v6235_v44  ;;  %v6283_v31 = vsel %vm1018_vm2, %v6257_v33, 0.0 }
0x1717   : > { %v12706_v34 = vsub.f32 %v12639_v47, %v6234_v2  ;;  %6284 = vadd.xlane.f32.xlu0 %v6283_v31  ;;  %v6225_v10 = vpop.xlane.xlu0 %6224  ;;  %v6280_v42 = vsel %vm1018_vm2, %v6256_v5, 0.0 }
0x1718   : > { %v6237_v61 = vmul.f32 0.03125, %v6225_v10  ;;  %6281 = vadd.xlane.f32.xlu1 %v6280_v42  ;;  %v6222_v9 = vpop.xlane.xlu1 %6221  ;;  %v6259_v24 = vmul.f32 %v12702_v41, %v12702_v41 }
0x1719   : > { %v6236_v36 = vmul.f32 0.03125, %v6222_v9  ;;  %v6258_v58 = vmul.f32 %v12706_v34, %v12706_v34  ;;  %v12739_v9 = vrot.slane %v12590_v13, %v3392_v40 }
0x171a   : > { %v12714_v18 = vsub.f32 %v12647_v7, %v6237_v61  ;;  %v6289_v47 = vsel %vm1018_vm2, %v6259_v24, 0.0 }
0x171b   : > { %v12718_v30 = vsub.f32 %v12649_v43, %v6236_v36  ;;  %6290 = vadd.xlane.f32.xlu0 %v6289_v47  ;;  %v6286_v38 = vsel %vm1018_vm2, %v6258_v58, 0.0  ;;  %v9392_v43 = vpack.c.bf16 %v6382_v37, %v6381_v25  ;;  %v6567_v58 = vld [vmem:[#allocation22 + $0x50] sm:$0xff]  ;;  %v6568_v47 = vld [vmem:[#allocation22 + $0x58] sm:$0xff] }
0x171c   : > { %6287 = vadd.xlane.f32.xlu1 %v6286_v38  ;;  %v6261_v6 = vmul.f32 %v12714_v18, %v12714_v18 }
0x171d   : > { %v6260_v62 = vmul.f32 %v12718_v30, %v12718_v30  ;;  %9393 = vmatprep.subr.bf16.mxu0 %v9392_v43 }
0x171e   : > { %v6295_v23 = vsel %vm1018_vm2, %v6261_v6, 0.0  ;;  %9395 = vmatpush3.bf16.msra.mxu0 %v9392_v43  ;;  %v9400_v43 = vpack.c.bf16 %v6568_v47, %v6567_v58 }
0x171f   : > { %6296 = vadd.xlane.f32.xlu0 %v6295_v23  ;;  %v6292_v7 = vsel %vm1018_vm2, %v6260_v62, 0.0  ;;  %9397 = vmatprep.subr.bf16.mxu0 %v12727_v19 }
0x1720   : > { %6293 = vadd.xlane.f32.xlu1 %v6292_v7 }
0x1798   : > { %v6267_v39 = vpop.xlane.xlu0 %6266 }
0x1799   : > { %v6299_v3 = vmul.f32 0.03125, %v6267_v39  ;;  %v6264_v14 = vpop.xlane.xlu1 %6263 }
0x179a   : > { %v6298_v60 = vmul.f32 0.03125, %v6264_v14 }
0x179b   : > { %v6311_v57 = vadd.f32 1e-05, %v6299_v3 }
0x179c   : > { %v6310_v1 = vadd.f32 1e-05, %v6298_v60  ;;  %v6273_v29 = vpop.xlane.xlu0 %6272 }
0x179d   : > { %9852 = vrsqrt.f32 %v6311_v57  ;;  %v6301_v11 = vmul.f32 0.03125, %v6273_v29  ;;  %v6270_v54 = vpop.xlane.xlu1 %6269  ;;  %v6569_v29 = vld [vmem:[#allocation22 + $0x60] sm:$0xff] }
0x179e   : > { %9854 = vrsqrt.f32 %v6310_v1  ;;  %v6300_v45 = vmul.f32 0.03125, %v6270_v54 }
0x179f   : > { %v6313_v63 = vadd.f32 1e-05, %v6301_v11  ;;  %v6570_v11 = vld [vmem:[#allocation22 + $0x68] sm:$0xff] }
0x17a0   : > { %v6312_v48 = vadd.f32 1e-05, %v6300_v45  ;;  %v6279_v59 = vpop.xlane.xlu0 %6278 }
0x17a1   : > { %9856 = vrsqrt.f32 %v6313_v63  ;;  %v6303_v15 = vmul.f32 0.03125, %v6279_v59  ;;  %v6276_v56 = vpop.xlane.xlu1 %6275 }
0x17a2   : > { %9858 = vrsqrt.f32 %v6312_v48  ;;  %v6302_v35 = vmul.f32 0.03125, %v6276_v56  ;;  %v9404_v56 = vpack.c.bf16 %v6570_v11, %v6569_v29 }
0x17a3   : > { %v6315_v52 = vadd.f32 1e-05, %v6303_v15 }
0x17a4   : > { %v6314_v22 = vadd.f32 1e-05, %v6302_v35  ;;  %v6285_v17 = vpop.xlane.xlu0 %6284 }
0x17a5   : > { %9860 = vrsqrt.f32 %v6315_v52  ;;  %v6305_v16 = vmul.f32 0.03125, %v6285_v17  ;;  %v6282_v44 = vpop.xlane.xlu1 %6281 }
0x17a6   : > { %9862 = vrsqrt.f32 %v6314_v22  ;;  %v6304_v33 = vmul.f32 0.03125, %v6282_v44 }
0x17a7   : > { %v9853_v2 = vpop.eup %9852  ;;  %v6317_v5 = vadd.f32 1e-05, %v6305_v16 }
0x17a8   : > { %v9855_v31 = vpop.eup %9854  ;;  %v6335_v10 = vmul.f32 %v9853_v2, %v12656_v8  ;;  %v6316_v42 = vadd.f32 1e-05, %v6304_v33  ;;  %v6291_v61 = vpop.xlane.xlu0 %6290 }
0x17a9   : > { %9864 = vrsqrt.f32 %v6317_v5  ;;  %v6307_v24 = vmul.f32 0.03125, %v6291_v61  ;;  %v6288_v36 = vpop.xlane.xlu1 %6287  ;;  %v6334_v21 = vmul.f32 %v9855_v31, %v12659_v0 }
0x17aa   : > { %v6351_v38 = vmul.f32 %v12733_v46, %v6335_v10  ;;  %9866 = vrsqrt.f32 %v6316_v42  ;;  %v6306_v6 = vmul.f32 0.03125, %v6288_v36 }
0x17ab   : > { %v9857_v62 = vpop.eup %9856  ;;  %v6319_v8 = vadd.f32 1e-05, %v6307_v24  ;;  %v6350_v23 = vmul.f32 %v12733_v46, %v6334_v21 }
0x17ac   : > { %v9859_v7 = vpop.eup %9858  ;;  %v6318_v25 = vadd.f32 1e-05, %v6306_v6  ;;  %v6297_v37 = vpop.xlane.xlu0 %6296  ;;  %v6337_v40 = vmul.f32 %v9857_v62, %v12666_v20  ;;  %v12750_v3 = vadd.f32 %v12739_v9, %v6351_v38  ;;  %v6572_v6 = vld [vmem:[#allocation22 + $0x78] sm:$0xff] }
0x17ad   : > { %9868 = vrsqrt.f32 %v6319_v8  ;;  %v6309_v4 = vmul.f32 0.03125, %v6297_v37  ;;  %v6294_v27 = vpop.xlane.xlu1 %6293  ;;  %v12746_v0 = vadd.f32 %v12739_v9, %v6350_v23  ;;  %v6336_v39 = vmul.f32 %v9859_v7, %v12670_v26 }
0x17ae   : > { %9870 = vrsqrt.f32 %v6318_v25  ;;  %v6308_v14 = vmul.f32 0.03125, %v6294_v27  ;;  %v6353_v60 = vmul.f32 %v12733_v46, %v6337_v40 }
0x17af   : > { %v9861_v57 = vpop.eup %9860  ;;  %v6321_v1 = vadd.f32 1e-05, %v6309_v4  ;;  %8960 = vmatprep.mubr.msk.f32.mxu0 %vm1018_vm2, %v12746_v0  ;;  %v6352_v20 = vmul.f32 %v12733_v46, %v6336_v39 }
0x17b0   : > { %v9863_v54 = vpop.eup %9862  ;;  %v6320_v45 = vadd.f32 1e-05, %v6308_v14  ;;  %8961 = vmatmul.mubr.msk.f32.vlgmr.msra.gmra.mrb[126].mxu0 %vm1018_vm2, %v12750_v3  ;;  %v6339_v26 = vmul.f32 %v9861_v57, %v12678_v49  ;;  %v12765_v59 = vadd.f32 %v12739_v9, %v6353_v60 }
0x17b1   : > { %9872 = vrsqrt.f32 %v6321_v1  ;;  %v12760_v63 = vadd.f32 %v12739_v9, %v6352_v20  ;;  %v6338_v48 = vmul.f32 %v9863_v54, %v12682_v55  ;;  %9399 = vmatpush3.bf16.msra.mxu0 %v12727_v19 }
0x17b2   : > { %9874 = vrsqrt.f32 %v6320_v45  ;;  %v6355_v15 = vmul.f32 %v12733_v46, %v6339_v26  ;;  %9401 = vmatprep.subr.bf16.mxu0 %v9400_v43 }
0x17b3   : > { %v9865_v35 = vpop.eup %9864  ;;  %8963 = vmatprep.mubr.msk.f32.mxu0 %vm1018_vm2, %v12760_v63  ;;  %v6354_v49 = vmul.f32 %v12733_v46, %v6338_v48 }
0x17b4   : > { %v9867_v52 = vpop.eup %9866  ;;  %8964 = vmatmul.mubr.msk.f32.gmra.mrb[128].mxu0 %vm1018_vm2, %v12765_v59  ;;  %v6341_v55 = vmul.f32 %v9865_v35, %v12690_v53  ;;  %v12779_v17 = vadd.f32 %v12739_v9, %v6355_v15 }
0x17b5   : > { %v12775_v19 = vadd.f32 %v12739_v9, %v6354_v49  ;;  %v6340_v22 = vmul.f32 %v9867_v52, %v12694_v12  ;;  %9403 = vmatpush3.bf16.msra.mxu0 %v9400_v43 }
0x17b6   : > { %v6357_v16 = vmul.f32 %v12733_v46, %v6341_v55  ;;  %9405 = vmatprep.subr.bf16.mxu0 %v9404_v56 }
0x17b7   : > { %v9869_v44 = vpop.eup %9868  ;;  %8966 = vmatprep.mubr.msk.f32.mxu0 %vm1018_vm2, %v12775_v19  ;;  %v6356_v33 = vmul.f32 %v12733_v46, %v6340_v22 }
0x17b8   : > { %v9871_v2 = vpop.eup %9870  ;;  %8967 = vmatmul.mubr.msk.f32.gmra.mrb[130].mxu0 %vm1018_vm2, %v12779_v17  ;;  %v6343_v53 = vmul.f32 %v9869_v44, %v12702_v41  ;;  %v12793_v31 = vadd.f32 %v12739_v9, %v6357_v16 }
0x17b9   : > { %v12789_v12 = vadd.f32 %v12739_v9, %v6356_v33  ;;  %v6342_v5 = vmul.f32 %v9871_v2, %v12706_v34  ;;  %9407 = vmatpush3.bf16.msra.mxu0 %v9404_v56 }
0x17ba   : > { %v6359_v10 = vmul.f32 %v12733_v46, %v6343_v53 }
0x17bb   : > { %v9873_v42 = vpop.eup %9872  ;;  %8969 = vmatprep.mubr.msk.f32.mxu0 %vm1018_vm2, %v12789_v12  ;;  %v6358_v61 = vmul.f32 %v12733_v46, %v6342_v5 }
0x17bc   : > { %v9875_v24 = vpop.eup %9874  ;;  %8970 = vmatmul.mubr.msk.f32.gmra.mrb[132].mxu0 %vm1018_vm2, %v12793_v31  ;;  %v6345_v41 = vmul.f32 %v9873_v42, %v12714_v18  ;;  %v12807_v21 = vadd.f32 %v12739_v9, %v6359_v10  ;;  %v6576_v42 = vrot.slane %v12590_v13, %v3600_v51 }
0x17bd   : > { %v12803_v34 = vadd.f32 %v12739_v9, %v6358_v61  ;;  %v6344_v36 = vmul.f32 %v9875_v24, %v12718_v30  ;;  %v6571_v30 = vld [vmem:[#allocation22 + $0x70] sm:$0xff] }
0x17be   : > { %v6361_v58 = vmul.f32 %v12733_v46, %v6345_v41  ;;  %v9408_v62 = vpack.c.bf16 %v6572_v6, %v6571_v30 }
0x17bf   : > { %8972 = vmatprep.mubr.msk.f32.mxu0 %vm1018_vm2, %v12803_v34  ;;  %v6360_v47 = vmul.f32 %v12733_v46, %v6344_v36  ;;  %v7580_v46 = vld [vmem:[#allocation20 + $0x1] ss:$0 sm:$0xff] }
0x17c0   : > { %8973 = vmatmul.mubr.msk.f32.gmra.mrb[134].mxu0 %vm1018_vm2, %v12807_v21  ;;  %v12819_v38 = vadd.f32 %v12739_v9, %v6361_v58  ;;  %9409 = vmatprep.subr.bf16.mxu0 %v9408_v62 }
0x17c1   : > { %v12816_v18 = vadd.f32 %v12739_v9, %v6360_v47  ;;  %9411 = vmatpush3.bf16.msra.mxu0 %v9408_v62 }
0x17c3   : > { %8975 = vmatprep.mubr.msk.f32.mxu0 %vm1018_vm2, %v12816_v18 }
0x17c4   : > { %8976 = vmatmul.mubr.msk.f32.gmra.mrb[136].mxu0 %vm1018_vm2, %v12819_v38 }
0x1883   : > { %v8962_v8 = vpop.f32.mrb[126].mxu0 }
0x1884   : > { %v6499_v23 = vadd.f32 %v8962_v8, %v7580_v46  ;;  %v6493_v7 = vpop.f32.mrb[127].mxu0 }
0x1885   : > { %v6494_v25 = vadd.f32 %v7580_v46, %v6493_v7 }
0x1886   : > { %v6553_v9 = vmax.f32 %v6499_v23, 0.0 }
0x1887   : > { %v6552_v37 = vmax.f32 %v6494_v25, 0.0  ;;  %v8965_v40 = vpop.f32.mrb[128].mxu0 }
0x1888   : > { %v6509_v43 = vadd.f32 %v8965_v40, %v7580_v46  ;;  %v6503_v4 = vpop.f32.mrb[129].mxu0 }
0x1889   : > { %v6504_v27 = vadd.f32 %v7580_v46, %v6503_v4  ;;  %8994 = vmatprep.mubr.msk.f32.mxu0 %vm3602_vm6, %v6552_v37 }
0x188a   : > { %8995 = vmatmul.mubr.msk.f32.vlgmr.msra.gmra.mrb[138].mxu0 %vm3602_vm6, %v6553_v9  ;;  %v6555_v60 = vmax.f32 %v6509_v43, 0.0 }
0x188b   : > { %v6554_v39 = vmax.f32 %v6504_v27, 0.0  ;;  %v8968_v14 = vpop.f32.mrb[130].mxu0 }
0x188c   : > { %v6519_v57 = vadd.f32 %v8968_v14, %v7580_v46  ;;  %v6513_v1 = vpop.f32.mrb[131].mxu0 }
0x188d   : > { %v6514_v20 = vadd.f32 %v7580_v46, %v6513_v1  ;;  %8997 = vmatprep.mubr.msk.f32.mxu0 %vm3602_vm6, %v6554_v39 }
0x188e   : > { %8998 = vmatmul.mubr.msk.f32.gmra.mrb[140].mxu0 %vm3602_vm6, %v6555_v60  ;;  %v6557_v54 = vmax.f32 %v6519_v57, 0.0 }
0x188f   : > { %v6556_v29 = vmax.f32 %v6514_v20, 0.0  ;;  %v8971_v11 = vpop.f32.mrb[132].mxu0 }
0x1890   : > { %v6529_v45 = vadd.f32 %v8971_v11, %v7580_v46  ;;  %v6523_v26 = vpop.f32.mrb[133].mxu0 }
0x1891   : > { %v6524_v48 = vadd.f32 %v7580_v46, %v6523_v26  ;;  %9000 = vmatprep.mubr.msk.f32.mxu0 %vm3602_vm6, %v6556_v29 }
0x1892   : > { %9001 = vmatmul.mubr.msk.f32.gmra.mrb[142].mxu0 %vm3602_vm6, %v6557_v54  ;;  %v6559_v35 = vmax.f32 %v6529_v45, 0.0 }
0x1893   : > { %v6558_v15 = vmax.f32 %v6524_v48, 0.0  ;;  %v8974_v56 = vpop.f32.mrb[134].mxu0 }
0x1894   : > { %v6539_v49 = vadd.f32 %v8974_v56, %v7580_v46  ;;  %v6533_v52 = vpop.f32.mrb[135].mxu0 }
0x1895   : > { %v6534_v55 = vadd.f32 %v7580_v46, %v6533_v52  ;;  %9003 = vmatprep.mubr.msk.f32.mxu0 %vm3602_vm6, %v6558_v15 }
0x1896   : > { %9004 = vmatmul.mubr.msk.f32.gmra.mrb[144].mxu0 %vm3602_vm6, %v6559_v35  ;;  %v6561_v44 = vmax.f32 %v6539_v49, 0.0 }
0x1897   : > { %v6560_v22 = vmax.f32 %v6534_v55, 0.0  ;;  %v8977_v16 = vpop.f32.mrb[136].mxu0 }
0x1898   : > { %v6549_v33 = vadd.f32 %v8977_v16, %v7580_v46  ;;  %v6543_v2 = vpop.f32.mrb[137].mxu0 }
0x1899   : > { %v6544_v53 = vadd.f32 %v7580_v46, %v6543_v2  ;;  %9006 = vmatprep.mubr.msk.f32.mxu0 %vm3602_vm6, %v6560_v22 }
0x189a   : > { %9007 = vmatmul.mubr.msk.f32.gmra.mrb[146].mxu0 %vm3602_vm6, %v6561_v44  ;;  %v6563_v10 = vmax.f32 %v6549_v33, 0.0 }
0x189b   : > { %v6562_v5 = vmax.f32 %v6544_v53, 0.0 }
0x189d   : > { %9009 = vmatprep.mubr.msk.f32.mxu0 %vm3602_vm6, %v6562_v5 }
0x189e   : > { %9010 = vmatmul.mubr.msk.f32.gmra.mrb[148].mxu0 %vm3602_vm6, %v6563_v10 }
0x195d   : > { %v8996_v61 = vpop.f32.mrb[138].mxu0 }
0x195e   : > { %v6685_v24 = vadd.f32 %v8996_v61, %v6576_v42  ;;  %v6679_v41 = vpop.f32.mrb[139].mxu0 }
0x195f   : > { %v6680_v36 = vadd.f32 %v6679_v41, %v6576_v42 }
0x1960   : > { %v6739_v58 = vadd.f32 %v6685_v24, %v12750_v3 }
0x1961   : > { %v6738_v47 = vadd.f32 %v6680_v36, %v12746_v0  ;;  %v8999_v30 = vpop.f32.mrb[140].mxu0 }
0x1962   : > { %v6695_v6 = vadd.f32 %v8999_v30, %v6576_v42  ;;  %v6689_v62 = vpop.f32.mrb[141].mxu0  ;;  %v6753_v46 = vsel %vm1018_vm2, %v6739_v58, 0.0 }
0x1963   : > { %v6690_v8 = vadd.f32 %v6689_v62, %v6576_v42  ;;  %6754 = vadd.xlane.f32.xlu0 %v6753_v46  ;;  %v6750_v23 = vsel %vm1018_vm2, %v6738_v47, 0.0 }
0x1964   : > { %v6741_v7 = vadd.f32 %v6695_v6, %v12765_v59  ;;  %6751 = vadd.xlane.f32.xlu1 %v6750_v23 }
0x1965   : > { %v6740_v51 = vadd.f32 %v6690_v8, %v12760_v63  ;;  %v9002_v25 = vpop.f32.mrb[142].mxu0 }
0x1966   : > { %v6705_v37 = vadd.f32 %v9002_v25, %v6576_v42  ;;  %v6699_v40 = vpop.f32.mrb[143].mxu0  ;;  %v6759_v3 = vsel %vm1018_vm2, %v6741_v7, 0.0 }
0x1967   : > { %v6700_v0 = vadd.f32 %v6699_v40, %v6576_v42  ;;  %6760 = vadd.xlane.f32.xlu0 %v6759_v3  ;;  %v6756_v9 = vsel %vm1018_vm2, %v6740_v51, 0.0 }
0x1968   : > { %v6743_v43 = vadd.f32 %v6705_v37, %v12779_v17  ;;  %6757 = vadd.xlane.f32.xlu1 %v6756_v9 }
0x1969   : > { %v6742_v4 = vadd.f32 %v6700_v0, %v12775_v19  ;;  %v9005_v27 = vpop.f32.mrb[144].mxu0 }
0x196a   : > { %v6715_v39 = vadd.f32 %v9005_v27, %v6576_v42  ;;  %v6709_v59 = vpop.f32.mrb[145].mxu0  ;;  %v6765_v14 = vsel %vm1018_vm2, %v6743_v43, 0.0 }
0x196b   : > { %v6710_v63 = vadd.f32 %v6709_v59, %v6576_v42  ;;  %6766 = vadd.xlane.f32.xlu0 %v6765_v14  ;;  %v6762_v60 = vsel %vm1018_vm2, %v6742_v4, 0.0 }
0x196c   : > { %v12853_v57 = vadd.f32 %v6715_v39, %v12793_v31  ;;  %6763 = vadd.xlane.f32.xlu1 %v6762_v60 }
0x196d   : > { %v12856_v1 = vadd.f32 %v6710_v63, %v12789_v12  ;;  %v9008_v17 = vpop.f32.mrb[146].mxu0 }
0x196e   : > { %v6725_v20 = vadd.f32 %v9008_v17, %v6576_v42  ;;  %v6719_v29 = vpop.f32.mrb[147].mxu0  ;;  %v6771_v19 = vsel %vm1018_vm2, %v12853_v57, 0.0 }
0x196f   : > { %v6720_v11 = vadd.f32 %v6719_v29, %v6576_v42  ;;  %6772 = vadd.xlane.f32.xlu0 %v6771_v19  ;;  %v6768_v54 = vsel %vm1018_vm2, %v12856_v1, 0.0 }
0x1970   : > { %v12863_v45 = vadd.f32 %v6725_v20, %v12807_v21  ;;  %6769 = vadd.xlane.f32.xlu1 %v6768_v54 }
0x1971   : > { %v12866_v31 = vadd.f32 %v6720_v11, %v12803_v34  ;;  %v9011_v12 = vpop.f32.mrb[148].mxu0 }
0x1972   : > { %v6735_v26 = vadd.f32 %v9011_v12, %v6576_v42  ;;  %v6729_v48 = vpop.f32.mrb[149].mxu0  ;;  %v6777_v15 = vsel %vm1018_vm2, %v12863_v45, 0.0 }
0x1973   : > { %v6730_v56 = vadd.f32 %v6729_v48, %v6576_v42  ;;  %6778 = vadd.xlane.f32.xlu0 %v6777_v15  ;;  %v6774_v35 = vsel %vm1018_vm2, %v12866_v31, 0.0 }
0x1974   : > { %v12873_v49 = vadd.f32 %v6735_v26, %v12819_v38  ;;  %6775 = vadd.xlane.f32.xlu1 %v6774_v35 }
0x1975   : > { %v12876_v21 = vadd.f32 %v6730_v56, %v12816_v18 }
0x1976   : > { %v6783_v34 = vsel %vm1018_vm2, %v12873_v49, 0.0 }
0x1977   : > { %6784 = vadd.xlane.f32.xlu0 %v6783_v34  ;;  %v6780_v52 = vsel %vm1018_vm2, %v12876_v21, 0.0 }
0x1978   : > { %6781 = vadd.xlane.f32.xlu1 %v6780_v52 }
0x19f0   : > { %v6755_v55 = vpop.xlane.xlu0 %6754 }
0x19f1   : > { %v6787_v22 = vmul.f32 0.03125, %v6755_v55  ;;  %v6752_v16 = vpop.xlane.xlu1 %6751 }
0x19f2   : > { %v6786_v44 = vmul.f32 0.03125, %v6752_v16 }
0x19f3   : > { %v12882_v33 = vsub.f32 %v6739_v58, %v6787_v22 }
0x19f4   : > { %v12884_v38 = vsub.f32 %v6738_v47, %v6786_v44  ;;  %v6761_v2 = vpop.xlane.xlu0 %6760 }
0x19f5   : > { %v6789_v53 = vmul.f32 0.03125, %v6761_v2  ;;  %v6758_v18 = vpop.xlane.xlu1 %6757  ;;  %v6811_v5 = vmul.f32 %v12882_v33, %v12882_v33 }
0x19f6   : > { %v6788_v10 = vmul.f32 0.03125, %v6758_v18  ;;  %v6810_v42 = vmul.f32 %v12884_v38, %v12884_v38 }
0x19f7   : > { %v12890_v61 = vsub.f32 %v6741_v7, %v6789_v53  ;;  %v6825_v24 = vsel %vm1018_vm2, %v6811_v5, 0.0 }
0x19f8   : > { %v12893_v41 = vsub.f32 %v6740_v51, %v6788_v10  ;;  %v6767_v36 = vpop.xlane.xlu0 %6766  ;;  %6826 = vadd.xlane.f32.xlu0 %v6825_v24  ;;  %v6822_v58 = vsel %vm1018_vm2, %v6810_v42, 0.0 }
0x19f9   : > { %v6791_v47 = vmul.f32 0.03125, %v6767_v36  ;;  %v6764_v30 = vpop.xlane.xlu1 %6763  ;;  %6823 = vadd.xlane.f32.xlu1 %v6822_v58  ;;  %v6813_v6 = vmul.f32 %v12890_v61, %v12890_v61 }
0x19fa   : > { %v6790_v62 = vmul.f32 0.03125, %v6764_v30  ;;  %v6812_v46 = vmul.f32 %v12893_v41, %v12893_v41 }
0x19fb   : > { %v12900_v8 = vsub.f32 %v6743_v43, %v6791_v47  ;;  %v6831_v23 = vsel %vm1018_vm2, %v6813_v6, 0.0 }
0x19fc   : > { %v12903_v7 = vsub.f32 %v6742_v4, %v6790_v62  ;;  %v6773_v51 = vpop.xlane.xlu0 %6772  ;;  %6832 = vadd.xlane.f32.xlu0 %v6831_v23  ;;  %v6828_v25 = vsel %vm1018_vm2, %v6812_v46, 0.0 }
0x19fd   : > { %v6793_v37 = vmul.f32 0.03125, %v6773_v51  ;;  %v6770_v40 = vpop.xlane.xlu1 %6769  ;;  %6829 = vadd.xlane.f32.xlu1 %v6828_v25  ;;  %v6815_v3 = vmul.f32 %v12900_v8, %v12900_v8 }
0x19fe   : > { %v6792_v0 = vmul.f32 0.03125, %v6770_v40  ;;  %v6814_v9 = vmul.f32 %v12903_v7, %v12903_v7 }
0x19ff   : > { %v12911_v43 = vsub.f32 %v12853_v57, %v6793_v37  ;;  %v6837_v4 = vsel %vm1018_vm2, %v6815_v3, 0.0  ;;  %v12951_v37 = vrot.slane %v12590_v13, %v3934_v32 }
0x1a00   : > { %v12915_v27 = vsub.f32 %v12856_v1, %v6792_v0  ;;  %v6779_v39 = vpop.xlane.xlu0 %6778  ;;  %6838 = vadd.xlane.f32.xlu0 %v6837_v4  ;;  %v6834_v59 = vsel %vm1018_vm2, %v6814_v9, 0.0  ;;  %v12956_v4 = vrot.slane %v12590_v13, %v3950_v28 }
0x1a01   : > { %v6795_v14 = vmul.f32 0.03125, %v6779_v39  ;;  %v6776_v63 = vpop.xlane.xlu1 %6775  ;;  %6835 = vadd.xlane.f32.xlu1 %v6834_v59  ;;  %v6817_v60 = vmul.f32 %v12911_v43, %v12911_v43 }
0x1a02   : > { %v6794_v17 = vmul.f32 0.03125, %v6776_v63  ;;  %v6816_v57 = vmul.f32 %v12915_v27, %v12915_v27 }
0x1a03   : > { %v12923_v20 = vsub.f32 %v12863_v45, %v6795_v14  ;;  %v6843_v1 = vsel %vm1018_vm2, %v6817_v60, 0.0 }
0x1a04   : > { %v12927_v29 = vsub.f32 %v12866_v31, %v6794_v17  ;;  %6844 = vadd.xlane.f32.xlu0 %v6843_v1  ;;  %v6785_v19 = vpop.xlane.xlu0 %6784  ;;  %v6840_v11 = vsel %vm1018_vm2, %v6816_v57, 0.0 }
0x1a05   : > { %v6797_v54 = vmul.f32 0.03125, %v6785_v19  ;;  %6841 = vadd.xlane.f32.xlu1 %v6840_v11  ;;  %v6782_v12 = vpop.xlane.xlu1 %6781  ;;  %v6819_v26 = vmul.f32 %v12923_v20, %v12923_v20 }
0x1a06   : > { %v6796_v48 = vmul.f32 0.03125, %v6782_v12  ;;  %v6818_v45 = vmul.f32 %v12927_v29, %v12927_v29 }
0x1a07   : > { %v12935_v15 = vsub.f32 %v12873_v49, %v6797_v54  ;;  %v6849_v31 = vsel %vm1018_vm2, %v6819_v26, 0.0 }
0x1a08   : > { %v12939_v56 = vsub.f32 %v12876_v21, %v6796_v48  ;;  %6850 = vadd.xlane.f32.xlu0 %v6849_v31  ;;  %v6846_v35 = vsel %vm1018_vm2, %v6818_v45, 0.0 }
0x1a09   : > { %6847 = vadd.xlane.f32.xlu1 %v6846_v35  ;;  %v6821_v34 = vmul.f32 %v12935_v15, %v12935_v15 }
0x1a0a   : > { %v6820_v52 = vmul.f32 %v12939_v56, %v12939_v56 }
0x1a0b   : > { %v6855_v55 = vsel %vm1018_vm2, %v6821_v34, 0.0 }
0x1a0c   : > { %6856 = vadd.xlane.f32.xlu0 %v6855_v55  ;;  %v6852_v49 = vsel %vm1018_vm2, %v6820_v52, 0.0 }
0x1a0d   : > { %6853 = vadd.xlane.f32.xlu1 %v6852_v49 }
0x1a85   : > { %v6827_v22 = vpop.xlane.xlu0 %6826 }
0x1a86   : > { %v6859_v16 = vmul.f32 0.03125, %v6827_v22  ;;  %v6824_v21 = vpop.xlane.xlu1 %6823 }
0x1a87   : > { %v6858_v44 = vmul.f32 0.03125, %v6824_v21 }
0x1a88   : > { %v6871_v2 = vadd.f32 1e-05, %v6859_v16 }
0x1a89   : > { %v6870_v53 = vadd.f32 1e-05, %v6858_v44  ;;  %v6833_v18 = vpop.xlane.xlu0 %6832 }
0x1a8a   : > { %9876 = vrsqrt.f32 %v6871_v2  ;;  %v6861_v5 = vmul.f32 0.03125, %v6833_v18  ;;  %v6830_v10 = vpop.xlane.xlu1 %6829 }
0x1a8b   : > { %9878 = vrsqrt.f32 %v6870_v53  ;;  %v6860_v42 = vmul.f32 0.03125, %v6830_v10 }
0x1a8c   : > { %v6873_v24 = vadd.f32 1e-05, %v6861_v5 }
0x1a8d   : > { %v6872_v36 = vadd.f32 1e-05, %v6860_v42  ;;  %v6839_v58 = vpop.xlane.xlu0 %6838 }
0x1a8e   : > { %9880 = vrsqrt.f32 %v6873_v24  ;;  %v6863_v47 = vmul.f32 0.03125, %v6839_v58  ;;  %v6836_v30 = vpop.xlane.xlu1 %6835 }
0x1a8f   : > { %9882 = vrsqrt.f32 %v6872_v36  ;;  %v6862_v6 = vmul.f32 0.03125, %v6836_v30 }
0x1a90   : > { %v6875_v62 = vadd.f32 1e-05, %v6863_v47 }
0x1a91   : > { %v6874_v46 = vadd.f32 1e-05, %v6862_v6  ;;  %v6845_v23 = vpop.xlane.xlu0 %6844 }
0x1a92   : > { %9884 = vrsqrt.f32 %v6875_v62  ;;  %v6865_v51 = vmul.f32 0.03125, %v6845_v23  ;;  %v6842_v25 = vpop.xlane.xlu1 %6841 }
0x1a93   : > { %9886 = vrsqrt.f32 %v6874_v46  ;;  %v6864_v40 = vmul.f32 0.03125, %v6842_v25 }
0x1a94   : > { %v9877_v3 = vpop.eup %9876  ;;  %v6877_v0 = vadd.f32 1e-05, %v6865_v51 }
0x1a95   : > { %v9879_v9 = vpop.eup %9878  ;;  %v6895_v39 = vmul.f32 %v9877_v3, %v12882_v33  ;;  %v6876_v59 = vadd.f32 1e-05, %v6864_v40  ;;  %v6851_v14 = vpop.xlane.xlu0 %6850 }
0x1a96   : > { %v6894_v63 = vmul.f32 %v9879_v9, %v12884_v38  ;;  %9888 = vrsqrt.f32 %v6877_v0  ;;  %v6867_v60 = vmul.f32 0.03125, %v6851_v14  ;;  %v6848_v32 = vpop.xlane.xlu1 %6847 }
0x1a97   : > { %v6911_v17 = vmul.f32 %v12951_v37, %v6895_v39  ;;  %9890 = vrsqrt.f32 %v6876_v59  ;;  %v6866_v57 = vmul.f32 0.03125, %v6848_v32 }
0x1a98   : > { %v9881_v1 = vpop.eup %9880  ;;  %v6910_v50 = vmul.f32 %v12951_v37, %v6894_v63  ;;  %v6879_v19 = vadd.f32 1e-05, %v6867_v60 }
0x1a99   : > { %v9883_v28 = vpop.eup %9882  ;;  %v6927_v13 = vadd.f32 %v12956_v4, %v6911_v17  ;;  %v6897_v33 = vmul.f32 %v9881_v1, %v12890_v61  ;;  %v6878_v11 = vadd.f32 1e-05, %v6866_v57  ;;  %v6857_v54 = vpop.xlane.xlu0 %6856 }
0x1a9a   : > { %v6926_v38 = vadd.f32 %v12956_v4, %v6910_v50  ;;  %v6896_v12 = vmul.f32 %v9883_v28, %v12893_v41  ;;  %9892 = vrsqrt.f32 %v6879_v19  ;;  %v6869_v26 = vmul.f32 0.03125, %v6857_v54  ;;  %v6854_v48 = vpop.xlane.xlu1 %6853 }
0x1a9b   : > { %6939 = vst.msk [vmem:[%s12967_s13 + $0x8] sm:$0xff] %vm1018_vm2, %v6927_v13  ;;  %v6913_v45 = vmul.f32 %v12951_v37, %v6897_v33  ;;  %9894 = vrsqrt.f32 %v6878_v11  ;;  %v6868_v61 = vmul.f32 0.03125, %v6854_v48 }
0x1a9c   : > { %v9885_v31 = vpop.eup %9884  ;;  %6938 = vst.msk [vmem:[%s12967_s13] sm:$0xff] %vm1018_vm2, %v6926_v38  ;;  %v6912_v41 = vmul.f32 %v12951_v37, %v6896_v12  ;;  %v6881_v35 = vadd.f32 1e-05, %v6869_v26 }
0x1a9d   : > { %v9887_v34 = vpop.eup %9886  ;;  %v6929_v52 = vadd.f32 %v12956_v4, %v6913_v45  ;;  %v6899_v55 = vmul.f32 %v9885_v31, %v12900_v8  ;;  %v6880_v49 = vadd.f32 1e-05, %v6868_v61 }
0x1a9e   : > { %v6928_v22 = vadd.f32 %v12956_v4, %v6912_v41  ;;  %v6898_v16 = vmul.f32 %v9887_v34, %v12903_v7  ;;  %9896 = vrsqrt.f32 %v6881_v35 }
0x1a9f   : > { %6941 = vst.msk [vmem:[%s12967_s13 + $0x18] sm:$0xff] %vm1018_vm2, %v6929_v52  ;;  %v6915_v21 = vmul.f32 %v12951_v37, %v6899_v55  ;;  %9898 = vrsqrt.f32 %v6880_v49 }
0x1aa0   : > { %v9889_v44 = vpop.eup %9888  ;;  %6940 = vst.msk [vmem:[%s12967_s13 + $0x10] sm:$0xff] %vm1018_vm2, %v6928_v22  ;;  %v6914_v2 = vmul.f32 %v12951_v37, %v6898_v16 }
0x1aa1   : > { %v9891_v8 = vpop.eup %9890  ;;  %v6931_v53 = vadd.f32 %v12956_v4, %v6915_v21  ;;  %v6901_v18 = vmul.f32 %v9889_v44, %v12911_v43 }
0x1aa2   : > { %v6930_v7 = vadd.f32 %v12956_v4, %v6914_v2  ;;  %v6900_v5 = vmul.f32 %v9891_v8, %v12915_v27 }
0x1aa3   : > { %6943 = vst.msk [vmem:[%s12967_s13 + $0x28] sm:$0xff] %vm1018_vm2, %v6931_v53  ;;  %v6917_v10 = vmul.f32 %v12951_v37, %v6901_v18 }
0x1aa4   : > { %v9893_v42 = vpop.eup %9892  ;;  %6942 = vst.msk [vmem:[%s12967_s13 + $0x20] sm:$0xff] %vm1018_vm2, %v6930_v7  ;;  %v6916_v24 = vmul.f32 %v12951_v37, %v6900_v5 }
0x1aa5   : > { %v9895_v36 = vpop.eup %9894  ;;  %v6933_v58 = vadd.f32 %v12956_v4, %v6917_v10  ;;  %v6903_v43 = vmul.f32 %v9893_v42, %v12923_v20 }
0x1aa6   : > { %v6932_v47 = vadd.f32 %v12956_v4, %v6916_v24  ;;  %v6902_v27 = vmul.f32 %v9895_v36, %v12927_v29 }
0x1aa7   : > { %6945 = vst.msk [vmem:[%s12967_s13 + $0x38] sm:$0xff] %vm1018_vm2, %v6933_v58  ;;  %v6919_v30 = vmul.f32 %v12951_v37, %v6903_v43 }
0x1aa8   : > { %v9897_v6 = vpop.eup %9896  ;;  %6944 = vst.msk [vmem:[%s12967_s13 + $0x30] sm:$0xff] %vm1018_vm2, %v6932_v47  ;;  %v6918_v62 = vmul.f32 %v12951_v37, %v6902_v27 }
0x1aa9   : > { %v9899_v46 = vpop.eup %9898  ;;  %v6935_v23 = vadd.f32 %v12956_v4, %v6919_v30  ;;  %v6905_v20 = vmul.f32 %v9897_v6, %v12935_v15 }
0x1aaa   : > { %v6934_v29 = vadd.f32 %v12956_v4, %v6918_v62  ;;  %v6904_v51 = vmul.f32 %v9899_v46, %v12939_v56 }
0x1aab   : > { %6947 = vst.msk [vmem:[%s12967_s13 + $0x48] sm:$0xff] %vm1018_vm2, %v6935_v23  ;;  %v6921_v25 = vmul.f32 %v12951_v37, %v6905_v20 }
0x1aac   : > { %6946 = vst.msk [vmem:[%s12967_s13 + $0x40] sm:$0xff] %vm1018_vm2, %v6934_v29  ;;  %v6920_v40 = vmul.f32 %v12951_v37, %v6904_v51 }
0x1aad   : > { %v6937_v3 = vadd.f32 %v12956_v4, %v6921_v25 }
0x1aae   : > { %v6936_v15 = vadd.f32 %v12956_v4, %v6920_v40 }
0x1aaf   : > { %6949 = vst.msk [vmem:[%s12967_s13 + $0x58] sm:$0xff] %vm1018_vm2, %v6937_v3 }
0x1ab0   : > { %6948 = vst.msk [vmem:[%s12967_s13 + $0x50] sm:$0xff] %vm1018_vm2, %v6936_v15 }
0x1ab1   : > { %10282 = shalt.err (!%p10279_p0)
}
0x1ab2   : > { %s10283_s19 = scalar_lea.hbm %s13021_s14, 1536  ;;  %s10287_s30 = scalar_lea.hbm %s13147_s22, 3072 }
0x1ab3   : > { %p10284_p6 = scmp.ne.s32.totalorder %s13021_s14, %s10283_s19  ;;  %p10288_p11 = scmp.lt.u32.totalorder %s13021_s14, %s13147_s22 }
0x1ab4   : > { %p10289_p5 = scmp.lt.u32.totalorder %s10287_s30, %s10283_s19  ;;  %p10291_p10 = scmp.lt.u32.totalorder %s10283_s19, %s13021_s14 }
0x1ab5   : > { %p10285_p2 = pnand %p10284_p6, %p13148_p8 }
0x1ab6   : > { %p10290_p9 = por %p10289_p5, %p10288_p11 }
0x1ab7   : > { %p10286_p7 = pneg %p10285_p2 }
0x1ab8   : > { %p10292_p12 = por %p10291_p10, %p10290_p9 }
0x1aba   : > { %p10293_p3 = pnand %p10292_p12, %p10286_p7 }
0x1abc   : > { %10296 = shalt.err (!%p10293_p3)
}
0x1abd   : > { %s10384_s15 = smov 128   ;;  %s10385_s4 = smov 8  }
0x1abe   : > { %9489 = dma.vmem_to_hbm [thread:$0]  (%p13148_p8), %s13023_s18, 1536, %s13021_s14, %s6951_s3, %s10384_s15, %s10384_s15, %s10385_s4  }
0x1abf PF: > { %s6979_s24 = sand.u32 1, %s10351_s25   ;;  %p13149_p4 = scmp.ne.s32.totalorder %s13125_s7, 0 }
0x1ac0   : > { %p13150_p1 = scmp.ge.s32.totalorder %s10363_s28, 2  ;;  %s6980_s20 = scalar_lea.sflag [#allocation4], %s6979_s24 }
0x1ac2   : > { %p9533_p13 = pnand %p13150_p1, %p13149_p4 }
0x1ac4   : > { %10346 = dma.done.wait (!%p9533_p13), %s6980_s20, 1536  }
0x1ac5   : > { %10348 = vsyncadd (!%p9533_p13), %s6980_s20, 4294965760  ;;  %p34_p0 = scmp.ge.s32.totalorder %s10768_s16, 4   ;;  %s13151_s25 = smov %s10355_s26 }
0x1ac6   : > { %s13152_s26 = smov %s10359_s27  ;;  %s13153_s27 = smov %s10780_s17 }
0x1ac7   : > { %s13154_s28 = smov %s10768_s16  ;;  %36 = sbr.rel (!%p34_p0) target bundleno = 23 (0x17), region = 203 }
0x1ace   :  { %6985 = vsyncpa [#allocation3], 1 }
0x1acf   :  { %6987 = vsyncpa [#allocation3 + $0x1], 1 }
0x1ad0   :  { %6988 = vsyncpa [#allocation6], 1 }
0x1ad1   :  { %6990 = vsyncpa [#allocation6 + $0x1], 1 }
0x1ad2   :  { %6991 = vsyncpa [#allocation9], 1 }
0x1ad3   :  { %6992 = vsyncpa [#allocation12], 1 }
0x1ad4   :  { %6993 = vsyncpa [#allocation15], 1 }
0x1ad5   :  { %6994 = vsyncpa [#allocation18], 1 }
0x1ad6   :  { %6995 = vsyncpa [#allocation21], 1 }
0x1ad7   :  { %6996 = vsyncpa [#allocation4], 1 }
0x1ad8   :  { %6998 = vsyncpa [#allocation4 + $0x1], 1 }

</bundles_post_ra>
